<compile_context>
chip_gen: v6e
topology: v6e:2x2x1
jax: 0.10.0
libtpu: 0.0.40
codegen_flags: <defaults>
</compile_context>

<pallas_src>
import functools

import jax
import jax.numpy as jnp
from jax.experimental import pallas as pl
from jax.experimental.pallas import tpu as pltpu


# ----------------------------------------------------------------------------
# Fused inception4c Pallas kernel (Nb batch images per grid step)
# ----------------------------------------------------------------------------
def _inception4c_kernel(x_ref,
                        w1_ref, s1_ref, b1_ref,      # fused 1x1 (b1|b2a|b3a)
                        w23_ref, s23_ref, b23_ref,   # combined 3x3 (b2b|b3b)
                        w4_ref, s4_ref, b4_ref,      # 1x1 512->64 (after pool)
                        o_ref,
                        pad_ref, pool_ref,
                        *, H, W):
    Nb, HW, C = x_ref.shape
    M = Nb * HW
    bf16 = jnp.bfloat16

    x2d = x_ref[...].reshape(M, C)                          # (M, 512) bf16

    # ---- fused 1x1 convs: lanes [0:128]=b1, [128:256]=b2a, [256:280]=b3a ---
    y = jnp.dot(x2d, w1_ref[...], preferred_element_type=jnp.float32)
    y = jnp.maximum(y * s1_ref[...] + b1_ref[...], 0.0)     # (M, 384) f32

    # branch1 -> its lane-aligned slice of the output block, immediately.
    o_ref[:, :, 0:128] = y[:, 0:128].reshape(Nb, HW, 128).astype(o_ref.dtype)

    # Combined 3x3 input tile: lanes 0:128 = b2a, 128:152 = b3a, 152:256 = 0
    # (already contiguous inside y — no repacking needed).
    a = y[:, 128:384].astype(bf16)                          # (M, 256)

    # ---- both 3x3 convs as one in-VMEM im2col matmul -----------------------
    # Border-only zero init (interior is rewritten every step anyway).
    pad_ref[:, 0:1, :, :] = jnp.zeros((Nb, 1, W + 2, 256), bf16)
    pad_ref[:, H + 1:H + 2, :, :] = jnp.zeros((Nb, 1, W + 2, 256), bf16)
    pad_ref[:, 1:H + 1, 0:1, :] = jnp.zeros((Nb, H, 1, 256), bf16)
    pad_ref[:, 1:H + 1, W + 1:W + 2, :] = jnp.zeros((Nb, H, 1, 256), bf16)
    pad_ref[:, 1:H + 1, 1:W + 1, :] = a.reshape(Nb, H, W, 256)

    # Hoist the sublane-axis dx shifts out of the dy loop: 3 shifted reads
    # total; dy is a cheap leading-axis slice of the loaded value.
    cols = [pad_ref[:, :, dx:dx + W, :] for dx in range(3)]  # (Nb,H+2,W,256)
    parts = []
    for dy in range(3):
        for dx in range(3):
            parts.append(cols[dx][:, dy:dy + H, :, :].reshape(M, 256))
    patches = jnp.concatenate(parts, axis=-1)               # (M, 2304) bf16

    yb = jnp.dot(patches, w23_ref[...], preferred_element_type=jnp.float32)
    yb = jnp.maximum(yb * s23_ref[...] + b23_ref[...], 0.0)  # (M, 320) f32
    o_ref[:, :, 128:384] = yb[:, 0:256].reshape(Nb, HW, 256).astype(o_ref.dtype)
    b3 = yb[:, 256:320]                                     # (M, 64) f32

    # ---- branch4: separable 3x3/s1/p1 maxpool fused with 1x1 conv ----------
    # Border-only -inf init of the padded pool scratch.
    pool_ref[:, 0:1, :, :] = jnp.full((Nb, 1, W + 2, C), -jnp.inf, bf16)
    pool_ref[:, H + 1:H + 2, :, :] = jnp.full((Nb, 1, W + 2, C), -jnp.inf, bf16)
    pool_ref[:, 1:H + 1, 0:1, :] = jnp.full((Nb, H, 1, C), -jnp.inf, bf16)
    pool_ref[:, 1:H + 1, W + 1:W + 2, :] = jnp.full((Nb, H, 1, C), -jnp.inf, bf16)
    pool_ref[:, 1:H + 1, 1:W + 1, :] = x_ref[...].reshape(Nb, H, W, C)

    rmax = jnp.maximum(
        jnp.maximum(pool_ref[:, 0:H, :, :], pool_ref[:, 1:H + 1, :, :]),
        pool_ref[:, 2:H + 2, :, :])                         # (Nb, H, W+2, 512)
    # TODO(synk): the two sublane-offset slices below could become
    # pltpu.roll (XLU slot) once packed-bf16 sublane rotates are validated on
    # the target toolchain; kept as plain slices for guaranteed lowering.
    pooled = jnp.maximum(
        jnp.maximum(rmax[:, :, 0:W, :], rmax[:, :, 1:W + 1, :]),
        rmax[:, :, 2:W + 2, :])                             # (Nb, H, W, 512)

    b4 = jnp.dot(pooled.reshape(M, C), w4_ref[...],
                 preferred_element_type=jnp.float32)
    b4 = jnp.maximum(b4 * s4_ref[...] + b4_ref[...], 0.0)   # (M, 64) f32

    # branches 3 and 4 share one lane-aligned 128-wide store.
    o_ref[:, :, 384:512] = jnp.concatenate([b3, b4], axis=-1).reshape(
        Nb, HW, 128).astype(o_ref.dtype)


def _pick_batch_block(n, hw, target_rows=256):
    """Largest divisor of n giving ~target_rows matmul rows per grid step."""
    nb = max(1, min(n, max(1, target_rows // hw)))
    while n % nb != 0:
        nb -= 1
    return nb


@jax.jit
def inception4c_forward(x_nchw, packed):
    """GoogLeNet inception4c forward. NCHW f32 in -> NCHW f32 out.

    (In a fully fused network the activations would stay flattened-NHWC bf16
    end-to-end; the transposes/casts here exist only to match the PyTorch
    NCHW module interface.)
    """
    N, C, H, W = x_nchw.shape
    assert C == 512, "inception4c expects 512 input channels"
    HW = H * W
    x = jnp.transpose(x_nchw, (0, 2, 3, 1)).astype(jnp.bfloat16)   # NHWC bf16
    x = x.reshape(N, HW, C)                                        # dense rows

    nb = _pick_batch_block(N, HW)
    grid = (N // nb,)
    kernel = functools.partial(_inception4c_kernel, H=H, W=W)
    # NOTE: one whole (Nb, H, W) block is processed per grid step; very large
    # spatial sizes would need spatial tiling with a 1-pixel halo.

    out = pl.pallas_call(
        kernel,
        out_shape=jax.ShapeDtypeStruct((N, HW, 512), jnp.bfloat16),
        grid_spec=pltpu.PrefetchScalarGridSpec(
            num_scalar_prefetch=0,
            grid=grid,
            in_specs=[
                pl.BlockSpec((nb, HW, C), lambda i: (i, 0, 0)),
                # Weights / folded-BN params: constant index maps (~2 MiB
                # total; pipeline_mode=pl.Buffered(1) could single-buffer them
                # if VMEM ever became tight on v7x).
                pl.BlockSpec((512, 384), lambda i: (0, 0)),
                pl.BlockSpec((1, 384), lambda i: (0, 0)),
                pl.BlockSpec((1, 384), lambda i: (0, 0)),
                pl.BlockSpec((2304, 320), lambda i: (0, 0)),
                pl.BlockSpec((1, 320), lambda i: (0, 0)),
                pl.BlockSpec((1, 320), lambda i: (0, 0)),
                pl.BlockSpec((512, 64), lambda i: (0, 0)),
                pl.BlockSpec((1, 64), lambda i: (0, 0)),
                pl.BlockSpec((1, 64), lambda i: (0, 0)),
            ],
            out_specs=pl.BlockSpec((nb, HW, 512), lambda i: (i, 0, 0)),
            scratch_shapes=[
                pltpu.VMEM((nb, H + 2, W + 2, 256), jnp.bfloat16),  # conv pad
                pltpu.VMEM((nb, H + 2, W + 2, 512), jnp.bfloat16),  # pool pad
            ],
        ),
        compiler_params=pltpu.CompilerParams(
            dimension_semantics=("parallel",)),
    )(x,
      packed["w1"], packed["s1"], packed["bi1"],
      packed["w23"], packed["s23"], packed["bi23"],
      packed["w4"], packed["s4"], packed["bi4"])

    out = out.reshape(N, H, W, 512)
    return jnp.transpose(out, (0, 3, 1, 2)).astype(jnp.float32)


# ----------------------------------------------------------------------------
# Parameter construction (synthetic, BN folded) and kernel-operand packing
# ----------------------------------------------------------------------------
def fold_bn(gamma, beta, mean, var, eps=1e-3):
    scale = gamma / jnp.sqrt(var + eps)
    bias = beta - mean * scale
    return scale, bias


def init_conv_bn(key, cin, cout, ksize):
    """Deterministic synthetic conv + BN (eval mode) params."""
    k_w, k_g, k_b, k_m, k_v = jax.random.split(key, 5)
    if ksize == 1:
        w = jax.random.normal(k_w, (cin, cout), jnp.float32) * 0.05
    else:
        # [kh, kw, cin, cout] -> [kh*kw*cin, cout]  (tap-major, then cin).
        w = jax.random.normal(k_w, (ksize, ksize, cin, cout), jnp.float32) * 0.05
        w = w.reshape(ksize * ksize * cin, cout)
    gamma = 1.0 + 0.1 * jax.random.normal(k_g, (cout,), jnp.float32)
    beta = 0.1 * jax.random.normal(k_b, (cout,), jnp.float32)
    mean = 0.1 * jax.random.normal(k_m, (cout,), jnp.float32)
    var = jnp.abs(jax.random.normal(k_v, (cout,), jnp.float32)) + 0.5
    scale, bias = fold_bn(gamma, beta, mean, var, eps=1e-3)
    return {"w": w, "scale": scale, "bias": bias}


def init_params(key):
    ks = jax.random.split(key, 6)
    return {
        "b1": init_conv_bn(ks[0], 512, 128, 1),
        "b2a": init_conv_bn(ks[1], 512, 128, 1),
        "b2b": init_conv_bn(ks[2], 128, 256, 3),
        "b3a": init_conv_bn(ks[3], 512, 24, 1),
        "b3b": init_conv_bn(ks[4], 24, 64, 3),
        "b4": init_conv_bn(ks[5], 512, 64, 1),
    }


def pack_params(p):
    """Fuse / pad raw params into bf16 kernel operands."""
    f32 = jnp.float32
    bf16 = jnp.bfloat16

    # Fused 1x1 weight: lanes [0:128]=b1, [128:256]=b2a, [256:280]=b3a, rest 0.
    w1 = jnp.zeros((512, 384), f32)
    w1 = w1.at[:, 0:128].set(p["b1"]["w"])
    w1 = w1.at[:, 128:256].set(p["b2a"]["w"])
    w1 = w1.at[:, 256:280].set(p["b3a"]["w"])
    s1 = jnp.ones((384,), f32)       # padded lanes: scale=1, bias=0 -> relu(0)=0
    bi1 = jnp.zeros((384,), f32)
    s1 = (s1.at[0:128].set(p["b1"]["scale"])
            .at[128:256].set(p["b2a"]["scale"])
            .at[256:280].set(p["b3a"]["scale"]))
    bi1 = (bi1.at[0:128].set(p["b1"]["bias"])
              .at[128:256].set(p["b2a"]["bias"])
              .at[256:280].set(p["b3a"]["bias"]))

    # Combined 3x3 weight for the joint im2col: for tap k,
    #   rows k*256 + [0:128]   -> b2 outputs (cols 0:256),
    #   rows k*256 + [128:152] -> b3 outputs (cols 256:320),
    #   remaining rows zero (they multiply zero-padded lanes).
    w2 = p["b2b"]["w"].reshape(9, 128, 256)
    w3 = p["b3b"]["w"].reshape(9, 24, 64)
    w23 = jnp.zeros((9, 256, 320), f32)
    w23 = w23.at[:, 0:128, 0:256].set(w2)
    w23 = w23.at[:, 128:152, 256:320].set(w3)
    w23 = w23.reshape(9 * 256, 320)
    s23 = jnp.concatenate([p["b2b"]["scale"], p["b3b"]["scale"]])
    bi23 = jnp.concatenate([p["b2b"]["bias"], p["b3b"]["bias"]])

    def row(v):
        return v.reshape(1, -1).astype(f32)

    return {
        "w1": w1.astype(bf16), "s1": row(s1), "bi1": row(bi1),
        "w23": w23.astype(bf16), "s23": row(s23), "bi23": row(bi23),
        "w4": p["b4"]["w"].astype(bf16), "s4": row(p["b4"]["scale"]),
        "bi4": row(p["b4"]["bias"]),
    }


# ----------------------------------------------------------------------------
# Pure-JAX f32 reference (for correctness check)
# ----------------------------------------------------------------------------
def _im2col_3x3(x_nhwc):
    N, H, W, C = x_nhwc.shape
    xp = jnp.pad(x_nhwc, ((0, 0), (1, 1), (1, 1), (0, 0)))
    shifts = [xp[:, dy:dy + H, dx:dx + W, :]
              for dy in range(3) for dx in range(3)]
    return jnp.concatenate(shifts, axis=-1)


def _maxpool3x3_ref(x_nhwc):
    N, H, W, C = x_nhwc.shape
    xp = jnp.pad(x_nhwc, ((0, 0), (1, 1), (1, 1), (0, 0)),
                 constant_values=-jnp.inf)
    m = xp[:, 0:H, 0:W, :]
    for dy in range(3):
        for dx in range(3):
            m = jnp.maximum(m, xp[:, dy:dy + H, dx:dx + W, :])
    return m


def reference_forward(x_nchw, p):
    x = jnp.transpose(x_nchw, (0, 2, 3, 1)).astype(jnp.float32)
    N, H, W, C = x.shape
    M = N * H * W

    def cbr(x2d, q):
        return jnp.maximum(x2d @ q["w"] * q["scale"] + q["bias"], 0.0)

    x2d = x.reshape(M, C)
    b1 = cbr(x2d, p["b1"]).reshape(N, H, W, 128)
    b2a = cbr(x2d, p["b2a"]).reshape(N, H, W, 128)
    b2 = cbr(_im2col_3x3(b2a).reshape(M, 9 * 128), p["b2b"]).reshape(N, H, W, 256)
    b3a = cbr(x2d, p["b3a"]).reshape(N, H, W, 24)
    b3 = cbr(_im2col_3x3(b3a).reshape(M, 9 * 24), p["b3b"]).reshape(N, H, W, 64)
    pooled = _maxpool3x3_ref(x)
    b4 = cbr(pooled.reshape(M, C), p["b4"]).reshape(N, H, W, 64)
    out = jnp.concatenate([b1, b2, b3, b4], axis=-1)
    return jnp.transpose(out, (0, 3, 1, 2))


if __name__ == "__main__":
    key = jax.random.PRNGKey(0)
    k_x, k_p = jax.random.split(key)

    # Module requires 512 input channels; keep batch/spatial small.
    N, C, H, W = 2, 512, 8, 8
    x = jax.random.normal(k_x, (N, C, H, W), jnp.float32)
    params = init_params(k_p)
    packed = pack_params(params)

    y = inception4c_forward(x, packed)
    y = jax.block_until_ready(y)

    assert y.shape == (N, 512, H, W), y.shape
    assert bool(jnp.all(jnp.isfinite(y)))
    assert bool(jnp.all(y >= 0.0))          # every branch ends in ReLU

    # Correctness vs. pure-JAX f32 reference (bf16 MXU path -> loose tol).
    y_ref = reference_forward(x, params)
    max_err = float(jnp.max(jnp.abs(y - y_ref)))
    ref_scale = float(jnp.max(jnp.abs(y_ref)))
    assert max_err <= 0.1 + 0.06 * ref_scale, (max_err, ref_scale)

    print("KERNEL_OK")
</pallas_src>

<mosaic_0001>
module attributes {stable_mosaic.version = 11 : i64} {
  func.func @_inception4c_kernel(%arg0: i32, %arg1: memref<2x64x512xbf16, #tpu.memory_space<vmem>>, %arg2: memref<512x384xbf16, #tpu.memory_space<vmem>>, %arg3: memref<1x384xf32, #tpu.memory_space<vmem>>, %arg4: memref<1x384xf32, #tpu.memory_space<vmem>>, %arg5: memref<2304x320xbf16, #tpu.memory_space<vmem>>, %arg6: memref<1x320xf32, #tpu.memory_space<vmem>>, %arg7: memref<1x320xf32, #tpu.memory_space<vmem>>, %arg8: memref<512x64xbf16, #tpu.memory_space<vmem>>, %arg9: memref<1x64xf32, #tpu.memory_space<vmem>>, %arg10: memref<1x64xf32, #tpu.memory_space<vmem>>, %arg11: memref<2x64x512xbf16, #tpu.memory_space<vmem>>, %arg12: memref<2x10x10x256xbf16, #tpu.memory_space<vmem>>, %arg13: memref<2x10x10x512xbf16, #tpu.memory_space<vmem>>) attributes {dimension_semantics = [#tpu.dimension_semantics<parallel>], iteration_bounds = array<i64: 1>, scalar_prefetch = 0 : i64, scratch_operands = 2 : i64, tpu.core_type = #tpu.core_type<tc>, window_params = [{transform_indices = @transform_0, window_bounds = array<i64: 2, 64, 512>}, {pipeline_mode = #tpu.pipeline_mode<synchronous>, transform_indices = @transform_1, window_bounds = array<i64: 512, 384>}, {pipeline_mode = #tpu.pipeline_mode<synchronous>, transform_indices = @transform_2, window_bounds = array<i64: 1, 384>}, {pipeline_mode = #tpu.pipeline_mode<synchronous>, transform_indices = @transform_3, window_bounds = array<i64: 1, 384>}, {pipeline_mode = #tpu.pipeline_mode<synchronous>, transform_indices = @transform_4, window_bounds = array<i64: 2304, 320>}, {pipeline_mode = #tpu.pipeline_mode<synchronous>, transform_indices = @transform_5, window_bounds = array<i64: 1, 320>}, {pipeline_mode = #tpu.pipeline_mode<synchronous>, transform_indices = @transform_6, window_bounds = array<i64: 1, 320>}, {pipeline_mode = #tpu.pipeline_mode<synchronous>, transform_indices = @transform_7, window_bounds = array<i64: 512, 64>}, {pipeline_mode = #tpu.pipeline_mode<synchronous>, transform_indices = @transform_8, window_bounds = array<i64: 1, 64>}, {pipeline_mode = #tpu.pipeline_mode<synchronous>, transform_indices = @transform_9, window_bounds = array<i64: 1, 64>}, {transform_indices = @transform_10, window_bounds = array<i64: 2, 64, 512>}]} {
    %c0 = arith.constant 0 : index
    %c0_0 = arith.constant 0 : index
    %c0_1 = arith.constant 0 : index
    %0 = vector.load %arg1[%c0, %c0_0, %c0_1] : memref<2x64x512xbf16, #tpu.memory_space<vmem>>, vector<2x64x512xbf16>
    %1 = vector.shape_cast %0 : vector<2x64x512xbf16> to vector<128x512xbf16>
    %c0_2 = arith.constant 0 : index
    %c0_3 = arith.constant 0 : index
    %2 = vector.load %arg2[%c0_2, %c0_3] : memref<512x384xbf16, #tpu.memory_space<vmem>>, vector<512x384xbf16>
    %cst = arith.constant dense<0.000000e+00> : vector<128x384xf32>
    %3 = tpu.matmul %1, %2, %cst {dimension_numbers = #tpu.dot_dimension_numbers<[1], [0], [0], [1], [0, 0, 1, 1], [], []>} : vector<128x512xbf16>, vector<512x384xbf16>, vector<128x384xf32> -> vector<128x384xf32>
    %c0_4 = arith.constant 0 : index
    %c0_5 = arith.constant 0 : index
    %4 = vector.load %arg3[%c0_4, %c0_5] : memref<1x384xf32, #tpu.memory_space<vmem>>, vector<1x384xf32>
    %5 = vector.broadcast %4 : vector<1x384xf32> to vector<128x384xf32>
    %6 = arith.mulf %3, %5 : vector<128x384xf32>
    %c0_6 = arith.constant 0 : index
    %c0_7 = arith.constant 0 : index
    %7 = vector.load %arg4[%c0_6, %c0_7] : memref<1x384xf32, #tpu.memory_space<vmem>>, vector<1x384xf32>
    %8 = vector.broadcast %7 : vector<1x384xf32> to vector<128x384xf32>
    %9 = arith.addf %6, %8 : vector<128x384xf32>
    %cst_8 = arith.constant 0.000000e+00 : f32
    %10 = vector.broadcast %cst_8 : f32 to vector<128x384xf32>
    %11 = arith.maximumf %9, %10 : vector<128x384xf32>
    %12 = vector.extract_strided_slice %11 {offsets = [0, 0], sizes = [128, 128], strides = [1, 1]} : vector<128x384xf32> to vector<128x128xf32>
    %13 = vector.shape_cast %12 : vector<128x128xf32> to vector<2x64x128xf32>
    %14 = arith.truncf %13 : vector<2x64x128xf32> to vector<2x64x128xbf16>
    %c0_9 = arith.constant 0 : index
    %c0_10 = arith.constant 0 : index
    %c0_11 = arith.constant 0 : index
    %15 = vector.load %arg11[%c0_9, %c0_10, %c0_11] : memref<2x64x512xbf16, #tpu.memory_space<vmem>>, vector<2x64x128xbf16>
    tpu.vector_store %arg11[%c0_9, %c0_10, %c0_11], %14 {strides = array<i32>} : memref<2x64x512xbf16, #tpu.memory_space<vmem>>, vector<2x64x128xbf16>,
    %16 = vector.extract_strided_slice %11 {offsets = [0, 128], sizes = [128, 256], strides = [1, 1]} : vector<128x384xf32> to vector<128x256xf32>
    %17 = arith.truncf %16 : vector<128x256xf32> to vector<128x256xbf16>
    %cst_12 = arith.constant 0.000000e+00 : bf16
    %18 = vector.broadcast %cst_12 : bf16 to vector<2x1x10x256xbf16>
    %c0_13 = arith.constant 0 : index
    %c0_14 = arith.constant 0 : index
    %c0_15 = arith.constant 0 : index
    %c0_16 = arith.constant 0 : index
    %19 = vector.load %arg12[%c0_13, %c0_14, %c0_15, %c0_16] : memref<2x10x10x256xbf16, #tpu.memory_space<vmem>>, vector<2x1x10x256xbf16>
    tpu.vector_store %arg12[%c0_13, %c0_14, %c0_15, %c0_16], %18 {strides = array<i32>} : memref<2x10x10x256xbf16, #tpu.memory_space<vmem>>, vector<2x1x10x256xbf16>,
    %cst_17 = arith.constant 0.000000e+00 : bf16
    %20 = vector.broadcast %cst_17 : bf16 to vector<2x1x10x256xbf16>
    %c0_18 = arith.constant 0 : index
    %c9 = arith.constant 9 : index
    %c0_19 = arith.constant 0 : index
    %c0_20 = arith.constant 0 : index
    %21 = vector.load %arg12[%c0_18, %c9, %c0_19, %c0_20] : memref<2x10x10x256xbf16, #tpu.memory_space<vmem>>, vector<2x1x10x256xbf16>
    tpu.vector_store %arg12[%c0_18, %c9, %c0_19, %c0_20], %20 {strides = array<i32>} : memref<2x10x10x256xbf16, #tpu.memory_space<vmem>>, vector<2x1x10x256xbf16>,
    %cst_21 = arith.constant 0.000000e+00 : bf16
    %22 = vector.broadcast %cst_21 : bf16 to vector<2x8x1x256xbf16>
    %c0_22 = arith.constant 0 : index
    %c1 = arith.constant 1 : index
    %c0_23 = arith.constant 0 : index
    %c0_24 = arith.constant 0 : index
    %23 = vector.load %arg12[%c0_22, %c1, %c0_23, %c0_24] : memref<2x10x10x256xbf16, #tpu.memory_space<vmem>>, vector<2x8x1x256xbf16>
    tpu.vector_store %arg12[%c0_22, %c1, %c0_23, %c0_24], %22 {strides = array<i32>} : memref<2x10x10x256xbf16, #tpu.memory_space<vmem>>, vector<2x8x1x256xbf16>,
    %cst_25 = arith.constant 0.000000e+00 : bf16
    %24 = vector.broadcast %cst_25 : bf16 to vector<2x8x1x256xbf16>
    %c0_26 = arith.constant 0 : index
    %c1_27 = arith.constant 1 : index
    %c9_28 = arith.constant 9 : index
    %c0_29 = arith.constant 0 : index
    %25 = vector.load %arg12[%c0_26, %c1_27, %c9_28, %c0_29] : memref<2x10x10x256xbf16, #tpu.memory_space<vmem>>, vector<2x8x1x256xbf16>
    tpu.vector_store %arg12[%c0_26, %c1_27, %c9_28, %c0_29], %24 {strides = array<i32>} : memref<2x10x10x256xbf16, #tpu.memory_space<vmem>>, vector<2x8x1x256xbf16>,
    %26 = vector.shape_cast %17 : vector<128x256xbf16> to vector<2x8x8x256xbf16>
    %c0_30 = arith.constant 0 : index
    %c1_31 = arith.constant 1 : index
    %c1_32 = arith.constant 1 : index
    %c0_33 = arith.constant 0 : index
    %27 = vector.load %arg12[%c0_30, %c1_31, %c1_32, %c0_33] : memref<2x10x10x256xbf16, #tpu.memory_space<vmem>>, vector<2x8x8x256xbf16>
    tpu.vector_store %arg12[%c0_30, %c1_31, %c1_32, %c0_33], %26 {strides = array<i32>} : memref<2x10x10x256xbf16, #tpu.memory_space<vmem>>, vector<2x8x8x256xbf16>,
    %c0_34 = arith.constant 0 : index
    %c0_35 = arith.constant 0 : index
    %c0_36 = arith.constant 0 : index
    %c0_37 = arith.constant 0 : index
    %28 = vector.load %arg12[%c0_34, %c0_35, %c0_36, %c0_37] : memref<2x10x10x256xbf16, #tpu.memory_space<vmem>>, vector<2x10x8x256xbf16>
    %c0_38 = arith.constant 0 : index
    %c0_39 = arith.constant 0 : index
    %c1_40 = arith.constant 1 : index
    %c0_41 = arith.constant 0 : index
    %29 = vector.load %arg12[%c0_38, %c0_39, %c1_40, %c0_41] : memref<2x10x10x256xbf16, #tpu.memory_space<vmem>>, vector<2x10x8x256xbf16>
    %c0_42 = arith.constant 0 : index
    %c0_43 = arith.constant 0 : index
    %c2 = arith.constant 2 : index
    %c0_44 = arith.constant 0 : index
    %30 = vector.load %arg12[%c0_42, %c0_43, %c2, %c0_44] : memref<2x10x10x256xbf16, #tpu.memory_space<vmem>>, vector<2x10x8x256xbf16>
    %31 = vector.extract_strided_slice %28 {offsets = [0, 0, 0, 0], sizes = [2, 8, 8, 256], strides = [1, 1, 1, 1]} : vector<2x10x8x256xbf16> to vector<2x8x8x256xbf16>
    %32 = vector.shape_cast %31 : vector<2x8x8x256xbf16> to vector<128x256xbf16>
    %33 = vector.extract_strided_slice %29 {offsets = [0, 0, 0, 0], sizes = [2, 8, 8, 256], strides = [1, 1, 1, 1]} : vector<2x10x8x256xbf16> to vector<2x8x8x256xbf16>
    %34 = vector.shape_cast %33 : vector<2x8x8x256xbf16> to vector<128x256xbf16>
    %35 = vector.extract_strided_slice %30 {offsets = [0, 0, 0, 0], sizes = [2, 8, 8, 256], strides = [1, 1, 1, 1]} : vector<2x10x8x256xbf16> to vector<2x8x8x256xbf16>
    %36 = vector.shape_cast %35 : vector<2x8x8x256xbf16> to vector<128x256xbf16>
    %37 = vector.extract_strided_slice %28 {offsets = [0, 1, 0, 0], sizes = [2, 8, 8, 256], strides = [1, 1, 1, 1]} : vector<2x10x8x256xbf16> to vector<2x8x8x256xbf16>
    %38 = vector.shape_cast %37 : vector<2x8x8x256xbf16> to vector<128x256xbf16>
    %39 = vector.extract_strided_slice %29 {offsets = [0, 1, 0, 0], sizes = [2, 8, 8, 256], strides = [1, 1, 1, 1]} : vector<2x10x8x256xbf16> to vector<2x8x8x256xbf16>
    %40 = vector.shape_cast %39 : vector<2x8x8x256xbf16> to vector<128x256xbf16>
    %41 = vector.extract_strided_slice %30 {offsets = [0, 1, 0, 0], sizes = [2, 8, 8, 256], strides = [1, 1, 1, 1]} : vector<2x10x8x256xbf16> to vector<2x8x8x256xbf16>
    %42 = vector.shape_cast %41 : vector<2x8x8x256xbf16> to vector<128x256xbf16>
    %43 = vector.extract_strided_slice %28 {offsets = [0, 2, 0, 0], sizes = [2, 8, 8, 256], strides = [1, 1, 1, 1]} : vector<2x10x8x256xbf16> to vector<2x8x8x256xbf16>
    %44 = vector.shape_cast %43 : vector<2x8x8x256xbf16> to vector<128x256xbf16>
    %45 = vector.extract_strided_slice %29 {offsets = [0, 2, 0, 0], sizes = [2, 8, 8, 256], strides = [1, 1, 1, 1]} : vector<2x10x8x256xbf16> to vector<2x8x8x256xbf16>
    %46 = vector.shape_cast %45 : vector<2x8x8x256xbf16> to vector<128x256xbf16>
    %47 = vector.extract_strided_slice %30 {offsets = [0, 2, 0, 0], sizes = [2, 8, 8, 256], strides = [1, 1, 1, 1]} : vector<2x10x8x256xbf16> to vector<2x8x8x256xbf16>
    %48 = vector.shape_cast %47 : vector<2x8x8x256xbf16> to vector<128x256xbf16>
    %49 = tpu.concatenate %32, %34, %36, %38, %40, %42, %44, %46, %48 in 1 : vector<128x256xbf16>, vector<128x256xbf16>, vector<128x256xbf16>, vector<128x256xbf16>, vector<128x256xbf16>, vector<128x256xbf16>, vector<128x256xbf16>, vector<128x256xbf16>, vector<128x256xbf16> -> vector<128x2304xbf16>
    %c0_45 = arith.constant 0 : index
    %c0_46 = arith.constant 0 : index
    %50 = vector.load %arg5[%c0_45, %c0_46] : memref<2304x320xbf16, #tpu.memory_space<vmem>>, vector<2304x320xbf16>
    %cst_47 = arith.constant dense<0.000000e+00> : vector<128x320xf32>
    %51 = tpu.matmul %49, %50, %cst_47 {dimension_numbers = #tpu.dot_dimension_numbers<[1], [0], [0], [1], [0, 0, 1, 1], [], []>} : vector<128x2304xbf16>, vector<2304x320xbf16>, vector<128x320xf32> -> vector<128x320xf32>
    %c0_48 = arith.constant 0 : index
    %c0_49 = arith.constant 0 : index
    %52 = vector.load %arg6[%c0_48, %c0_49] : memref<1x320xf32, #tpu.memory_space<vmem>>, vector<1x320xf32>
    %53 = vector.broadcast %52 : vector<1x320xf32> to vector<128x320xf32>
    %54 = arith.mulf %51, %53 : vector<128x320xf32>
    %c0_50 = arith.constant 0 : index
    %c0_51 = arith.constant 0 : index
    %55 = vector.load %arg7[%c0_50, %c0_51] : memref<1x320xf32, #tpu.memory_space<vmem>>, vector<1x320xf32>
    %56 = vector.broadcast %55 : vector<1x320xf32> to vector<128x320xf32>
    %57 = arith.addf %54, %56 : vector<128x320xf32>
    %cst_52 = arith.constant 0.000000e+00 : f32
    %58 = vector.broadcast %cst_52 : f32 to vector<128x320xf32>
    %59 = arith.maximumf %57, %58 : vector<128x320xf32>
    %60 = vector.extract_strided_slice %59 {offsets = [0, 0], sizes = [128, 256], strides = [1, 1]} : vector<128x320xf32> to vector<128x256xf32>
    %61 = vector.shape_cast %60 : vector<128x256xf32> to vector<2x64x256xf32>
    %62 = arith.truncf %61 : vector<2x64x256xf32> to vector<2x64x256xbf16>
    %c0_53 = arith.constant 0 : index
    %c0_54 = arith.constant 0 : index
    %c128 = arith.constant 128 : index
    %63 = vector.load %arg11[%c0_53, %c0_54, %c128] : memref<2x64x512xbf16, #tpu.memory_space<vmem>>, vector<2x64x256xbf16>
    tpu.vector_store %arg11[%c0_53, %c0_54, %c128], %62 {strides = array<i32>} : memref<2x64x512xbf16, #tpu.memory_space<vmem>>, vector<2x64x256xbf16>,
    %64 = vector.extract_strided_slice %59 {offsets = [0, 256], sizes = [128, 64], strides = [1, 1]} : vector<128x320xf32> to vector<128x64xf32>
    %cst_55 = arith.constant 0xFF80 : bf16
    %65 = vector.broadcast %cst_55 : bf16 to vector<2x1x10x512xbf16>
    %c0_56 = arith.constant 0 : index
    %c0_57 = arith.constant 0 : index
    %c0_58 = arith.constant 0 : index
    %c0_59 = arith.constant 0 : index
    %66 = vector.load %arg13[%c0_56, %c0_57, %c0_58, %c0_59] : memref<2x10x10x512xbf16, #tpu.memory_space<vmem>>, vector<2x1x10x512xbf16>
    tpu.vector_store %arg13[%c0_56, %c0_57, %c0_58, %c0_59], %65 {strides = array<i32>} : memref<2x10x10x512xbf16, #tpu.memory_space<vmem>>, vector<2x1x10x512xbf16>,
    %cst_60 = arith.constant 0xFF80 : bf16
    %67 = vector.broadcast %cst_60 : bf16 to vector<2x1x10x512xbf16>
    %c0_61 = arith.constant 0 : index
    %c9_62 = arith.constant 9 : index
    %c0_63 = arith.constant 0 : index
    %c0_64 = arith.constant 0 : index
    %68 = vector.load %arg13[%c0_61, %c9_62, %c0_63, %c0_64] : memref<2x10x10x512xbf16, #tpu.memory_space<vmem>>, vector<2x1x10x512xbf16>
    tpu.vector_store %arg13[%c0_61, %c9_62, %c0_63, %c0_64], %67 {strides = array<i32>} : memref<2x10x10x512xbf16, #tpu.memory_space<vmem>>, vector<2x1x10x512xbf16>,
    %cst_65 = arith.constant 0xFF80 : bf16
    %69 = vector.broadcast %cst_65 : bf16 to vector<2x8x1x512xbf16>
    %c0_66 = arith.constant 0 : index
    %c1_67 = arith.constant 1 : index
    %c0_68 = arith.constant 0 : index
    %c0_69 = arith.constant 0 : index
    %70 = vector.load %arg13[%c0_66, %c1_67, %c0_68, %c0_69] : memref<2x10x10x512xbf16, #tpu.memory_space<vmem>>, vector<2x8x1x512xbf16>
    tpu.vector_store %arg13[%c0_66, %c1_67, %c0_68, %c0_69], %69 {strides = array<i32>} : memref<2x10x10x512xbf16, #tpu.memory_space<vmem>>, vector<2x8x1x512xbf16>,
    %cst_70 = arith.constant 0xFF80 : bf16
    %71 = vector.broadcast %cst_70 : bf16 to vector<2x8x1x512xbf16>
    %c0_71 = arith.constant 0 : index
    %c1_72 = arith.constant 1 : index
    %c9_73 = arith.constant 9 : index
    %c0_74 = arith.constant 0 : index
    %72 = vector.load %arg13[%c0_71, %c1_72, %c9_73, %c0_74] : memref<2x10x10x512xbf16, #tpu.memory_space<vmem>>, vector<2x8x1x512xbf16>
    tpu.vector_store %arg13[%c0_71, %c1_72, %c9_73, %c0_74], %71 {strides = array<i32>} : memref<2x10x10x512xbf16, #tpu.memory_space<vmem>>, vector<2x8x1x512xbf16>,
    %c0_75 = arith.constant 0 : index
    %c0_76 = arith.constant 0 : index
    %c0_77 = arith.constant 0 : index
    %73 = vector.load %arg1[%c0_75, %c0_76, %c0_77] : memref<2x64x512xbf16, #tpu.memory_space<vmem>>, vector<2x64x512xbf16>
    %74 = vector.shape_cast %73 : vector<2x64x512xbf16> to vector<2x8x8x512xbf16>
    %c0_78 = arith.constant 0 : index
    %c1_79 = arith.constant 1 : index
    %c1_80 = arith.constant 1 : index
    %c0_81 = arith.constant 0 : index
    %75 = vector.load %arg13[%c0_78, %c1_79, %c1_80, %c0_81] : memref<2x10x10x512xbf16, #tpu.memory_space<vmem>>, vector<2x8x8x512xbf16>
    tpu.vector_store %arg13[%c0_78, %c1_79, %c1_80, %c0_81], %74 {strides = array<i32>} : memref<2x10x10x512xbf16, #tpu.memory_space<vmem>>, vector<2x8x8x512xbf16>,
    %c0_82 = arith.constant 0 : index
    %c0_83 = arith.constant 0 : index
    %c0_84 = arith.constant 0 : index
    %c0_85 = arith.constant 0 : index
    %76 = vector.load %arg13[%c0_82, %c0_83, %c0_84, %c0_85] : memref<2x10x10x512xbf16, #tpu.memory_space<vmem>>, vector<2x8x10x512xbf16>
    %c0_86 = arith.constant 0 : index
    %c1_87 = arith.constant 1 : index
    %c0_88 = arith.constant 0 : index
    %c0_89 = arith.constant 0 : index
    %77 = vector.load %arg13[%c0_86, %c1_87, %c0_88, %c0_89] : memref<2x10x10x512xbf16, #tpu.memory_space<vmem>>, vector<2x8x10x512xbf16>
    %78 = arith.maximumf %76, %77 : vector<2x8x10x512xbf16>
    %c0_90 = arith.constant 0 : index
    %c2_91 = arith.constant 2 : index
    %c0_92 = arith.constant 0 : index
    %c0_93 = arith.constant 0 : index
    %79 = vector.load %arg13[%c0_90, %c2_91, %c0_92, %c0_93] : memref<2x10x10x512xbf16, #tpu.memory_space<vmem>>, vector<2x8x10x512xbf16>
    %80 = arith.maximumf %78, %79 : vector<2x8x10x512xbf16>
    %81 = vector.extract_strided_slice %80 {offsets = [0, 0, 0, 0], sizes = [2, 8, 8, 512], strides = [1, 1, 1, 1]} : vector<2x8x10x512xbf16> to vector<2x8x8x512xbf16>
    %82 = vector.extract_strided_slice %80 {offsets = [0, 0, 1, 0], sizes = [2, 8, 8, 512], strides = [1, 1, 1, 1]} : vector<2x8x10x512xbf16> to vector<2x8x8x512xbf16>
    %83 = arith.maximumf %81, %82 : vector<2x8x8x512xbf16>
    %84 = vector.extract_strided_slice %80 {offsets = [0, 0, 2, 0], sizes = [2, 8, 8, 512], strides = [1, 1, 1, 1]} : vector<2x8x10x512xbf16> to vector<2x8x8x512xbf16>
    %85 = arith.maximumf %83, %84 : vector<2x8x8x512xbf16>
    %86 = vector.shape_cast %85 : vector<2x8x8x512xbf16> to vector<128x512xbf16>
    %c0_94 = arith.constant 0 : index
    %c0_95 = arith.constant 0 : index
    %87 = vector.load %arg8[%c0_94, %c0_95] : memref<512x64xbf16, #tpu.memory_space<vmem>>, vector<512x64xbf16>
    %cst_96 = arith.constant dense<0.000000e+00> : vector<128x64xf32>
    %88 = tpu.matmul %86, %87, %cst_96 {dimension_numbers = #tpu.dot_dimension_numbers<[1], [0], [0], [1], [0, 0, 1, 1], [], []>} : vector<128x512xbf16>, vector<512x64xbf16>, vector<128x64xf32> -> vector<128x64xf32>
    %c0_97 = arith.constant 0 : index
    %c0_98 = arith.constant 0 : index
    %89 = vector.load %arg9[%c0_97, %c0_98] : memref<1x64xf32, #tpu.memory_space<vmem>>, vector<1x64xf32>
    %90 = vector.broadcast %89 : vector<1x64xf32> to vector<128x64xf32>
    %91 = arith.mulf %88, %90 : vector<128x64xf32>
    %c0_99 = arith.constant 0 : index
    %c0_100 = arith.constant 0 : index
    %92 = vector.load %arg10[%c0_99, %c0_100] : memref<1x64xf32, #tpu.memory_space<vmem>>, vector<1x64xf32>
    %93 = vector.broadcast %92 : vector<1x64xf32> to vector<128x64xf32>
    %94 = arith.addf %91, %93 : vector<128x64xf32>
    %cst_101 = arith.constant 0.000000e+00 : f32
    %95 = vector.broadcast %cst_101 : f32 to vector<128x64xf32>
    %96 = arith.maximumf %94, %95 : vector<128x64xf32>
    %97 = tpu.concatenate %64, %96 in 1 : vector<128x64xf32>, vector<128x64xf32> -> vector<128x128xf32>
    %98 = vector.shape_cast %97 : vector<128x128xf32> to vector<2x64x128xf32>
    %99 = arith.truncf %98 : vector<2x64x128xf32> to vector<2x64x128xbf16>
    %c0_102 = arith.constant 0 : index
    %c0_103 = arith.constant 0 : index
    %c384 = arith.constant 384 : index
    %100 = vector.load %arg11[%c0_102, %c0_103, %c384] : memref<2x64x512xbf16, #tpu.memory_space<vmem>>, vector<2x64x128xbf16>
    tpu.vector_store %arg11[%c0_102, %c0_103, %c384], %99 {strides = array<i32>} : memref<2x64x512xbf16, #tpu.memory_space<vmem>>, vector<2x64x128xbf16>,
    return
  }
  func.func @transform_0(%arg0: i32) -> (i32, i32, i32) {
    %c0_i32 = arith.constant 0 : i32
    %c0_i32_0 = arith.constant 0 : i32
    %c0_i32_1 = arith.constant 0 : i32
    return %arg0, %c0_i32, %c0_i32_0 : i32, i32, i32
  }
  func.func @transform_1(%arg0: i32) -> (i32, i32) {
    %c0_i32 = arith.constant 0 : i32
    %c0_i32_0 = arith.constant 0 : i32
    %c0_i32_1 = arith.constant 0 : i32
    return %c0_i32, %c0_i32_0 : i32, i32
  }
  func.func @transform_2(%arg0: i32) -> (i32, i32) {
    %c0_i32 = arith.constant 0 : i32
    %c0_i32_0 = arith.constant 0 : i32
    %c0_i32_1 = arith.constant 0 : i32
    return %c0_i32, %c0_i32_0 : i32, i32
  }
  func.func @transform_3(%arg0: i32) -> (i32, i32) {
    %c0_i32 = arith.constant 0 : i32
    %c0_i32_0 = arith.constant 0 : i32
    %c0_i32_1 = arith.constant 0 : i32
    return %c0_i32, %c0_i32_0 : i32, i32
  }
  func.func @transform_4(%arg0: i32) -> (i32, i32) {
    %c0_i32 = arith.constant 0 : i32
    %c0_i32_0 = arith.constant 0 : i32
    %c0_i32_1 = arith.constant 0 : i32
    return %c0_i32, %c0_i32_0 : i32, i32
  }
  func.func @transform_5(%arg0: i32) -> (i32, i32) {
    %c0_i32 = arith.constant 0 : i32
    %c0_i32_0 = arith.constant 0 : i32
    %c0_i32_1 = arith.constant 0 : i32
    return %c0_i32, %c0_i32_0 : i32, i32
  }
  func.func @transform_6(%arg0: i32) -> (i32, i32) {
    %c0_i32 = arith.constant 0 : i32
    %c0_i32_0 = arith.constant 0 : i32
    %c0_i32_1 = arith.constant 0 : i32
    return %c0_i32, %c0_i32_0 : i32, i32
  }
  func.func @transform_7(%arg0: i32) -> (i32, i32) {
    %c0_i32 = arith.constant 0 : i32
    %c0_i32_0 = arith.constant 0 : i32
    %c0_i32_1 = arith.constant 0 : i32
    return %c0_i32, %c0_i32_0 : i32, i32
  }
  func.func @transform_8(%arg0: i32) -> (i32, i32) {
    %c0_i32 = arith.constant 0 : i32
    %c0_i32_0 = arith.constant 0 : i32
    %c0_i32_1 = arith.constant 0 : i32
    return %c0_i32, %c0_i32_0 : i32, i32
  }
  func.func @transform_9(%arg0: i32) -> (i32, i32) {
    %c0_i32 = arith.constant 0 : i32
    %c0_i32_0 = arith.constant 0 : i32
    %c0_i32_1 = arith.constant 0 : i32
    return %c0_i32, %c0_i32_0 : i32, i32
  }
  func.func @transform_10(%arg0: i32) -> (i32, i32, i32) {
    %c0_i32 = arith.constant 0 : i32
    %c0_i32_0 = arith.constant 0 : i32
    %c0_i32_1 = arith.constant 0 : i32
    return %arg0, %c0_i32, %c0_i32_0 : i32, i32, i32
  }
}

</mosaic_0001>

<bundles_post_ra>
// kernel: inception4c_forward.1
= control target key start
LH: loop header
LB: loop body
LE: loop exit
PB: predicated region body
PF: predicated region fallthrough
CT: control target
= control target key end

     0   :  { %vm1573_vm0 = vcmask 1040384   ;;  %vm1574_vm1 = vsmask.f32 256  ;;  %vm1576_vm2 = vcmask 1044484   ;;  %vm1577_vm3 = vsmask.f32 4352  ;;  %s19611_s1 = inlined_call_operand.vmem [shape: bf16[512,384], index: 1, kind: input, shape index: {}]   ;;  %s19612_s0 = inlined_call_operand.vmem [shape: bf16[2,64,512], index: 0, kind: input, shape index: {}]   ;;  %s19613_s4 = inlined_call_operand.vmem [shape: bf16[2304,320], index: 4, kind: input, shape index: {}]   ;;  %s19614_s2 = inlined_call_operand.vmem [shape: f32[1,384], index: 2, kind: input, shape index: {}]   ;;  %s19615_s3 = inlined_call_operand.vmem [shape: f32[1,384], index: 3, kind: input, shape index: {}]   ;;  %s19616_s10 = inlined_call_operand.vmem [shape: bf16[2,64,512], index: 10, kind: output, shape index: {}]   ;;  %s19617_s7 = inlined_call_operand.vmem [shape: bf16[512,64], index: 7, kind: input, shape index: {}]   ;;  %s19618_s5 = inlined_call_operand.vmem [shape: f32[1,320], index: 5, kind: input, shape index: {}]   ;;  %s19619_s6 = inlined_call_operand.vmem [shape: f32[1,320], index: 6, kind: input, shape index: {}]   ;;  %s19620_s8 = inlined_call_operand.vmem [shape: f32[1,64], index: 8, kind: input, shape index: {}]   ;;  %s19621_s9 = inlined_call_operand.vmem [shape: f32[1,64], index: 9, kind: input, shape index: {}]  }
   0x1   :  { %v12357_v0 = vld [vmem:[%s19611_s1 + $0xac] ss:$12 sps:$4 sm:$0xff]   ;;  %v12361_v2 = vld [vmem:[%s19611_s1 + $0xa8] ss:$12 sps:$4 sm:$0xff]   ;;  %v12367_v6 = vld [vmem:[%s19611_s1 + $0x90] ss:$12 sps:$4 sm:$0xff]  }
   0x2   :  { %v12359_v1 = vld [vmem:[%s19611_s1 + $0x22c] ss:$12 sps:$4 sm:$0xff]   ;;  %869 = vmatprep.subr.bf16.mxu0 %v12357_v0  ;;  %v12362_v3 = vld [vmem:[%s19611_s1 + $0x228] ss:$12 sps:$4 sm:$0xff]   ;;  %v12368_v7 = vld [vmem:[%s19611_s1 + $0x210] ss:$12 sps:$4 sm:$0xff]  }
   0x3   :  { %982 = vmatprep.subr.bf16.mxu1 %v12359_v1  ;;  %v12363_v4 = vld [vmem:[%s19611_s1 + $0x94] ss:$12 sps:$4 sm:$0xff]   ;;  %870 = vmatpush1.bf16.msra.mxu0 %v12361_v2  ;;  %v12369_v8 = vld [vmem:[%s19611_s1 + $0x7c] ss:$12 sps:$4 sm:$0xff]   ;;  %v12373_v10 = vld [vmem:[%s19611_s1 + $0x78] ss:$12 sps:$4 sm:$0xff]  }
   0x4   :  { %983 = vmatpush1.bf16.msra.mxu1 %v12362_v3  ;;  %v12365_v5 = vld [vmem:[%s19611_s1 + $0x214] ss:$12 sps:$4 sm:$0xff]   ;;  %871 = vmatprep.subr.bf16.mxu0 %v12363_v4  ;;  %v12371_v9 = vld [vmem:[%s19611_s1 + $0x1fc] ss:$12 sps:$4 sm:$0xff]   ;;  %v12374_v11 = vld [vmem:[%s19611_s1 + $0x1f8] ss:$12 sps:$4 sm:$0xff]  }
   0x5   :  { %984 = vmatprep.subr.bf16.mxu1 %v12365_v5  ;;  %v12375_v12 = vld [vmem:[%s19611_s1 + $0x64] ss:$12 sps:$4 sm:$0xff]   ;;  %v12379_v14 = vld [vmem:[%s19611_s1 + $0x60] ss:$12 sps:$4 sm:$0xff]   ;;  %v12385_v18 = vld [vmem:[%s19611_s1 + $0x48] ss:$12 sps:$4 sm:$0xff]  }
   0x6   :  { %v12377_v13 = vld [vmem:[%s19611_s1 + $0x1e4] ss:$12 sps:$4 sm:$0xff]   ;;  %v12380_v15 = vld [vmem:[%s19611_s1 + $0x1e0] ss:$12 sps:$4 sm:$0xff]   ;;  %v12386_v19 = vld [vmem:[%s19611_s1 + $0x1c8] ss:$12 sps:$4 sm:$0xff]  }
   0x7   :  { %872 = vmatpush1.bf16.msra.mxu0 %v12367_v6  ;;  %v12381_v16 = vld [vmem:[%s19611_s1 + $0x4c] ss:$12 sps:$4 sm:$0xff]   ;;  %v12387_v20 = vld [vmem:[%s19611_s1 + $0x34] ss:$12 sps:$4 sm:$0xff]   ;;  %v12391_v22 = vld [vmem:[%s19611_s1 + $0x30] ss:$12 sps:$4 sm:$0xff]  }
   0x8   :  { %985 = vmatpush1.bf16.msra.mxu1 %v12368_v7  ;;  %873 = vmatprep.subr.bf16.mxu0 %v12369_v8  ;;  %v12383_v17 = vld [vmem:[%s19611_s1 + $0x1cc] ss:$12 sps:$4 sm:$0xff]   ;;  %v12389_v21 = vld [vmem:[%s19611_s1 + $0x1b4] ss:$12 sps:$4 sm:$0xff]   ;;  %v12392_v23 = vld [vmem:[%s19611_s1 + $0x1b0] ss:$12 sps:$4 sm:$0xff]  }
   0x9   :  { %986 = vmatprep.subr.bf16.mxu1 %v12371_v9  ;;  %v12393_v24 = vld [vmem:[%s19611_s1 + $0x1c] ss:$12 sps:$4 sm:$0xff]   ;;  %v12397_v26 = vld [vmem:[%s19611_s1 + $0x18] ss:$12 sps:$4 sm:$0xff]   ;;  %v12403_v30 = vld [vmem:[%s19611_s1] ss:$12 sps:$4 sm:$0xff]  }
   0xa   :  { %v12395_v25 = vld [vmem:[%s19611_s1 + $0x19c] ss:$12 sps:$4 sm:$0xff]   ;;  %v12398_v27 = vld [vmem:[%s19611_s1 + $0x198] ss:$12 sps:$4 sm:$0xff]   ;;  %v12404_v31 = vld [vmem:[%s19611_s1 + $0x180] ss:$12 sps:$4 sm:$0xff]  }
   0xb   :  { %874 = vmatpush1.bf16.msra.mxu0 %v12373_v10  ;;  %v12399_v28 = vld [vmem:[%s19611_s1 + $0x4] ss:$12 sps:$4 sm:$0xff]   ;;  %v12405_v32 = vld [vmem:[%s19611_s1 + $0x16c] ss:$12 sps:$4 sm:$0xff]   ;;  %v12409_v34 = vld [vmem:[%s19611_s1 + $0x168] ss:$12 sps:$4 sm:$0xff]  }
   0xc   :  { %987 = vmatpush1.bf16.msra.mxu1 %v12374_v11  ;;  %875 = vmatprep.subr.bf16.mxu0 %v12375_v12  ;;  %v12401_v29 = vld [vmem:[%s19611_s1 + $0x184] ss:$12 sps:$4 sm:$0xff]   ;;  %v12407_v33 = vld [vmem:[%s19611_s1 + $0x2ec] ss:$12 sps:$4 sm:$0xff]   ;;  %v12410_v35 = vld [vmem:[%s19611_s1 + $0x2e8] ss:$12 sps:$4 sm:$0xff]  }
   0xd   :  { %988 = vmatprep.subr.bf16.mxu1 %v12377_v13  ;;  %v12411_v36 = vld [vmem:[%s19611_s1 + $0x154] ss:$12 sps:$4 sm:$0xff]   ;;  %v12415_v38 = vld [vmem:[%s19611_s1 + $0x150] ss:$12 sps:$4 sm:$0xff]   ;;  %v12421_v42 = vld [vmem:[%s19611_s1 + $0x138] ss:$12 sps:$4 sm:$0xff]  }
   0xe   :  { %v12413_v37 = vld [vmem:[%s19611_s1 + $0x2d4] ss:$12 sps:$4 sm:$0xff]   ;;  %v12416_v39 = vld [vmem:[%s19611_s1 + $0x2d0] ss:$12 sps:$4 sm:$0xff]   ;;  %v12422_v43 = vld [vmem:[%s19611_s1 + $0x2b8] ss:$12 sps:$4 sm:$0xff]  }
   0xf   :  { %876 = vmatpush1.bf16.msra.mxu0 %v12379_v14  ;;  %v12417_v40 = vld [vmem:[%s19611_s1 + $0x13c] ss:$12 sps:$4 sm:$0xff]   ;;  %v12423_v44 = vld [vmem:[%s19611_s1 + $0x124] ss:$12 sps:$4 sm:$0xff]   ;;  %v12427_v46 = vld [vmem:[%s19611_s1 + $0x120] ss:$12 sps:$4 sm:$0xff]  }
  0x10   :  { %989 = vmatpush1.bf16.msra.mxu1 %v12380_v15  ;;  %877 = vmatprep.subr.bf16.mxu0 %v12381_v16  ;;  %v12419_v41 = vld [vmem:[%s19611_s1 + $0x2bc] ss:$12 sps:$4 sm:$0xff]   ;;  %v12425_v45 = vld [vmem:[%s19611_s1 + $0x2a4] ss:$12 sps:$4 sm:$0xff]   ;;  %v12428_v47 = vld [vmem:[%s19611_s1 + $0x2a0] ss:$12 sps:$4 sm:$0xff]  }
  0x11   :  { %990 = vmatprep.subr.bf16.mxu1 %v12383_v17  ;;  %v12429_v48 = vld [vmem:[%s19611_s1 + $0x10c] ss:$12 sps:$4 sm:$0xff]   ;;  %v13368_v49 = vld [vmem:[%s19612_s0 + $0x4] ss:$16 sps:$4 sm:$0xff]   ;;  %v12439_v56 = vld [vmem:[%s19611_s1 + $0xf0] ss:$12 sps:$4 sm:$0xff]  }
  0x12   :  { %v12431_v50 = vld [vmem:[%s19611_s1 + $0x28c] ss:$12 sps:$4 sm:$0xff]   ;;  %v12433_v52 = vld [vmem:[%s19611_s1 + $0x108] ss:$12 sps:$4 sm:$0xff]   ;;  %901 = vmatprep.mubr.bf16.mxu0 %v13368_v49  ;;  %v12440_v57 = vld [vmem:[%s19611_s1 + $0x270] ss:$12 sps:$4 sm:$0xff]  }
  0x13   :  { %878 = vmatpush1.bf16.msra.mxu0 %v12385_v18  ;;  %v13376_v51 = vld [vmem:[%s19612_s0 + $0xc] ss:$16 sps:$4 sm:$0xff]   ;;  %v12434_v53 = vld [vmem:[%s19611_s1 + $0x288] ss:$12 sps:$4 sm:$0xff]   ;;  %v12445_v60 = vld [vmem:[%s19611_s1 + $0xd8] ss:$12 sps:$4 sm:$0xff]  }
  0x14   :  { %991 = vmatpush1.bf16.msra.mxu1 %v12386_v19  ;;  %879 = vmatprep.subr.bf16.mxu0 %v12387_v20  ;;  %v12435_v54 = vld [vmem:[%s19611_s1 + $0xf4] ss:$12 sps:$4 sm:$0xff]   ;;  %v12441_v58 = vld [vmem:[%s19611_s1 + $0xdc] ss:$12 sps:$4 sm:$0xff]   ;;  %v12446_v61 = vld [vmem:[%s19611_s1 + $0x258] ss:$12 sps:$4 sm:$0xff]  }
  0x15   :  { %992 = vmatprep.subr.bf16.mxu1 %v12389_v21  ;;  %1014 = vmatprep.mubr.bf16.mxu1 %v13376_v51  ;;  %v12437_v55 = vld [vmem:[%s19611_s1 + $0x274] ss:$12 sps:$4 sm:$0xff]   ;;  %v12443_v59 = vld [vmem:[%s19611_s1 + $0x25c] ss:$12 sps:$4 sm:$0xff]   ;;  %v12447_v62 = vld [vmem:[%s19611_s1 + $0xc4] ss:$12 sps:$4 sm:$0xff]  }
  0x16   :  { %v12449_v63 = vld [vmem:[%s19611_s1 + $0x244] ss:$12 sps:$4 sm:$0xff]   ;;  %v12451_v0 = vld [vmem:[%s19611_s1 + $0xc0] ss:$12 sps:$4 sm:$0xff]   ;;  %v13433_v4 = vld [vmem:[%s19612_s0 + $0x8] ss:$16 sps:$4 sm:$0xff]  }
  0x17   :  { %880 = vmatpush1.bf16.msra.mxu0 %v12391_v22  ;;  %v12452_v1 = vld [vmem:[%s19611_s1 + $0x240] ss:$12 sps:$4 sm:$0xff]   ;;  %v12459_v2 = vld [vmem:[%s19611_s1 + $0x170] ss:$12 sps:$4 sm:$0xff]   ;;  %v13447_v8 = vld [vmem:[%s19612_s0 + $0x24] ss:$16 sps:$4 sm:$0xff]  }
  0x18   :  { %993 = vmatpush1.bf16.msra.mxu1 %v12392_v23  ;;  %881 = vmatprep.subr.bf16.mxu0 %v12393_v24  ;;  %v13428_v3 = vld [vmem:[%s19612_s0] ss:$16 sps:$4 sm:$0xff]   ;;  %v13452_v9 = vld [vmem:[%s19612_s0 + $0x2c] ss:$16 sps:$4 sm:$0xff]   ;;  %v12469_v10 = vld [vmem:[%s19611_s1 + $0x158] ss:$12 sps:$4 sm:$0xff]  }
  0x19   :  { %994 = vmatprep.subr.bf16.mxu1 %v12395_v25  ;;  %v12460_v5 = vld [vmem:[%s19611_s1 + $0x2f0] ss:$12 sps:$4 sm:$0xff]   ;;  %v12470_v11 = vld [vmem:[%s19611_s1 + $0x2d8] ss:$12 sps:$4 sm:$0xff]   ;;  %v12479_v14 = vld [vmem:[%s19611_s1 + $0x140] ss:$12 sps:$4 sm:$0xff]  }
  0x1a   :  { %v12461_v6 = vld [vmem:[%s19611_s1 + $0xb0] ss:$12 sps:$4 sm:$0xff]   ;;  %v12471_v12 = vld [vmem:[%s19611_s1 + $0x98] ss:$12 sps:$4 sm:$0xff]   ;;  %v12480_v16 = vld [vmem:[%s19611_s1 + $0x2c0] ss:$12 sps:$4 sm:$0xff]  }
  0x1b   :  { %882 = vmatpush1.bf16.msra.mxu0 %v12397_v26  ;;  %v12462_v7 = vld [vmem:[%s19611_s1 + $0x230] ss:$12 sps:$4 sm:$0xff]   ;;  %v12472_v13 = vld [vmem:[%s19611_s1 + $0x218] ss:$12 sps:$4 sm:$0xff]   ;;  %v12481_v20 = vld [vmem:[%s19611_s1 + $0x80] ss:$12 sps:$4 sm:$0xff]  }
  0x1c   :  { %995 = vmatpush1.bf16.msra.mxu1 %v12398_v27  ;;  %883 = vmatprep.subr.bf16.mxu0 %v12399_v28  ;;  %v13476_v15 = vld [vmem:[%s19612_s0 + $0x20] ss:$16 sps:$4 sm:$0xff]   ;;  %v13484_v17 = vld [vmem:[%s19612_s0 + $0x28] ss:$16 sps:$4 sm:$0xff]   ;;  %v13489_v18 = vld [vmem:[%s19612_s0 + $0x44] ss:$16 sps:$4 sm:$0xff]  }
  0x1d   :  { %996 = vmatprep.subr.bf16.mxu1 %v12401_v29  ;;  %v13494_v19 = vld [vmem:[%s19612_s0 + $0x4c] ss:$16 sps:$4 sm:$0xff]   ;;  %v12489_v22 = vld [vmem:[%s19611_s1 + $0x128] ss:$12 sps:$4 sm:$0xff]   ;;  %v13518_v25 = vld [vmem:[%s19612_s0 + $0x40] ss:$16 sps:$4 sm:$0xff]  }
  0x1e   :  { %v12482_v21 = vld [vmem:[%s19611_s1 + $0x200] ss:$12 sps:$4 sm:$0xff]   ;;  %v12490_v23 = vld [vmem:[%s19611_s1 + $0x2a8] ss:$12 sps:$4 sm:$0xff]   ;;  %vm1575_vm4 = vmand %vm1573_vm0, %vm1574_vm1  ;;  %vm1628_vm5 = vsmask.f32 7938 }
  0x1f   :  { %884 = vmatpush1.bf16.msra.mxu0 %v12403_v30  ;;  %v12491_v24 = vld [vmem:[%s19611_s1 + $0x68] ss:$12 sps:$4 sm:$0xff]   ;;  %v13536_v29 = vld [vmem:[%s19612_s0 + $0x6c] ss:$16 sps:$4 sm:$0xff]   ;;  %vm1578_vm6 = vmand %vm1576_vm2, %vm1577_vm3  ;;  %vm1630_vm7 = vsmask.f32 7954 }
  0x20   :  { %997 = vmatpush1.bf16.msra.mxu1 %v12404_v31  ;;  %885 = vmatprep.subr.bf16.mxu0 %v12405_v32  ;;  %v13523_v26 = vld [vmem:[%s19612_s0 + $0x48] ss:$16 sps:$4 sm:$0xff]   ;;  %v13531_v28 = vld [vmem:[%s19612_s0 + $0x64] ss:$16 sps:$4 sm:$0xff]   ;;  %v12499_v30 = vld [vmem:[%s19611_s1 + $0x110] ss:$12 sps:$4 sm:$0xff]  }
  0x21   :  { %998 = vmatprep.subr.bf16.mxu1 %v12407_v33  ;;  %v12492_v27 = vld [vmem:[%s19611_s1 + $0x1e8] ss:$12 sps:$4 sm:$0xff]   ;;  %v12500_v31 = vld [vmem:[%s19611_s1 + $0x290] ss:$12 sps:$4 sm:$0xff]   ;;  %vm13846_vm8 = vmor %vm1578_vm6, %vm1575_vm4  ;;  %vm1905_vm12 = vcmask 1043456   ;;  %vm1907_vm13 = vcmask 1047556  }
  0x22   :  { %v12501_v32 = vld [vmem:[%s19611_s1 + $0x50] ss:$12 sps:$4 sm:$0xff]   ;;  %vm1629_vm9 = vmand %vm1573_vm0, %vm1628_vm5  ;;  %vm2066_vm1 = vsmask.f32 3328  ;;  %vm2325_vm4 = vcmask 1042432  }
  0x23   :  { %886 = vmatpush2.bf16.msra.mxu0 %v12409_v34  ;;  %v12502_v33 = vld [vmem:[%s19611_s1 + $0x1d0] ss:$12 sps:$4 sm:$0xff]   ;;  %v12509_v34 = vld [vmem:[%s19611_s1 + $0xf8] ss:$12 sps:$4 sm:$0xff]   ;;  %vm1631_vm10 = vmand %vm1576_vm2, %vm1630_vm7  ;;  %vm2067_vm2 = vsmask.f32 7440 }
  0x24   :  { %999 = vmatpush2.bf16.msra.mxu1 %v12410_v35  ;;  %887 = vmatprep.subr.bf16.mxu0 %v12411_v36  ;;  %v12510_v35 = vld [vmem:[%s19611_s1 + $0x278] ss:$12 sps:$4 sm:$0xff]   ;;  %vm13868_vm11 = vmor %vm1631_vm10, %vm1629_vm9 }
  0x25   :  { %1000 = vmatprep.subr.bf16.mxu1 %v12413_v37  ;;  %v12511_v36 = vld [vmem:[%s19611_s1 + $0x38] ss:$12 sps:$4 sm:$0xff]   ;;  %v13566_v37 = vld [vmem:[%s19612_s0 + $0x60] ss:$16 sps:$4 sm:$0xff]   ;;  %vm1906_vm14 = vmand %vm1905_vm12, %vm1628_vm5  ;;  %vm2326_vm5 = vcmask 1046532  }
  0x26   :  { %vm1908_vm15 = vmand %vm1907_vm13, %vm1630_vm7  ;;  %vm10467_vm7 = vcmask 523264  }
  0x27   :  { %888 = vmatpush2.bf16.msra.mxu0 %v12415_v38  ;;  %v13571_v38 = vld [vmem:[%s19612_s0 + $0x68] ss:$16 sps:$4 sm:$0xff]   ;;  %vm13899_vm0 = vmor %vm1908_vm15, %vm1906_vm14 }
  0x28   :  { %1001 = vmatpush2.bf16.msra.mxu1 %v12416_v39  ;;  %889 = vmatprep.subr.bf16.mxu0 %v12417_v40  ;;  %v12512_v39 = vld [vmem:[%s19611_s1 + $0x1b8] ss:$12 sps:$4 sm:$0xff]   ;;  %vm14282_vm3 = vmor %vm2066_vm1, %vm2067_vm2 }
  0x29   :  { %1002 = vmatprep.subr.bf16.mxu1 %v12419_v41  ;;  %v13579_v40 = vld [vmem:[%s19612_s0 + $0x84] ss:$16 sps:$4 sm:$0xff]   ;;  %v13584_v41 = vld [vmem:[%s19612_s0 + $0x8c] ss:$16 sps:$4 sm:$0xff]   ;;  %vm14847_vm6 = vmor %vm2325_vm4, %vm2326_vm5 }
  0x2b   :  { %890 = vmatpush2.bf16.msra.mxu0 %v12421_v42  ;;  %v12519_v42 = vld [vmem:[%s19611_s1 + $0xe0] ss:$12 sps:$4 sm:$0xff]  }
  0x2c   :  { %1003 = vmatpush2.bf16.msra.mxu1 %v12422_v43  ;;  %891 = vmatprep.subr.bf16.mxu0 %v12423_v44  ;;  %v12520_v43 = vld [vmem:[%s19611_s1 + $0x260] ss:$12 sps:$4 sm:$0xff]  }
  0x2d   :  { %1004 = vmatprep.subr.bf16.mxu1 %v12425_v45  ;;  %v12521_v44 = vld [vmem:[%s19611_s1 + $0x20] ss:$12 sps:$4 sm:$0xff]  }
  0x2e   :  { %v12522_v45 = vld [vmem:[%s19611_s1 + $0x1a0] ss:$12 sps:$4 sm:$0xff]  }
  0x2f   :  { %892 = vmatpush2.bf16.msra.mxu0 %v12427_v46  ;;  %v12529_v46 = vld [vmem:[%s19611_s1 + $0xc8] ss:$12 sps:$4 sm:$0xff]  }
  0x30   :  { %1005 = vmatpush2.bf16.msra.mxu1 %v12428_v47  ;;  %893 = vmatprep.subr.bf16.mxu0 %v12429_v48  ;;  %v13608_v47 = vld [vmem:[%s19612_s0 + $0x80] ss:$16 sps:$4 sm:$0xff]   ;;  %v13613_v48 = vld [vmem:[%s19612_s0 + $0x88] ss:$16 sps:$4 sm:$0xff]  }
  0x31   :  { %1006 = vmatprep.subr.bf16.mxu1 %v12431_v50  ;;  %v12530_v50 = vld [vmem:[%s19611_s1 + $0x248] ss:$12 sps:$4 sm:$0xff]  }
  0x33   :  { %894 = vmatpush2.bf16.msra.mxu0 %v12433_v52  ;;  %v12531_v52 = vld [vmem:[%s19611_s1 + $0x8] ss:$12 sps:$4 sm:$0xff]  }
  0x34   :  { %1007 = vmatpush2.bf16.msra.mxu1 %v12434_v53  ;;  %895 = vmatprep.subr.bf16.mxu0 %v12435_v54  ;;  %v12532_v53 = vld [vmem:[%s19611_s1 + $0x188] ss:$12 sps:$4 sm:$0xff]  }
  0x35   :  { %1008 = vmatprep.subr.bf16.mxu1 %v12437_v55  ;;  %v12503_v54 = vld [vmem:[%s19612_s0 + $0xa4] ss:$16 sps:$4 sm:$0xff]   ;;  %v12505_v55 = vld [vmem:[%s19612_s0 + $0xac] ss:$16 sps:$4 sm:$0xff]  }
  0x37   :  { %896 = vmatpush2.bf16.msra.mxu0 %v12439_v56  ;;  %v12507_v56 = vld [vmem:[%s19612_s0 + $0xa0] ss:$16 sps:$4 sm:$0xff]  }
  0x38   :  { %1009 = vmatpush2.bf16.msra.mxu1 %v12440_v57  ;;  %897 = vmatprep.subr.bf16.mxu0 %v12441_v58  ;;  %v12508_v57 = vld [vmem:[%s19612_s0 + $0xa8] ss:$16 sps:$4 sm:$0xff]   ;;  %v12513_v58 = vld [vmem:[%s19612_s0 + $0xc4] ss:$16 sps:$4 sm:$0xff]  }
  0x39   :  { %1010 = vmatprep.subr.bf16.mxu1 %v12443_v59  ;;  %v12515_v59 = vld [vmem:[%s19612_s0 + $0xcc] ss:$16 sps:$4 sm:$0xff]  }
  0x3b   :  { %898 = vmatpush2.bf16.msra.mxu0 %v12445_v60  ;;  %v13647_v60 = vld [vmem:[%s19612_s0 + $0xc0] ss:$16 sps:$4 sm:$0xff]  }
  0x3c   :  { %1011 = vmatpush2.bf16.msra.mxu1 %v12446_v61  ;;  %899 = vmatprep.subr.bf16.mxu0 %v12447_v62  ;;  %v13652_v61 = vld [vmem:[%s19612_s0 + $0xc8] ss:$16 sps:$4 sm:$0xff]   ;;  %v13657_v62 = vld [vmem:[%s19612_s0 + $0xe4] ss:$16 sps:$4 sm:$0xff]  }
  0x3d   :  { %1012 = vmatprep.subr.bf16.mxu1 %v12449_v63  ;;  %v13662_v63 = vld [vmem:[%s19612_s0 + $0xec] ss:$16 sps:$4 sm:$0xff]  }
  0x3f   :  { %900 = vmatpush2.bf16.msra.mxu0 %v12451_v0  ;;  %v13671_v0 = vld [vmem:[%s19612_s0 + $0xe0] ss:$16 sps:$4 sm:$0xff]  }
  0x40   :  { %1013 = vmatpush2.bf16.msra.mxu1 %v12452_v1  ;;  %11482 = vmatprep.subr.bf16.mxu0 %v12459_v2  ;;  %v13676_v1 = vld [vmem:[%s19612_s0 + $0xe8] ss:$16 sps:$4 sm:$0xff]   ;;  %v12538_v2 = vld [vmem:[%s19613_s4 + $0x94] ss:$12 sps:$4 sm:$0xff]  }
  0x41   :  { %11546 = vmatprep.subr.bf16.mxu1 %v12460_v5  ;;  %v12539_v5 = vld [vmem:[%s19613_s4 + $0x78] ss:$12 sps:$4 sm:$0xff]  }
  0x42   :  { %902 = vmatmul.mubr.bf16.vlgmr.msra.gmra.mxu0 %v13428_v3 }
  0x43   :  { %1015 = vmatmul.mubr.bf16.vlgmr.msra.gmra.mxu1 %v13433_v4  ;;  %11483 = vmatpush3.bf16.msra.mxu0 %v12461_v6  ;;  %v12547_v6 = vld [vmem:[%s19613_s4 + $0x64] ss:$12 sps:$4 sm:$0xff]  }
  0x44   :  { %11547 = vmatpush3.bf16.msra.mxu1 %v12462_v7  ;;  %911 = vmatprep.mubr.bf16.mxu0 %v13447_v8  ;;  %v12544_v7 = vld [vmem:[%s19613_s4 + $0x22c] ss:$12 sps:$4 sm:$0xff]  }
  0x45   :  { %1024 = vmatprep.mubr.bf16.mxu1 %v13452_v9  ;;  %11484 = vmatprep.subr.bf16.mxu0 %v12469_v10  ;;  %v12553_v10 = vld [vmem:[%s19613_s4 + $0x4c] ss:$12 sps:$4 sm:$0xff]  }
  0x46   :  { %11548 = vmatprep.subr.bf16.mxu1 %v12470_v11  ;;  %v12550_v11 = vld [vmem:[%s19613_s4 + $0x214] ss:$12 sps:$4 sm:$0xff]  }
  0x47   :  { %11485 = vmatpush3.bf16.msra.mxu0 %v12471_v12  ;;  %v12551_v12 = vld [vmem:[%s19613_s4 + $0x48] ss:$12 sps:$4 sm:$0xff]  }
  0x48   :  { %11549 = vmatpush3.bf16.msra.mxu1 %v12472_v13  ;;  %11486 = vmatprep.subr.bf16.mxu0 %v12479_v14  ;;  %v12548_v13 = vld [vmem:[%s19613_s4 + $0x210] ss:$12 sps:$4 sm:$0xff]   ;;  %v12559_v14 = vld [vmem:[%s19613_s4 + $0x34] ss:$12 sps:$4 sm:$0xff]  }
  0x49   :  { %11550 = vmatprep.subr.bf16.mxu1 %v12480_v16  ;;  %v12557_v16 = vld [vmem:[%s19613_s4 + $0x30] ss:$12 sps:$4 sm:$0xff]  }
  0x4a   :  { %912 = vmatmul.mubr.bf16.gmra.mxu0 %v13476_v15 }
  0x4b   :  { %1025 = vmatmul.mubr.bf16.gmra.mxu1 %v13484_v17  ;;  %921 = vmatprep.mubr.bf16.mxu0 %v13489_v18 }
  0x4c   :  { %1034 = vmatprep.mubr.bf16.mxu1 %v13494_v19  ;;  %11487 = vmatpush3.bf16.msra.mxu0 %v12481_v20  ;;  %v12563_v20 = vld [vmem:[%s19613_s4 + $0x18] ss:$12 sps:$4 sm:$0xff]  }
  0x4d   :  { %11551 = vmatpush3.bf16.msra.mxu1 %v12482_v21  ;;  %11488 = vmatprep.subr.bf16.mxu0 %v12489_v22  ;;  %v12560_v21 = vld [vmem:[%s19613_s4 + $0x1e0] ss:$12 sps:$4 sm:$0xff]   ;;  %v12571_v22 = vld [vmem:[%s19613_s4 + $0x4] ss:$12 sps:$4 sm:$0xff]  }
  0x4e   :  { %11552 = vmatprep.subr.bf16.mxu1 %v12490_v23  ;;  %v12568_v23 = vld [vmem:[%s19613_s4 + $0x1cc] ss:$12 sps:$4 sm:$0xff]  }
  0x50   :  { %11489 = vmatpush3.bf16.msra.mxu0 %v12491_v24  ;;  %v12569_v24 = vld [vmem:[%s19613_s4] ss:$12 sps:$4 sm:$0xff]  }
  0x51   :  { %11553 = vmatpush3.bf16.msra.mxu1 %v12492_v27  ;;  %11490 = vmatprep.subr.bf16.mxu0 %v12499_v30  ;;  %v12574_v27 = vld [vmem:[%s19613_s4 + $0x1b4] ss:$12 sps:$4 sm:$0xff]  }
  0x52   :  { %11554 = vmatprep.subr.bf16.mxu1 %v12500_v31  ;;  %922 = vmatmul.mubr.bf16.gmra.mxu0 %v13518_v25  ;;  %v12583_v30 = vld [vmem:[%s19613_s4 + $0x154] ss:$12 sps:$4 sm:$0xff]   ;;  %v12580_v31 = vld [vmem:[%s19613_s4 + $0x19c] ss:$12 sps:$4 sm:$0xff]  }
  0x53   :  { %1035 = vmatmul.mubr.bf16.gmra.mxu1 %v13523_v26  ;;  %931 = vmatprep.mubr.bf16.mxu0 %v13531_v28 }
  0x54   :  { %1044 = vmatprep.mubr.bf16.mxu1 %v13536_v29  ;;  %11491 = vmatpush3.bf16.msra.mxu0 %v12501_v32  ;;  %v12581_v32 = vld [vmem:[%s19613_s4 + $0x150] ss:$12 sps:$4 sm:$0xff]  }
  0x55   :  { %11555 = vmatpush3.bf16.msra.mxu1 %v12502_v33  ;;  %11492 = vmatprep.subr.bf16.mxu0 %v12509_v34  ;;  %v12578_v33 = vld [vmem:[%s19613_s4 + $0x198] ss:$12 sps:$4 sm:$0xff]   ;;  %v12589_v34 = vld [vmem:[%s19613_s4 + $0x13c] ss:$12 sps:$4 sm:$0xff]  }
  0x56   :  { %11556 = vmatprep.subr.bf16.mxu1 %v12510_v35  ;;  %v12586_v35 = vld [vmem:[%s19613_s4 + $0x184] ss:$12 sps:$4 sm:$0xff]  }
  0x58   :  { %11493 = vmatpush3.bf16.msra.mxu0 %v12511_v36  ;;  %v12587_v36 = vld [vmem:[%s19613_s4 + $0x138] ss:$12 sps:$4 sm:$0xff]  }
  0x59   :  { %11557 = vmatpush3.bf16.msra.mxu1 %v12512_v39  ;;  %11494 = vmatprep.subr.bf16.mxu0 %v12519_v42  ;;  %v12592_v39 = vld [vmem:[%s19613_s4 + $0x2ec] ss:$12 sps:$4 sm:$0xff]  }
  0x5a   :  { %11558 = vmatprep.subr.bf16.mxu1 %v12520_v43  ;;  %932 = vmatmul.mubr.bf16.gmra.mxu0 %v13566_v37  ;;  %v12601_v42 = vld [vmem:[%s19613_s4 + $0x10c] ss:$12 sps:$4 sm:$0xff]   ;;  %v12598_v43 = vld [vmem:[%s19613_s4 + $0x2d4] ss:$12 sps:$4 sm:$0xff]  }
  0x5b   :  { %1045 = vmatmul.mubr.bf16.gmra.mxu1 %v13571_v38  ;;  %941 = vmatprep.mubr.bf16.mxu0 %v13579_v40 }
  0x5c   :  { %1054 = vmatprep.mubr.bf16.mxu1 %v13584_v41  ;;  %11495 = vmatpush3.bf16.msra.mxu0 %v12521_v44  ;;  %v12599_v44 = vld [vmem:[%s19613_s4 + $0x108] ss:$12 sps:$4 sm:$0xff]  }
  0x5d   :  { %11559 = vmatpush3.bf16.msra.mxu1 %v12522_v45  ;;  %11496 = vmatprep.subr.bf16.mxu0 %v12529_v46  ;;  %v1580_v45 = vld [vmem:[#allocation2 + $0xb0] sm:$0x11]  ;;  %v1633_v46 = vld [vmem:[#allocation2 + $0x18] sm:$0x11] }
  0x5e   :  { %11560 = vmatprep.subr.bf16.mxu1 %v12530_v50  ;;  %v12607_v50 = vld [vmem:[%s19613_s4 + $0xf4] ss:$12 sps:$4 sm:$0xff]  }
  0x60   :  { %11497 = vmatpush3.bf16.msra.mxu0 %v12531_v52  ;;  %v1581_v52 = vsel %vm13846_vm8, 0, %v1580_v45  ;;  %v1660_v45 = vld [vmem:[#allocation2 + $0x80] sm:$0x11] }
  0x61   :  { %11561 = vmatpush3.bf16.msra.mxu1 %v12532_v53  ;;  %v12604_v53 = vld [vmem:[%s19613_s4 + $0x2bc] ss:$12 sps:$4 sm:$0xff]   ;;  %1582 = vst [vmem:[#allocation2 + $0xb0] sm:$0x11] %v1581_v52 }
  0x62   :  { %942 = vmatmul.mubr.bf16.gmra.mxu0 %v13608_v47  ;;  %5821 = vmatprep.subr.bf16.mxu1 %v12544_v7  ;;  %v12614_v7 = vld [vmem:[%s19613_s4 + $0x288] ss:$12 sps:$4 sm:$0xff]  }
  0x63   :  { %1055 = vmatmul.mubr.bf16.gmra.mxu1 %v13613_v48  ;;  %951 = vmatprep.mubr.bf16.mxu0 %v12503_v54 }
  0x64   :  { %1064 = vmatprep.mubr.bf16.mxu1 %v12505_v55 }
  0x6a   :  { %952 = vmatmul.mubr.bf16.gmra.mxu0 %v12507_v56 }
  0x6b   :  { %1065 = vmatmul.mubr.bf16.gmra.mxu1 %v12508_v57  ;;  %961 = vmatprep.mubr.bf16.mxu0 %v12513_v58 }
  0x6c   :  { %1074 = vmatprep.mubr.bf16.mxu1 %v12515_v59 }
  0x72   :  { %962 = vmatmul.mubr.bf16.gmra.mxu0 %v13647_v60 }
  0x73   :  { %1075 = vmatmul.mubr.bf16.gmra.mxu1 %v13652_v61  ;;  %971 = vmatprep.mubr.bf16.mxu0 %v13657_v62 }
  0x74   :  { %1084 = vmatprep.mubr.bf16.mxu1 %v13662_v63 }
  0x7a   :  { %972 = vmatmul.mubr.bf16.gmra.mxu0 %v13671_v0 }
  0x7b   :  { %1085 = vmatmul.mubr.bf16.gmra.mxu1 %v13676_v1  ;;  %1127 = vmatprep.mubr.bf16.mxu0 %v13368_v49  ;;  %v12535_v49 = vld [vmem:[%s19613_s4 + $0xac] ss:$12 sps:$4 sm:$0xff]  }
  0x7c   :  { %1224 = vmatprep.mubr.bf16.mxu1 %v13376_v51  ;;  %v12533_v51 = vld [vmem:[%s19613_s4 + $0xa8] ss:$12 sps:$4 sm:$0xff]   ;;  %5708 = vmatprep.subr.bf16.mxu0 %v12535_v49 }
  0x7d   :  { %v1586_v49 = vld [vmem:[#allocation2 + $0x128] sm:$0x11] }
  0x82   :  { %1128 = vmatmul.mubr.bf16.vlgmr.msra.gmra.mxu0 %v13428_v3  ;;  %v12536_v3 = vld [vmem:[%s19613_s4 + $0x90] ss:$12 sps:$4 sm:$0xff]  }
  0x83   :  { %1225 = vmatmul.mubr.bf16.vlgmr.msra.gmra.mxu1 %v13433_v4  ;;  %1135 = vmatprep.mubr.bf16.mxu0 %v13447_v8  ;;  %v12541_v4 = vld [vmem:[%s19613_s4 + $0x7c] ss:$12 sps:$4 sm:$0xff]   ;;  %v12545_v8 = vld [vmem:[%s19613_s4 + $0x60] ss:$12 sps:$4 sm:$0xff]  }
  0x84   :  { %1232 = vmatprep.mubr.bf16.mxu1 %v13452_v9  ;;  %5709 = vmatpush1.bf16.msra.mxu0 %v12533_v51  ;;  %v12542_v9 = vld [vmem:[%s19613_s4 + $0x228] ss:$12 sps:$4 sm:$0xff]  }
  0x85   :  { %5710 = vmatprep.subr.bf16.mxu0 %v12538_v2  ;;  %5822 = vmatpush1.bf16.msra.mxu1 %v12542_v9  ;;  %v1639_v51 = vld [vmem:[#allocation2 + $0x48] sm:$0x11]  ;;  %v1587_v2 = vsel %vm13846_vm8, 0, %v1586_v49  ;;  %v1589_v9 = vld [vmem:[#allocation2 + $0x78] sm:$0x11] }
  0x86   :  { %5823 = vmatprep.subr.bf16.mxu1 %v12550_v11  ;;  %1588 = vst [vmem:[#allocation2 + $0x128] sm:$0x11] %v1587_v2  ;;  %v13160_v11 = vmov 0  }
  0x87   :  { %1563 = vst [vmem:[#allocation2 + $0x110] sm:$0xff] %v13160_v11  ;;  %1564 = vst [vmem:[#allocation2 + $0x38] sm:$0x11] %v13160_v11 }
  0x88   :  { %5711 = vmatpush1.bf16.msra.mxu0 %v12536_v3  ;;  %v1640_v3 = vsel %vm13868_vm11, 0, %v1639_v51  ;;  %1565 = vst [vmem:[#allocation2 + $0xa0] sm:$0xff] %v13160_v11  ;;  %1566 = vst [vmem:[#allocation2 + $0x20] sm:$0x11] %v13160_v11 }
  0x89   :  { %5712 = vmatprep.subr.bf16.mxu0 %v12541_v4  ;;  %5824 = vmatpush1.bf16.msra.mxu1 %v12548_v13  ;;  %v12619_v4 = vld [vmem:[%s19613_s4 + $0xc4] ss:$12 sps:$4 sm:$0xff]   ;;  %1641 = vst [vmem:[#allocation2 + $0x48] sm:$0x11] %v1640_v3  ;;  %1568 = vst [vmem:[#allocation2 + $0xf8] sm:$0xff] %v13160_v11 }
  0x8a   :  { %1136 = vmatmul.mubr.bf16.gmra.mxu0 %v13476_v15  ;;  %v12556_v15 = vld [vmem:[%s19613_s4 + $0x1fc] ss:$12 sps:$4 sm:$0xff]   ;;  %1569 = vst [vmem:[#allocation2 + $0x138] sm:$0x11] %v13160_v11  ;;  %1570 = vst [vmem:[#allocation2 + $0x88] sm:$0xff] %v13160_v11 }
  0x8b   :  { %1233 = vmatmul.mubr.bf16.gmra.mxu1 %v13484_v17  ;;  %1143 = vmatprep.mubr.bf16.mxu0 %v13489_v18  ;;  %v12554_v17 = vld [vmem:[%s19613_s4 + $0x1f8] ss:$12 sps:$4 sm:$0xff]   ;;  %v12565_v18 = vld [vmem:[%s19613_s4 + $0x1c] ss:$12 sps:$4 sm:$0xff]   ;;  %1571 = vst [vmem:[#allocation2 + $0xb8] sm:$0x11] %v13160_v11 }
  0x8c   :  { %1240 = vmatprep.mubr.bf16.mxu1 %v13494_v19  ;;  %5713 = vmatpush1.bf16.msra.mxu0 %v12539_v5  ;;  %v12562_v19 = vld [vmem:[%s19613_s4 + $0x1e4] ss:$12 sps:$4 sm:$0xff]   ;;  %v19782_v5 = vmov 0 }
  0x8d   :  { %5714 = vmatprep.subr.bf16.mxu0 %v12547_v6  ;;  %5825 = vmatprep.subr.bf16.mxu1 %v12556_v15  ;;  %v19783_v5 = vsel %vm13899_vm0, 4294967295, %v19782_v5  ;;  %v12616_v6 = vld [vmem:[%s19613_s4 + $0x28c] ss:$12 sps:$4 sm:$0xff]  }
  0x8e   :  { %5826 = vmatpush1.bf16.msra.mxu1 %v12554_v17  ;;  %19784 = vst [vmem:[#allocation6_spill] sm:$0xff] %v19783_v5  ;;  %v12625_v15 = vld [vmem:[%s19613_s4 + $0x3ac] ss:$12 sps:$4 sm:$0xff]  }
  0x8f   :  { %5827 = vmatprep.subr.bf16.mxu1 %v12562_v19  ;;  %v1592_v17 = vld [vmem:[#allocation2 + $0xa8] sm:$0x11]  ;;  %v1645_v19 = vld [vmem:[#allocation2 + $0x60] sm:$0x11] }
  0x90   :  { %5715 = vmatpush1.bf16.msra.mxu0 %v12545_v8  ;;  %v12617_v8 = vld [vmem:[%s19613_s4 + $0xc0] ss:$12 sps:$4 sm:$0xff]  }
  0x91   :  { %5716 = vmatprep.subr.bf16.mxu0 %v12553_v10  ;;  %v1642_v10 = vld [vmem:[#allocation2 + $0xf0] sm:$0x11] }
  0x92   :  { %1144 = vmatmul.mubr.bf16.gmra.mxu0 %v13518_v25  ;;  %5828 = vmatpush1.bf16.msra.mxu1 %v12560_v21  ;;  %v12566_v25 = vld [vmem:[%s19613_s4 + $0x1c8] ss:$12 sps:$4 sm:$0xff]   ;;  %v1643_v13 = vsel %vm13868_vm11, 0, %v1642_v10 }
  0x93   :  { %1241 = vmatmul.mubr.bf16.gmra.mxu1 %v13523_v26  ;;  %1151 = vmatprep.mubr.bf16.mxu0 %v13531_v28  ;;  %v12577_v26 = vld [vmem:[%s19613_s4 + $0x16c] ss:$12 sps:$4 sm:$0xff]   ;;  %v12575_v28 = vld [vmem:[%s19613_s4 + $0x168] ss:$12 sps:$4 sm:$0xff]   ;;  %1644 = vst [vmem:[#allocation2 + $0xf0] sm:$0x11] %v1643_v13 }
  0x94   :  { %1248 = vmatprep.mubr.bf16.mxu1 %v13536_v29  ;;  %5717 = vmatpush1.bf16.msra.mxu0 %v12551_v12  ;;  %v12572_v29 = vld [vmem:[%s19613_s4 + $0x1b0] ss:$12 sps:$4 sm:$0xff]   ;;  %v1590_v12 = vsel %vm13846_vm8, 0, %v1589_v9 }
  0x95   :  { %5718 = vmatprep.subr.bf16.mxu0 %v12559_v14  ;;  %5829 = vmatprep.subr.bf16.mxu1 %v12568_v23  ;;  %1591 = vst [vmem:[#allocation2 + $0x78] sm:$0x11] %v1590_v12  ;;  %v12622_v14 = vld [vmem:[%s19613_s4 + $0x274] ss:$12 sps:$4 sm:$0xff]   ;;  %v12628_v21 = vld [vmem:[%s19613_s4 + $0x25c] ss:$12 sps:$4 sm:$0xff]  }
  0x96   :  { %5830 = vmatpush1.bf16.msra.mxu1 %v12566_v25  ;;  %v1595_v23 = vld [vmem:[#allocation2 + $0x28] sm:$0x11]  ;;  %v1616_v12 = vld [vmem:[#allocation2 + $0x100] sm:$0x11] }
  0x97   :  { %5831 = vmatprep.subr.bf16.mxu1 %v12574_v27  ;;  %v1596_v25 = vsel %vm13846_vm8, 0, %v1595_v23  ;;  %v12634_v27 = vld [vmem:[%s19613_s4 + $0x244] ss:$12 sps:$4 sm:$0xff]  }
  0x98   :  { %5719 = vmatpush1.bf16.msra.mxu0 %v12557_v16  ;;  %v12620_v16 = vld [vmem:[%s19613_s4 + $0x270] ss:$12 sps:$4 sm:$0xff]   ;;  %1597 = vst [vmem:[#allocation2 + $0x28] sm:$0x11] %v1596_v25 }
  0x99   :  { %5720 = vmatprep.subr.bf16.mxu0 %v12565_v18  ;;  %v1593_v18 = vsel %vm13846_vm8, 0, %v1592_v17 }
  0x9a   :  { %1152 = vmatmul.mubr.bf16.gmra.mxu0 %v13566_v37  ;;  %5832 = vmatpush1.bf16.msra.mxu1 %v12572_v29  ;;  %v12584_v37 = vld [vmem:[%s19613_s4 + $0x180] ss:$12 sps:$4 sm:$0xff]   ;;  %1594 = vst [vmem:[#allocation2 + $0xa8] sm:$0x11] %v1593_v18  ;;  %v1598_v29 = vld [vmem:[#allocation2 + $0x70] sm:$0x11] }
  0x9b   :  { %1249 = vmatmul.mubr.bf16.gmra.mxu1 %v13571_v38  ;;  %1159 = vmatprep.mubr.bf16.mxu0 %v13579_v40  ;;  %v12595_v38 = vld [vmem:[%s19613_s4 + $0x124] ss:$12 sps:$4 sm:$0xff]   ;;  %v12593_v40 = vld [vmem:[%s19613_s4 + $0x120] ss:$12 sps:$4 sm:$0xff]  }
  0x9c   :  { %1256 = vmatprep.mubr.bf16.mxu1 %v13584_v41  ;;  %5721 = vmatpush1.bf16.msra.mxu0 %v12563_v20  ;;  %v12590_v41 = vld [vmem:[%s19613_s4 + $0x2e8] ss:$12 sps:$4 sm:$0xff]   ;;  %v1646_v20 = vsel %vm13868_vm11, 0, %v1645_v19 }
  0x9d   :  { %5722 = vmatprep.subr.bf16.mxu0 %v12571_v22  ;;  %5833 = vmatprep.subr.bf16.mxu1 %v12580_v31  ;;  %1647 = vst [vmem:[#allocation2 + $0x60] sm:$0x11] %v1646_v20  ;;  %v12626_v22 = vld [vmem:[%s19613_s4 + $0x258] ss:$12 sps:$4 sm:$0xff]   ;;  %v1599_v31 = vsel %vm13846_vm8, 0, %v1598_v29 }
  0x9e   :  { %5834 = vmatpush1.bf16.msra.mxu1 %v12578_v33  ;;  %1600 = vst [vmem:[#allocation2 + $0x70] sm:$0x11] %v1599_v31  ;;  %v1601_v33 = vld [vmem:[#allocation2 + $0x90] sm:$0x11] }
  0x9f   :  { %5835 = vmatprep.subr.bf16.mxu1 %v12586_v35  ;;  %v1602_v35 = vsel %vm13846_vm8, 0, %v1601_v33 }
  0xa0   :  { %5723 = vmatpush1.bf16.msra.mxu0 %v12569_v24  ;;  %v1648_v24 = vld [vmem:[#allocation2 + $0x118] sm:$0x11]  ;;  %1603 = vst [vmem:[#allocation2 + $0x90] sm:$0x11] %v1602_v35 }
  0xa1   :  { %5724 = vmatprep.subr.bf16.mxu0 %v12577_v26  ;;  %v1649_v26 = vsel %vm13868_vm11, 0, %v1648_v24 }
  0xa2   :  { %1160 = vmatmul.mubr.bf16.gmra.mxu0 %v13608_v47  ;;  %5836 = vmatpush1.bf16.msra.mxu1 %v12584_v37  ;;  %v12596_v47 = vld [vmem:[%s19613_s4 + $0x2d0] ss:$12 sps:$4 sm:$0xff]   ;;  %1650 = vst [vmem:[#allocation2 + $0x118] sm:$0x11] %v1649_v26  ;;  %v1604_v37 = vld [vmem:[#allocation2 + $0x108] sm:$0x11] }
  0xa3   :  { %1257 = vmatmul.mubr.bf16.gmra.mxu1 %v13613_v48  ;;  %1167 = vmatprep.mubr.bf16.mxu0 %v12503_v54  ;;  %v19776_v48 = vmov 0  ;;  %v12605_v54 = vld [vmem:[%s19613_s4 + $0xf0] ss:$12 sps:$4 sm:$0xff]  }
  0xa4   :  { %1264 = vmatprep.mubr.bf16.mxu1 %v12505_v55  ;;  %5725 = vmatpush2.bf16.msra.mxu0 %v12575_v28  ;;  %v19777_v48 = vsel %vm13846_vm8, 4294967295, %v19776_v48  ;;  %v12602_v55 = vld [vmem:[%s19613_s4 + $0x2b8] ss:$12 sps:$4 sm:$0xff]   ;;  %v12632_v28 = vld [vmem:[%s19613_s4 + $0x240] ss:$12 sps:$4 sm:$0xff]  }
  0xa5   :  { %5726 = vmatprep.subr.bf16.mxu0 %v12583_v30  ;;  %5837 = vmatprep.subr.bf16.mxu1 %v12592_v39  ;;  %19778 = vst [vmem:[#allocation4_spill] sm:$0xff] %v19777_v48  ;;  %v1651_v30 = vld [vmem:[#allocation2 + $0x30] sm:$0x11]  ;;  %v1657_v39 = vld [vmem:[#allocation2 + $0x40] sm:$0x11] }
  0xa6   :  { %5838 = vmatpush2.bf16.msra.mxu1 %v12590_v41  ;;  %v12640_v41 = vld [vmem:[%s19613_s4 + $0x52c] ss:$12 sps:$4 sm:$0xff]  }
  0xa7   :  { %5839 = vmatprep.subr.bf16.mxu1 %v12598_v43  ;;  %v1291_v43 = vlaneseq }
  0xa8   :  { %5727 = vmatpush2.bf16.msra.mxu0 %v12581_v32  ;;  %v1652_v32 = vsel %vm13868_vm11, 0, %v1651_v30 }
  0xa9   :  { %5728 = vmatprep.subr.bf16.mxu0 %v12589_v34  ;;  %1653 = vst [vmem:[#allocation2 + $0x30] sm:$0x11] %v1652_v32  ;;  %v1654_v34 = vld [vmem:[#allocation2 + $0x68] sm:$0x11] }
  0xaa   :  { %1168 = vmatmul.mubr.bf16.gmra.mxu0 %v12507_v56  ;;  %5840 = vmatpush2.bf16.msra.mxu1 %v12596_v47  ;;  %v19779_v56 = vmov 0  ;;  %v13972_v47 = vshrl.u32 %v1291_v43, 7 }
  0xab   :  { %1265 = vmatmul.mubr.bf16.gmra.mxu1 %v12508_v57  ;;  %1175 = vmatprep.mubr.bf16.mxu0 %v12513_v58  ;;  %v19780_v56 = vsel %vm13868_vm11, 4294967295, %v19779_v56  ;;  %v1583_v57 = vld [vmem:[#allocation2 + $0xc8] sm:$0x11] }
  0xac   :  { %1272 = vmatprep.mubr.bf16.mxu1 %v12515_v59  ;;  %5729 = vmatpush2.bf16.msra.mxu0 %v12587_v36  ;;  %19781 = vst [vmem:[#allocation5_spill] sm:$0xff] %v19780_v56  ;;  %v1636_v58 = vld [vmem:[#allocation2 + $0xe8] sm:$0x11]  ;;  %v1634_v59 = vsel %vm13868_vm11, 0, %v1633_v46  ;;  %v1655_v36 = vsel %vm13868_vm11, 0, %v1654_v34  ;;  %v1661_v46 = vsel %vm13868_vm11, 0, %v1660_v45 }
  0xad   :  { %5730 = vmatprep.subr.bf16.mxu0 %v12595_v38  ;;  %5841 = vmatprep.subr.bf16.mxu1 %v12604_v53  ;;  %1635 = vst [vmem:[#allocation2 + $0x18] sm:$0x11] %v1634_v59  ;;  %1656 = vst [vmem:[#allocation2 + $0x68] sm:$0x11] %v1655_v36  ;;  %v1605_v38 = vsel %vm13846_vm8, 0, %v1604_v37  ;;  %v13980_v52 = vsub.s32 0, %v13972_v47 }
  0xae   :  { %5842 = vmatpush2.bf16.msra.mxu1 %v12602_v55  ;;  %1606 = vst [vmem:[#allocation2 + $0x108] sm:$0x11] %v1605_v38  ;;  %1662 = vst [vmem:[#allocation2 + $0x80] sm:$0x11] %v1661_v46  ;;  %v13985_v53 = vld [vmem:[%s19615_s3] sm:$0x7] }
  0xaf   :  { %19785 = vst [vmem:[#allocation7_spill] sm:$0xff] %v13980_v52  ;;  %v1663_v55 = vld [vmem:[#allocation2 + $0x130] sm:$0x11]  ;;  %v14001_v51 = vrot.slane %v13985_v53, %v13980_v52 }
  0xb0   :  { %5731 = vmatpush2.bf16.msra.mxu0 %v12593_v40  ;;  %v1658_v40 = vsel %vm13868_vm11, 0, %v1657_v39 }
  0xb1   :  { %5732 = vmatprep.subr.bf16.mxu0 %v12601_v42  ;;  %1659 = vst [vmem:[#allocation2 + $0x40] sm:$0x11] %v1658_v40  ;;  %v1607_v42 = vld [vmem:[#allocation2 + $0xd8] sm:$0x11] }
  0xb2   :  { %1176 = vmatmul.mubr.bf16.gmra.mxu0 %v13647_v60  ;;  %v1584_v60 = vsel %vm13846_vm8, 0, %v1583_v57 }
  0xb3   :  { %1273 = vmatmul.mubr.bf16.gmra.mxu1 %v13652_v61  ;;  %1183 = vmatprep.mubr.bf16.mxu0 %v13657_v62  ;;  %v1637_v61 = vsel %vm13868_vm11, 0, %v1636_v58  ;;  %v12613_v62 = vld [vmem:[%s19613_s4 + $0xdc] ss:$12 sps:$4 sm:$0xff]   ;;  %1585 = vst [vmem:[#allocation2 + $0xc8] sm:$0x11] %v1584_v60  ;;  %v1664_v58 = vsel %vm13868_vm11, 0, %v1663_v55 }
  0xb4   :  { %1280 = vmatprep.mubr.bf16.mxu1 %v13662_v63  ;;  %5733 = vmatpush2.bf16.msra.mxu0 %v12599_v44  ;;  %1638 = vst [vmem:[#allocation2 + $0xe8] sm:$0x11] %v1637_v61  ;;  %v12610_v63 = vld [vmem:[%s19613_s4 + $0x2a4] ss:$12 sps:$4 sm:$0xff]   ;;  %v1608_v44 = vsel %vm13846_vm8, 0, %v1607_v42 }
  0xb5   :  { %5734 = vmatprep.subr.bf16.mxu0 %v12607_v50  ;;  %5843 = vmatprep.subr.bf16.mxu1 %v12610_v63  ;;  %1609 = vst [vmem:[#allocation2 + $0xd8] sm:$0x11] %v1608_v44  ;;  %v13977_v50 = vld [vmem:[%s19614_s2] sm:$0x7]  ;;  %1665 = vst [vmem:[#allocation2 + $0x130] sm:$0x11] %v1664_v58 }
  0xb6   :  { %v13993_v59 = vrot.slane %v13977_v50, %v13980_v52  ;;  %v1613_v60 = vld [vmem:[#allocation2 + $0xe0] sm:$0x11]  ;;  %v1666_v61 = vld [vmem:[#allocation2 + $0x10] sm:$0x11]  ;;  %v1622_v58 = vld [vmem:[#allocation2 + $0x58] sm:$0x11] }
  0xb7   :  { %v1672_v44 = vld [vmem:[#allocation2] sm:$0x11] }
  0xb8   :  { %5735 = vmatpush2.bf16.msra.mxu0 %v12605_v54  ;;  %v1610_v54 = vld [vmem:[#allocation2 + $0x8] sm:$0x11] }
  0xb9   :  { %5736 = vmatprep.subr.bf16.mxu0 %v12613_v62  ;;  %v1611_v57 = vsel %vm13846_vm8, 0, %v1610_v54 }
  0xba   :  { %1184 = vmatmul.mubr.bf16.gmra.mxu0 %v13671_v0  ;;  %v12611_v0 = vld [vmem:[%s19613_s4 + $0xd8] ss:$12 sps:$4 sm:$0xff]   ;;  %1612 = vst [vmem:[#allocation2 + $0x8] sm:$0x11] %v1611_v57  ;;  %v1673_v57 = vsel %vm13868_vm11, 0, %v1672_v44 }
  0xbb   :  { %1281 = vmatmul.mubr.bf16.gmra.mxu1 %v13676_v1  ;;  %v12608_v1 = vld [vmem:[%s19613_s4 + $0x2a0] ss:$12 sps:$4 sm:$0xff]   ;;  %1674 = vst [vmem:[#allocation2] sm:$0x11] %v1673_v57 }
  0xbc   :  { %5737 = vmatpush2.bf16.msra.mxu0 %v12611_v0  ;;  %5844 = vmatpush2.bf16.msra.mxu1 %v12608_v1  ;;  %v1614_v0 = vsel %vm13846_vm8, 0, %v1613_v60  ;;  %v1667_v1 = vsel %vm13868_vm11, 0, %v1666_v61 }
  0xbd   :  { %5738 = vmatprep.subr.bf16.mxu0 %v12619_v4  ;;  %5845 = vmatprep.subr.bf16.mxu1 %v12616_v6  ;;  %1615 = vst [vmem:[#allocation2 + $0xe0] sm:$0x11] %v1614_v0  ;;  %1668 = vst [vmem:[#allocation2 + $0x10] sm:$0x11] %v1667_v1 }
  0xc0   :  { %5739 = vmatpush2.bf16.msra.mxu0 %v12617_v8  ;;  %5846 = vmatpush2.bf16.msra.mxu1 %v12614_v7 }
  0xc1   :  { %5847 = vmatprep.subr.bf16.mxu1 %v12622_v14  ;;  %5934 = vmatprep.subr.bf16.mxu0 %v12625_v15  ;;  %v1617_v15 = vsel %vm13846_vm8, 0, %v1616_v12 }
  0xc2   :  { %1618 = vst [vmem:[#allocation2 + $0x100] sm:$0x11] %v1617_v15 }
  0xc4   :  { %5848 = vmatpush2.bf16.msra.mxu1 %v12620_v16  ;;  %v1669_v16 = vld [vmem:[#allocation2 + $0x98] sm:$0x11] }
  0xc5   :  { %5849 = vmatprep.subr.bf16.mxu1 %v12628_v21  ;;  %v1670_v21 = vsel %vm13868_vm11, 0, %v1669_v16 }
  0xc6   :  { %1671 = vst [vmem:[#allocation2 + $0x98] sm:$0x11] %v1670_v21 }
  0xc8   :  { %5850 = vmatpush2.bf16.msra.mxu1 %v12626_v22 }
  0xc9   :  { %5851 = vmatprep.subr.bf16.mxu1 %v12634_v27 }
  0xcc   :  { %5852 = vmatpush2.bf16.msra.mxu1 %v12632_v28 }
  0xcd   :  { %6047 = vmatprep.subr.bf16.mxu1 %v12640_v41  ;;  %v1619_v41 = vld [vmem:[#allocation2 + $0xd0] sm:$0x11] }
  0xce   :  { %v1620_v55 = vsel %vm13846_vm8, 0, %v1619_v41 }
  0xcf   :  { %1621 = vst [vmem:[#allocation2 + $0xd0] sm:$0x11] %v1620_v55 }
 0x102   :  { %v903_v62 = vpop.f32.mrf.mxu0 }
 0x103   :  { %v1016_v63 = vpop.f32.mrf.mxu1 }
 0x104   :  { %v1017_v49 = vadd.f32 %v1016_v63, %v903_v62  ;;  %v905_v2 = vpop.f32.mrf.mxu0  ;;  %v1675_v63 = vld [vmem:[#allocation2 + $0x120] sm:$0x11] }
 0x105   :  { %v1018_v3 = vpop.f32.mrf.mxu1 }
 0x106   :  { %v1306_v4 = vmul.f32 %v13993_v59, %v1017_v49  ;;  %v14004_v6 = vadd.f32 %v1018_v3, %v905_v2  ;;  %v907_v7 = vpop.f32.mrf.mxu0  ;;  %v1623_v49 = vsel %vm13846_vm8, 0, %v1622_v58  ;;  %v1676_v2 = vsel %vm13868_vm11, 0, %v1675_v63 }
 0x107   :  { %v1020_v8 = vpop.f32.mrf.mxu1  ;;  %1624 = vst [vmem:[#allocation2 + $0x58] sm:$0x11] %v1623_v49  ;;  %1677 = vst [vmem:[#allocation2 + $0x120] sm:$0x11] %v1676_v2 }
 0x108   :  { %v1371_v9 = vadd.f32 %v14001_v51, %v1306_v4  ;;  %v1021_v10 = vadd.f32 %v1020_v8, %v907_v7  ;;  %v14007_v13 = vpop.f32.mrf.mxu0 }
 0x109   :  { %v14009_v14 = vpop.f32.mrf.mxu1 }
 0x10a   :  { %v1419_v17 = vmax.f32 %v1371_v9, 0.0  ;;  %v1309_v18 = vmul.f32 %v13993_v59, %v1021_v10  ;;  %v913_v19 = vpop.f32.mrf.mxu0 }
 0x10b   :  { %v1026_v20 = vpop.f32.mrf.mxu1 }
 0x10c   :  { %v11418_v22 = vpack.c.bf16 %v1419_v17, %v1419_v17  ;;  %v1374_v23 = vadd.f32 %v14001_v51, %v1309_v18  ;;  %v1027_v24 = vadd.f32 %v1026_v20, %v913_v19  ;;  %v915_v25 = vpop.f32.mrf.mxu0 }
 0x10d   :  { %v1028_v26 = vpop.f32.mrf.mxu1 }
 0x10e   :  { %1531 = vst [vmem:[%s19616_s10] sm:$0xf] %v11418_v22  ;;  %v1422_v27 = vmax.f32 %v1374_v23, 0.0  ;;  %v14020_v28 = vadd.f32 %v1028_v26, %v915_v25  ;;  %v1312_v29 = vmul.f32 %v13993_v59, %v1027_v24  ;;  %v917_v30 = vpop.f32.mrf.mxu0  ;;  %v1625_v24 = vld [vmem:[#allocation2 + $0xc0] sm:$0x11]  ;;  %v1678_v25 = vld [vmem:[#allocation2 + $0x50] sm:$0x11] }
 0x10f   :  { %v1030_v31 = vpop.f32.mrf.mxu1 }
 0x110   :  { %v11419_v32 = vpack.c.bf16 %v1422_v27, %v1422_v27  ;;  %v1031_v33 = vadd.f32 %v1030_v31, %v917_v30  ;;  %v1377_v34 = vadd.f32 %v14001_v51, %v1312_v29  ;;  %v14024_v35 = vpop.f32.mrf.mxu0  ;;  %v1626_v30 = vsel %vm13846_vm8, 0, %v1625_v24 }
 0x111   :  { %v14026_v36 = vpop.f32.mrf.mxu1  ;;  %v1679_v31 = vsel %vm13868_vm11, 0, %v1678_v25  ;;  %1627 = vst [vmem:[#allocation2 + $0xc0] sm:$0x11] %v1626_v30 }
 0x112   :  { %1532 = vst [vmem:[%s19616_s10 + $0x10] sm:$0xf] %v11419_v32  ;;  %v1315_v37 = vmul.f32 %v13993_v59, %v1031_v33  ;;  %v1425_v38 = vmax.f32 %v1377_v34, 0.0  ;;  %v923_v39 = vpop.f32.mrf.mxu0  ;;  %1680 = vst [vmem:[#allocation2 + $0x50] sm:$0x11] %v1679_v31 }
 0x113   :  { %v1036_v40 = vpop.f32.mrf.mxu1 }
 0x114   :  { %v1380_v42 = vadd.f32 %v14001_v51, %v1315_v37  ;;  %v1037_v43 = vadd.f32 %v1036_v40, %v923_v39  ;;  %v11420_v45 = vpack.c.bf16 %v1425_v38, %v1425_v38  ;;  %v925_v46 = vpop.f32.mrf.mxu0 }
 0x115   :  { %v1038_v54 = vpop.f32.mrf.mxu1 }
 0x116   :  { %v1428_v60 = vmax.f32 %v1380_v42, 0.0  ;;  %v1318_v61 = vmul.f32 %v13993_v59, %v1037_v43  ;;  %v14038_v62 = vadd.f32 %v1038_v54, %v925_v46  ;;  %1533 = vst [vmem:[%s19616_s10 + $0x20] sm:$0xf] %v11420_v45  ;;  %v927_v0 = vpop.f32.mrf.mxu0 }
 0x117   :  { %v1040_v1 = vpop.f32.mrf.mxu1 }
 0x118   :  { %v11421_v3 = vpack.c.bf16 %v1428_v60, %v1428_v60  ;;  %v1383_v4 = vadd.f32 %v14001_v51, %v1318_v61  ;;  %v1041_v7 = vadd.f32 %v1040_v1, %v927_v0  ;;  %v14048_v8 = vpop.f32.mrf.mxu0 }
 0x119   :  { %v14050_v9 = vpop.f32.mrf.mxu1 }
 0x11a   :  { %1534 = vst [vmem:[%s19616_s10 + $0x30] sm:$0xf] %v11421_v3  ;;  %v1431_v10 = vmax.f32 %v1383_v4, 0.0  ;;  %v1321_v12 = vmul.f32 %v13993_v59, %v1041_v7  ;;  %v933_v15 = vpop.f32.mrf.mxu0 }
 0x11b   :  { %v1046_v16 = vpop.f32.mrf.mxu1 }
 0x11c   :  { %v11422_v17 = vpack.c.bf16 %v1431_v10, %v1431_v10  ;;  %v1047_v18 = vadd.f32 %v1046_v16, %v933_v15  ;;  %v1386_v19 = vadd.f32 %v14001_v51, %v1321_v12  ;;  %v935_v20 = vpop.f32.mrf.mxu0 }
 0x11d   :  { %v1048_v21 = vpop.f32.mrf.mxu1 }
 0x11e   :  { %1535 = vst [vmem:[%s19616_s10 + $0x40] sm:$0xf] %v11422_v17  ;;  %v1324_v22 = vmul.f32 %v13993_v59, %v1047_v18  ;;  %v14061_v23 = vadd.f32 %v1048_v21, %v935_v20  ;;  %v1434_v26 = vmax.f32 %v1386_v19, 0.0  ;;  %v937_v27 = vpop.f32.mrf.mxu0 }
 0x11f   :  { %v1050_v29 = vpop.f32.mrf.mxu1 }
 0x120   :  { %v1389_v32 = vadd.f32 %v14001_v51, %v1324_v22  ;;  %v1051_v33 = vadd.f32 %v1050_v29, %v937_v27  ;;  %v11423_v34 = vpack.c.bf16 %v1434_v26, %v1434_v26  ;;  %v14068_v37 = vpop.f32.mrf.mxu0  ;;  %v14101_v27 = vsub.s32 1, %v13972_v47 }
 0x121   :  { %v14070_v38 = vpop.f32.mrf.mxu1 }
 0x122   :  { %v1437_v39 = vmax.f32 %v1389_v32, 0.0  ;;  %v1327_v40 = vmul.f32 %v13993_v59, %v1051_v33  ;;  %1536 = vst [vmem:[%s19616_s10 + $0x50] sm:$0xf] %v11423_v34  ;;  %v943_v41 = vpop.f32.mrf.mxu0  ;;  %19786 = vst [vmem:[#allocation8_spill] sm:$0xff] %v14101_v27 }
 0x123   :  { %v1056_v42 = vpop.f32.mrf.mxu1 }
 0x124   :  { %v11424_v43 = vpack.c.bf16 %v1437_v39, %v1437_v39  ;;  %v1392_v44 = vadd.f32 %v14001_v51, %v1327_v40  ;;  %v1057_v45 = vadd.f32 %v1056_v42, %v943_v41  ;;  %v945_v46 = vpop.f32.mrf.mxu0  ;;  %v14113_v42 = vrot.slane %v13977_v50, %v14101_v27 }
 0x125   :  { %v1058_v54 = vpop.f32.mrf.mxu1 }
 0x126   :  { %1537 = vst [vmem:[%s19616_s10 + $0x60] sm:$0xf] %v11424_v43  ;;  %v1440_v55 = vmax.f32 %v1392_v44, 0.0  ;;  %v14080_v57 = vadd.f32 %v1058_v54, %v945_v46  ;;  %v1330_v58 = vmul.f32 %v13993_v59, %v1057_v45  ;;  %v947_v60 = vpop.f32.mrf.mxu0  ;;  %v14116_v46 = vld [vmem:[#allocation2 + $0x38] sm:$0x11] }
 0x127   :  { %v1060_v61 = vpop.f32.mrf.mxu1 }
 0x128   :  { %v11425_v63 = vpack.c.bf16 %v1440_v55, %v1440_v55  ;;  %v1061_v0 = vadd.f32 %v1060_v61, %v947_v60  ;;  %v1395_v1 = vadd.f32 %v14001_v51, %v1330_v58  ;;  %v14084_v49 = vpop.f32.mrf.mxu0  ;;  %v2072_v58 = vrot.slane %v13160_v11, 4 }
 0x129   :  { %v14086_v2 = vpop.f32.mrf.mxu1  ;;  %v2075_v60 = vrot.slane %v13160_v11, 5  ;;  %v1023_v61 = vadd.f32 %v14009_v14, %v14007_v13  ;;  %v14140_v13 = vsub.s32 2, %v13972_v47 }
 0x12a   :  { %1538 = vst [vmem:[%s19616_s10 + $0x70] sm:$0xf] %v11425_v63  ;;  %v1333_v3 = vmul.f32 %v13993_v59, %v1061_v0  ;;  %v1443_v4 = vmax.f32 %v1395_v1, 0.0  ;;  %v953_v7 = vpop.f32.mrf.mxu0 }
 0x12b   :  { %v1066_v10 = vpop.f32.mrf.mxu1  ;;  %19787 = vst [vmem:[#allocation9_spill] sm:$0xff] %v14140_v13 }
 0x12c   :  { %v1398_v12 = vadd.f32 %v14001_v51, %v1333_v3  ;;  %v1067_v15 = vadd.f32 %v1066_v10, %v953_v7  ;;  %v11426_v16 = vpack.c.bf16 %v1443_v4, %v1443_v4  ;;  %v955_v17 = vpop.f32.mrf.mxu0  ;;  %v1307_v7 = vmul.f32 %v14113_v42, %v14004_v6 }
 0x12d   :  { %v1068_v18 = vpop.f32.mrf.mxu1  ;;  %v14133_v10 = vrot.slane %v13985_v53, %v14101_v27  ;;  %v1310_v6 = vmul.f32 %v14113_v42, %v1023_v61 }
 0x12e   :  { %v1446_v19 = vmax.f32 %v1398_v12, 0.0  ;;  %v1336_v20 = vmul.f32 %v13993_v59, %v1067_v15  ;;  %v14094_v21 = vadd.f32 %v1068_v18, %v955_v17  ;;  %1539 = vst [vmem:[%s19616_s10 + $0x80] sm:$0xf] %v11426_v16  ;;  %v957_v22 = vpop.f32.mrf.mxu0  ;;  %v2076_v17 = vor.u32 %v2075_v60, %v2072_v58 }
 0x12f   :  { %v1070_v24 = vpop.f32.mrf.mxu1  ;;  %v2079_v18 = vshll.u32 %v14116_v46, 16 }
 0x130   :  { %v11427_v25 = vpack.c.bf16 %v1446_v19, %v1446_v19  ;;  %v1401_v26 = vadd.f32 %v14001_v51, %v1336_v20  ;;  %v1071_v29 = vadd.f32 %v1070_v24, %v957_v22  ;;  %v14103_v30 = vpop.f32.mrf.mxu0  ;;  %v1313_v19 = vmul.f32 %v14113_v42, %v14020_v28 }
 0x131   :  { %v14105_v31 = vpop.f32.mrf.mxu1  ;;  %v1033_v20 = vadd.f32 %v14026_v36, %v14024_v35  ;;  %v1043_v28 = vadd.f32 %v14050_v9, %v14048_v8  ;;  %v14162_v36 = vrot.slane %v13977_v50, %v14140_v13 }
 0x132   :  { %1540 = vst [vmem:[%s19616_s10 + $0x90] sm:$0xf] %v11427_v25  ;;  %v1449_v32 = vmax.f32 %v1401_v26, 0.0  ;;  %v1339_v33 = vmul.f32 %v13993_v59, %v1071_v29  ;;  %v963_v34 = vpop.f32.mrf.mxu0  ;;  %v14153_v26 = vld [vmem:[#allocation2 + $0x110] sm:$0xee]  ;;  %v14156_v29 = vadd.f32 %v14133_v10, %v1307_v7  ;;  %v14175_v8 = vadd.f32 %v14133_v10, %v1313_v19 }
 0x133   :  { %v1076_v39 = vpop.f32.mrf.mxu1  ;;  %v1316_v9 = vmul.f32 %v14113_v42, %v1033_v20 }
 0x134   :  { %v11428_v40 = vpack.c.bf16 %v1449_v32, %v1449_v32  ;;  %v1077_v41 = vadd.f32 %v1076_v39, %v963_v34  ;;  %v1404_v43 = vadd.f32 %v14001_v51, %v1339_v33  ;;  %v965_v44 = vpop.f32.mrf.mxu0 }
 0x135   :  { %v1078_v45 = vpop.f32.mrf.mxu1 }
 0x136   :  { %1541 = vst [vmem:[%s19616_s10 + $0xa0] sm:$0xf] %v11428_v40  ;;  %v1342_v54 = vmul.f32 %v13993_v59, %v1077_v41  ;;  %v14122_v55 = vadd.f32 %v1078_v45, %v965_v44  ;;  %v1452_v63 = vmax.f32 %v1404_v43, 0.0  ;;  %v967_v0 = vpop.f32.mrf.mxu0  ;;  %v14167_v40 = vrot.slane %v2076_v17, 4 }
 0x137   :  { %v1080_v1 = vpop.f32.mrf.mxu1  ;;  %v14169_v41 = vrot.slane %v2079_v18, 5  ;;  %v14172_v43 = vadd.f32 %v14133_v10, %v1310_v6  ;;  %v1426_v18 = vmax.f32 %v14175_v8, 0.0  ;;  %v14197_v6 = vadd.f32 %v14133_v10, %v1316_v9 }
 0x138   :  { %v1407_v3 = vadd.f32 %v14001_v51, %v1342_v54  ;;  %v1081_v4 = vadd.f32 %v1080_v1, %v967_v0  ;;  %v11429_v12 = vpack.c.bf16 %v1452_v63, %v1452_v63  ;;  %v14135_v15 = vpop.f32.mrf.mxu0  ;;  %v1319_v54 = vmul.f32 %v14113_v42, %v14038_v62 }
 0x139   :  { %v14137_v11 = vpop.f32.mrf.mxu1  ;;  %v1420_v63 = vmax.f32 %v14156_v29, 0.0  ;;  %v1322_v0 = vmul.f32 %v14113_v42, %v1043_v28  ;;  %v1423_v17 = vmax.f32 %v14172_v43, 0.0 }
 0x13a   :  { %v1455_v14 = vmax.f32 %v1407_v3, 0.0  ;;  %v1345_v16 = vmul.f32 %v13993_v59, %v1081_v4  ;;  %1542 = vst [vmem:[%s19616_s10 + $0xb0] sm:$0xf] %v11429_v12  ;;  %v973_v47 = vpop.f32.mrf.mxu0 }
 0x13b   :  { %v1086_v22 = vpop.f32.mrf.mxu1  ;;  %v14207_v28 = vadd.f32 %v14133_v10, %v1322_v0 }
 0x13c   :  { %v11430_v24 = vpack.c.bf16 %v1455_v14, %v1455_v14  ;;  %v1410_v25 = vadd.f32 %v14001_v51, %v1345_v16  ;;  %v1087_v32 = vadd.f32 %v1086_v22, %v973_v47  ;;  %v975_v33 = vpop.f32.mrf.mxu0  ;;  %v14200_v22 = vadd.f32 %v14133_v10, %v1319_v54 }
 0x13d   :  { %v1088_v35 = vpop.f32.mrf.mxu1  ;;  %v14295_v16 = vsel %vm14282_vm3, %v14167_v40, %v14169_v41 }
 0x13e   :  { %1543 = vst [vmem:[%s19616_s10 + $0xc0] sm:$0xf] %v11430_v24  ;;  %v1458_v34 = vmax.f32 %v1410_v25, 0.0  ;;  %v1089_v39 = vadd.f32 %v1088_v35, %v975_v33  ;;  %v1348_v50 = vmul.f32 %v13993_v59, %v1087_v32  ;;  %v977_v44 = vpop.f32.mrf.mxu0  ;;  %v1053_v24 = vadd.f32 %v14070_v38, %v14068_v37  ;;  %v2036_v38 = vld [vmem:[#allocation2 + $0x20] sm:$0x11] }
 0x13f   :  { %v1090_v45 = vpop.f32.mrf.mxu1  ;;  %v1063_v32 = vadd.f32 %v14086_v2, %v14084_v49  ;;  %v1073_v33 = vadd.f32 %v14105_v31, %v14103_v30  ;;  %v1083_v49 = vadd.f32 %v14137_v11, %v14135_v15  ;;  %v14226_v2 = vrot.slane %v13985_v53, %v14140_v13 }
 0x140   :  { %v11431_v58 = vpack.c.bf16 %v1458_v34, %v1458_v34  ;;  %v1349_v60 = vmul.f32 %v14113_v42, %v1089_v39  ;;  %v1091_v61 = vadd.f32 %v1090_v45, %v977_v44  ;;  %v1413_v1 = vadd.f32 %v14001_v51, %v1348_v50  ;;  %v979_v3 = vpop.f32.mrf.mxu0 }
 0x141   :  { %v1092_v4 = vpop.f32.mrf.mxu1  ;;  %v1429_v44 = vmax.f32 %v14197_v6, 0.0  ;;  %v1325_v45 = vmul.f32 %v14113_v42, %v14061_v23  ;;  %v1432_v54 = vmax.f32 %v14200_v22, 0.0  ;;  %v1331_v15 = vmul.f32 %v14113_v42, %v14080_v57 }
 0x142   :  { %1544 = vst [vmem:[%s19616_s10 + $0xd0] sm:$0xf] %v11431_v58  ;;  %v14190_v62 = vadd.f32 %v14133_v10, %v1349_v60  ;;  %v1351_v12 = vmul.f32 %v13993_v59, %v1091_v61  ;;  %v1093_v14 = vadd.f32 %v1092_v4, %v979_v3  ;;  %v1461_v19 = vmax.f32 %v1413_v1, 0.0  ;;  %v11498_v20 = vpop.f32.mrf.mxu0 }
 0x143   :  { %v11562_v47 = vpop.f32.mrf.mxu1  ;;  %v1328_v58 = vmul.f32 %v14113_v42, %v1053_v24  ;;  %v1334_v11 = vmul.f32 %v14113_v42, %v1063_v32  ;;  %v1337_v61 = vmul.f32 %v14113_v42, %v14094_v21  ;;  %v1340_v53 = vmul.f32 %v14113_v42, %v1073_v33 }
 0x144   :  { %v1416_v59 = vadd.f32 %v14001_v51, %v1351_v12  ;;  %v1352_v25 = vmul.f32 %v14113_v42, %v1093_v14  ;;  %v11432_v35 = vpack.c.bf16 %v1461_v19, %v1461_v19  ;;  %v11499_v34 = vpop.f32.mrf.mxu0  ;;  %v1435_v3 = vmax.f32 %v14207_v28, 0.0 }
 0x145   :  { %v11563_v39 = vpop.f32.mrf.mxu1  ;;  %v11500_v37 = vadd.f32 %v11499_v34, %v11498_v20  ;;  %v14242_v57 = vadd.f32 %v14133_v10, %v1325_v45  ;;  %v1343_v21 = vmul.f32 %v14113_v42, %v14122_v55  ;;  %v1346_v19 = vmul.f32 %v14113_v42, %v1083_v49 }
 0x146   :  { %v1464_v9 = vmax.f32 %v1416_v59, 0.0  ;;  %v14214_v50 = vadd.f32 %v14133_v10, %v1352_v25  ;;  %v11564_v51 = vadd.f32 %v11563_v39, %v11562_v47  ;;  %1545 = vst [vmem:[%s19616_s10 + $0xe0] sm:$0xf] %v11432_v35  ;;  %v11501_v30 = vpop.f32.mrf.mxu0  ;;  %v2191_v24 = vshll.u32 %v2036_v38, 16 }
 0x147   :  { %v11565_v31 = vpop.f32.mrf.mxu1  ;;  %v14248_v59 = vadd.f32 %v14133_v10, %v1328_v58  ;;  %v14252_v33 = vadd.f32 %v14133_v10, %v1331_v15  ;;  %v14255_v35 = vadd.f32 %v14133_v10, %v1334_v11  ;;  %v14258_v34 = vadd.f32 %v14133_v10, %v1337_v61 }
 0x148   :  { %v11433_v23 = vpack.c.bf16 %v1464_v9, %v1464_v9  ;;  %v1227_v60 = vadd.f32 %v11564_v51, %v11500_v37  ;;  %v11502_v0 = vpop.f32.mrf.mxu0  ;;  %v14261_v42 = vadd.f32 %v14133_v10, %v1340_v53  ;;  %v1438_v45 = vmax.f32 %v14242_v57, 0.0 }
 0x149   :  { %v11566_v1 = vpop.f32.mrf.mxu1  ;;  %v11503_v12 = vadd.f32 %v11502_v0, %v11501_v30  ;;  %v14266_v49 = vadd.f32 %v14133_v10, %v1343_v21  ;;  %v14269_v30 = vadd.f32 %v14133_v10, %v1346_v19  ;;  %v2193_v11 = vrot.slane %v2191_v24, 5  ;;  %v1913_v24 = vld [vmem:[#allocation2 + $0x18] sm:$0x11] }
 0x14a   :  { %1546 = vst [vmem:[%s19616_s10 + $0xf0] sm:$0xf] %v11433_v23  ;;  %v1308_v4 = vmul.f32 %v14162_v36, %v1227_v60  ;;  %v11567_v14 = vadd.f32 %v11566_v1, %v11565_v31  ;;  %v11504_v20 = vpop.f32.mrf.mxu0  ;;  %v1441_v61 = vmax.f32 %v14248_v59, 0.0  ;;  %v1444_v53 = vmax.f32 %v14252_v33, 0.0  ;;  %v12653_v59 = vld [vmem:[%s19613_s4 + $0x330] ss:$12 sps:$4 sm:$0xff]  }
 0x14b   :  { %v11568_v47 = vpop.f32.mrf.mxu1  ;;  %v12646_v33 = vld [vmem:[%s19613_s4 + $0x514] ss:$12 sps:$4 sm:$0xff]  }
 0x14c   :  { %v1373_v25 = vadd.f32 %v14226_v2, %v1308_v4  ;;  %v1230_v32 = vadd.f32 %v11567_v14, %v11503_v12  ;;  %v11505_v55 = vpop.f32.mrf.mxu0 }
 0x14d   :  { %v11569_v39 = vpop.f32.mrf.mxu1  ;;  %v11506_v51 = vadd.f32 %v11505_v55, %v11504_v20 }
 0x14e   :  { %v1421_v9 = vmax.f32 %v1373_v25, 0.0  ;;  %v1311_v37 = vmul.f32 %v14162_v36, %v1230_v32  ;;  %v11570_v38 = vadd.f32 %v11569_v39, %v11568_v47  ;;  %v11507_v31 = vpop.f32.mrf.mxu0  ;;  %v1910_v47 = vld [vmem:[#allocation2 + $0xb0] sm:$0xff] }
 0x14f   :  { %v11571_v58 = vpop.f32.mrf.mxu1 }
 0x150   :  { %v11434_v23 = vpack.c.bf16 %v1421_v9, %v1420_v63  ;;  %v1376_v60 = vadd.f32 %v14226_v2, %v1311_v37  ;;  %v1235_v15 = vadd.f32 %v11570_v38, %v11506_v51  ;;  %v11508_v4 = vpop.f32.mrf.mxu0  ;;  %v19788_v63 = vmov 0 }
 0x151   :  { %v11572_v10 = vpop.f32.mrf.mxu1  ;;  %v19789_v63 = vsel %vm14282_vm3, 4294967295, %v19788_v63  ;;  %v11509_v25 = vadd.f32 %v11508_v4, %v11507_v31  ;;  %v14300_v31 = vsel %vm14282_vm3, %v14167_v40, %v2193_v11 }
 0x152   :  { %v1746_v14 = vshrl.u32 %v11434_v23, 16  ;;  %v1424_v21 = vmax.f32 %v1376_v60, 0.0  ;;  %v1314_v29 = vmul.f32 %v14162_v36, %v1235_v15  ;;  %19790 = vst [vmem:[#allocation10_spill] sm:$0xff] %v19789_v63  ;;  %v11573_v32 = vadd.f32 %v11572_v10, %v11571_v58  ;;  %v11510_v55 = vpop.f32.mrf.mxu0 }
 0x153   :  { %v11574_v39 = vpop.f32.mrf.mxu1  ;;  %v1749_v37 = vshll.u32 %v11434_v23, 16 }
 0x154   :  { %v1748_v9 = vrot.slane %v1746_v14, 7  ;;  %v11435_v51 = vpack.c.bf16 %v1424_v21, %v1423_v17  ;;  %v1379_v38 = vadd.f32 %v14226_v2, %v1314_v29  ;;  %v1238_v60 = vadd.f32 %v11573_v32, %v11509_v25  ;;  %v11511_v15 = vpop.f32.mrf.mxu0 }
 0x155   :  { %v11575_v7 = vpop.f32.mrf.mxu1  ;;  %v11512_v14 = vadd.f32 %v11511_v15, %v11510_v55 }
 0x156   :  { %v1751_v43 = vor.u32 %v1749_v37, %v1748_v9  ;;  %v1752_v17 = vrot.slane %v1748_v9, 4  ;;  %v1754_v23 = vshrl.u32 %v11435_v51, 16  ;;  %v1427_v4 = vmax.f32 %v1379_v38, 0.0  ;;  %v11513_v29 = vpop.f32.mrf.mxu0  ;;  %v1916_v9 = vld [vmem:[#allocation2 + $0xc8] sm:$0xff] }
 0x157   :  { %v1317_v10 = vmul.f32 %v14162_v36, %v1238_v60  ;;  %v11576_v21 = vadd.f32 %v11575_v7, %v11574_v39  ;;  %v11577_v25 = vpop.f32.mrf.mxu1  ;;  %v1757_v32 = vshll.u32 %v11435_v51, 16  ;;  %v1919_v37 = vld [vmem:[#allocation2 + $0xe8] sm:$0x11] }
 0x158   :  { %v14306_v41 = vsel %vm13899_vm0, %v1751_v43, %v1910_v47  ;;  %v1914_v40 = vsel %vm13846_vm8, %v1752_v17, %v1913_v24  ;;  %v1756_v11 = vrot.slane %v1754_v23, 7  ;;  %v11436_v55 = vpack.c.bf16 %v1427_v4, %v1426_v18  ;;  %v11514_v38 = vpop.f32.mrf.mxu0  ;;  %v14314_v47 = vld [vmem:[#allocation2 + $0x110] sm:$0xff] }
 0x159   :  { %1912 = vst [vmem:[#allocation2 + $0xb0] sm:$0xff] %v14306_v41  ;;  %1915 = vst [vmem:[#allocation2 + $0x18] sm:$0x11] %v1914_v40  ;;  %v1382_v7 = vadd.f32 %v14226_v2, %v1317_v10  ;;  %v1243_v39 = vadd.f32 %v11576_v21, %v11512_v14  ;;  %v11578_v60 = vpop.f32.mrf.mxu1  ;;  %v14318_v24 = vcombine.high %v14314_v47, %v14306_v41  ;;  %v12623_v10 = vld [vmem:[%s19613_s4 + $0x3a8] ss:$12 sps:$4 sm:$0xff]   ;;  %v2087_v6 = vshll.u32 %v14306_v41, 16 }
 0x15a   :  { %v1759_v51 = vor.u32 %v1757_v32, %v1756_v11  ;;  %v1760_v15 = vrot.slane %v1756_v11, 4  ;;  %v11515_v43 = vadd.f32 %v11514_v38, %v11513_v29  ;;  %v11579_v17 = vadd.f32 %v11578_v60, %v11577_v25  ;;  %v11516_v18 = vpop.f32.mrf.mxu0  ;;  %v12631_v11 = vld [vmem:[%s19613_s4 + $0x394] ss:$12 sps:$4 sm:$0xff]   ;;  %v1922_v38 = vld [vmem:[#allocation2 + $0x128] sm:$0xff] }
 0x15b   :  { %19791 = vst [vmem:[#allocation11_spill] sm:$0xff] %v14318_v24  ;;  %v1762_v23 = vshrl.u32 %v11436_v55, 16  ;;  %v1765_v40 = vshll.u32 %v11436_v55, 16  ;;  %v1430_v58 = vmax.f32 %v1382_v7, 0.0  ;;  %v1320_v8 = vmul.f32 %v14162_v36, %v1243_v39  ;;  %v11580_v4 = vpop.f32.mrf.mxu1  ;;  %5740 = vmatprep.mubr.bf16.mxu0 %v14318_v24  ;;  %v1925_v60 = vld [vmem:[#allocation2 + $0x48] sm:$0x11] }
 0x15c   :  { %v14327_v14 = vsel %vm13899_vm0, %v1759_v51, %v1916_v9  ;;  %v1920_v21 = vsel %vm13846_vm8, %v1760_v15, %v1919_v37  ;;  %v1246_v29 = vadd.f32 %v11579_v17, %v11515_v43  ;;  %v14333_v25 = vcombine.low %v14314_v47, %v14306_v41  ;;  %v11517_v7 = vpop.f32.mrf.mxu0  ;;  %v12629_v17 = vld [vmem:[%s19613_s4 + $0x390] ss:$12 sps:$4 sm:$0xff]  }
 0x15d   :  { %1918 = vst [vmem:[#allocation2 + $0xc8] sm:$0xff] %v14327_v14  ;;  %1921 = vst [vmem:[#allocation2 + $0xe8] sm:$0x11] %v1920_v21  ;;  %v1764_v32 = vrot.slane %v1762_v23, 7  ;;  %v11437_v9 = vpack.c.bf16 %v1430_v58, %v1429_v44  ;;  %v1385_v55 = vadd.f32 %v14226_v2, %v1320_v8  ;;  %v11581_v37 = vpop.f32.mrf.mxu1  ;;  %v2084_v39 = vshrl.u32 %v14306_v41, 16 }
 0x15e   :  { %19792 = vst [vmem:[#allocation12_spill] sm:$0xff] %v14333_v25  ;;  %v1323_v51 = vmul.f32 %v14162_v36, %v1246_v29  ;;  %v11518_v15 = vadd.f32 %v11517_v7, %v11516_v18  ;;  %v11582_v43 = vadd.f32 %v11581_v37, %v11580_v4  ;;  %5741 = vmatmul.mubr.bf16.vlgmr.msra.gmra.mxu0 %v14333_v25  ;;  %v11519_v21 = vpop.f32.mrf.mxu0  ;;  %v12637_v7 = vld [vmem:[%s19613_s4 + $0x37c] ss:$12 sps:$4 sm:$0xff]   ;;  %v1931_v37 = vld [vmem:[#allocation2 + $0xf0] sm:$0x11] }
 0x15f   :  { %v1767_v44 = vor.u32 %v1765_v40, %v1764_v32  ;;  %v1768_v58 = vrot.slane %v1764_v32, 4  ;;  %v1770_v23 = vshrl.u32 %v11437_v9, 16  ;;  %v1773_v8 = vshll.u32 %v11437_v9, 16  ;;  %v11583_v20 = vpop.f32.mrf.mxu1  ;;  %5935 = vmatpush1.bf16.msra.mxu0 %v12623_v10 }
 0x160   :  { %v1433_v19 = vmax.f32 %v1385_v55, 0.0  ;;  %v1388_v29 = vadd.f32 %v14226_v2, %v1323_v51  ;;  %v1251_v18 = vadd.f32 %v11582_v43, %v11518_v15  ;;  %5936 = vmatprep.subr.bf16.mxu0 %v12631_v11  ;;  %v14350_v4 = vrot.slane %v2084_v39, 4  ;;  %v11520_v10 = vpop.f32.mrf.mxu0  ;;  %v1928_v11 = vld [vmem:[#allocation2 + $0x78] sm:$0xff] }
 0x161   :  { %v14357_v41 = vsel %vm13899_vm0, %v1767_v44, %v1922_v38  ;;  %v1926_v40 = vsel %vm13846_vm8, %v1768_v58, %v1925_v60  ;;  %v1772_v32 = vrot.slane %v1770_v23, 7  ;;  %v11584_v9 = vpop.f32.mrf.mxu1  ;;  %v2089_v55 = vrot.slane %v2087_v6, 5 }
 0x162   :  { %1924 = vst [vmem:[#allocation2 + $0x128] sm:$0xff] %v14357_v41  ;;  %1927 = vst [vmem:[#allocation2 + $0x48] sm:$0x11] %v1926_v40  ;;  %v11438_v39 = vpack.c.bf16 %v1433_v19, %v1432_v54  ;;  %v1436_v51 = vmax.f32 %v1388_v29, 0.0  ;;  %v1326_v15 = vmul.f32 %v14162_v36, %v1251_v18  ;;  %v11521_v38 = vadd.f32 %v11520_v10, %v11519_v21  ;;  %v11522_v60 = vpop.f32.mrf.mxu0  ;;  %v12635_v19 = vld [vmem:[%s19613_s4 + $0x378] ss:$12 sps:$4 sm:$0xff]  }
 0x163   :  { %v1775_v43 = vor.u32 %v1773_v8, %v1772_v32  ;;  %v1776_v44 = vrot.slane %v1772_v32, 4  ;;  %v11585_v12 = vadd.f32 %v11584_v9, %v11583_v20  ;;  %v11586_v58 = vpop.f32.mrf.mxu1  ;;  %5937 = vmatpush1.bf16.msra.mxu0 %v12629_v17  ;;  %v14367_v6 = vcombine.high %v14327_v14, %v14357_v41  ;;  %v1934_v8 = vld [vmem:[#allocation2 + $0xa8] sm:$0xff]  ;;  %v1937_v21 = vld [vmem:[#allocation2 + $0x60] sm:$0x11] }
 0x164   :  { %v1778_v23 = vshrl.u32 %v11438_v39, 16  ;;  %v1781_v40 = vshll.u32 %v11438_v39, 16  ;;  %v11439_v22 = vpack.c.bf16 %v1436_v51, %v1435_v3  ;;  %v1391_v54 = vadd.f32 %v14226_v2, %v1326_v15  ;;  %5938 = vmatprep.subr.bf16.mxu0 %v12637_v7  ;;  %v11523_v18 = vpop.f32.mrf.mxu0  ;;  %v12643_v7 = vld [vmem:[%s19613_s4 + $0x364] ss:$12 sps:$4 sm:$0xff]  }
 0x165   :  { %19793 = vst [vmem:[#allocation13_spill] sm:$0xff] %v14367_v6  ;;  %v14377_v20 = vsel %vm13899_vm0, %v1775_v43, %v1928_v11  ;;  %v1932_v17 = vsel %vm13846_vm8, %v1776_v44, %v1931_v37  ;;  %v1254_v29 = vadd.f32 %v11585_v12, %v11521_v38  ;;  %v11587_v28 = vpop.f32.mrf.mxu1  ;;  %5750 = vmatprep.mubr.bf16.mxu0 %v14367_v6  ;;  %v14390_v12 = vld [vmem:[#allocation2 + $0x18] sm:$0x11]  ;;  %v1940_v37 = vld [vmem:[#allocation2 + $0x28] sm:$0xff] }
 0x166   :  { %v14384_v3 = vcombine.low %v14327_v14, %v14357_v41  ;;  %1930 = vst [vmem:[#allocation2 + $0x78] sm:$0xff] %v14377_v20  ;;  %1933 = vst [vmem:[#allocation2 + $0xf0] sm:$0x11] %v1932_v17  ;;  %v1780_v32 = vrot.slane %v1778_v23, 7  ;;  %v1786_v10 = vshrl.u32 %v11439_v22, 16  ;;  %v1789_v9 = vshll.u32 %v11439_v22, 16  ;;  %v11525_v38 = vpop.f32.mrf.mxu0 }
 0x167   :  { %v1439_v11 = vmax.f32 %v1391_v54, 0.0  ;;  %v1329_v39 = vmul.f32 %v14162_v36, %v1254_v29  ;;  %v11524_v51 = vadd.f32 %v11523_v18, %v11522_v60  ;;  %v11588_v15 = vadd.f32 %v11587_v28, %v11586_v58  ;;  %v11589_v43 = vpop.f32.mrf.mxu1  ;;  %v12641_v23 = vld [vmem:[%s19613_s4 + $0x360] ss:$12 sps:$4 sm:$0xff]   ;;  %5939 = vmatpush1.bf16.msra.mxu0 %v12635_v19  ;;  %v1943_v29 = vld [vmem:[#allocation2 + $0x118] sm:$0x11] }
 0x168   :  { %19794 = vst [vmem:[#allocation14_spill] sm:$0xff] %v14384_v3  ;;  %5751 = vmatmul.mubr.bf16.gmra.mxu0 %v14384_v3  ;;  %v2090_v44 = vor.u32 %v2089_v55, %v14350_v4  ;;  %v1783_v17 = vor.u32 %v1781_v40, %v1780_v32  ;;  %v1784_v22 = vrot.slane %v1780_v32, 4  ;;  %v1788_v54 = vrot.slane %v1786_v10, 7  ;;  %v11526_v18 = vpop.f32.mrf.mxu0  ;;  %5940 = vmatprep.subr.bf16.mxu0 %v12643_v7  ;;  %v12649_v55 = vld [vmem:[%s19613_s4 + $0x34c] ss:$12 sps:$4 sm:$0xff]  }
 0x169   :  { %v11440_v1 = vpack.c.bf16 %v1439_v11, %v1438_v45  ;;  %v1394_v60 = vadd.f32 %v14226_v2, %v1329_v39  ;;  %v1259_v58 = vadd.f32 %v11588_v15, %v11524_v51  ;;  %v11590_v28 = vpop.f32.mrf.mxu1  ;;  %v2093_v4 = vshll.u32 %v14390_v12, 16 }
 0x16a   :  { %v2091_v0 = vrot.slane %v2090_v44, 4  ;;  %v14407_v40 = vsel %vm13899_vm0, %v1783_v17, %v1934_v8  ;;  %v1938_v57 = vsel %vm13846_vm8, %v1784_v22, %v1937_v21  ;;  %v1791_v45 = vor.u32 %v1789_v9, %v1788_v54  ;;  %v11528_v39 = vpop.f32.mrf.mxu0  ;;  %v12647_v44 = vld [vmem:[%s19613_s4 + $0x348] ss:$12 sps:$4 sm:$0xff]  }
 0x16b   :  { %v1792_v19 = vrot.slane %v1788_v54, 4  ;;  %1936 = vst [vmem:[#allocation2 + $0xa8] sm:$0xff] %v14407_v40  ;;  %1939 = vst [vmem:[#allocation2 + $0x60] sm:$0x11] %v1938_v57  ;;  %v1794_v32 = vshrl.u32 %v11440_v1, 16  ;;  %v1797_v10 = vshll.u32 %v11440_v1, 16  ;;  %v1332_v7 = vmul.f32 %v14162_v36, %v1259_v58  ;;  %v11592_v51 = vpop.f32.mrf.mxu1  ;;  %5941 = vmatpush1.bf16.msra.mxu0 %v12641_v23 }
 0x16c   :  { %v1442_v11 = vmax.f32 %v1394_v60, 0.0  ;;  %v14415_v15 = vsel %vm13899_vm0, %v1791_v45, %v1940_v37  ;;  %v11527_v21 = vadd.f32 %v11526_v18, %v11525_v38  ;;  %v11591_v9 = vadd.f32 %v11590_v28, %v11589_v43  ;;  %v1946_v17 = vld [vmem:[#allocation2 + $0x70] sm:$0xff]  ;;  %v11529_v60 = vpop.f32.mrf.mxu0  ;;  %5942 = vmatprep.subr.bf16.mxu0 %v12649_v55 }
 0x16d   :  { %v1944_v8 = vsel %vm13846_vm8, %v1792_v19, %v1943_v29  ;;  %1942 = vst [vmem:[#allocation2 + $0x28] sm:$0xff] %v14415_v15  ;;  %v1796_v1 = vrot.slane %v1794_v32, 7  ;;  %v1397_v37 = vadd.f32 %v14226_v2, %v1332_v7  ;;  %v2095_v54 = vrot.slane %v2093_v4, 5  ;;  %v11593_v29 = vpop.f32.mrf.mxu1  ;;  %v12655_v38 = vld [vmem:[%s19613_s4 + $0x334] ss:$12 sps:$4 sm:$0xff]  }
 0x16e   :  { %1945 = vst [vmem:[#allocation2 + $0x118] sm:$0x11] %v1944_v8  ;;  %v11441_v22 = vpack.c.bf16 %v1442_v11, %v1441_v61  ;;  %v1949_v43 = vld [vmem:[#allocation2 + $0x30] sm:$0x11]  ;;  %v1262_v23 = vadd.f32 %v11591_v9, %v11527_v21  ;;  %v11530_v58 = vadd.f32 %v11529_v60, %v11528_v39  ;;  %v11594_v18 = vadd.f32 %v11593_v29, %v11592_v51  ;;  %v11531_v45 = vpop.f32.mrf.mxu0  ;;  %v12661_v29 = vld [vmem:[%s19613_s4 + $0x31c] ss:$12 sps:$4 sm:$0xff]  }
 0x16f   :  { %v14431_v28 = vcombine.high %v14377_v20, %v14407_v40  ;;  %v1799_v61 = vor.u32 %v1797_v10, %v1796_v1  ;;  %v1800_v4 = vrot.slane %v1796_v1, 4  ;;  %v11595_v19 = vpop.f32.mrf.mxu1  ;;  %v1445_v32 = vmax.f32 %v1397_v37, 0.0  ;;  %5943 = vmatpush1.bf16.msra.mxu0 %v12647_v44  ;;  %v1952_v44 = vld [vmem:[#allocation2 + $0x90] sm:$0xff] }
 0x170   :  { %v1802_v57 = vshrl.u32 %v11441_v22, 16  ;;  %v1805_v55 = vshll.u32 %v11441_v22, 16  ;;  %v1335_v11 = vmul.f32 %v14162_v36, %v1262_v23  ;;  %v14439_v7 = vsel %vm14282_vm3, %v2091_v0, %v2095_v54  ;;  %v12638_v0 = vld [vmem:[%s19613_s4 + $0x528] ss:$12 sps:$4 sm:$0xff]   ;;  %v11532_v9 = vpop.f32.mrf.mxu0  ;;  %5944 = vmatprep.subr.bf16.mxu0 %v12655_v38 }
 0x171   :  { %19795 = vst [vmem:[#allocation15_spill] sm:$0xff] %v14431_v28  ;;  %v1267_v39 = vadd.f32 %v11594_v18, %v11530_v58  ;;  %5760 = vmatprep.mubr.bf16.mxu0 %v14431_v28  ;;  %v14444_v51 = vsel %vm13899_vm0, %v1799_v61, %v1946_v17  ;;  %v1950_v10 = vsel %vm13846_vm8, %v1800_v4, %v1949_v43  ;;  %v11596_v1 = vpop.f32.mrf.mxu1  ;;  %v1955_v17 = vld [vmem:[#allocation2 + $0x68] sm:$0x11] }
 0x172   :  { %v1804_v8 = vrot.slane %v1802_v57, 7  ;;  %v14450_v21 = vcombine.low %v14295_v16, %v14439_v7  ;;  %1948 = vst [vmem:[#allocation2 + $0x70] sm:$0xff] %v14444_v51  ;;  %1951 = vst [vmem:[#allocation2 + $0x30] sm:$0x11] %v1950_v10  ;;  %v11442_v22 = vpack.c.bf16 %v1445_v32, %v1444_v53  ;;  %v1400_v37 = vadd.f32 %v14226_v2, %v1335_v11  ;;  %v14470_v53 = vpop.f32.mrf.mxu0 }
 0x173   :  { %v14461_v54 = vcombine.high %v14295_v16, %v14439_v7  ;;  %v1338_v60 = vmul.f32 %v14162_v36, %v1267_v39  ;;  %v11533_v23 = vadd.f32 %v11532_v9, %v11531_v45  ;;  %v11597_v58 = vadd.f32 %v11596_v1, %v11595_v19  ;;  %v14472_v18 = vpop.f32.mrf.mxu1  ;;  %v12659_v16 = vld [vmem:[%s19613_s4 + $0x318] ss:$12 sps:$4 sm:$0xff]   ;;  %v14479_v45 = vld [vmem:[#allocation2 + $0xe8] sm:$0x11]  ;;  %5945 = vmatpush1.bf16.msra.mxu0 %v12653_v59  ;;  %v12644_v39 = vld [vmem:[%s19613_s4 + $0x510] ss:$12 sps:$4 sm:$0xff]  }
 0x174   :  { %19796 = vst [vmem:[#allocation16_spill] sm:$0xff] %v14450_v21  ;;  %v1807_v38 = vor.u32 %v1805_v55, %v1804_v8  ;;  %v1808_v43 = vrot.slane %v1804_v8, 4  ;;  %v1810_v61 = vshrl.u32 %v11442_v22, 16  ;;  %v1813_v4 = vshll.u32 %v11442_v22, 16  ;;  %v14493_v8 = vpop.f32.mrf.mxu0  ;;  %v12667_v9 = vld [vmem:[%s19613_s4 + $0x304] ss:$12 sps:$4 sm:$0xff]   ;;  %5946 = vmatprep.subr.bf16.mxu0 %v12661_v29 }
 0x175   :  { %19797 = vst [vmem:[#allocation17_spill] sm:$0xff] %v14461_v54  ;;  %v1448_v57 = vmax.f32 %v1400_v37, 0.0  ;;  %5853 = vmatprep.mubr.bf16.mxu1 %v14461_v54  ;;  %v1403_v55 = vadd.f32 %v14226_v2, %v1338_v60  ;;  %v1270_v11 = vadd.f32 %v11597_v58, %v11533_v23  ;;  %v14491_v10 = vcombine.low %v14377_v20, %v14407_v40  ;;  %v14495_v59 = vpop.f32.mrf.mxu1 }
 0x176   :  { %v1953_v19 = vsel %vm13899_vm0, %v1807_v38, %v1952_v44  ;;  %v1956_v32 = vsel %vm13846_vm8, %v1808_v43, %v1955_v17  ;;  %5854 = vmatmul.mubr.bf16.vlgmr.msra.gmra.mxu1 %v14450_v21  ;;  %v1812_v1 = vrot.slane %v1810_v61, 7  ;;  %v1961_v44 = vld [vmem:[#allocation2 + $0x40] sm:$0x11]  ;;  %v19799_v17 = vmax.f32 %v14255_v35, 0.0  ;;  %v1958_v43 = vld [vmem:[#allocation2 + $0x108] sm:$0xff] }
 0x177   :  { %19798 = vst [vmem:[#allocation18_spill] sm:$0xff] %v14491_v10  ;;  %1954 = vst [vmem:[#allocation2 + $0x90] sm:$0xff] %v1953_v19  ;;  %v1451_v37 = vmax.f32 %v1403_v55, 0.0  ;;  %6048 = vmatpush1.bf16.msra.mxu1 %v12638_v0  ;;  %v2098_v60 = vshrl.u32 %v14327_v14, 16  ;;  %v1341_v23 = vmul.f32 %v14162_v36, %v1270_v11  ;;  %5761 = vmatmul.mubr.bf16.gmra.mxu0 %v14491_v10  ;;  %v2101_v58 = vshll.u32 %v14327_v14, 16  ;;  %v14511_v0 = vpop.f32.mrf.mxu0 }
 0x178   :  { %1957 = vst [vmem:[#allocation2 + $0x68] sm:$0x11] %v1956_v32  ;;  %v11443_v22 = vpack.c.bf16 %v1448_v57, %v19799_v17  ;;  %6049 = vmatprep.subr.bf16.mxu1 %v12646_v33  ;;  %v2107_v61 = vshll.u32 %v14479_v45, 16  ;;  %v12652_v35 = vld [vmem:[%s19613_s4 + $0x4fc] ss:$12 sps:$4 sm:$0xff]   ;;  %v14513_v57 = vpop.f32.mrf.mxu1  ;;  %v1815_v29 = vor.u32 %v1813_v4, %v1812_v1  ;;  %v1816_v55 = vrot.slane %v1812_v1, 4  ;;  %5947 = vmatpush1.bf16.msra.mxu0 %v12659_v16 }
 0x179   :  { %v2112_v32 = vshrl.u32 %v14357_v41, 16  ;;  %v12665_v14 = vld [vmem:[%s19613_s4 + $0x300] ss:$12 sps:$4 sm:$0xff]   ;;  %v19800_v11 = vmax.f32 %v14258_v34, 0.0  ;;  %v1406_v38 = vadd.f32 %v14226_v2, %v1341_v23  ;;  %v2100_v13 = vrot.slane %v2098_v60, 4  ;;  %v14522_v27 = vpop.f32.mrf.mxu0  ;;  %5948 = vmatprep.subr.bf16.mxu0 %v12667_v9 }
 0x17a   :  { %v1818_v19 = vshrl.u32 %v11443_v22, 16  ;;  %v1967_v33 = vld [vmem:[#allocation2 + $0x80] sm:$0x11]  ;;  %v2103_v56 = vrot.slane %v2101_v58, 5  ;;  %v14524_v4 = vpop.f32.mrf.mxu1  ;;  %v12673_v16 = vld [vmem:[%s19613_s4 + $0x46c] ss:$12 sps:$4 sm:$0xff]   ;;  %v14531_v1 = vsel %vm13899_vm0, %v1815_v29, %v1958_v43  ;;  %v1962_v34 = vsel %vm13846_vm8, %v1816_v55, %v1961_v44 }
 0x17b   :  { %v11444_v17 = vpack.c.bf16 %v1451_v37, %v19800_v11  ;;  %v1821_v23 = vshll.u32 %v11443_v22, 16  ;;  %6050 = vmatpush1.bf16.msra.mxu1 %v12644_v39  ;;  %v14535_v60 = vld [vmem:[#allocation2 + $0x48] sm:$0x11]  ;;  %v12650_v9 = vld [vmem:[%s19613_s4 + $0x4f8] ss:$12 sps:$4 sm:$0xff]   ;;  %1960 = vst [vmem:[#allocation2 + $0x108] sm:$0xff] %v14531_v1  ;;  %v14545_v21 = vpop.f32.mrf.mxu0 }
 0x17c   :  { %v1820_v37 = vrot.slane %v1818_v19, 7  ;;  %1963 = vst [vmem:[#allocation2 + $0x40] sm:$0x11] %v1962_v34  ;;  %v1964_v58 = vld [vmem:[#allocation2 + $0xd8] sm:$0xff]  ;;  %v1454_v52 = vmax.f32 %v1406_v38, 0.0  ;;  %v2104_v43 = vor.u32 %v2103_v56, %v2100_v13  ;;  %v2109_v29 = vrot.slane %v2107_v61, 5  ;;  %6051 = vmatprep.subr.bf16.mxu1 %v12652_v35  ;;  %v14547_v54 = vpop.f32.mrf.mxu1  ;;  %5949 = vmatpush1.bf16.msra.mxu0 %v12665_v14 }
 0x17d   :  { %v1826_v11 = vshrl.u32 %v11444_v17, 16  ;;  %v12658_v44 = vld [vmem:[%s19613_s4 + $0x4e4] ss:$12 sps:$4 sm:$0xff]   ;;  %v2114_v55 = vrot.slane %v2112_v32, 4  ;;  %v2115_v19 = vshll.u32 %v14357_v41, 16  ;;  %v1829_v38 = vshll.u32 %v11444_v17, 16  ;;  %5950 = vmatprep.subr.bf16.mxu0 %v12673_v16 }
 0x17e   :  { %v1823_v39 = vor.u32 %v1821_v23, %v1820_v37  ;;  %v1824_v22 = vrot.slane %v1820_v37, 4  ;;  %v12671_v56 = vld [vmem:[%s19613_s4 + $0x468] ss:$12 sps:$4 sm:$0xff]   ;;  %v19801_v61 = vmax.f32 %v14261_v42, 0.0  ;;  %v2121_v34 = vshll.u32 %v14535_v60, 16 }
 0x17f   :  { %v1828_v13 = vrot.slane %v1826_v11, 7  ;;  %v12679_v41 = vld [vmem:[%s19613_s4 + $0x454] ss:$12 sps:$4 sm:$0xff]   ;;  %v1970_v37 = vld [vmem:[#allocation2 + $0x8] sm:$0xff]  ;;  %v2117_v17 = vrot.slane %v2115_v19, 5  ;;  %6052 = vmatpush1.bf16.msra.mxu1 %v12650_v9  ;;  %v11541_v9 = vpop.f32.mrf.mxu0 }
 0x180   :  { %v11445_v35 = vpack.c.bf16 %v1454_v52, %v19801_v61  ;;  %v14560_v32 = vsel %vm13899_vm0, %v1823_v39, %v1964_v58  ;;  %v1968_v14 = vsel %vm13846_vm8, %v1824_v22, %v1967_v33  ;;  %v1973_v23 = vld [vmem:[#allocation2 + $0x130] sm:$0x11]  ;;  %v11536_v52 = vadd.f32 %v14493_v8, %v14470_v53  ;;  %v12656_v42 = vld [vmem:[%s19613_s4 + $0x4e0] ss:$12 sps:$4 sm:$0xff]   ;;  %6053 = vmatprep.subr.bf16.mxu1 %v12658_v44  ;;  %v14575_v61 = vpop.f32.mrf.mxu1 }
 0x181   :  { %1966 = vst [vmem:[#allocation2 + $0xd8] sm:$0xff] %v14560_v32  ;;  %1969 = vst [vmem:[#allocation2 + $0x80] sm:$0x11] %v1968_v14  ;;  %v1831_v16 = vor.u32 %v1829_v38, %v1828_v13  ;;  %v1832_v58 = vrot.slane %v1828_v13, 4  ;;  %v2105_v39 = vrot.slane %v2104_v43, 4  ;;  %v2118_v19 = vor.u32 %v2117_v17, %v2114_v55  ;;  %5951 = vmatpush2.bf16.msra.mxu0 %v12671_v56 }
 0x182   :  { %v1834_v11 = vshrl.u32 %v11445_v35, 16  ;;  %v12664_v33 = vld [vmem:[%s19613_s4 + $0x4cc] ss:$12 sps:$4 sm:$0xff]   ;;  %v1837_v22 = vshll.u32 %v11445_v35, 16  ;;  %v2123_v53 = vrot.slane %v2121_v34, 5  ;;  %v11600_v8 = vadd.f32 %v14495_v59, %v14472_v18  ;;  %5952 = vmatprep.subr.bf16.mxu0 %v12679_v41  ;;  %v1976_v59 = vld [vmem:[#allocation2 + $0xe0] sm:$0xff] }
 0x183   :  { %v12677_v13 = vld [vmem:[%s19613_s4 + $0x450] ss:$12 sps:$4 sm:$0xff]   ;;  %v14582_v43 = vsel %vm13899_vm0, %v1831_v16, %v1970_v37  ;;  %v1974_v44 = vsel %vm13846_vm8, %v1832_v58, %v1973_v23  ;;  %v14588_v18 = vsel %vm14282_vm3, %v2105_v39, %v2109_v29  ;;  %v2119_v56 = vrot.slane %v2118_v19, 4  ;;  %6054 = vmatpush1.bf16.msra.mxu1 %v12656_v42  ;;  %v12662_v37 = vld [vmem:[%s19613_s4 + $0x4c8] ss:$12 sps:$4 sm:$0xff]   ;;  %v11543_v39 = vpop.f32.mrf.mxu0 }
 0x184   :  { %v1836_v55 = vrot.slane %v1834_v11, 7  ;;  %v1979_v38 = vld [vmem:[#allocation2 + $0x10] sm:$0x11]  ;;  %1972 = vst [vmem:[#allocation2 + $0x8] sm:$0xff] %v14582_v43  ;;  %1975 = vst [vmem:[#allocation2 + $0x130] sm:$0x11] %v1974_v44  ;;  %v1275_v35 = vadd.f32 %v11600_v8, %v11536_v52  ;;  %v11539_v34 = vadd.f32 %v14522_v27, %v14511_v0  ;;  %v11603_v14 = vadd.f32 %v14524_v4, %v14513_v57 }
 0x185   :  { %v12670_v29 = vld [vmem:[%s19613_s4 + $0x4b4] ss:$12 sps:$4 sm:$0xff]   ;;  %v14603_v17 = vcombine.high %v14415_v15, %v14444_v51  ;;  %v14607_v27 = vcombine.low %v14415_v15, %v14444_v51  ;;  %6055 = vmatprep.subr.bf16.mxu1 %v12664_v33  ;;  %v12683_v0 = vld [vmem:[%s19613_s4 + $0x438] ss:$12 sps:$4 sm:$0xff]   ;;  %v12685_v57 = vld [vmem:[%s19613_s4 + $0x43c] ss:$12 sps:$4 sm:$0xff]   ;;  %v14617_v4 = vsel %vm14282_vm3, %v2119_v56, %v2123_v53  ;;  %v11607_v33 = vpop.f32.mrf.mxu1  ;;  %5953 = vmatpush2.bf16.msra.mxu0 %v12677_v13 }
 0x186   :  { %v1839_v41 = vor.u32 %v1837_v22, %v1836_v55  ;;  %v1840_v23 = vrot.slane %v1836_v55, 4  ;;  %v1344_v52 = vmul.f32 %v14162_v36, %v1275_v35  ;;  %v1278_v42 = vadd.f32 %v11603_v14, %v11539_v34  ;;  %v14620_v16 = vld [vmem:[#allocation2 + $0xf0] sm:$0x11]  ;;  %v14622_v58 = vld [vmem:[#allocation2 + $0x60] sm:$0x11]  ;;  %5954 = vmatprep.subr.bf16.mxu0 %v12685_v57 }
 0x187   :  { %19802 = vst [vmem:[#allocation19_spill] sm:$0xff] %v14603_v17  ;;  %19803 = vst [vmem:[#allocation20_spill] sm:$0xff] %v14607_v27  ;;  %v2126_v11 = vshrl.u32 %v14377_v20, 16  ;;  %v14633_v53 = vcombine.high %v14588_v18, %v14617_v4  ;;  %v14637_v8 = vcombine.low %v14588_v18, %v14617_v4  ;;  %5770 = vmatprep.mubr.bf16.mxu0 %v14603_v17  ;;  %6056 = vmatpush1.bf16.msra.mxu1 %v12662_v37  ;;  %v12691_v56 = vld [vmem:[%s19613_s4 + $0x424] ss:$12 sps:$4 sm:$0xff]  }
 0x188   :  { %v14627_v22 = vsel %vm13899_vm0, %v1839_v41, %v1976_v59  ;;  %v1980_v19 = vsel %vm13846_vm8, %v1840_v23, %v1979_v38  ;;  %v1409_v13 = vadd.f32 %v14226_v2, %v1344_v52  ;;  %v1347_v44 = vmul.f32 %v14162_v36, %v1278_v42  ;;  %5771 = vmatmul.mubr.bf16.gmra.mxu0 %v14607_v27  ;;  %v12668_v59 = vld [vmem:[%s19613_s4 + $0x4b0] ss:$12 sps:$4 sm:$0xff]  }
 0x189   :  { %19804 = vst [vmem:[#allocation21_spill] sm:$0xff] %v14633_v53  ;;  %19805 = vst [vmem:[#allocation22_spill] sm:$0xff] %v14637_v8  ;;  %v2128_v55 = vrot.slane %v2126_v11, 4  ;;  %v2129_v38 = vshll.u32 %v14377_v20, 16  ;;  %5863 = vmatprep.mubr.bf16.mxu1 %v14633_v53  ;;  %v2135_v35 = vshll.u32 %v14620_v16, 16  ;;  %v2140_v34 = vshrl.u32 %v14407_v40, 16  ;;  %6057 = vmatprep.subr.bf16.mxu1 %v12670_v29  ;;  %v11544_v11 = vpop.f32.mrf.mxu0 }
 0x18a   :  { %1978 = vst [vmem:[#allocation2 + $0xe0] sm:$0xff] %v14627_v22  ;;  %1981 = vst [vmem:[#allocation2 + $0x10] sm:$0x11] %v1980_v19  ;;  %v2143_v14 = vshll.u32 %v14407_v40, 16  ;;  %v2149_v41 = vshll.u32 %v14622_v58, 16  ;;  %v1457_v37 = vmax.f32 %v1409_v13, 0.0  ;;  %5864 = vmatmul.mubr.bf16.gmra.mxu1 %v14637_v8  ;;  %v1412_v23 = vadd.f32 %v14226_v2, %v1347_v44  ;;  %v11608_v19 = vpop.f32.mrf.mxu1  ;;  %5955 = vmatpush2.bf16.msra.mxu0 %v12683_v0 }
 0x18b   :  { %v12676_v20 = vld [vmem:[%s19613_s4 + $0x49c] ss:$12 sps:$4 sm:$0xff]   ;;  %v2131_v52 = vrot.slane %v2129_v38, 5  ;;  %v11542_v42 = vadd.f32 %v11541_v9, %v14545_v21  ;;  %v2137_v25 = vrot.slane %v2135_v35, 5  ;;  %v2142_v40 = vrot.slane %v2140_v34, 4  ;;  %6058 = vmatpush1.bf16.msra.mxu1 %v12668_v59  ;;  %5956 = vmatprep.subr.bf16.mxu0 %v12691_v56 }
 0x18c   :  { %v2145_v24 = vrot.slane %v2143_v14, 5  ;;  %v2151_v27 = vrot.slane %v2149_v41, 5  ;;  %v12689_v29 = vld [vmem:[%s19613_s4 + $0x420] ss:$12 sps:$4 sm:$0xff]   ;;  %v19806_v13 = vmax.f32 %v14266_v49, 0.0  ;;  %v1460_v53 = vmax.f32 %v1412_v23, 0.0  ;;  %6059 = vmatprep.subr.bf16.mxu1 %v12676_v20 }
 0x18d   :  { %v2132_v44 = vor.u32 %v2131_v52, %v2128_v55  ;;  %v11606_v21 = vadd.f32 %v14575_v61, %v14547_v54  ;;  %v12674_v9 = vld [vmem:[%s19613_s4 + $0x498] ss:$12 sps:$4 sm:$0xff]   ;;  %v11545_v38 = vadd.f32 %v11544_v11, %v11543_v39  ;;  %v11609_v35 = vadd.f32 %v11608_v19, %v11607_v33  ;;  %v12680_v20 = vld [vmem:[%s19613_s4 + $0x480] ss:$12 sps:$4 sm:$0xff]  }
 0x18e   :  { %v11446_v8 = vpack.c.bf16 %v1457_v37, %v19806_v13  ;;  %v12697_v0 = vld [vmem:[%s19613_s4 + $0x40c] ss:$12 sps:$4 sm:$0xff]   ;;  %v2146_v57 = vor.u32 %v2145_v24, %v2142_v40  ;;  %v14677_v49 = vcombine.high %v14314_v47, %v14531_v1  ;;  %v12682_v54 = vld [vmem:[%s19613_s4 + $0x484] ss:$12 sps:$4 sm:$0xff]   ;;  %v19808_v59 = vmax.f32 %v14269_v30, 0.0  ;;  %5957 = vmatpush2.bf16.msra.mxu0 %v12689_v29 }
 0x18f   :  { %v2133_v34 = vrot.slane %v2132_v44, 4  ;;  %v1985_v14 = vld [vmem:[#allocation2 + $0x98] sm:$0x11]  ;;  %v1283_v24 = vadd.f32 %v11606_v21, %v11542_v42  ;;  %v1286_v39 = vadd.f32 %v11609_v35, %v11545_v38  ;;  %v14687_v33 = vcombine.low %v14314_v47, %v14531_v1  ;;  %v12695_v30 = vld [vmem:[%s19613_s4 + $0x408] ss:$12 sps:$4 sm:$0xff]   ;;  %6060 = vmatpush1.bf16.msra.mxu1 %v12674_v9  ;;  %5958 = vmatprep.subr.bf16.mxu0 %v12697_v0  ;;  %v1982_v52 = vld [vmem:[#allocation2 + $0x100] sm:$0xff] }
 0x190   :  { %19807 = vst [vmem:[#allocation23_spill] sm:$0xff] %v14677_v49  ;;  %v1842_v61 = vshrl.u32 %v11446_v8, 16  ;;  %v1845_v55 = vshll.u32 %v11446_v8, 16  ;;  %v11447_v56 = vpack.c.bf16 %v1460_v53, %v19808_v59  ;;  %v2147_v41 = vrot.slane %v2146_v57, 4  ;;  %5780 = vmatprep.mubr.bf16.mxu0 %v14677_v49  ;;  %v12688_v47 = vld [vmem:[%s19613_s4 + $0x5ec] ss:$12 sps:$4 sm:$0xff]   ;;  %6061 = vmatprep.subr.bf16.mxu1 %v12682_v54 }
 0x191   :  { %19809 = vst [vmem:[#allocation24_spill] sm:$0xff] %v14687_v33  ;;  %v14697_v23 = vsel %vm14282_vm3, %v2133_v34, %v2137_v25  ;;  %v1991_v42 = vld [vmem:[#allocation2] sm:$0x11]  ;;  %v1350_v19 = vmul.f32 %v14162_v36, %v1283_v24  ;;  %v1353_v40 = vmul.f32 %v14162_v36, %v1286_v39  ;;  %5781 = vmatmul.mubr.bf16.gmra.mxu0 %v14687_v33  ;;  %v14709_v25 = vld [vmem:[#allocation2 + $0x118] sm:$0x11]  ;;  %v2154_v29 = vshrl.u32 %v14415_v15, 16 }
 0x192   :  { %v1844_v53 = vrot.slane %v1842_v61, 7  ;;  %v1850_v8 = vshrl.u32 %v11447_v56, 16  ;;  %v1853_v37 = vshll.u32 %v11447_v56, 16  ;;  %v14704_v11 = vsel %vm14282_vm3, %v2147_v41, %v2151_v27  ;;  %v12703_v13 = vld [vmem:[%s19613_s4 + $0x3f4] ss:$12 sps:$4 sm:$0xff]   ;;  %5959 = vmatpush2.bf16.msra.mxu0 %v12695_v30 }
 0x193   :  { %v14717_v27 = vcombine.high %v14697_v23, %v14704_v11  ;;  %v1988_v0 = vld [vmem:[#allocation2 + $0xd0] sm:$0xff]  ;;  %v1415_v36 = vadd.f32 %v14226_v2, %v1350_v19  ;;  %v14722_v57 = vcombine.low %v14697_v23, %v14704_v11  ;;  %v1418_v38 = vadd.f32 %v14226_v2, %v1353_v40  ;;  %6062 = vmatpush1.bf16.msra.mxu1 %v12680_v20  ;;  %v12709_v41 = vld [vmem:[%s19613_s4 + $0x3dc] ss:$12 sps:$4 sm:$0xff]  }
 0x194   :  { %v1847_v44 = vor.u32 %v1845_v55, %v1844_v53  ;;  %v1848_v21 = vrot.slane %v1844_v53, 4  ;;  %v1852_v9 = vrot.slane %v1850_v8, 7  ;;  %v14725_v35 = vrot.slane %v2154_v29, 4  ;;  %v12686_v54 = vld [vmem:[%s19613_s4 + $0x5e8] ss:$12 sps:$4 sm:$0xff]   ;;  %6063 = vmatprep.subr.bf16.mxu1 %v12688_v47  ;;  %5960 = vmatprep.subr.bf16.mxu0 %v12703_v13 }
 0x195   :  { %19810 = vst [vmem:[#allocation25_spill] sm:$0xff] %v14717_v27  ;;  %19811 = vst [vmem:[#allocation26_spill] sm:$0xff] %v14722_v57  ;;  %v12701_v61 = vld [vmem:[%s19613_s4 + $0x3f0] ss:$12 sps:$4 sm:$0xff]   ;;  %5873 = vmatprep.mubr.bf16.mxu1 %v14717_v27  ;;  %v12694_v34 = vld [vmem:[%s19613_s4 + $0x5d4] ss:$12 sps:$4 sm:$0xff]   ;;  %v15143_v17 = vcombine.high %v14617_v4, %v14697_v23 }
 0x196   :  { %v14735_v55 = vsel %vm13899_vm0, %v1847_v44, %v1982_v52  ;;  %v1986_v59 = vsel %vm13846_vm8, %v1848_v21, %v1985_v14  ;;  %v1855_v56 = vor.u32 %v1853_v37, %v1852_v9  ;;  %v1856_v2 = vrot.slane %v1852_v9, 4  ;;  %5874 = vmatmul.mubr.bf16.gmra.mxu1 %v14722_v57  ;;  %v14748_v39 = vld [vmem:[#allocation2 + $0x30] sm:$0x11]  ;;  %v12707_v47 = vld [vmem:[%s19613_s4 + $0x3d8] ss:$12 sps:$4 sm:$0xff]   ;;  %5961 = vmatpush2.bf16.msra.mxu0 %v12701_v61 }
 0x197   :  { %1984 = vst [vmem:[#allocation2 + $0x100] sm:$0xff] %v14735_v55  ;;  %1987 = vst [vmem:[#allocation2 + $0x98] sm:$0x11] %v1986_v59  ;;  %v1463_v24 = vmax.f32 %v1415_v36, 0.0  ;;  %v1466_v14 = vmax.f32 %v1418_v38, 0.0  ;;  %v2157_v30 = vshll.u32 %v14415_v15, 16  ;;  %v14777_v36 = vcombine.high %v14560_v32, %v14582_v43  ;;  %6064 = vmatpush2.bf16.msra.mxu1 %v12686_v54  ;;  %5962 = vmatprep.subr.bf16.mxu0 %v12709_v41 }
 0x198   :  { %v2163_v20 = vshll.u32 %v14709_v25, 16  ;;  %v14754_v53 = vsel %vm13899_vm0, %v1855_v56, %v1988_v0  ;;  %v1992_v8 = vsel %vm13846_vm8, %v1856_v2, %v1991_v42  ;;  %v2168_v37 = vshrl.u32 %v14444_v51, 16  ;;  %v12692_v15 = vld [vmem:[%s19613_s4 + $0x5d0] ss:$12 sps:$4 sm:$0xff]   ;;  %v14782_v2 = vld [vmem:[#allocation2 + $0x40] sm:$0x11]  ;;  %6065 = vmatprep.subr.bf16.mxu1 %v12694_v34 }
 0x199   :  { %v2171_v52 = vshll.u32 %v14444_v51, 16  ;;  %1990 = vst [vmem:[#allocation2 + $0xd0] sm:$0xff] %v14754_v53  ;;  %1993 = vst [vmem:[#allocation2] sm:$0x11] %v1992_v8  ;;  %v19812_v19 = vmax.f32 %v14190_v62, 0.0  ;;  %v19813_v42 = vmax.f32 %v14214_v50, 0.0  ;;  %5790 = vmatprep.mubr.bf16.mxu0 %v14777_v36  ;;  %v14788_v54 = vcombine.low %v14560_v32, %v14582_v43 }
 0x19a   :  { %v2159_v44 = vrot.slane %v2157_v30, 5  ;;  %v2165_v51 = vrot.slane %v2163_v20, 5  ;;  %v12700_v21 = vld [vmem:[%s19613_s4 + $0x5bc] ss:$12 sps:$4 sm:$0xff]   ;;  %v2170_v13 = vrot.slane %v2168_v37, 4  ;;  %v2177_v0 = vshll.u32 %v14748_v39, 16  ;;  %5963 = vmatpush2.bf16.msra.mxu0 %v12707_v47 }
 0x19b   :  { %v11448_v40 = vpack.c.bf16 %v1463_v24, %v19812_v19  ;;  %v11449_v29 = vpack.c.bf16 %v1466_v14, %v19813_v42  ;;  %v2173_v9 = vrot.slane %v2171_v52, 5  ;;  %19814 = vst [vmem:[#allocation27_spill] sm:$0xff] %v14777_v36  ;;  %v12715_v62 = vld [vmem:[%s19613_s4 + $0x3c4] ss:$12 sps:$4 sm:$0xff]   ;;  %v1994_v61 = vld [vmem:[#allocation2 + $0x58] sm:$0xff]  ;;  %19815 = vst [vmem:[#allocation28_spill] sm:$0xff] %v14788_v54  ;;  %5791 = vmatmul.mubr.bf16.gmra.mxu0 %v14788_v54  ;;  %6066 = vmatpush2.bf16.msra.mxu1 %v12692_v15 }
 0x19c   :  { %v1997_v24 = vld [vmem:[#allocation2 + $0x120] sm:$0x11]  ;;  %v2003_v14 = vld [vmem:[#allocation2 + $0x50] sm:$0x11]  ;;  %v2160_v30 = vor.u32 %v2159_v44, %v14725_v35  ;;  %v2179_v8 = vrot.slane %v2177_v0, 5  ;;  %v2196_v34 = vshrl.u32 %v14531_v1, 16  ;;  %6067 = vmatprep.subr.bf16.mxu1 %v12700_v21  ;;  %5964 = vmatprep.subr.bf16.mxu0 %v12715_v62  ;;  %v15126_v36 = vcombine.low %v14735_v55, %v14754_v53 }
 0x19d   :  { %v1858_v50 = vshrl.u32 %v11448_v40, 16  ;;  %v1861_v38 = vshll.u32 %v11448_v40, 16  ;;  %v1866_v59 = vshrl.u32 %v11449_v29, 16  ;;  %v1869_v56 = vshll.u32 %v11449_v29, 16  ;;  %v12698_v41 = vld [vmem:[%s19613_s4 + $0x5b8] ss:$12 sps:$4 sm:$0xff]  }
 0x19e   :  { %v2174_v20 = vor.u32 %v2173_v9, %v2170_v13  ;;  %v2199_v19 = vshll.u32 %v14531_v1, 16  ;;  %v12713_v35 = vld [vmem:[%s19613_s4 + $0x3c0] ss:$12 sps:$4 sm:$0xff]   ;;  %v2161_v42 = vrot.slane %v2160_v30, 4  ;;  %v2205_v44 = vshll.u32 %v14782_v2, 16  ;;  %19849 = vst [vmem:[#allocation58_spill] sm:$0xff] %v15126_v36 }
 0x19f   :  { %v1860_v37 = vrot.slane %v1858_v50, 7  ;;  %v1868_v52 = vrot.slane %v1866_v59, 7  ;;  %v2000_v40 = vld [vmem:[#allocation2 + $0xc0] sm:$0xff]  ;;  %v14802_v13 = vcombine.high %v14627_v22, %v14735_v55  ;;  %v12721_v1 = vld [vmem:[%s19613_s4 + $0x6ac] ss:$12 sps:$4 sm:$0xff]   ;;  %5965 = vmatpush2.bf16.msra.mxu0 %v12713_v35  ;;  %6068 = vmatpush2.bf16.msra.mxu1 %v12698_v41  ;;  %v2210_v35 = vshrl.u32 %v14560_v32, 16 }
 0x1a0   :  { %v2175_v29 = vrot.slane %v2174_v20, 4  ;;  %v12706_v59 = vld [vmem:[%s19613_s4 + $0x5a4] ss:$12 sps:$4 sm:$0xff]   ;;  %v14812_v15 = vsel %vm14282_vm3, %v2161_v42, %v2165_v51  ;;  %v2198_v20 = vrot.slane %v2196_v34, 4  ;;  %v2201_v33 = vrot.slane %v2199_v19, 5  ;;  %6160 = vmatprep.subr.bf16.mxu0 %v12721_v1  ;;  %19850 = vst [vmem:[#allocation59_spill] sm:$0xff] %v15143_v17 }
 0x1a1   :  { %19816 = vst [vmem:[#allocation29_spill] sm:$0xff] %v14802_v13  ;;  %v1863_v47 = vor.u32 %v1861_v38, %v1860_v37  ;;  %v1864_v9 = vrot.slane %v1860_v37, 4  ;;  %v1871_v0 = vor.u32 %v1869_v56, %v1868_v52  ;;  %v1872_v50 = vrot.slane %v1868_v52, 4  ;;  %5800 = vmatprep.mubr.bf16.mxu0 %v14802_v13  ;;  %v14819_v38 = vld [vmem:[#allocation2 + $0x80] sm:$0x11]  ;;  %6069 = vmatprep.subr.bf16.mxu1 %v12706_v59 }
 0x1a2   :  { %v14816_v30 = vsel %vm14282_vm3, %v2175_v29, %v2179_v8  ;;  %v14831_v8 = vld [vmem:[#allocation2 + $0x130] sm:$0x11]  ;;  %v2202_v37 = vor.u32 %v2201_v33, %v2198_v20  ;;  %v2207_v52 = vrot.slane %v2205_v44, 5  ;;  %v19819_v34 = vmov 0  ;;  %v2062_v27 = vld [vmem:[#allocation2 + $0xd0] sm:$0xee] }
 0x1a3   :  { %v14823_v21 = vsel %vm13899_vm0, %v1863_v47, %v1994_v61  ;;  %v1998_v62 = vsel %vm13846_vm8, %v1864_v9, %v1997_v24  ;;  %v2001_v51 = vsel %vm13899_vm0, %v1871_v0, %v2000_v40  ;;  %v2004_v56 = vsel %vm13846_vm8, %v1872_v50, %v2003_v14  ;;  %v12704_v14 = vld [vmem:[%s19613_s4 + $0x5a0] ss:$12 sps:$4 sm:$0xff]   ;;  %v14870_v0 = vld [vmem:[#allocation2 + $0x10] sm:$0x11] }
 0x1a4   :  { %1996 = vst [vmem:[#allocation2 + $0x58] sm:$0xff] %v14823_v21  ;;  %1999 = vst [vmem:[#allocation2 + $0x120] sm:$0x11] %v1998_v62  ;;  %v14836_v61 = vcombine.high %v14812_v15, %v14816_v30  ;;  %v14840_v24 = vcombine.low %v14812_v15, %v14816_v30  ;;  %v19820_v34 = vsel %vm14847_vm6, 4294967295, %v19819_v34  ;;  %v14853_v19 = vcombine.low %v14627_v22, %v14735_v55  ;;  %v12712_v40 = vld [vmem:[%s19613_s4 + $0x58c] ss:$12 sps:$4 sm:$0xff]  }
 0x1a5   :  { %2002 = vst [vmem:[#allocation2 + $0xc0] sm:$0xff] %v2001_v51  ;;  %2005 = vst [vmem:[#allocation2 + $0x50] sm:$0x11] %v2004_v56  ;;  %v2213_v33 = vshll.u32 %v14560_v32, 16  ;;  %v2219_v41 = vshll.u32 %v14819_v38, 16  ;;  %v2203_v42 = vrot.slane %v2202_v37, 4  ;;  %v14868_v9 = vcombine.high %v14754_v53, %v14823_v21  ;;  %6070 = vmatpush2.bf16.msra.mxu1 %v12704_v14 }
 0x1a6   :  { %19817 = vst [vmem:[#allocation30_spill] sm:$0xff] %v14836_v61  ;;  %19818 = vst [vmem:[#allocation31_spill] sm:$0xff] %v14840_v24  ;;  %5883 = vmatprep.mubr.bf16.mxu1 %v14836_v61  ;;  %v2224_v29 = vshrl.u32 %v14582_v43, 16  ;;  %v2227_v44 = vshll.u32 %v14582_v43, 16  ;;  %v2233_v1 = vshll.u32 %v14831_v8, 16  ;;  %v2212_v47 = vrot.slane %v2210_v35, 4  ;;  %5801 = vmatmul.mubr.bf16.gmra.mxu0 %v14853_v19 }
 0x1a7   :  { %19821 = vst [vmem:[#allocation32_spill] sm:$0xff] %v19820_v34  ;;  %19822 = vst [vmem:[#allocation33_spill] sm:$0xff] %v14853_v19  ;;  %5884 = vmatmul.mubr.bf16.gmra.mxu1 %v14840_v24  ;;  %v2215_v32 = vrot.slane %v2213_v33, 5  ;;  %v19824_v50 = vrot.slane %v14116_v46, 5  ;;  %v19825_v59 = vrot.slane %v14153_v26, 9  ;;  %v14885_v51 = vsel %vm14282_vm3, %v2203_v42, %v2207_v52  ;;  %5810 = vmatprep.mubr.bf16.mxu0 %v14868_v9 }
 0x1a8   :  { %19823 = vst [vmem:[#allocation34_spill] sm:$0xff] %v14868_v9  ;;  %v12710_v62 = vld [vmem:[%s19613_s4 + $0x588] ss:$12 sps:$4 sm:$0xff]   ;;  %v2221_v56 = vrot.slane %v2219_v41, 5  ;;  %v2226_v37 = vrot.slane %v2224_v29, 4  ;;  %v2229_v35 = vrot.slane %v2227_v44, 5  ;;  %v14892_v26 = vcombine.high %v14300_v31, %v14885_v51  ;;  %6071 = vmatprep.subr.bf16.mxu1 %v12712_v40 }
 0x1a9   :  { %v14878_v20 = vsel %vm14847_vm6, %v19825_v59, %v19824_v50  ;;  %v14888_v46 = vld [vmem:[#allocation2 + $0x98] sm:$0x11]  ;;  %v14896_v33 = vcombine.low %v14300_v31, %v14885_v51  ;;  %v2216_v50 = vor.u32 %v2215_v32, %v2212_v47  ;;  %v2235_v59 = vrot.slane %v2233_v1, 5  ;;  %v12718_v52 = vld [vmem:[%s19613_s4 + $0x574] ss:$12 sps:$4 sm:$0xff]   ;;  %6072 = vmatpush2.bf16.msra.mxu1 %v12710_v62 }
 0x1aa   :  { %19826 = vst [vmem:[#allocation35_spill] sm:$0xff] %v14892_v26  ;;  %v2230_v41 = vor.u32 %v2229_v35, %v2226_v37  ;;  %v2238_v14 = vshrl.u32 %v14627_v22, 16  ;;  %v2241_v42 = vshll.u32 %v14627_v22, 16  ;;  %v2247_v29 = vshll.u32 %v14870_v0, 16  ;;  %5893 = vmatprep.mubr.bf16.mxu1 %v14892_v26  ;;  %v2047_v32 = vld [vmem:[#allocation2 + $0xb0] sm:$0xee]  ;;  %6073 = vmatprep.subr.bf16.mxu1 %v12718_v52 }
 0x1ab   :  { %19827 = vst [vmem:[#allocation36_spill] sm:$0xff] %v14896_v33  ;;  %v2217_v31 = vrot.slane %v2216_v50, 4  ;;  %v2252_v44 = vshrl.u32 %v14735_v55, 16  ;;  %v2255_v1 = vshll.u32 %v14735_v55, 16  ;;  %v2261_v47 = vshll.u32 %v14888_v46, 16 }
 0x1ac   :  { %v2231_v5 = vrot.slane %v2230_v41, 4  ;;  %v14911_v37 = vcombine.low %v14754_v53, %v14823_v21  ;;  %v2240_v35 = vrot.slane %v2238_v14, 4  ;;  %v2243_v48 = vrot.slane %v2241_v42, 5  ;;  %v12716_v40 = vld [vmem:[%s19613_s4 + $0x570] ss:$12 sps:$4 sm:$0xff]  }
 0x1ad   :  { %v14918_v50 = vsel %vm14282_vm3, %v2217_v31, %v2221_v56  ;;  %v2249_v26 = vrot.slane %v2247_v29, 5  ;;  %v2254_v49 = vrot.slane %v2252_v44, 4  ;;  %v2257_v9 = vrot.slane %v2255_v1, 5  ;;  %v12724_v41 = vld [vmem:[%s19613_s4 + $0x55c] ss:$12 sps:$4 sm:$0xff]   ;;  %6074 = vmatpush2.bf16.msra.mxu1 %v12716_v40 }
 0x1ae   :  { %19828 = vst [vmem:[#allocation37_spill] sm:$0xff] %v14911_v37  ;;  %v14925_v14 = vsel %vm14282_vm3, %v2231_v5, %v2235_v59  ;;  %v2244_v62 = vor.u32 %v2243_v48, %v2240_v35  ;;  %v10729_v42 = vrot.slane %v2047_v32, 9  ;;  %v2334_v19 = vrot.slane %v14390_v12, 5  ;;  %v14933_v31 = vld [vmem:[#allocation2] sm:$0x11]  ;;  %5811 = vmatmul.mubr.bf16.gmra.mxu0 %v14911_v37  ;;  %6075 = vmatprep.subr.bf16.mxu1 %v12724_v41  ;;  %v19949_v34 = vld [vmem:[#allocation33_spill] sm:$0xff] }
 0x1af   :  { %5894 = vmatmul.mubr.bf16.gmra.mxu1 %v14896_v33  ;;  %v14931_v56 = vcombine.high %v14918_v50, %v14925_v14  ;;  %v2258_v29 = vor.u32 %v2257_v9, %v2254_v49  ;;  %v2263_v52 = vrot.slane %v2261_v47, 5  ;;  %v2266_v44 = vshrl.u32 %v14754_v53, 16  ;;  %v12722_v5 = vld [vmem:[%s19613_s4 + $0x558] ss:$12 sps:$4 sm:$0xff]   ;;  %v2048_v9 = vld [vmem:[#allocation2 + $0xc8] sm:$0xee] }
 0x1b0   :  { %v2245_v48 = vrot.slane %v2244_v62, 4  ;;  %v14942_v12 = vsel %vm14847_vm6, %v10729_v42, %v2334_v19  ;;  %v14944_v59 = vld [vmem:[#allocation2 + $0x120] sm:$0x11]  ;;  %v2269_v49 = vshll.u32 %v14754_v53, 16  ;;  %v14950_v1 = vcombine.low %v14918_v50, %v14925_v14 }
 0x1b1   :  { %19829 = vst [vmem:[#allocation38_spill] sm:$0xff] %v14931_v56  ;;  %5903 = vmatprep.mubr.bf16.mxu1 %v14931_v56  ;;  %v2259_v47 = vrot.slane %v2258_v29, 4  ;;  %v14954_v32 = vcombine.high %v14878_v20, %v14942_v12  ;;  %v2268_v35 = vrot.slane %v2266_v44, 4  ;;  %v12730_v19 = vld [vmem:[%s19613_s4 + $0x544] ss:$12 sps:$4 sm:$0xff]   ;;  %v2275_v42 = vshll.u32 %v14933_v31, 16  ;;  %6076 = vmatpush2.bf16.msra.mxu1 %v12722_v5 }
 0x1b2   :  { %19830 = vst [vmem:[#allocation39_spill] sm:$0xff] %v14950_v1  ;;  %v14961_v40 = vsel %vm14282_vm3, %v2245_v48, %v2249_v26  ;;  %v2271_v62 = vrot.slane %v2269_v49, 5  ;;  %v2280_v33 = vshrl.u32 %v14823_v21, 16  ;;  %v2049_v29 = vld [vmem:[#allocation2 + $0x128] sm:$0xee]  ;;  %v2283_v41 = vshll.u32 %v14823_v21, 16  ;;  %6077 = vmatprep.subr.bf16.mxu1 %v12730_v19 }
 0x1b3   :  { %19831 = vst [vmem:[#allocation40_spill] sm:$0xff] %v14954_v32  ;;  %v14967_v37 = vsel %vm14282_vm3, %v2259_v47, %v2263_v52  ;;  %5966 = vmatprep.mubr.bf16.mxu0 %v14954_v32  ;;  %v2289_v44 = vshll.u32 %v14944_v59, 16  ;;  %v12719_v26 = vld [vmem:[%s19613_s4 + $0x6a8] ss:$12 sps:$4 sm:$0xff]   ;;  %v10730_v48 = vrot.slane %v2048_v9, 9  ;;  %v2338_v13 = vrot.slane %v14479_v45, 5 }
 0x1b4   :  { %v14977_v49 = vcombine.high %v14961_v40, %v14967_v37  ;;  %v2282_v56 = vrot.slane %v2280_v33, 4  ;;  %v12727_v52 = vld [vmem:[%s19613_s4 + $0x694] ss:$12 sps:$4 sm:$0xff]   ;;  %v2051_v47 = vld [vmem:[#allocation2 + $0xa8] sm:$0xee]  ;;  %v2272_v32 = vor.u32 %v2271_v62, %v2268_v35  ;;  %v2285_v24 = vrot.slane %v2283_v41, 5 }
 0x1b5   :  { %v12728_v21 = vld [vmem:[%s19613_s4 + $0x540] ss:$12 sps:$4 sm:$0xff]   ;;  %v10731_v9 = vrot.slane %v2049_v29, 9  ;;  %v14988_v54 = vcombine.low %v14878_v20, %v14942_v12  ;;  %v2342_v33 = vrot.slane %v14535_v60, 5  ;;  %v2277_v61 = vrot.slane %v2275_v42, 5 }
 0x1b6   :  { %19832 = vst [vmem:[#allocation41_spill] sm:$0xff] %v14977_v49  ;;  %v12736_v5 = vld [vmem:[%s19613_s4 + $0x82c] ss:$12 sps:$4 sm:$0xff]   ;;  %v2286_v57 = vor.u32 %v2285_v24, %v2282_v56  ;;  %v2291_v35 = vrot.slane %v2289_v44, 5  ;;  %v14997_v45 = vsel %vm14847_vm6, %v10730_v48, %v2338_v13  ;;  %v10733_v62 = vrot.slane %v2051_v47, 9  ;;  %6078 = vmatpush2.bf16.msra.mxu1 %v12728_v21 }
 0x1b7   :  { %19833 = vst [vmem:[#allocation42_spill] sm:$0xff] %v14988_v54  ;;  %5904 = vmatmul.mubr.bf16.gmra.mxu1 %v14950_v1  ;;  %v2050_v19 = vld [vmem:[#allocation2 + $0x78] sm:$0xee]  ;;  %5967 = vmatmul.mubr.bf16.vlgmr.msra.gmra.mxu0 %v14988_v54  ;;  %v15003_v60 = vsel %vm14847_vm6, %v10731_v9, %v2342_v33  ;;  %v15007_v20 = vcombine.low %v14942_v12, %v14997_v45  ;;  %v2350_v24 = vrot.slane %v14622_v58, 5  ;;  %v2273_v56 = vrot.slane %v2272_v32, 4  ;;  %v13143_v54 = vld [vmem:[#allocation2 + $0xb0] sm:$0xff] }
 0x1b8   :  { %5913 = vmatprep.mubr.bf16.mxu1 %v14977_v49  ;;  %v2287_v42 = vrot.slane %v2286_v57, 4  ;;  %v15012_v13 = vcombine.high %v14997_v45, %v15003_v60  ;;  %6161 = vmatpush1.bf16.msra.mxu0 %v12719_v26  ;;  %v12725_v29 = vld [vmem:[%s19613_s4 + $0x690] ss:$12 sps:$4 sm:$0xff]   ;;  %v10732_v44 = vrot.slane %v2050_v19, 9  ;;  %v2346_v58 = vrot.slane %v14620_v16, 5 }
 0x1b9   :  { %19834 = vst [vmem:[#allocation43_spill] sm:$0xff] %v15007_v20  ;;  %v12733_v41 = vld [vmem:[%s19613_s4 + $0x67c] ss:$12 sps:$4 sm:$0xff]   ;;  %6162 = vmatprep.subr.bf16.mxu0 %v12727_v52  ;;  %6273 = vmatprep.subr.bf16.mxu1 %v12736_v5  ;;  %v15023_v57 = vcombine.low %v14961_v40, %v14967_v37  ;;  %v15027_v32 = vsel %vm14282_vm3, %v2273_v56, %v2277_v61  ;;  %v2053_v52 = vld [vmem:[#allocation2 + $0x70] sm:$0xee]  ;;  %v2358_v19 = vrot.slane %v14748_v39, 5 }
 0x1ba   :  { %19835 = vst [vmem:[#allocation44_spill] sm:$0xff] %v15012_v13  ;;  %v15031_v26 = vsel %vm14282_vm3, %v2287_v42, %v2291_v35  ;;  %5976 = vmatprep.mubr.bf16.mxu0 %v15012_v13  ;;  %v15040_v16 = vsel %vm14847_vm6, %v10733_v62, %v2350_v24  ;;  %v12731_v61 = vld [vmem:[%s19613_s4 + $0x678] ss:$12 sps:$4 sm:$0xff]   ;;  %v15047_v21 = vcombine.low %v14997_v45, %v15003_v60  ;;  %v2052_v33 = vld [vmem:[#allocation2 + $0x28] sm:$0xee]  ;;  %v10735_v35 = vrot.slane %v2053_v52, 9 }
 0x1bb   :  { %19836 = vst [vmem:[#allocation45_spill] sm:$0xff] %v15023_v57  ;;  %v15036_v48 = vcombine.high %v15027_v32, %v15031_v26  ;;  %v15051_v47 = vsel %vm14847_vm6, %v10732_v44, %v2346_v58  ;;  %v12739_v9 = vld [vmem:[%s19613_s4 + $0x664] ss:$12 sps:$4 sm:$0xff]   ;;  %v12737_v62 = vld [vmem:[%s19613_s4 + $0x660] ss:$12 sps:$4 sm:$0xff]   ;;  %v10734_v24 = vrot.slane %v2052_v33, 9  ;;  %v15088_v33 = vcombine.high %v14582_v43, %v14627_v22 }
 0x1bc   :  { %6163 = vmatpush1.bf16.msra.mxu0 %v12725_v29  ;;  %19838 = vst [vmem:[#allocation47_spill] sm:$0xff] %v15047_v21  ;;  %v15059_v5 = vcombine.high %v15051_v47, %v15040_v16  ;;  %v2354_v56 = vrot.slane %v14709_v25, 5  ;;  %v2056_v42 = vld [vmem:[#allocation2 + $0xa0] sm:$0xee]  ;;  %v12745_v39 = vld [vmem:[%s19613_s4 + $0x64c] ss:$12 sps:$4 sm:$0xff]   ;;  %v15074_v29 = vcombine.low %v15027_v32, %v15031_v26  ;;  %v15081_v44 = vsel %vm14847_vm6, %v10735_v35, %v2358_v19 }
 0x1bd   :  { %19837 = vst [vmem:[#allocation46_spill] sm:$0xff] %v15036_v48  ;;  %6164 = vmatprep.subr.bf16.mxu0 %v12733_v41  ;;  %v12743_v41 = vld [vmem:[%s19613_s4 + $0x648] ss:$12 sps:$4 sm:$0xff]   ;;  %v10736_v58 = vrot.slane %v2056_v42, 9  ;;  %v13142_v52 = vld [vmem:[#allocation2 + $0x20] sm:$0x11]  ;;  %v15106_v49 = vcombine.low %v15051_v47, %v15040_v16 }
 0x1be   :  { %19839 = vst [vmem:[#allocation48_spill] sm:$0xff] %v15059_v5  ;;  %19840 = vst [vmem:[#allocation49_spill] sm:$0xff] %v15074_v29  ;;  %v12751_v25 = vld [vmem:[%s19613_s4 + $0x634] ss:$12 sps:$4 sm:$0xff]   ;;  %v2355_v35 = vsel %vm14847_vm6, %v10734_v24, %v2354_v56  ;;  %v2057_v19 = vld [vmem:[#allocation2 + $0x108] sm:$0xee] }
 0x1bf   :  { %5914 = vmatmul.mubr.bf16.gmra.mxu1 %v15023_v57  ;;  %5977 = vmatmul.mubr.bf16.gmra.mxu0 %v15047_v21  ;;  %19841 = vst [vmem:[#allocation50_spill] sm:$0xff] %v15088_v33  ;;  %v2059_v57 = vld [vmem:[#allocation2 + $0x8] sm:$0xee]  ;;  %19845 = vst [vmem:[#allocation54_spill] sm:$0xff] %v15106_v49  ;;  %v12749_v24 = vld [vmem:[%s19613_s4 + $0x630] ss:$12 sps:$4 sm:$0xff]  }
 0x1c0   :  { %5923 = vmatprep.mubr.bf16.mxu1 %v15036_v48  ;;  %5986 = vmatprep.mubr.bf16.mxu0 %v15059_v5  ;;  %v13144_v5 = vld [vmem:[#allocation2 + $0xc8] sm:$0xff]  ;;  %v2370_v1 = vrot.slane %v14819_v38, 5  ;;  %v10737_v38 = vrot.slane %v2057_v19, 9  ;;  %v15206_v19 = vcombine.high %v14925_v14, %v14961_v40 }
 0x1c1   :  { %6165 = vmatpush1.bf16.msra.mxu0 %v12731_v61  ;;  %v2362_v61 = vrot.slane %v13142_v52, 5  ;;  %v15090_v21 = vcombine.high %v13143_v54, %v13144_v5  ;;  %v15092_v48 = vcombine.low %v13143_v54, %v13144_v5  ;;  %v15096_v42 = vld [vmem:[#allocation2 + $0x128] sm:$0xff]  ;;  %v15098_v52 = vld [vmem:[#allocation2 + $0x78] sm:$0xff]  ;;  %v15109_v54 = vcombine.high %v2355_v35, %v15081_v44  ;;  %v2060_v5 = vld [vmem:[#allocation2 + $0xe0] sm:$0xee] }
 0x1c2   :  { %6166 = vmatprep.subr.bf16.mxu0 %v12739_v9  ;;  %v2058_v9 = vld [vmem:[#allocation2 + $0xd8] sm:$0xee]  ;;  %v15102_v13 = vcombine.high %v15096_v42, %v15098_v52  ;;  %19861 = vst [vmem:[#allocation70_spill] sm:$0xff] %v15206_v19 }
 0x1c3   :  { %19842 = vst [vmem:[#allocation51_spill] sm:$0xff] %v15090_v21  ;;  %19843 = vst [vmem:[#allocation52_spill] sm:$0xff] %v15092_v48  ;;  %v10738_v56 = vrot.slane %v2058_v9, 9  ;;  %v2366_v9 = vrot.slane %v14782_v2, 5  ;;  %v15151_v2 = vcombine.low %v14617_v4, %v14697_v23  ;;  %v12734_v4 = vld [vmem:[%s19613_s4 + $0x828] ss:$12 sps:$4 sm:$0xff]  }
 0x1c4   :  { %19844 = vst [vmem:[#allocation53_spill] sm:$0xff] %v15102_v13  ;;  %19846 = vst [vmem:[#allocation55_spill] sm:$0xff] %v15109_v54  ;;  %v12742_v23 = vld [vmem:[%s19613_s4 + $0x814] ss:$12 sps:$4 sm:$0xff]  }
 0x1c5   :  { %6167 = vmatpush1.bf16.msra.mxu0 %v12737_v62  ;;  %v15113_v62 = vcombine.low %v14582_v43, %v14627_v22  ;;  %v12757_v43 = vld [vmem:[%s19613_s4 + $0x61c] ss:$12 sps:$4 sm:$0xff]   ;;  %v15135_v22 = vsel %vm14847_vm6, %v10736_v58, %v2362_v61  ;;  %v15147_v58 = vcombine.high %v14942_v12, %v14997_v45  ;;  %19852 = vst [vmem:[#allocation61_spill] sm:$0xff] %v15151_v2  ;;  %v2386_v12 = vrot.slane %v14933_v31, 5 }
 0x1c6   :  { %6168 = vmatprep.subr.bf16.mxu0 %v12745_v39  ;;  %v15122_v39 = vcombine.high %v14735_v55, %v14754_v53  ;;  %v2374_v55 = vrot.slane %v14831_v8, 5  ;;  %v2061_v53 = vld [vmem:[#allocation2 + $0x100] sm:$0xee]  ;;  %v15155_v8 = vcombine.high %v14704_v11, %v14812_v15  ;;  %v15168_v45 = vcombine.low %v14704_v11, %v14812_v15  ;;  %v19930_v63 = vld [vmem:[#allocation54_spill] sm:$0xff] }
 0x1c7   :  { %19847 = vst [vmem:[#allocation56_spill] sm:$0xff] %v15113_v62  ;;  %5924 = vmatmul.mubr.bf16.gmra.mxu1 %v15074_v29  ;;  %5987 = vmatmul.mubr.bf16.gmra.mxu0 %v15106_v49  ;;  %v10739_v29 = vrot.slane %v2059_v57, 9  ;;  %v2378_v49 = vrot.slane %v14870_v0, 5  ;;  %19851 = vst [vmem:[#allocation60_spill] sm:$0xff] %v15147_v58  ;;  %v15159_v0 = vcombine.high %v15003_v60, %v15051_v47  ;;  %v12755_v15 = vld [vmem:[%s19613_s4 + $0x618] ss:$12 sps:$4 sm:$0xff]  }
 0x1c8   :  { %19848 = vst [vmem:[#allocation57_spill] sm:$0xff] %v15122_v39  ;;  %6079 = vmatprep.mubr.bf16.mxu1 %v15090_v21  ;;  %5996 = vmatprep.mubr.bf16.mxu0 %v15109_v54  ;;  %v10740_v21 = vrot.slane %v2060_v5, 9  ;;  %19853 = vst [vmem:[#allocation62_spill] sm:$0xff] %v15155_v8  ;;  %v15163_v57 = vsel %vm14847_vm6, %v10738_v56, %v2370_v1  ;;  %v15185_v31 = vcombine.high %v14885_v51, %v14918_v50  ;;  %v12748_v56 = vld [vmem:[%s19613_s4 + $0x7fc] ss:$12 sps:$4 sm:$0xff]  }
 0x1c9   :  { %6169 = vmatpush1.bf16.msra.mxu0 %v12743_v41  ;;  %19854 = vst [vmem:[#allocation63_spill] sm:$0xff] %v15159_v0  ;;  %v10742_v41 = vrot.slane %v2062_v27, 9  ;;  %19855 = vst [vmem:[#allocation64_spill] sm:$0xff] %v15168_v45  ;;  %v15181_v27 = vcombine.high %v15040_v16, %v2355_v35  ;;  %v15188_v11 = vcombine.low %v15040_v16, %v2355_v35  ;;  %v2382_v61 = vrot.slane %v14888_v46, 5 }
 0x1ca   :  { %6170 = vmatprep.subr.bf16.mxu0 %v12751_v25  ;;  %v15178_v25 = vcombine.low %v15003_v60, %v15051_v47  ;;  %19858 = vst [vmem:[#allocation67_spill] sm:$0xff] %v15185_v31  ;;  %v2367_v1 = vsel %vm14847_vm6, %v10737_v38, %v2366_v9  ;;  %v15197_v60 = vsel %vm14847_vm6, %v10740_v21, %v2378_v49  ;;  %v10741_v47 = vrot.slane %v2061_v53, 9  ;;  %v12761_v38 = vld [vmem:[%s19613_s4 + $0x600] ss:$12 sps:$4 sm:$0xff]  }
 0x1cb   :  { %19857 = vst [vmem:[#allocation66_spill] sm:$0xff] %v15181_v27  ;;  %19859 = vst [vmem:[#allocation68_spill] sm:$0xff] %v15188_v11  ;;  %v15202_v16 = vcombine.low %v14885_v51, %v14918_v50  ;;  %v15209_v5 = vcombine.high %v2367_v1, %v15163_v57  ;;  %v15217_v46 = vcombine.low %v2355_v35, %v15081_v44  ;;  %v12763_v51 = vld [vmem:[%s19613_s4 + $0x604] ss:$12 sps:$4 sm:$0xff]  }
 0x1cc   :  { %19856 = vst [vmem:[#allocation65_spill] sm:$0xff] %v15178_v25  ;;  %v2375_v50 = vsel %vm14847_vm6, %v10739_v29, %v2374_v55  ;;  %v15226_v49 = vcombine.high %v14967_v37, %v15027_v32  ;;  %v15229_v21 = vcombine.low %v2367_v1, %v15163_v57  ;;  %v15240_v29 = vsel %vm14847_vm6, %v10742_v41, %v2386_v12  ;;  %v12746_v41 = vld [vmem:[%s19613_s4 + $0x7f8] ss:$12 sps:$4 sm:$0xff]  }
 0x1cd   :  { %6171 = vmatpush1.bf16.msra.mxu0 %v12749_v24  ;;  %19860 = vst [vmem:[#allocation69_spill] sm:$0xff] %v15202_v16  ;;  %19862 = vst [vmem:[#allocation71_spill] sm:$0xff] %v15209_v5  ;;  %v15213_v24 = vcombine.low %v14925_v14, %v14961_v40  ;;  %v12740_v14 = vld [vmem:[%s19613_s4 + $0x810] ss:$12 sps:$4 sm:$0xff]   ;;  %v15236_v40 = vcombine.high %v15135_v22, %v2367_v1  ;;  %v15243_v35 = vcombine.high %v2375_v50, %v15197_v60 }
 0x1ce   :  { %6172 = vmatprep.subr.bf16.mxu0 %v12757_v43  ;;  %19864 = vst [vmem:[#allocation73_spill] sm:$0xff] %v15217_v46  ;;  %19865 = vst [vmem:[#allocation74_spill] sm:$0xff] %v15226_v49  ;;  %v15251_v43 = vcombine.low %v14967_v37, %v15027_v32  ;;  %v15259_v9 = vsel %vm14847_vm6, %v10741_v47, %v2382_v61  ;;  %v15262_v55 = vcombine.low %v2375_v50, %v15197_v60  ;;  %v12769_v37 = vld [vmem:[%s19613_s4 + $0x76c] ss:$12 sps:$4 sm:$0xff]   ;;  %v12767_v61 = vld [vmem:[%s19613_s4 + $0x768] ss:$12 sps:$4 sm:$0xff]  }
 0x1cf   :  { %19863 = vst [vmem:[#allocation72_spill] sm:$0xff] %v15213_v24  ;;  %6080 = vmatmul.mubr.bf16.vlgmr.msra.gmra.mxu1 %v15092_v48  ;;  %19866 = vst [vmem:[#allocation75_spill] sm:$0xff] %v15229_v21  ;;  %5997 = vmatmul.mubr.bf16.gmra.mxu0 %v15217_v46  ;;  %v15269_v32 = vcombine.high %v15259_v9, %v15240_v29  ;;  %v15273_v53 = vcombine.low %v15259_v9, %v15240_v29  ;;  %v13151_v48 = vld [vmem:[#allocation2 + $0xd8] sm:$0xff] }
 0x1d0   :  { %6089 = vmatprep.mubr.bf16.mxu1 %v15102_v13  ;;  %6274 = vmatpush1.bf16.msra.mxu1 %v12734_v4  ;;  %19867 = vst [vmem:[#allocation76_spill] sm:$0xff] %v15236_v40  ;;  %19868 = vst [vmem:[#allocation77_spill] sm:$0xff] %v15243_v35  ;;  %v15280_v12 = vcombine.low %v15096_v42, %v15098_v52  ;;  %v12754_v4 = vld [vmem:[%s19613_s4 + $0x7e4] ss:$12 sps:$4 sm:$0xff]   ;;  %v12775_v42 = vld [vmem:[%s19613_s4 + $0x754] ss:$12 sps:$4 sm:$0xff]  }
 0x1d1   :  { %6275 = vmatprep.subr.bf16.mxu1 %v12742_v23  ;;  %19869 = vst [vmem:[#allocation78_spill] sm:$0xff] %v15251_v43  ;;  %6006 = vmatprep.mubr.bf16.mxu0 %v15236_v40  ;;  %19870 = vst [vmem:[#allocation79_spill] sm:$0xff] %v15262_v55  ;;  %v13147_v23 = vld [vmem:[#allocation2 + $0xa8] sm:$0xff] }
 0x1d2   :  { %6173 = vmatpush1.bf16.msra.mxu0 %v12755_v15  ;;  %19871 = vst [vmem:[#allocation80_spill] sm:$0xff] %v15269_v32  ;;  %19872 = vst [vmem:[#allocation81_spill] sm:$0xff] %v15273_v53  ;;  %v13148_v15 = vld [vmem:[#allocation2 + $0x28] sm:$0xff] }
 0x1d3   :  { %6174 = vmatprep.subr.bf16.mxu0 %v12763_v51  ;;  %19873 = vst [vmem:[#allocation82_spill] sm:$0xff] %v15280_v12  ;;  %v15285_v47 = vcombine.high %v13147_v23, %v13148_v15  ;;  %v15292_v51 = vcombine.low %v15135_v22, %v2367_v1  ;;  %v12752_v52 = vld [vmem:[%s19613_s4 + $0x7e0] ss:$12 sps:$4 sm:$0xff]   ;;  %v12758_v1 = vld [vmem:[%s19613_s4 + $0x7c8] ss:$12 sps:$4 sm:$0xff]  }
 0x1d4   :  { %6276 = vmatpush1.bf16.msra.mxu1 %v12740_v14  ;;  %v15302_v14 = vcombine.high %v15163_v57, %v2375_v50  ;;  %v12760_v22 = vld [vmem:[%s19613_s4 + $0x7cc] ss:$12 sps:$4 sm:$0xff]  }
 0x1d5   :  { %6277 = vmatprep.subr.bf16.mxu1 %v12748_v56  ;;  %19874 = vst [vmem:[#allocation83_spill] sm:$0xff] %v15285_v47  ;;  %19875 = vst [vmem:[#allocation84_spill] sm:$0xff] %v15292_v51  ;;  %v12773_v56 = vld [vmem:[%s19613_s4 + $0x750] ss:$12 sps:$4 sm:$0xff]  }
 0x1d6   :  { %6175 = vmatpush1.bf16.msra.mxu0 %v12761_v38  ;;  %19876 = vst [vmem:[#allocation85_spill] sm:$0xff] %v15302_v14  ;;  %v15315_v38 = vld [vmem:[#allocation2 + $0x90] sm:$0xff] }
 0x1d7   :  { %6090 = vmatmul.mubr.bf16.gmra.mxu1 %v15280_v12  ;;  %6176 = vmatprep.subr.bf16.mxu0 %v12769_v37  ;;  %v12766_v37 = vld [vmem:[%s19613_s4 + $0x7b4] ss:$12 sps:$4 sm:$0xff]  }
 0x1d8   :  { %6099 = vmatprep.mubr.bf16.mxu1 %v15285_v47  ;;  %6278 = vmatpush1.bf16.msra.mxu1 %v12746_v41  ;;  %v12781_v41 = vld [vmem:[%s19613_s4 + $0x73c] ss:$12 sps:$4 sm:$0xff]   ;;  %v15326_v47 = vcombine.low %v13147_v23, %v13148_v15  ;;  %v13149_v12 = vld [vmem:[#allocation2 + $0x70] sm:$0xff] }
 0x1d9   :  { %6279 = vmatprep.subr.bf16.mxu1 %v12754_v4  ;;  %6007 = vmatmul.mubr.bf16.gmra.mxu0 %v15292_v51  ;;  %v12779_v4 = vld [vmem:[%s19613_s4 + $0x738] ss:$12 sps:$4 sm:$0xff]   ;;  %v15329_v13 = vcombine.high %v13149_v12, %v15315_v38  ;;  %v12764_v23 = vld [vmem:[%s19613_s4 + $0x7b0] ss:$12 sps:$4 sm:$0xff]  }
 0x1da   :  { %6016 = vmatprep.mubr.bf16.mxu0 %v15302_v14  ;;  %6177 = vmatpush2.bf16.msra.mxu0 %v12767_v61  ;;  %v2063_v61 = vld [vmem:[#allocation2 + $0x58] sm:$0xee]  ;;  %19877 = vst [vmem:[#allocation86_spill] sm:$0xff] %v15326_v47 }
 0x1db   :  { %6178 = vmatprep.subr.bf16.mxu0 %v12775_v42  ;;  %19878 = vst [vmem:[#allocation87_spill] sm:$0xff] %v15329_v13  ;;  %v15333_v42 = vcombine.low %v15163_v57, %v2375_v50  ;;  %v12772_v15 = vld [vmem:[%s19613_s4 + $0x79c] ss:$12 sps:$4 sm:$0xff]   ;;  %v15347_v57 = vcombine.high %v15197_v60, %v15259_v9  ;;  %v12785_v50 = vld [vmem:[%s19613_s4 + $0x720] ss:$12 sps:$4 sm:$0xff]  }
 0x1dc   :  { %6280 = vmatpush1.bf16.msra.mxu1 %v12752_v52  ;;  %v12787_v52 = vld [vmem:[%s19613_s4 + $0x724] ss:$12 sps:$4 sm:$0xff]  }
 0x1dd   :  { %6281 = vmatprep.subr.bf16.mxu1 %v12760_v22  ;;  %19879 = vst [vmem:[#allocation88_spill] sm:$0xff] %v15333_v42  ;;  %19880 = vst [vmem:[#allocation89_spill] sm:$0xff] %v15347_v57  ;;  %v12793_v22 = vld [vmem:[%s19613_s4 + $0x70c] ss:$12 sps:$4 sm:$0xff]  }
 0x1de   :  { %6179 = vmatpush2.bf16.msra.mxu0 %v12773_v56  ;;  %v2390_v56 = vrot.slane %v14944_v59, 5 }
 0x1df   :  { %6100 = vmatmul.mubr.bf16.gmra.mxu1 %v15326_v47  ;;  %6180 = vmatprep.subr.bf16.mxu0 %v12781_v41  ;;  %v12770_v41 = vld [vmem:[%s19613_s4 + $0x798] ss:$12 sps:$4 sm:$0xff]   ;;  %v13150_v47 = vld [vmem:[#allocation2 + $0x108] sm:$0xff] }
 0x1e0   :  { %6109 = vmatprep.mubr.bf16.mxu1 %v15329_v13  ;;  %6282 = vmatpush1.bf16.msra.mxu1 %v12758_v1  ;;  %v10743_v1 = vrot.slane %v2063_v61, 9  ;;  %v12791_v13 = vld [vmem:[%s19613_s4 + $0x708] ss:$12 sps:$4 sm:$0xff]   ;;  %v15368_v61 = vcombine.low %v13149_v12, %v15315_v38  ;;  %v15382_v12 = vcombine.low %v15197_v60, %v15259_v9  ;;  %v12797_v9 = vld [vmem:[%s19613_s4 + $0x6f0] ss:$12 sps:$4 sm:$0xff]  }
 0x1e1   :  { %6283 = vmatprep.subr.bf16.mxu1 %v12766_v37  ;;  %6017 = vmatmul.mubr.bf16.gmra.mxu0 %v15333_v42  ;;  %v12778_v37 = vld [vmem:[%s19613_s4 + $0x784] ss:$12 sps:$4 sm:$0xff]   ;;  %v12782_v60 = vld [vmem:[%s19613_s4 + $0x8e8] ss:$12 sps:$4 sm:$0xff]  }
 0x1e2   :  { %6026 = vmatprep.mubr.bf16.mxu0 %v15347_v57  ;;  %6181 = vmatpush2.bf16.msra.mxu0 %v12779_v4  ;;  %19881 = vst [vmem:[#allocation90_spill] sm:$0xff] %v15368_v61  ;;  %v15372_v59 = vsel %vm14847_vm6, %v10743_v1, %v2390_v56  ;;  %v12799_v4 = vld [vmem:[%s19613_s4 + $0x6f4] ss:$12 sps:$4 sm:$0xff]   ;;  %19883 = vst [vmem:[#allocation92_spill] sm:$0xff] %v15382_v12  ;;  %v15409_v56 = vcombine.low %v13150_v47, %v13151_v48 }
 0x1e3   :  { %6182 = vmatprep.subr.bf16.mxu0 %v12787_v52  ;;  %v15377_v52 = vcombine.high %v13150_v47, %v13151_v48  ;;  %v12790_v1 = vld [vmem:[%s19613_s4 + $0x8d4] ss:$12 sps:$4 sm:$0xff]   ;;  %v15423_v48 = vcombine.low %v15240_v29, %v15372_v59  ;;  %v12796_v47 = vld [vmem:[%s19613_s4 + $0x8bc] ss:$12 sps:$4 sm:$0xff]  }
 0x1e4   :  { %6284 = vmatpush1.bf16.msra.mxu1 %v12764_v23  ;;  %v12776_v23 = vld [vmem:[%s19613_s4 + $0x780] ss:$12 sps:$4 sm:$0xff]   ;;  %19885 = vst [vmem:[#allocation94_spill] sm:$0xff] %v15409_v56 }
 0x1e5   :  { %6285 = vmatprep.subr.bf16.mxu1 %v12772_v15  ;;  %19882 = vst [vmem:[#allocation91_spill] sm:$0xff] %v15377_v52  ;;  %v12784_v15 = vld [vmem:[%s19613_s4 + $0x8ec] ss:$12 sps:$4 sm:$0xff]   ;;  %19886 = vst [vmem:[#allocation95_spill] sm:$0xff] %v15423_v48 }
 0x1e6   :  { %6183 = vmatpush2.bf16.msra.mxu0 %v12785_v50  ;;  %v15393_v50 = vcombine.high %v15240_v29, %v15372_v59  ;;  %v12794_v29 = vld [vmem:[%s19613_s4 + $0x8b8] ss:$12 sps:$4 sm:$0xff]  }
 0x1e7   :  { %6110 = vmatmul.mubr.bf16.gmra.mxu1 %v15368_v61  ;;  %6184 = vmatprep.subr.bf16.mxu0 %v12793_v22  ;;  %v12805_v22 = vld [vmem:[%s19613_s4 + $0x6dc] ss:$12 sps:$4 sm:$0xff]   ;;  %v19910_v61 = vld [vmem:[#allocation28_spill] sm:$0xff] }
 0x1e8   :  { %6119 = vmatprep.mubr.bf16.mxu1 %v15377_v52  ;;  %6286 = vmatpush1.bf16.msra.mxu1 %v12770_v41  ;;  %19884 = vst [vmem:[#allocation93_spill] sm:$0xff] %v15393_v50  ;;  %v12803_v41 = vld [vmem:[%s19613_s4 + $0x6d8] ss:$12 sps:$4 sm:$0xff]  }
 0x1e9   :  { %6287 = vmatprep.subr.bf16.mxu1 %v12778_v37  ;;  %6027 = vmatmul.mubr.bf16.gmra.mxu0 %v15382_v12  ;;  %v12811_v37 = vld [vmem:[%s19613_s4 + $0x6c4] ss:$12 sps:$4 sm:$0xff]  }
 0x1ea   :  { %6036 = vmatprep.mubr.bf16.mxu0 %v15393_v50  ;;  %6185 = vmatpush2.bf16.msra.mxu0 %v12791_v13  ;;  %v12788_v13 = vld [vmem:[%s19613_s4 + $0x8d0] ss:$12 sps:$4 sm:$0xff]  }
 0x1eb   :  { %6186 = vmatprep.subr.bf16.mxu0 %v12799_v4  ;;  %v15431_v4 = vcombine.high %v14439_v7, %v14588_v18 }
 0x1ec   :  { %6288 = vmatpush1.bf16.msra.mxu1 %v12776_v23  ;;  %v12809_v23 = vld [vmem:[%s19613_s4 + $0x6c0] ss:$12 sps:$4 sm:$0xff]  }
 0x1ed   :  { %6289 = vmatprep.subr.bf16.mxu1 %v12784_v15  ;;  %19887 = vst [vmem:[#allocation96_spill] sm:$0xff] %v15431_v4  ;;  %v12817_v15 = vld [vmem:[%s19613_s4 + $0x9ac] ss:$12 sps:$4 sm:$0xff]  }
 0x1ee   :  { %6187 = vmatpush2.bf16.msra.mxu0 %v12797_v9  ;;  %v2396_v9 = vshll.u32 %v15315_v38, 16 }
 0x1ef   :  { %6120 = vmatmul.mubr.bf16.gmra.mxu1 %v15409_v56  ;;  %6188 = vmatprep.subr.bf16.mxu0 %v12805_v22  ;;  %v12802_v22 = vld [vmem:[%s19613_s4 + $0x8a4] ss:$12 sps:$4 sm:$0xff]   ;;  %v12949_v56 = vld [vmem:[%s19613_s4 + $0xd6c] ss:$12 sps:$4 sm:$0xff]  }
 0x1f0   :  { %6129 = vmatprep.mubr.bf16.mxu1 %v15088_v33  ;;  %6290 = vmatpush2.bf16.msra.mxu1 %v12782_v60  ;;  %v2393_v60 = vshrl.u32 %v15315_v38, 16  ;;  %v12823_v38 = vld [vmem:[%s19613_s4 + $0x994] ss:$12 sps:$4 sm:$0xff]   ;;  %v15460_v33 = vcombine.low %v14439_v7, %v14588_v18  ;;  %v15471_v7 = vld [vmem:[#allocation2 + $0x68] sm:$0x11] }
 0x1f1   :  { %6291 = vmatprep.subr.bf16.mxu1 %v12790_v1  ;;  %6037 = vmatmul.mubr.bf16.gmra.mxu0 %v15423_v48  ;;  %v12800_v1 = vld [vmem:[%s19613_s4 + $0x8a0] ss:$12 sps:$4 sm:$0xff]   ;;  %v12806_v18 = vld [vmem:[%s19613_s4 + $0x888] ss:$12 sps:$4 sm:$0xff]  }
 0x1f2   :  { %6189 = vmatpush2.bf16.msra.mxu0 %v12803_v41  ;;  %6192 = vmatprep.mubr.bf16.mxu0 %v15431_v4  ;;  %v12815_v41 = vld [vmem:[%s19613_s4 + $0x9a8] ss:$12 sps:$4 sm:$0xff]   ;;  %19888 = vst [vmem:[#allocation97_spill] sm:$0xff] %v15460_v33 }
 0x1f3   :  { %6190 = vmatprep.subr.bf16.mxu0 %v12811_v37  ;;  %v12821_v37 = vld [vmem:[%s19613_s4 + $0x990] ss:$12 sps:$4 sm:$0xff]  }
 0x1f4   :  { %6292 = vmatpush2.bf16.msra.mxu1 %v12788_v13  ;;  %v12808_v13 = vld [vmem:[%s19613_s4 + $0x88c] ss:$12 sps:$4 sm:$0xff]   ;;  %v12957_v4 = vld [vmem:[%s19613_s4 + $0xd3c] ss:$12 sps:$4 sm:$0xff]  }
 0x1f5   :  { %6293 = vmatprep.subr.bf16.mxu1 %v12796_v47  ;;  %v2395_v47 = vrot.slane %v2393_v60, 4  ;;  %v12827_v60 = vld [vmem:[%s19613_s4 + $0x978] ss:$12 sps:$4 sm:$0xff]  }
 0x1f6   :  { %6191 = vmatpush2.bf16.msra.mxu0 %v12809_v23  ;;  %v2398_v23 = vrot.slane %v2396_v9, 5 }
 0x1f7   :  { %6130 = vmatmul.mubr.bf16.gmra.mxu1 %v15113_v62  ;;  %6386 = vmatprep.subr.bf16.mxu0 %v12817_v15  ;;  %v15476_v62 = vld [vmem:[#allocation2 + $0xc0] sm:$0xff] }
 0x1f8   :  { %6139 = vmatprep.mubr.bf16.mxu1 %v15122_v39  ;;  %6294 = vmatpush2.bf16.msra.mxu1 %v12794_v29  ;;  %v12829_v29 = vld [vmem:[%s19613_s4 + $0x97c] ss:$12 sps:$4 sm:$0xff]   ;;  %v12814_v15 = vld [vmem:[%s19613_s4 + $0x874] ss:$12 sps:$4 sm:$0xff]   ;;  %v2399_v9 = vor.u32 %v2398_v23, %v2395_v47  ;;  %v12818_v23 = vld [vmem:[%s19613_s4 + $0x858] ss:$12 sps:$4 sm:$0xff]  }
 0x1f9   :  { %6295 = vmatprep.subr.bf16.mxu1 %v12802_v22  ;;  %6193 = vmatmul.mubr.bf16.vlgmr.msra.gmra.mxu0 %v15460_v33  ;;  %v13152_v22 = vld [vmem:[#allocation2 + $0x58] sm:$0xff] }
 0x1fa   :  { %6202 = vmatprep.mubr.bf16.mxu0 %v15143_v17  ;;  %6387 = vmatpush1.bf16.msra.mxu0 %v12815_v41  ;;  %v15489_v39 = vcombine.high %v13152_v22, %v15476_v62  ;;  %v12812_v41 = vld [vmem:[%s19613_s4 + $0x870] ss:$12 sps:$4 sm:$0xff]   ;;  %v2400_v47 = vrot.slane %v2399_v9, 4  ;;  %v15521_v9 = vcombine.low %v13152_v22, %v15476_v62  ;;  %v12832_v22 = vld [vmem:[%s19613_s4 + $0xb2c] ss:$12 sps:$4 sm:$0xff]  }
 0x1fb   :  { %6388 = vmatprep.subr.bf16.mxu0 %v12823_v38  ;;  %v12835_v38 = vld [vmem:[%s19613_s4 + $0x964] ss:$12 sps:$4 sm:$0xff]   ;;  %v19911_v17 = vld [vmem:[#allocation29_spill] sm:$0xff] }
 0x1fc   :  { %6296 = vmatpush2.bf16.msra.mxu1 %v12800_v1  ;;  %19889 = vst [vmem:[#allocation98_spill] sm:$0xff] %v15489_v39  ;;  %v2402_v1 = vshll.u32 %v15471_v7, 16  ;;  %19890 = vst [vmem:[#allocation99_spill] sm:$0xff] %v15521_v9 }
 0x1fd   :  { %6297 = vmatprep.subr.bf16.mxu1 %v12808_v13  ;;  %v12820_v13 = vld [vmem:[%s19613_s4 + $0x85c] ss:$12 sps:$4 sm:$0xff]  }
 0x1fe   :  { %6389 = vmatpush1.bf16.msra.mxu0 %v12821_v37  ;;  %v12833_v37 = vld [vmem:[%s19613_s4 + $0x960] ss:$12 sps:$4 sm:$0xff]  }
 0x1ff   :  { %6140 = vmatmul.mubr.bf16.gmra.mxu1 %v15126_v36  ;;  %6390 = vmatprep.subr.bf16.mxu0 %v12829_v29  ;;  %v12841_v29 = vld [vmem:[%s19613_s4 + $0x94c] ss:$12 sps:$4 sm:$0xff]  }
 0x200   :  { %6149 = vmatprep.mubr.bf16.mxu1 %v15489_v39  ;;  %6298 = vmatpush2.bf16.msra.mxu1 %v12806_v18  ;;  %v2404_v18 = vrot.slane %v2402_v1, 5  ;;  %v12826_v39 = vld [vmem:[%s19613_s4 + $0x844] ss:$12 sps:$4 sm:$0xff]   ;;  %v12847_v1 = vld [vmem:[%s19613_s4 + $0x934] ss:$12 sps:$4 sm:$0xff]  }
 0x201   :  { %6299 = vmatprep.subr.bf16.mxu1 %v12814_v15  ;;  %6203 = vmatmul.mubr.bf16.gmra.mxu0 %v15151_v2  ;;  %v12839_v15 = vld [vmem:[%s19613_s4 + $0x948] ss:$12 sps:$4 sm:$0xff]  }
 0x202   :  { %6212 = vmatprep.mubr.bf16.mxu0 %v15155_v8  ;;  %6391 = vmatpush1.bf16.msra.mxu0 %v12827_v60  ;;  %v15525_v60 = vsel %vm14282_vm3, %v2400_v47, %v2404_v18  ;;  %v12830_v47 = vld [vmem:[%s19613_s4 + $0xb28] ss:$12 sps:$4 sm:$0xff]   ;;  %v12859_v18 = vld [vmem:[%s19613_s4 + $0x904] ss:$12 sps:$4 sm:$0xff]   ;;  %v12943_v8 = vld [vmem:[%s19613_s4 + $0x80] ss:$12 sps:$4 sm:$0xff]  }
 0x203   :  { %6392 = vmatprep.subr.bf16.mxu0 %v12835_v38  ;;  %v15540_v38 = vcombine.high %v14816_v30, %v15525_v60 }
 0x204   :  { %6300 = vmatpush2.bf16.msra.mxu1 %v12812_v41  ;;  %v12824_v41 = vld [vmem:[%s19613_s4 + $0x840] ss:$12 sps:$4 sm:$0xff]  }
 0x205   :  { %6301 = vmatprep.subr.bf16.mxu1 %v12820_v13  ;;  %19891 = vst [vmem:[#allocation100_spill] sm:$0xff] %v15540_v38  ;;  %v12845_v13 = vld [vmem:[%s19613_s4 + $0x930] ss:$12 sps:$4 sm:$0xff]  }
 0x206   :  { %6393 = vmatpush1.bf16.msra.mxu0 %v12833_v37  ;;  %v12853_v37 = vld [vmem:[%s19613_s4 + $0x91c] ss:$12 sps:$4 sm:$0xff]  }
 0x207   :  { %6150 = vmatmul.mubr.bf16.gmra.mxu1 %v15521_v9  ;;  %6394 = vmatprep.subr.bf16.mxu0 %v12841_v29  ;;  %v2054_v29 = vld [vmem:[#allocation2 + $0x90] sm:$0xee] }
 0x208   :  { %6302 = vmatpush2.bf16.msra.mxu1 %v12818_v23  ;;  %6305 = vmatprep.mubr.bf16.mxu1 %v15147_v58  ;;  %v12838_v23 = vld [vmem:[%s19613_s4 + $0xb14] ss:$12 sps:$4 sm:$0xff]   ;;  %v2426_v58 = vrot.slane %v15471_v7, 5  ;;  %v12850_v7 = vld [vmem:[%s19613_s4 + $0xae4] ss:$12 sps:$4 sm:$0xff]  }
 0x209   :  { %6303 = vmatprep.subr.bf16.mxu1 %v12826_v39  ;;  %6213 = vmatmul.mubr.bf16.gmra.mxu0 %v15168_v45  ;;  %v12851_v39 = vld [vmem:[%s19613_s4 + $0x918] ss:$12 sps:$4 sm:$0xff]  }
 0x20a   :  { %6222 = vmatprep.mubr.bf16.mxu0 %v15540_v38  ;;  %6395 = vmatpush1.bf16.msra.mxu0 %v12839_v15  ;;  %v12836_v15 = vld [vmem:[%s19613_s4 + $0xb10] ss:$12 sps:$4 sm:$0xff]   ;;  %v12935_v38 = vld [vmem:[%s19613_s4 + $0x98] ss:$12 sps:$4 sm:$0xff]  }
 0x20b   :  { %6396 = vmatprep.subr.bf16.mxu0 %v12847_v1  ;;  %v15568_v1 = vcombine.low %v14816_v30, %v15525_v60  ;;  %v12865_v30 = vld [vmem:[%s19613_s4 + $0xa6c] ss:$12 sps:$4 sm:$0xff]  }
 0x20c   :  { %6304 = vmatpush2.bf16.msra.mxu1 %v12824_v41  ;;  %v12844_v41 = vld [vmem:[%s19613_s4 + $0xafc] ss:$12 sps:$4 sm:$0xff]  }
 0x20d   :  { %6499 = vmatprep.subr.bf16.mxu1 %v12832_v22  ;;  %19892 = vst [vmem:[#allocation101_spill] sm:$0xff] %v15568_v1  ;;  %v10744_v22 = vrot.slane %v2054_v29, 9  ;;  %v12842_v29 = vld [vmem:[%s19613_s4 + $0xaf8] ss:$12 sps:$4 sm:$0xff]  }
 0x20e   :  { %6397 = vmatpush1.bf16.msra.mxu0 %v12845_v13  ;;  %v12857_v13 = vld [vmem:[%s19613_s4 + $0x900] ss:$12 sps:$4 sm:$0xff]  }
 0x20f   :  { %6306 = vmatmul.mubr.bf16.vlgmr.msra.gmra.mxu1 %v15007_v20  ;;  %6398 = vmatprep.subr.bf16.mxu0 %v12853_v37  ;;  %v2407_v37 = vshrl.u32 %v15476_v62, 16  ;;  %v12871_v20 = vld [vmem:[%s19613_s4 + $0xa54] ss:$12 sps:$4 sm:$0xff]  }
 0x210   :  { %6315 = vmatprep.mubr.bf16.mxu1 %v15159_v0  ;;  %6500 = vmatpush1.bf16.msra.mxu1 %v12830_v47  ;;  %v2410_v47 = vshll.u32 %v15476_v62, 16  ;;  %v12863_v0 = vld [vmem:[%s19613_s4 + $0xa68] ss:$12 sps:$4 sm:$0xff]  }
 0x211   :  { %6501 = vmatprep.subr.bf16.mxu1 %v12838_v23  ;;  %6223 = vmatmul.mubr.bf16.gmra.mxu0 %v15568_v1  ;;  %v15591_v23 = vld [vmem:[#allocation2 + $0x50] sm:$0x11]  ;;  %v19906_v1 = vld [vmem:[#allocation25_spill] sm:$0xff] }
 0x212   :  { %6232 = vmatprep.mubr.bf16.mxu0 %v15185_v31  ;;  %6399 = vmatpush1.bf16.msra.mxu0 %v12851_v39  ;;  %v12848_v39 = vld [vmem:[%s19613_s4 + $0xae0] ss:$12 sps:$4 sm:$0xff]  }
 0x213   :  { %6400 = vmatprep.subr.bf16.mxu0 %v12859_v18  ;;  %v12856_v18 = vld [vmem:[%s19613_s4 + $0xacc] ss:$12 sps:$4 sm:$0xff]  }
 0x214   :  { %6502 = vmatpush1.bf16.msra.mxu1 %v12836_v15  ;;  %v12869_v15 = vld [vmem:[%s19613_s4 + $0xa50] ss:$12 sps:$4 sm:$0xff]  }
 0x215   :  { %6503 = vmatprep.subr.bf16.mxu1 %v12844_v41  ;;  %v2416_v41 = vshll.u32 %v15591_v23, 16 }
 0x216   :  { %6401 = vmatpush1.bf16.msra.mxu0 %v12857_v13  ;;  %v12877_v13 = vld [vmem:[%s19613_s4 + $0xa3c] ss:$12 sps:$4 sm:$0xff]  }
 0x217   :  { %6316 = vmatmul.mubr.bf16.gmra.mxu1 %v15178_v25  ;;  %6402 = vmatprep.subr.bf16.mxu0 %v12865_v30  ;;  %v2409_v30 = vrot.slane %v2407_v37, 4  ;;  %v15621_v25 = vsel %vm14847_vm6, %v10744_v22, %v2426_v58  ;;  %v12875_v37 = vld [vmem:[%s19613_s4 + $0xa38] ss:$12 sps:$4 sm:$0xff]   ;;  %v12868_v22 = vld [vmem:[%s19613_s4 + $0xa9c] ss:$12 sps:$4 sm:$0xff]  }
 0x218   :  { %6325 = vmatprep.mubr.bf16.mxu1 %v15181_v27  ;;  %6504 = vmatpush1.bf16.msra.mxu1 %v12842_v29  ;;  %v2412_v27 = vrot.slane %v2410_v47, 5  ;;  %v12854_v29 = vld [vmem:[%s19613_s4 + $0xac8] ss:$12 sps:$4 sm:$0xff]   ;;  %v12883_v47 = vld [vmem:[%s19613_s4 + $0xa24] ss:$12 sps:$4 sm:$0xff]   ;;  %v15634_v58 = vcombine.high %v15081_v44, %v15621_v25 }
 0x219   :  { %6505 = vmatprep.subr.bf16.mxu1 %v12850_v7  ;;  %6233 = vmatmul.mubr.bf16.gmra.mxu0 %v15202_v16  ;;  %v12862_v7 = vld [vmem:[%s19613_s4 + $0xab4] ss:$12 sps:$4 sm:$0xff]  }
 0x21a   :  { %6242 = vmatprep.mubr.bf16.mxu0 %v15206_v19  ;;  %6403 = vmatpush2.bf16.msra.mxu0 %v12863_v0  ;;  %v2413_v0 = vor.u32 %v2412_v27, %v2409_v30  ;;  %19893 = vst [vmem:[#allocation102_spill] sm:$0xff] %v15634_v58  ;;  %v12881_v27 = vld [vmem:[%s19613_s4 + $0xa20] ss:$12 sps:$4 sm:$0xff]   ;;  %v12874_v30 = vld [vmem:[%s19613_s4 + $0xa84] ss:$12 sps:$4 sm:$0xff]  }
 0x21b   :  { %6404 = vmatprep.subr.bf16.mxu0 %v12871_v20  ;;  %v12860_v20 = vld [vmem:[%s19613_s4 + $0xab0] ss:$12 sps:$4 sm:$0xff]  }
 0x21c   :  { %6506 = vmatpush1.bf16.msra.mxu1 %v12848_v39  ;;  %v12889_v39 = vld [vmem:[%s19613_s4 + $0xa0c] ss:$12 sps:$4 sm:$0xff]  }
 0x21d   :  { %6507 = vmatprep.subr.bf16.mxu1 %v12856_v18  ;;  %v2414_v18 = vrot.slane %v2413_v0, 4 }
 0x21e   :  { %6405 = vmatpush2.bf16.msra.mxu0 %v12869_v15  ;;  %v2418_v15 = vrot.slane %v2416_v41, 5  ;;  %v15665_v41 = vcombine.low %v15081_v44, %v15621_v25  ;;  %v12872_v44 = vld [vmem:[%s19613_s4 + $0xa80] ss:$12 sps:$4 sm:$0xff]  }
 0x21f   :  { %6326 = vmatmul.mubr.bf16.gmra.mxu1 %v15188_v11  ;;  %6406 = vmatprep.subr.bf16.mxu0 %v12877_v13  ;;  %v12866_v13 = vld [vmem:[%s19613_s4 + $0xa98] ss:$12 sps:$4 sm:$0xff]  }
 0x220   :  { %6335 = vmatprep.mubr.bf16.mxu1 %v15634_v58  ;;  %6508 = vmatpush1.bf16.msra.mxu1 %v12854_v29  ;;  %v12887_v29 = vld [vmem:[%s19613_s4 + $0xa08] ss:$12 sps:$4 sm:$0xff]   ;;  %19894 = vst [vmem:[#allocation103_spill] sm:$0xff] %v15665_v41 }
 0x221   :  { %6509 = vmatprep.subr.bf16.mxu1 %v12862_v7  ;;  %6243 = vmatmul.mubr.bf16.gmra.mxu0 %v15213_v24  ;;  %v15661_v7 = vpop.f32.mrf.mxu0  ;;  %v12927_v24 = vld [vmem:[%s19613_s4 + $0xb0] ss:$12 sps:$4 sm:$0xff]  }
 0x222   :  { %6252 = vmatprep.mubr.bf16.mxu0 %v15226_v49  ;;  %6407 = vmatpush2.bf16.msra.mxu0 %v12875_v37  ;;  %v15669_v37 = vsel %vm14282_vm3, %v2414_v18, %v2418_v15  ;;  %v12901_v15 = vld [vmem:[%s19613_s4 + $0x9dc] ss:$12 sps:$4 sm:$0xff]  }
 0x223   :  { %6408 = vmatprep.subr.bf16.mxu0 %v12883_v47  ;;  %v15671_v0 = vpop.f32.mrf.mxu0  ;;  %v12895_v47 = vld [vmem:[%s19613_s4 + $0x9f4] ss:$12 sps:$4 sm:$0xff]  }
 0x224   :  { %6510 = vmatpush1.bf16.msra.mxu1 %v12860_v20  ;;  %v15683_v20 = vcombine.high %v15031_v26, %v15669_v37 }
 0x225   :  { %6511 = vmatprep.subr.bf16.mxu1 %v12868_v22  ;;  %v15685_v22 = vpop.f32.mrf.mxu0 }
 0x226   :  { %6409 = vmatpush2.bf16.msra.mxu0 %v12881_v27  ;;  %19895 = vst [vmem:[#allocation104_spill] sm:$0xff] %v15683_v20  ;;  %v12880_v27 = vld [vmem:[%s19613_s4 + $0xbec] ss:$12 sps:$4 sm:$0xff]  }
 0x227   :  { %6336 = vmatmul.mubr.bf16.gmra.mxu1 %v15665_v41  ;;  %6410 = vmatprep.subr.bf16.mxu0 %v12889_v39  ;;  %v12893_v39 = vld [vmem:[%s19613_s4 + $0x9f0] ss:$12 sps:$4 sm:$0xff]   ;;  %v15695_v18 = vpop.f32.mrf.mxu0  ;;  %v2430_v41 = vrot.slane %v15591_v23, 5 }
 0x228   :  { %6345 = vmatprep.mubr.bf16.mxu1 %v15209_v5  ;;  %6512 = vmatpush1.bf16.msra.mxu1 %v12866_v13  ;;  %v12878_v13 = vld [vmem:[%s19613_s4 + $0xbe8] ss:$12 sps:$4 sm:$0xff]   ;;  %v12917_v23 = vld [vmem:[%s19613_s4 + $0xc90] ss:$12 sps:$4 sm:$0xff]  }
 0x229   :  { %6513 = vmatprep.subr.bf16.mxu1 %v12874_v30  ;;  %6253 = vmatmul.mubr.bf16.gmra.mxu0 %v15251_v43  ;;  %v12886_v30 = vld [vmem:[%s19613_s4 + $0xbd4] ss:$12 sps:$4 sm:$0xff]  }
 0x22a   :  { %6262 = vmatprep.mubr.bf16.mxu0 %v15683_v20  ;;  %6411 = vmatpush2.bf16.msra.mxu0 %v12887_v29  ;;  %v15706_v29 = vpop.f32.mrf.mxu0 }
 0x22b   :  { %6412 = vmatprep.subr.bf16.mxu0 %v12895_v47  ;;  %v12899_v47 = vld [vmem:[%s19613_s4 + $0x9d8] ss:$12 sps:$4 sm:$0xff]  }
 0x22c   :  { %6514 = vmatpush1.bf16.msra.mxu1 %v12872_v44  ;;  %v15714_v44 = vcombine.low %v15031_v26, %v15669_v37  ;;  %v15727_v26 = vpop.f32.mrf.mxu0 }
 0x22d   :  { %6515 = vmatprep.subr.bf16.mxu1 %v12880_v27  ;;  %v12907_v27 = vld [vmem:[%s19613_s4 + $0x9c4] ss:$12 sps:$4 sm:$0xff]  }
 0x22e   :  { %6413 = vmatpush2.bf16.msra.mxu0 %v12893_v39  ;;  %19896 = vst [vmem:[#allocation105_spill] sm:$0xff] %v15714_v44  ;;  %v12884_v39 = vld [vmem:[%s19613_s4 + $0xbd0] ss:$12 sps:$4 sm:$0xff]   ;;  %v15742_v5 = vpop.f32.mrf.mxu0 }
 0x22f   :  { %6346 = vmatmul.mubr.bf16.gmra.mxu1 %v15229_v21  ;;  %6414 = vmatprep.subr.bf16.mxu0 %v12901_v15  ;;  %v12892_v21 = vld [vmem:[%s19613_s4 + $0xbbc] ss:$12 sps:$4 sm:$0xff]   ;;  %v12905_v15 = vld [vmem:[%s19613_s4 + $0x9c0] ss:$12 sps:$4 sm:$0xff]  }
 0x230   :  { %6355 = vmatprep.mubr.bf16.mxu1 %v15243_v35  ;;  %6516 = vmatpush2.bf16.msra.mxu1 %v12878_v13  ;;  %v12913_v13 = vld [vmem:[%s19613_s4 + $0xcac] ss:$12 sps:$4 sm:$0xff]   ;;  %v2064_v35 = vld [vmem:[#allocation2 + $0xc0] sm:$0xee] }
 0x231   :  { %6517 = vmatprep.subr.bf16.mxu1 %v12886_v30  ;;  %6263 = vmatmul.mubr.bf16.gmra.mxu0 %v15714_v44  ;;  %v12890_v30 = vld [vmem:[%s19613_s4 + $0xbb8] ss:$12 sps:$4 sm:$0xff]  }
 0x232   :  { %6415 = vmatpush2.bf16.msra.mxu0 %v12899_v47  ;;  %6418 = vmatprep.mubr.bf16.mxu0 %v14367_v6  ;;  %v12898_v47 = vld [vmem:[%s19613_s4 + $0xba4] ss:$12 sps:$4 sm:$0xff]  }
 0x233   :  { %6416 = vmatprep.subr.bf16.mxu0 %v12907_v27  ;;  %v12911_v27 = vld [vmem:[%s19613_s4 + $0xca8] ss:$12 sps:$4 sm:$0xff]  }
 0x234   :  { %6518 = vmatpush2.bf16.msra.mxu1 %v12884_v39  ;;  %v10745_v39 = vrot.slane %v2064_v35, 9  ;;  %v15760_v35 = vpop.f32.mrf.mxu0 }
 0x235   :  { %6519 = vmatprep.subr.bf16.mxu1 %v12892_v21  ;;  %v12919_v21 = vld [vmem:[%s19613_s4 + $0xc94] ss:$12 sps:$4 sm:$0xff]  }
 0x236   :  { %6417 = vmatpush2.bf16.msra.mxu0 %v12905_v15  ;;  %v12896_v15 = vld [vmem:[%s19613_s4 + $0xba0] ss:$12 sps:$4 sm:$0xff]  }
 0x237   :  { %6356 = vmatmul.mubr.bf16.gmra.mxu1 %v15262_v55  ;;  %6612 = vmatprep.subr.bf16.mxu0 %v12913_v13  ;;  %v12904_v55 = vld [vmem:[%s19613_s4 + $0xb8c] ss:$12 sps:$4 sm:$0xff]   ;;  %v15768_v13 = vsel %vm14847_vm6, %v10745_v39, %v2430_v41  ;;  %v12910_v41 = vld [vmem:[%s19613_s4 + $0xb74] ss:$12 sps:$4 sm:$0xff]  }
 0x238   :  { %6365 = vmatprep.mubr.bf16.mxu1 %v15269_v32  ;;  %6520 = vmatpush2.bf16.msra.mxu1 %v12890_v30  ;;  %19897 = vst [vmem:[#allocation106_spill] sm:$0xff] %v15768_v13  ;;  %v12925_v30 = vld [vmem:[%s19613_s4 + $0xc7c] ss:$12 sps:$4 sm:$0xff]   ;;  %v15786_v58 = vcombine.high %v15372_v59, %v15768_v13 }
 0x239   :  { %6521 = vmatprep.subr.bf16.mxu1 %v12898_v47  ;;  %6419 = vmatmul.mubr.bf16.vlgmr.msra.gmra.mxu0 %v14384_v3  ;;  %v5855_v47 = vpop.f32.mrf.mxu1  ;;  %v12902_v32 = vld [vmem:[%s19613_s4 + $0xb88] ss:$12 sps:$4 sm:$0xff]  }
 0x23a   :  { %6428 = vmatprep.mubr.bf16.mxu0 %v14431_v28  ;;  %6613 = vmatpush1.bf16.msra.mxu0 %v12911_v27  ;;  %v15777_v27 = vadd.f32 %v5855_v47, %v15661_v7  ;;  %19898 = vst [vmem:[#allocation107_spill] sm:$0xff] %v15786_v58 }
 0x23b   :  { %6614 = vmatprep.subr.bf16.mxu0 %v12919_v21  ;;  %v5857_v39 = vpop.f32.mrf.mxu1  ;;  %v15782_v21 = vpop.f32.mrf.mxu0 }
 0x23c   :  { %6522 = vmatpush2.bf16.msra.mxu1 %v12896_v15  ;;  %v12923_v15 = vld [vmem:[%s19613_s4 + $0xc78] ss:$12 sps:$4 sm:$0xff]   ;;  %v15792_v7 = vadd.f32 %v5857_v39, %v15671_v0 }
 0x23d   :  { %6523 = vmatprep.subr.bf16.mxu1 %v12904_v55  ;;  %v12930_v55 = vld [vmem:[%s19613_s4 + $0xc64] ss:$12 sps:$4 sm:$0xff]   ;;  %v5859_v47 = vpop.f32.mrf.mxu1  ;;  %v15805_v0 = vpop.f32.mrf.mxu0 }
 0x23e   :  { %6615 = vmatpush1.bf16.msra.mxu0 %v12917_v23  ;;  %v12908_v23 = vld [vmem:[%s19613_s4 + $0xb70] ss:$12 sps:$4 sm:$0xff]   ;;  %v15803_v11 = vadd.f32 %v5859_v47, %v15685_v22  ;;  %v12914_v47 = vld [vmem:[%s19613_s4 + $0xb58] ss:$12 sps:$4 sm:$0xff]  }
 0x23f   :  { %6366 = vmatmul.mubr.bf16.gmra.mxu1 %v15273_v53  ;;  %6616 = vmatprep.subr.bf16.mxu0 %v12925_v30  ;;  %v12916_v30 = vld [vmem:[%s19613_s4 + $0xb5c] ss:$12 sps:$4 sm:$0xff]   ;;  %v5861_v39 = vpop.f32.mrf.mxu1 }
 0x240   :  { %6375 = vmatprep.mubr.bf16.mxu1 %v15786_v58  ;;  %6524 = vmatpush2.bf16.msra.mxu1 %v12902_v32  ;;  %v19899_v53 = vld [vmem:[#allocation19_spill] sm:$0xff]  ;;  %v12928_v32 = vld [vmem:[%s19613_s4 + $0xc60] ss:$12 sps:$4 sm:$0xff]   ;;  %v15816_v22 = vadd.f32 %v5861_v39, %v15695_v18  ;;  %v15824_v58 = vpop.f32.mrf.mxu0  ;;  %v12922_v18 = vld [vmem:[%s19613_s4 + $0xb44] ss:$12 sps:$4 sm:$0xff]  }
 0x241   :  { %6525 = vmatprep.subr.bf16.mxu1 %v12910_v41  ;;  %6429 = vmatmul.mubr.bf16.gmra.mxu0 %v14491_v10  ;;  %v12933_v41 = vld [vmem:[%s19613_s4 + $0xc4c] ss:$12 sps:$4 sm:$0xff]   ;;  %v15844_v39 = vld [vmem:[#allocation2 + $0x110] sm:$0xff] }
 0x242   :  { %6438 = vmatprep.mubr.bf16.mxu0 %v19899_v53  ;;  %6617 = vmatpush1.bf16.msra.mxu0 %v12923_v15  ;;  %v15828_v15 = vcombine.low %v15372_v59, %v15768_v13  ;;  %v19901_v59 = vld [vmem:[#allocation21_spill] sm:$0xff]  ;;  %v15849_v20 = vpop.f32.mrf.mxu0  ;;  %v2433_v43 = vshrl.u32 %v15844_v39, 16  ;;  %v2436_v49 = vshll.u32 %v15844_v39, 16 }
 0x243   :  { %6618 = vmatprep.subr.bf16.mxu0 %v12930_v55  ;;  %v12931_v55 = vld [vmem:[%s19613_s4 + $0xc48] ss:$12 sps:$4 sm:$0xff]  }
 0x244   :  { %6526 = vmatpush2.bf16.msra.mxu1 %v12908_v23  ;;  %19900 = vst [vmem:[#allocation108_spill] sm:$0xff] %v15828_v15  ;;  %v12938_v23 = vld [vmem:[%s19613_s4 + $0xc34] ss:$12 sps:$4 sm:$0xff]   ;;  %v2438_v31 = vrot.slane %v2436_v49, 5 }
 0x245   :  { %6527 = vmatprep.subr.bf16.mxu1 %v12916_v30  ;;  %v12920_v30 = vld [vmem:[%s19613_s4 + $0xb40] ss:$12 sps:$4 sm:$0xff]  }
 0x246   :  { %6619 = vmatpush1.bf16.msra.mxu0 %v12928_v32  ;;  %v13154_v32 = vld [vmem:[#allocation2 + $0x90] sm:$0xff]  ;;  %v12942_v49 = vld [vmem:[%s19613_s4 + $0x140] ss:$12 sps:$4 sm:$0xff]  }
 0x247   :  { %6376 = vmatmul.mubr.bf16.gmra.mxu1 %v15828_v15  ;;  %6620 = vmatprep.subr.bf16.mxu0 %v12933_v41  ;;  %v15847_v44 = vcombine.high %v13154_v32, %v15844_v39  ;;  %v12926_v41 = vld [vmem:[%s19613_s4 + $0x170] ss:$12 sps:$4 sm:$0xff]   ;;  %v15882_v36 = vcombine.low %v13154_v32, %v15844_v39 }
 0x248   :  { %6528 = vmatpush2.bf16.msra.mxu1 %v12914_v47  ;;  %6531 = vmatprep.mubr.bf16.mxu1 %v19901_v59  ;;  %v19903_v47 = vld [vmem:[#allocation20_spill] sm:$0xff]  ;;  %v12936_v15 = vld [vmem:[%s19613_s4 + $0xc30] ss:$12 sps:$4 sm:$0xff]  }
 0x249   :  { %19902 = vst [vmem:[#allocation109_spill] sm:$0xff] %v15847_v44  ;;  %6529 = vmatprep.subr.bf16.mxu1 %v12922_v18  ;;  %6439 = vmatmul.mubr.bf16.gmra.mxu0 %v19903_v47  ;;  %v12941_v18 = vld [vmem:[%s19613_s4 + $0xc1c] ss:$12 sps:$4 sm:$0xff]   ;;  %19905 = vst [vmem:[#allocation110_spill] sm:$0xff] %v15882_v36 }
 0x24a   :  { %6448 = vmatprep.mubr.bf16.mxu0 %v15847_v44  ;;  %6621 = vmatpush1.bf16.msra.mxu0 %v12931_v55  ;;  %v15867_v44 = vpop.f32.mrf.mxu0  ;;  %v12934_v55 = vld [vmem:[%s19613_s4 + $0x158] ss:$12 sps:$4 sm:$0xff]   ;;  %v5865_v9 = vpop.f32.mrf.mxu1 }
 0x24b   :  { %6622 = vmatprep.subr.bf16.mxu0 %v12938_v23  ;;  %v12939_v23 = vld [vmem:[%s19613_s4 + $0xc18] ss:$12 sps:$4 sm:$0xff]   ;;  %v15879_v16 = vadd.f32 %v5865_v9, %v15706_v29 }
 0x24c   :  { %6530 = vmatpush2.bf16.msra.mxu1 %v12920_v30  ;;  %v15875_v19 = vpop.f32.mrf.mxu0  ;;  %v19904_v30 = vld [vmem:[#allocation22_spill] sm:$0xff]  ;;  %v5867_v45 = vpop.f32.mrf.mxu1  ;;  %v19907_v32 = vld [vmem:[#allocation27_spill] sm:$0xff] }
 0x24d   :  { %11610 = vmatprep.subr.bf16.mxu1 %v12926_v41  ;;  %v2435_v41 = vrot.slane %v2433_v43, 4  ;;  %v15894_v29 = vadd.f32 %v5867_v45, %v15727_v26  ;;  %v19920_v59 = vld [vmem:[#allocation39_spill] sm:$0xff] }
 0x24e   :  { %6623 = vmatpush1.bf16.msra.mxu0 %v12936_v15  ;;  %v12946_v15 = vld [vmem:[%s19613_s4 + $0xc04] ss:$12 sps:$4 sm:$0xff]   ;;  %v15891_v9 = vpop.f32.mrf.mxu0  ;;  %v5869_v43 = vpop.f32.mrf.mxu1  ;;  %v19926_v47 = vld [vmem:[#allocation47_spill] sm:$0xff] }
 0x24f   :  { %6532 = vmatmul.mubr.bf16.vlgmr.msra.gmra.mxu1 %v19904_v30  ;;  %6624 = vmatprep.subr.bf16.mxu0 %v12941_v18  ;;  %v12944_v18 = vld [vmem:[%s19613_s4 + $0xc00] ss:$12 sps:$4 sm:$0xff]   ;;  %v15909_v45 = vadd.f32 %v5869_v43, %v15742_v5  ;;  %v2439_v26 = vor.u32 %v2438_v31, %v2435_v41  ;;  %v12950_v31 = vld [vmem:[%s19613_s4 + $0x128] ss:$12 sps:$4 sm:$0xff]   ;;  %v16034_v30 = vcombine.high %v15476_v62, %v15844_v39 }
 0x250   :  { %6541 = vmatprep.mubr.bf16.mxu1 %v19906_v1  ;;  %11611 = vmatpush3.bf16.msra.mxu1 %v12927_v24  ;;  %v15901_v24 = vld [vmem:[#allocation2 + $0x138] sm:$0x11]  ;;  %v19908_v41 = vld [vmem:[#allocation26_spill] sm:$0xff] }
 0x251   :  { %11612 = vmatprep.subr.bf16.mxu1 %v12934_v55  ;;  %6449 = vmatmul.mubr.bf16.gmra.mxu0 %v15882_v36  ;;  %v15906_v55 = vpop.f32.mrf.mxu0  ;;  %v2442_v36 = vshll.u32 %v15901_v24, 16  ;;  %v12963_v1 = vld [vmem:[%s19613_s4 + $0xd08] ss:$12 sps:$4 sm:$0xff]   ;;  %19918 = vst [vmem:[#allocation113_spill] sm:$0xff] %v16034_v30 }
 0x252   :  { %6458 = vmatprep.mubr.bf16.mxu0 %v19907_v32  ;;  %6625 = vmatpush1.bf16.msra.mxu0 %v12939_v23  ;;  %v5871_v23 = vpop.f32.mrf.mxu1  ;;  %v19924_v32 = vld [vmem:[#allocation45_spill] sm:$0xff] }
 0x253   :  { %6626 = vmatprep.subr.bf16.mxu0 %v12946_v15  ;;  %v15919_v2 = vadd.f32 %v5871_v23, %v15760_v35  ;;  %v15921_v5 = vpop.f32.mrf.mxu0  ;;  %v15930_v15 = vrot.slane %v2439_v26, 4  ;;  %v2444_v43 = vrot.slane %v2442_v36, 5  ;;  %v19909_v23 = vld [vmem:[#allocation30_spill] sm:$0xff] }
 0x254   :  { %11613 = vmatpush3.bf16.msra.mxu1 %v12935_v38  ;;  %v12947_v38 = vld [vmem:[%s19613_s4 + $0xd68] ss:$12 sps:$4 sm:$0xff]   ;;  %v12958_v36 = vld [vmem:[%s19613_s4 + $0x110] ss:$12 sps:$4 sm:$0xff]  }
 0x255   :  { %11614 = vmatprep.subr.bf16.mxu1 %v12942_v49  ;;  %v15932_v35 = vpop.f32.mrf.mxu0  ;;  %v12954_v49 = vld [vmem:[%s19613_s4 + $0xd54] ss:$12 sps:$4 sm:$0xff]  }
 0x256   :  { %6627 = vmatpush1.bf16.msra.mxu0 %v12944_v18  ;;  %v12951_v18 = vld [vmem:[%s19613_s4 + $0x68] ss:$12 sps:$4 sm:$0xff]   ;;  %v5875_v52 = vpop.f32.mrf.mxu1 }
 0x257   :  { %6542 = vmatmul.mubr.bf16.gmra.mxu1 %v19908_v41  ;;  %6628 = vmatprep.subr.bf16.mxu0 %v12949_v56  ;;  %v15942_v26 = vpop.f32.mrf.mxu0  ;;  %v15948_v56 = vadd.f32 %v5875_v52, %v15782_v21  ;;  %v12979_v41 = vld [vmem:[%s19613_s4 + $0xc8] ss:$12 sps:$4 sm:$0xff]  }
 0x258   :  { %6551 = vmatprep.mubr.bf16.mxu1 %v19909_v23  ;;  %11615 = vmatpush3.bf16.msra.mxu1 %v12943_v8  ;;  %v12952_v8 = vld [vmem:[%s19613_s4 + $0xd50] ss:$12 sps:$4 sm:$0xff]   ;;  %v5877_v33 = vpop.f32.mrf.mxu1 }
 0x259   :  { %6459 = vmatmul.mubr.bf16.gmra.mxu0 %v19910_v61  ;;  %11616 = vmatprep.subr.bf16.mxu1 %v12950_v31  ;;  %v2445_v31 = vsel %vm14282_vm3, %v15930_v15, %v2444_v43  ;;  %v15961_v52 = vadd.f32 %v5877_v33, %v15805_v0  ;;  %v15963_v21 = vpop.f32.mrf.mxu0  ;;  %v12966_v43 = vld [vmem:[%s19613_s4 + $0xf8] ss:$12 sps:$4 sm:$0xff]  }
 0x25a   :  { %6468 = vmatprep.mubr.bf16.mxu0 %v19911_v17  ;;  %6629 = vmatpush2.bf16.msra.mxu0 %v12947_v38  ;;  %v12959_v38 = vld [vmem:[%s19613_s4 + $0x50] ss:$12 sps:$4 sm:$0xff]   ;;  %v5879_v51 = vpop.f32.mrf.mxu1  ;;  %v12955_v33 = vld [vmem:[%s19613_s4 + $0xd38] ss:$12 sps:$4 sm:$0xff]  }
 0x25b   :  { %6630 = vmatprep.subr.bf16.mxu0 %v12954_v49  ;;  %v15972_v49 = vcombine.high %v15525_v60, %v2445_v31  ;;  %v15975_v40 = vadd.f32 %v5879_v51, %v15824_v58  ;;  %v19913_v0 = vld [vmem:[#allocation31_spill] sm:$0xff]  ;;  %v15988_v51 = vpop.f32.mrf.mxu0 }
 0x25c   :  { %11617 = vmatpush3.bf16.msra.mxu1 %v12951_v18  ;;  %v5881_v18 = vpop.f32.mrf.mxu1  ;;  %v12967_v58 = vld [vmem:[%s19613_s4 + $0x38] ss:$12 sps:$4 sm:$0xff]  }
 0x25d   :  { %11618 = vmatprep.subr.bf16.mxu1 %v12958_v36  ;;  %19912 = vst [vmem:[#allocation111_spill] sm:$0xff] %v15972_v49  ;;  %v12962_v36 = vld [vmem:[%s19613_s4 + $0xd24] ss:$12 sps:$4 sm:$0xff]   ;;  %v15986_v23 = vadd.f32 %v5881_v18, %v15849_v20  ;;  %v12960_v20 = vld [vmem:[%s19613_s4 + $0xd20] ss:$12 sps:$4 sm:$0xff]  }
 0x25e   :  { %6631 = vmatpush2.bf16.msra.mxu0 %v12952_v8  ;;  %v19914_v8 = vld [vmem:[#allocation33_spill] sm:$0xff] }
 0x25f   :  { %6552 = vmatmul.mubr.bf16.gmra.mxu1 %v19913_v0  ;;  %6632 = vmatprep.subr.bf16.mxu0 %v12957_v4  ;;  %v12974_v4 = vld [vmem:[%s19613_s4 + $0xe0] ss:$12 sps:$4 sm:$0xff]   ;;  %v19915_v0 = vld [vmem:[#allocation34_spill] sm:$0xff] }
 0x260   :  { %6561 = vmatprep.mubr.bf16.mxu1 %v15972_v49  ;;  %11619 = vmatpush3.bf16.msra.mxu1 %v12959_v38  ;;  %v15998_v49 = vpop.f32.mrf.mxu0  ;;  %v12965_v38 = vld [vmem:[%s19613_s4 + $0xd0c] ss:$12 sps:$4 sm:$0xff]  }
 0x261   :  { %6469 = vmatmul.mubr.bf16.gmra.mxu0 %v19914_v8  ;;  %11620 = vmatprep.subr.bf16.mxu1 %v12966_v43  ;;  %v12975_v43 = vld [vmem:[%s19613_s4 + $0x20] ss:$12 sps:$4 sm:$0xff]  }
 0x262   :  { %6478 = vmatprep.mubr.bf16.mxu0 %v19915_v0  ;;  %6633 = vmatpush2.bf16.msra.mxu0 %v12955_v33  ;;  %v16006_v18 = vpop.f32.mrf.mxu0  ;;  %v16012_v33 = vcombine.low %v15525_v60, %v2445_v31  ;;  %v12970_v60 = vld [vmem:[%s19613_s4 + $0xcf4] ss:$12 sps:$4 sm:$0xff]   ;;  %v19919_v0 = vld [vmem:[#allocation37_spill] sm:$0xff] }
 0x263   :  { %6634 = vmatprep.subr.bf16.mxu0 %v12962_v36 }
 0x264   :  { %11621 = vmatpush3.bf16.msra.mxu1 %v12967_v58  ;;  %19916 = vst [vmem:[#allocation112_spill] sm:$0xff] %v16012_v33  ;;  %v16017_v36 = vpop.f32.mrf.mxu0 }
 0x265   :  { %11622 = vmatprep.subr.bf16.mxu1 %v12974_v4  ;;  %v19917_v4 = vld [vmem:[#allocation38_spill] sm:$0xff] }
 0x266   :  { %6635 = vmatpush2.bf16.msra.mxu0 %v12960_v20  ;;  %v16030_v20 = vpop.f32.mrf.mxu0 }
 0x267   :  { %v5885_v58 = vpop.f32.mrf.mxu1  ;;  %6562 = vmatmul.mubr.bf16.gmra.mxu1 %v16012_v33  ;;  %6636 = vmatprep.subr.bf16.mxu0 %v12965_v38  ;;  %v12980_v38 = vld [vmem:[%s19613_s4 + $0x8] ss:$12 sps:$4 sm:$0xff]  }
 0x268   :  { %v16027_v31 = vadd.f32 %v5885_v58, %v15867_v44  ;;  %6571 = vmatprep.mubr.bf16.mxu1 %v19917_v4  ;;  %11623 = vmatpush3.bf16.msra.mxu1 %v12975_v43  ;;  %v12982_v44 = vld [vmem:[%s19613_s4 + $0x470] ss:$12 sps:$4 sm:$0xff]   ;;  %v16047_v62 = vpop.f32.mrf.mxu0 }
 0x269   :  { %v5887_v33 = vpop.f32.mrf.mxu1  ;;  %6479 = vmatmul.mubr.bf16.gmra.mxu0 %v19919_v0  ;;  %11624 = vmatprep.subr.bf16.mxu1 %v12979_v41  ;;  %v12968_v43 = vld [vmem:[%s19613_s4 + $0xcf0] ss:$12 sps:$4 sm:$0xff]  }
 0x26a   :  { %v16044_v58 = vadd.f32 %v5887_v33, %v15875_v19  ;;  %6488 = vmatprep.mubr.bf16.mxu0 %v16034_v30  ;;  %6637 = vmatpush2.bf16.msra.mxu0 %v12963_v1  ;;  %v12973_v41 = vld [vmem:[%s19613_s4 + $0xcdc] ss:$12 sps:$4 sm:$0xff]   ;;  %v16058_v19 = vpop.f32.mrf.mxu0 }
 0x26b   :  { %v5889_v4 = vpop.f32.mrf.mxu1  ;;  %6638 = vmatprep.subr.bf16.mxu0 %v12970_v60  ;;  %v12971_v60 = vld [vmem:[%s19613_s4 + $0xcd8] ss:$12 sps:$4 sm:$0xff]  }
 0x26c   :  { %v16056_v0 = vadd.f32 %v5889_v4, %v15891_v9  ;;  %11625 = vmatpush3.bf16.msra.mxu1 %v12980_v38  ;;  %v16063_v30 = vpop.f32.mrf.mxu0  ;;  %v13155_v9 = vld [vmem:[#allocation2 + $0xc0] sm:$0xff] }
 0x26d   :  { %v5891_v33 = vpop.f32.mrf.mxu1  ;;  %11738 = vmatprep.subr.bf16.mxu1 %v12982_v44  ;;  %v16070_v4 = vcombine.low %v13155_v9, %v15844_v39  ;;  %v19922_v44 = vld [vmem:[#allocation41_spill] sm:$0xff]  ;;  %v19923_v39 = vld [vmem:[#allocation44_spill] sm:$0xff]  ;;  %v16088_v9 = vld [vmem:[#allocation2 + $0xb8] sm:$0x11] }
 0x26e   :  { %v16061_v1 = vadd.f32 %v5891_v33, %v15906_v55  ;;  %6639 = vmatpush2.bf16.msra.mxu0 %v12968_v43  ;;  %v12978_v55 = vld [vmem:[%s19613_s4 + $0xcc4] ss:$12 sps:$4 sm:$0xff]   ;;  %v16079_v43 = vpop.f32.mrf.mxu0 }
 0x26f   :  { %v5895_v8 = vpop.f32.mrf.mxu1  ;;  %6572 = vmatmul.mubr.bf16.gmra.mxu1 %v19920_v59  ;;  %19921 = vst [vmem:[#allocation114_spill] sm:$0xff] %v16070_v4  ;;  %6640 = vmatprep.subr.bf16.mxu0 %v12973_v41 }
 0x270   :  { %v16076_v38 = vadd.f32 %v5895_v8, %v15921_v5  ;;  %6581 = vmatprep.mubr.bf16.mxu1 %v19922_v44  ;;  %v16086_v41 = vpop.f32.mrf.mxu0  ;;  %v12976_v5 = vld [vmem:[%s19613_s4 + $0xcc0] ss:$12 sps:$4 sm:$0xff]   ;;  %v2456_v44 = vshll.u32 %v16088_v9, 16 }
 0x271   :  { %v5897_v33 = vpop.f32.mrf.mxu1  ;;  %6489 = vmatmul.mubr.bf16.gmra.mxu0 %v16070_v4 }
 0x272   :  { %v16083_v59 = vadd.f32 %v5897_v33, %v15932_v35  ;;  %6641 = vmatpush2.bf16.msra.mxu0 %v12971_v60  ;;  %6644 = vmatprep.mubr.bf16.mxu0 %v19923_v39  ;;  %v12981_v35 = vld [vmem:[%s19613_s4 + $0x2f0] ss:$12 sps:$4 sm:$0xff]   ;;  %v16100_v33 = vpop.f32.mrf.mxu0  ;;  %v2458_v48 = vrot.slane %v2456_v44, 5  ;;  %v19927_v44 = vld [vmem:[#allocation48_spill] sm:$0xff] }
 0x273   :  { %v5899_v8 = vpop.f32.mrf.mxu1  ;;  %6642 = vmatprep.subr.bf16.mxu0 %v12978_v55  ;;  %v12983_v55 = vld [vmem:[%s19613_s4 + $0x230] ss:$12 sps:$4 sm:$0xff]  }
 0x274   :  { %v16098_v60 = vadd.f32 %v5899_v8, %v15942_v26  ;;  %v16105_v17 = vpop.f32.mrf.mxu0  ;;  %v12985_v26 = vld [vmem:[%s19613_s4 + $0x2d8] ss:$12 sps:$4 sm:$0xff]  }
 0x275   :  { %v5901_v4 = vpop.f32.mrf.mxu1 }
 0x276   :  { %v16103_v39 = vadd.f32 %v5901_v4, %v15963_v21  ;;  %6643 = vmatpush2.bf16.msra.mxu0 %v12976_v5  ;;  %v19925_v21 = vld [vmem:[#allocation46_spill] sm:$0xff] }
 0x277   :  { %v5905_v61 = vpop.f32.mrf.mxu1  ;;  %6582 = vmatmul.mubr.bf16.gmra.mxu1 %v19924_v32  ;;  %11674 = vmatprep.subr.bf16.mxu0 %v12981_v35  ;;  %v5968_v4 = vpop.f32.mrf.mxu0 }
 0x278   :  { %v16115_v8 = vadd.f32 %v5905_v61, %v15988_v51  ;;  %6591 = vmatprep.mubr.bf16.mxu1 %v19925_v21  ;;  %v16119_v13 = vadd.f32 %v5968_v4, %v15777_v27  ;;  %v12987_v61 = vld [vmem:[%s19613_s4 + $0x218] ss:$12 sps:$4 sm:$0xff]   ;;  %v2459_v21 = vsel %vm14282_vm3, %v15930_v15, %v2458_v48 }
 0x279   :  { %v5907_v5 = vpop.f32.mrf.mxu1  ;;  %6645 = vmatmul.mubr.bf16.vlgmr.msra.gmra.mxu0 %v19926_v47  ;;  %v5970_v35 = vpop.f32.mrf.mxu0  ;;  %v16148_v48 = vcombine.high %v15669_v37, %v2459_v21  ;;  %v2055_v15 = vld [vmem:[#allocation2 + $0xf8] sm:$0xee] }
 0x27a   :  { %v16123_v32 = vadd.f32 %v5907_v5, %v15998_v49  ;;  %6654 = vmatprep.mubr.bf16.mxu0 %v19927_v44  ;;  %11675 = vmatpush3.bf16.msra.mxu0 %v12983_v55  ;;  %v16133_v27 = vadd.f32 %v5970_v35, %v15792_v7  ;;  %v12989_v49 = vld [vmem:[%s19613_s4 + $0x2c0] ss:$12 sps:$4 sm:$0xff]  }
 0x27b   :  { %v5909_v51 = vpop.f32.mrf.mxu1  ;;  %11676 = vmatprep.subr.bf16.mxu0 %v12985_v26  ;;  %v5972_v55 = vpop.f32.mrf.mxu0  ;;  %19928 = vst [vmem:[#allocation115_spill] sm:$0xff] %v16148_v48  ;;  %v12991_v26 = vld [vmem:[%s19613_s4 + $0x200] ss:$12 sps:$4 sm:$0xff]  }
 0x27c   :  { %v16139_v4 = vadd.f32 %v5909_v51, %v16006_v18  ;;  %v16142_v44 = vadd.f32 %v5972_v55, %v15803_v11  ;;  %v19929_v35 = vld [vmem:[#allocation49_spill] sm:$0xff] }
 0x27d   :  { %v5911_v5 = vpop.f32.mrf.mxu1  ;;  %v5974_v7 = vpop.f32.mrf.mxu0  ;;  %v12993_v11 = vld [vmem:[%s19613_s4 + $0x2a8] ss:$12 sps:$4 sm:$0xff]  }
 0x27e   :  { %v16145_v47 = vadd.f32 %v5911_v5, %v16017_v36  ;;  %11677 = vmatpush3.bf16.msra.mxu0 %v12987_v61  ;;  %v16155_v51 = vadd.f32 %v5974_v7, %v15816_v22  ;;  %v2466_v22 = vrot.slane %v15901_v24, 5  ;;  %v12997_v24 = vld [vmem:[%s19613_s4 + $0x290] ss:$12 sps:$4 sm:$0xff]  }
 0x27f   :  { %v5915_v18 = vpop.f32.mrf.mxu1  ;;  %6592 = vmatmul.mubr.bf16.gmra.mxu1 %v19929_v35  ;;  %11678 = vmatprep.subr.bf16.mxu0 %v12989_v49  ;;  %v5978_v61 = vpop.f32.mrf.mxu0  ;;  %v10746_v35 = vrot.slane %v2055_v15, 9 }
 0x280   :  { %v16161_v36 = vadd.f32 %v5915_v18, %v16030_v20  ;;  %6601 = vmatprep.mubr.bf16.mxu1 %v16148_v48  ;;  %v16165_v5 = vadd.f32 %v5978_v61, %v15879_v16  ;;  %v12995_v20 = vld [vmem:[%s19613_s4 + $0x1e8] ss:$12 sps:$4 sm:$0xff]   ;;  %v16186_v61 = vcombine.low %v15669_v37, %v2459_v21  ;;  %v19932_v21 = vld [vmem:[#allocation11_spill] sm:$0xff] }
 0x281   :  { %v5917_v55 = vpop.f32.mrf.mxu1  ;;  %6655 = vmatmul.mubr.bf16.gmra.mxu0 %v19930_v63  ;;  %v5980_v7 = vpop.f32.mrf.mxu0 }
 0x282   :  { %v16170_v49 = vadd.f32 %v5917_v55, %v16047_v62  ;;  %6664 = vmatprep.mubr.bf16.mxu0 %v15109_v54  ;;  %11679 = vmatpush3.bf16.msra.mxu0 %v12991_v26  ;;  %v16177_v16 = vadd.f32 %v5980_v7, %v15894_v29  ;;  %19931 = vst [vmem:[#allocation116_spill] sm:$0xff] %v16186_v61 }
 0x283   :  { %v5919_v18 = vpop.f32.mrf.mxu1  ;;  %11680 = vmatprep.subr.bf16.mxu0 %v12993_v11  ;;  %v5982_v15 = vpop.f32.mrf.mxu0  ;;  %v2467_v29 = vsel %vm14847_vm6, %v10746_v35, %v2466_v22 }
 0x284   :  { %v16183_v62 = vadd.f32 %v5919_v18, %v16058_v19  ;;  %v16189_v55 = vadd.f32 %v5982_v15, %v15909_v45  ;;  %v12999_v19 = vld [vmem:[%s19613_s4 + $0x1d0] ss:$12 sps:$4 sm:$0xff]   ;;  %v13001_v45 = vld [vmem:[%s19613_s4 + $0x278] ss:$12 sps:$4 sm:$0xff]   ;;  %v16211_v22 = vcombine.high %v15621_v25, %v2467_v29 }
 0x285   :  { %v5921_v26 = vpop.f32.mrf.mxu1  ;;  %v5984_v7 = vpop.f32.mrf.mxu0 }
 0x286   :  { %v16194_v11 = vadd.f32 %v5921_v26, %v16063_v30  ;;  %11681 = vmatpush3.bf16.msra.mxu0 %v12995_v20  ;;  %v16201_v37 = vadd.f32 %v5984_v7, %v15919_v2  ;;  %19933 = vst [vmem:[#allocation11_spill] sm:$0xff] %v16211_v22 }
 0x287   :  { %v5925_v18 = vpop.f32.mrf.mxu1  ;;  %6602 = vmatmul.mubr.bf16.gmra.mxu1 %v16186_v61  ;;  %11682 = vmatprep.subr.bf16.mxu0 %v12997_v24  ;;  %v5988_v35 = vpop.f32.mrf.mxu0  ;;  %v16250_v61 = vcombine.low %v15621_v25, %v2467_v29 }
 0x288   :  { %v16207_v30 = vadd.f32 %v5925_v18, %v16079_v43  ;;  %6757 = vmatprep.mubr.bf16.mxu1 %v19932_v21  ;;  %v16214_v15 = vadd.f32 %v5988_v35, %v15948_v56  ;;  %v13003_v43 = vld [vmem:[%s19613_s4 + $0x1b8] ss:$12 sps:$4 sm:$0xff]   ;;  %v13005_v56 = vld [vmem:[%s19613_s4 + $0x260] ss:$12 sps:$4 sm:$0xff]  }
 0x289   :  { %v5927_v20 = vpop.f32.mrf.mxu1  ;;  %6665 = vmatmul.mubr.bf16.gmra.mxu0 %v15217_v46  ;;  %v5990_v24 = vpop.f32.mrf.mxu0  ;;  %v12986_v35 = vld [vmem:[%s19613_s4 + $0x458] ss:$12 sps:$4 sm:$0xff]  }
 0x28a   :  { %v16218_v2 = vadd.f32 %v5927_v20, %v16086_v41  ;;  %6674 = vmatprep.mubr.bf16.mxu0 %v16211_v22  ;;  %11683 = vmatpush3.bf16.msra.mxu0 %v12999_v19  ;;  %v16225_v7 = vadd.f32 %v5990_v24, %v15961_v52  ;;  %v12984_v19 = vld [vmem:[%s19613_s4 + $0x3b0] ss:$12 sps:$4 sm:$0xff]  }
 0x28b   :  { %v5929_v26 = vpop.f32.mrf.mxu1  ;;  %11684 = vmatprep.subr.bf16.mxu0 %v13001_v45  ;;  %v5992_v18 = vpop.f32.mrf.mxu0 }
 0x28c   :  { %v16231_v41 = vadd.f32 %v5929_v26, %v16100_v33  ;;  %v16240_v52 = vadd.f32 %v5992_v18, %v15975_v40  ;;  %v13006_v33 = vld [vmem:[%s19613_s4 + $0x1a0] ss:$12 sps:$4 sm:$0xff]  }
 0x28d   :  { %v5931_v21 = vpop.f32.mrf.mxu1  ;;  %v5994_v20 = vpop.f32.mrf.mxu0  ;;  %v19934_v26 = vld [vmem:[#allocation12_spill] sm:$0xff] }
 0x28e   :  { %v16243_v45 = vadd.f32 %v5931_v21, %v16105_v17  ;;  %11685 = vmatpush3.bf16.msra.mxu0 %v13003_v43  ;;  %19935 = vst [vmem:[#allocation12_spill] sm:$0xff] %v16250_v61  ;;  %v16253_v48 = vadd.f32 %v5994_v20, %v15986_v23  ;;  %v13009_v17 = vld [vmem:[%s19613_s4 + $0x248] ss:$12 sps:$4 sm:$0xff]   ;;  %v12988_v43 = vld [vmem:[%s19613_s4 + $0x398] ss:$12 sps:$4 sm:$0xff]  }
 0x28f   :  { %v6081_v24 = vpop.f32.mrf.mxu1  ;;  %6758 = vmatmul.mubr.bf16.vlgmr.msra.gmra.mxu1 %v19934_v26  ;;  %11686 = vmatprep.subr.bf16.mxu0 %v13005_v56  ;;  %v5998_v29 = vpop.f32.mrf.mxu0  ;;  %v12990_v23 = vld [vmem:[%s19613_s4 + $0x440] ss:$12 sps:$4 sm:$0xff]   ;;  %v12994_v26 = vld [vmem:[%s19613_s4 + $0x428] ss:$12 sps:$4 sm:$0xff]  }
 0x290   :  { %v16259_v40 = vadd.f32 %v6081_v24, %v16119_v13  ;;  %6765 = vmatprep.mubr.bf16.mxu1 %v14367_v6  ;;  %11739 = vmatpush3.bf16.msra.mxu1 %v12984_v19  ;;  %v16273_v13 = vadd.f32 %v5998_v29, %v16027_v31  ;;  %v13010_v19 = vld [vmem:[%s19613_s4 + $0x188] ss:$12 sps:$4 sm:$0xff]   ;;  %v12992_v20 = vld [vmem:[%s19613_s4 + $0x380] ss:$12 sps:$4 sm:$0xff]   ;;  %v13066_v6 = vld [vmem:[%s19613_s4 + $0x9f8] ss:$12 sps:$4 sm:$0xff]  }
 0x291   :  { %v6083_v25 = vpop.f32.mrf.mxu1  ;;  %11740 = vmatprep.subr.bf16.mxu1 %v12986_v35  ;;  %6675 = vmatmul.mubr.bf16.gmra.mxu0 %v16250_v61  ;;  %v6000_v21 = vpop.f32.mrf.mxu0  ;;  %v13013_v35 = vld [vmem:[%s19613_s4 + $0x5f0] ss:$12 sps:$4 sm:$0xff]  }
 0x292   :  { %v16270_v56 = vadd.f32 %v6083_v25, %v16133_v27  ;;  %6684 = vmatprep.mubr.bf16.mxu0 %v15302_v14  ;;  %11687 = vmatpush3.bf16.msra.mxu0 %v13006_v33  ;;  %v16286_v31 = vadd.f32 %v6000_v21, %v16044_v58 }
 0x293   :  { %v6085_v18 = vpop.f32.mrf.mxu1  ;;  %11688 = vmatprep.subr.bf16.mxu0 %v13009_v17  ;;  %v6002_v24 = vpop.f32.mrf.mxu0 }
 0x294   :  { %v16283_v27 = vadd.f32 %v6085_v18, %v16142_v44  ;;  %11741 = vmatpush3.bf16.msra.mxu1 %v12988_v43  ;;  %v16298_v44 = vadd.f32 %v6002_v24, %v16056_v0  ;;  %v12996_v0 = vld [vmem:[%s19613_s4 + $0x368] ss:$12 sps:$4 sm:$0xff]  }
 0x295   :  { %v6087_v33 = vpop.f32.mrf.mxu1  ;;  %11742 = vmatprep.subr.bf16.mxu1 %v12990_v23  ;;  %v6004_v43 = vpop.f32.mrf.mxu0 }
 0x296   :  { %v16295_v17 = vadd.f32 %v6087_v33, %v16155_v51  ;;  %11689 = vmatpush3.bf16.msra.mxu0 %v13010_v19  ;;  %v16306_v29 = vadd.f32 %v6004_v43, %v16061_v1  ;;  %v13000_v33 = vld [vmem:[%s19613_s4 + $0x350] ss:$12 sps:$4 sm:$0xff]  }
 0x297   :  { %v6091_v58 = vpop.f32.mrf.mxu1  ;;  %6766 = vmatmul.mubr.bf16.gmra.mxu1 %v14384_v3  ;;  %11802 = vmatprep.subr.bf16.mxu0 %v13013_v35  ;;  %v19997_v3 = vld [vmem:[#allocation94_spill] sm:$0xff] }
 0x298   :  { %v16302_v25 = vadd.f32 %v6091_v58, %v16165_v5  ;;  %6773 = vmatprep.mubr.bf16.mxu1 %v14431_v28  ;;  %11743 = vmatpush3.bf16.msra.mxu1 %v12992_v20  ;;  %v12998_v5 = vld [vmem:[%s19613_s4 + $0x410] ss:$12 sps:$4 sm:$0xff]  }
 0x299   :  { %v6093_v51 = vpop.f32.mrf.mxu1  ;;  %v6008_v23 = vpop.f32.mrf.mxu0  ;;  %6685 = vmatmul.mubr.bf16.gmra.mxu0 %v15333_v42  ;;  %11744 = vmatprep.subr.bf16.mxu1 %v12994_v26  ;;  %v19996_v28 = vld [vmem:[#allocation62_spill] sm:$0xff] }
 0x29a   :  { %v16316_v19 = vadd.f32 %v6093_v51, %v16177_v16  ;;  %v16319_v18 = vadd.f32 %v6008_v23, %v16076_v38  ;;  %6694 = vmatprep.mubr.bf16.mxu0 %v15347_v57  ;;  %v13002_v38 = vld [vmem:[%s19613_s4 + $0x3f8] ss:$12 sps:$4 sm:$0xff]  }
 0x29b   :  { %v6095_v1 = vpop.f32.mrf.mxu1  ;;  %v6010_v21 = vpop.f32.mrf.mxu0 }
 0x29c   :  { %v16323_v35 = vadd.f32 %v6095_v1, %v16189_v55  ;;  %v16326_v20 = vadd.f32 %v6010_v21, %v16083_v59  ;;  %11745 = vmatpush3.bf16.msra.mxu1 %v12996_v0  ;;  %v2065_v59 = vld [vmem:[#allocation2 + $0x88] sm:$0xee]  ;;  %v2470_v1 = vrot.slane %v16088_v9, 5 }
 0x29d   :  { %v6097_v16 = vpop.f32.mrf.mxu1  ;;  %v6012_v24 = vpop.f32.mrf.mxu0  ;;  %11746 = vmatprep.subr.bf16.mxu1 %v12998_v5  ;;  %v10747_v5 = vrot.slane %v2065_v59, 9 }
 0x29e   :  { %v16335_v26 = vadd.f32 %v6097_v16, %v16201_v37  ;;  %v16338_v55 = vadd.f32 %v6012_v24, %v16098_v60  ;;  %v13004_v37 = vld [vmem:[%s19613_s4 + $0x338] ss:$12 sps:$4 sm:$0xff]  }
 0x29f   :  { %v6101_v58 = vpop.f32.mrf.mxu1  ;;  %6774 = vmatmul.mubr.bf16.gmra.mxu1 %v14491_v10  ;;  %v6014_v43 = vpop.f32.mrf.mxu0 }
 0x2a0   :  { %v16342_v0 = vadd.f32 %v6101_v58, %v16214_v15  ;;  %6781 = vmatprep.mubr.bf16.mxu1 %v19899_v53  ;;  %v16346_v51 = vadd.f32 %v6014_v43, %v16103_v39  ;;  %11747 = vmatpush3.bf16.msra.mxu1 %v13000_v33  ;;  %v13007_v15 = vld [vmem:[%s19613_s4 + $0x3e0] ss:$12 sps:$4 sm:$0xff]   ;;  %v13011_v58 = vld [vmem:[%s19613_s4 + $0x3c8] ss:$12 sps:$4 sm:$0xff]  }
 0x2a1   :  { %v6103_v60 = vpop.f32.mrf.mxu1  ;;  %v6018_v23 = vpop.f32.mrf.mxu0  ;;  %6695 = vmatmul.mubr.bf16.gmra.mxu0 %v15382_v12  ;;  %11748 = vmatprep.subr.bf16.mxu1 %v13002_v38  ;;  %v13008_v38 = vld [vmem:[%s19613_s4 + $0x320] ss:$12 sps:$4 sm:$0xff]  }
 0x2a2   :  { %v16357_v39 = vadd.f32 %v6103_v60, %v16225_v7  ;;  %v16360_v21 = vadd.f32 %v6018_v23, %v16115_v8  ;;  %6704 = vmatprep.mubr.bf16.mxu0 %v15393_v50  ;;  %v2471_v8 = vsel %vm14847_vm6, %v10747_v5, %v2470_v1  ;;  %v19938_v1 = vld [vmem:[#allocation106_spill] sm:$0xff]  ;;  %v19995_v53 = vld [vmem:[#allocation61_spill] sm:$0xff] }
 0x2a3   :  { %v6105_v33 = vpop.f32.mrf.mxu1  ;;  %v6020_v16 = vpop.f32.mrf.mxu0 }
 0x2a4   :  { %v16364_v24 = vadd.f32 %v6105_v33, %v16240_v52  ;;  %v16367_v9 = vadd.f32 %v6020_v16, %v16123_v32  ;;  %11749 = vmatpush3.bf16.msra.mxu1 %v13004_v37  ;;  %v19936_v37 = vld [vmem:[#allocation20_spill] sm:$0xff]  ;;  %v19937_v33 = vld [vmem:[#allocation23_spill] sm:$0xff] }
 0x2a5   :  { %v6107_v7 = vpop.f32.mrf.mxu1  ;;  %v6022_v59 = vpop.f32.mrf.mxu0  ;;  %11750 = vmatprep.subr.bf16.mxu1 %v13007_v15  ;;  %v16392_v15 = vcombine.high %v19938_v1, %v2471_v8 }
 0x2a6   :  { %v16378_v52 = vadd.f32 %v6107_v7, %v16253_v48  ;;  %v16381_v32 = vadd.f32 %v6022_v59, %v16139_v4  ;;  %v13012_v4 = vld [vmem:[%s19613_s4 + $0x308] ss:$12 sps:$4 sm:$0xff]   ;;  %v19940_v7 = vld [vmem:[#allocation95_spill] sm:$0xff] }
 0x2a7   :  { %v6111_v43 = vpop.f32.mrf.mxu1  ;;  %6782 = vmatmul.mubr.bf16.gmra.mxu1 %v19936_v37  ;;  %v6024_v60 = vpop.f32.mrf.mxu0  ;;  %19939 = vst [vmem:[#allocation23_spill] sm:$0xff] %v16392_v15 }
 0x2a8   :  { %v16385_v23 = vadd.f32 %v6111_v43, %v16273_v13  ;;  %6789 = vmatprep.mubr.bf16.mxu1 %v19937_v33  ;;  %v16389_v5 = vadd.f32 %v6024_v60, %v16145_v47  ;;  %11751 = vmatpush3.bf16.msra.mxu1 %v13008_v38  ;;  %v13014_v13 = vld [vmem:[%s19613_s4 + $0x770] ss:$12 sps:$4 sm:$0xff]  }
 0x2a9   :  { %v6113_v48 = vpop.f32.mrf.mxu1  ;;  %v6028_v16 = vpop.f32.mrf.mxu0  ;;  %6705 = vmatmul.mubr.bf16.gmra.mxu0 %v19940_v7  ;;  %11752 = vmatprep.subr.bf16.mxu1 %v13011_v58 }
 0x2aa   :  { %v16402_v47 = vadd.f32 %v6113_v48, %v16286_v31  ;;  %v16405_v59 = vadd.f32 %v6028_v16, %v16161_v36  ;;  %6714 = vmatprep.mubr.bf16.mxu0 %v16392_v15  ;;  %v19941_v16 = vld [vmem:[#allocation24_spill] sm:$0xff]  ;;  %v16422_v15 = vcombine.low %v19938_v1, %v2471_v8  ;;  %v19944_v8 = vld [vmem:[#allocation17_spill] sm:$0xff] }
 0x2ab   :  { %v6115_v38 = vpop.f32.mrf.mxu1  ;;  %v6030_v43 = vpop.f32.mrf.mxu0 }
 0x2ac   :  { %v16409_v60 = vadd.f32 %v6115_v38, %v16298_v44  ;;  %v16412_v33 = vadd.f32 %v6030_v43, %v16170_v49  ;;  %11753 = vmatpush3.bf16.msra.mxu1 %v13012_v4  ;;  %19942 = vst [vmem:[#allocation106_spill] sm:$0xff] %v16422_v15  ;;  %v19943_v4 = vld [vmem:[#allocation27_spill] sm:$0xff] }
 0x2ad   :  { %v6117_v58 = vpop.f32.mrf.mxu1  ;;  %v6032_v61 = vpop.f32.mrf.mxu0  ;;  %11866 = vmatprep.subr.bf16.mxu1 %v13014_v13 }
 0x2ae   :  { %v16415_v31 = vadd.f32 %v6117_v58, %v16306_v29  ;;  %v16418_v36 = vadd.f32 %v6032_v61, %v16183_v62 }
 0x2af   :  { %v6121_v48 = vpop.f32.mrf.mxu1  ;;  %6790 = vmatmul.mubr.bf16.gmra.mxu1 %v19941_v16  ;;  %v6034_v44 = vpop.f32.mrf.mxu0 }
 0x2b0   :  { %v16425_v49 = vadd.f32 %v6121_v48, %v16319_v18  ;;  %6797 = vmatprep.mubr.bf16.mxu1 %v19943_v4  ;;  %v16429_v13 = vadd.f32 %v6034_v44, %v16194_v11 }
 0x2b1   :  { %v6123_v29 = vpop.f32.mrf.mxu1  ;;  %v6038_v38 = vpop.f32.mrf.mxu0  ;;  %6715 = vmatmul.mubr.bf16.gmra.mxu0 %v16422_v15  ;;  %v19948_v15 = vld [vmem:[#allocation21_spill] sm:$0xff] }
 0x2b2   :  { %v16433_v62 = vadd.f32 %v6123_v29, %v16326_v20  ;;  %v16436_v61 = vadd.f32 %v6038_v38, %v16207_v30  ;;  %6854 = vmatprep.mubr.bf16.mxu0 %v19944_v8  ;;  %v13015_v30 = vld [vmem:[%s19613_s4 + $0x530] ss:$12 sps:$4 sm:$0xff]   ;;  %v19945_v29 = vld [vmem:[#allocation28_spill] sm:$0xff] }
 0x2b3   :  { %v6125_v1 = vpop.f32.mrf.mxu1  ;;  %v6040_v18 = vpop.f32.mrf.mxu0 }
 0x2b4   :  { %v16440_v43 = vadd.f32 %v6125_v1, %v16338_v55  ;;  %v16443_v11 = vadd.f32 %v6040_v18, %v16218_v2  ;;  %v13017_v2 = vld [vmem:[%s19613_s4 + $0x5d8] ss:$12 sps:$4 sm:$0xff]  }
 0x2b5   :  { %v6127_v58 = vpop.f32.mrf.mxu1  ;;  %v6042_v48 = vpop.f32.mrf.mxu0  ;;  %v19947_v18 = vld [vmem:[#allocation16_spill] sm:$0xff] }
 0x2b6   :  { %v16446_v16 = vadd.f32 %v6127_v58, %v16346_v51  ;;  %v16449_v20 = vadd.f32 %v6042_v48, %v16231_v41  ;;  %v19946_v51 = vld [vmem:[#allocation29_spill] sm:$0xff] }
 0x2b7   :  { %v6131_v44 = vpop.f32.mrf.mxu1  ;;  %6798 = vmatmul.mubr.bf16.gmra.mxu1 %v19945_v29  ;;  %v6044_v55 = vpop.f32.mrf.mxu0 }
 0x2b8   :  { %v16459_v38 = vadd.f32 %v6131_v44, %v16360_v21  ;;  %6805 = vmatprep.mubr.bf16.mxu1 %v19946_v51  ;;  %v16463_v41 = vadd.f32 %v6044_v55, %v16243_v45  ;;  %v13019_v21 = vld [vmem:[%s19613_s4 + $0x518] ss:$12 sps:$4 sm:$0xff]   ;;  %v13021_v55 = vld [vmem:[%s19613_s4 + $0x5c0] ss:$12 sps:$4 sm:$0xff]  }
 0x2b9   :  { %v6133_v8 = vpop.f32.mrf.mxu1  ;;  %v6194_v1 = vpop.f32.mrf.mxu0  ;;  %6855 = vmatmul.mubr.bf16.vlgmr.msra.gmra.mxu0 %v19947_v18  ;;  %v19994_v51 = vld [vmem:[#allocation91_spill] sm:$0xff] }
 0x2ba   :  { %v16467_v58 = vadd.f32 %v6133_v8, %v16367_v9  ;;  %v16470_v48 = vadd.f32 %v6194_v1, %v16259_v40  ;;  %6862 = vmatprep.mubr.bf16.mxu0 %v19948_v15  ;;  %11803 = vmatpush3.bf16.msra.mxu0 %v13015_v30 }
 0x2bb   :  { %v6135_v44 = vpop.f32.mrf.mxu1  ;;  %v6196_v45 = vpop.f32.mrf.mxu0  ;;  %11804 = vmatprep.subr.bf16.mxu0 %v13017_v2  ;;  %v13023_v2 = vld [vmem:[%s19613_s4 + $0x500] ss:$12 sps:$4 sm:$0xff]  }
 0x2bc   :  { %v16480_v9 = vadd.f32 %v6135_v44, %v16381_v32  ;;  %v16483_v40 = vadd.f32 %v6196_v45, %v16270_v56  ;;  %v13025_v56 = vld [vmem:[%s19613_s4 + $0x5a8] ss:$12 sps:$4 sm:$0xff]  }
 0x2bd   :  { %v6137_v8 = vpop.f32.mrf.mxu1  ;;  %v6198_v1 = vpop.f32.mrf.mxu0  ;;  %v19950_v44 = vld [vmem:[#allocation34_spill] sm:$0xff] }
 0x2be   :  { %v16486_v30 = vadd.f32 %v6137_v8, %v16389_v5  ;;  %v16489_v18 = vadd.f32 %v6198_v1, %v16283_v27  ;;  %11805 = vmatpush3.bf16.msra.mxu0 %v13019_v21  ;;  %v19951_v8 = vld [vmem:[#allocation22_spill] sm:$0xff] }
 0x2bf   :  { %v6141_v22 = vpop.f32.mrf.mxu1  ;;  %6806 = vmatmul.mubr.bf16.gmra.mxu1 %v19949_v34  ;;  %v6200_v32 = vpop.f32.mrf.mxu0  ;;  %11806 = vmatprep.subr.bf16.mxu0 %v13021_v55  ;;  %v19952_v34 = vld [vmem:[#allocation25_spill] sm:$0xff] }
 0x2c0   :  { %v16499_v5 = vadd.f32 %v6141_v22, %v16405_v59  ;;  %6813 = vmatprep.mubr.bf16.mxu1 %v19950_v44  ;;  %v16503_v27 = vadd.f32 %v6200_v32, %v16295_v17  ;;  %v13027_v22 = vld [vmem:[%s19613_s4 + $0x4e8] ss:$12 sps:$4 sm:$0xff]   ;;  %v13029_v32 = vld [vmem:[%s19613_s4 + $0x590] ss:$12 sps:$4 sm:$0xff]  }
 0x2c1   :  { %v6143_v21 = vpop.f32.mrf.mxu1  ;;  %v6204_v45 = vpop.f32.mrf.mxu0  ;;  %6863 = vmatmul.mubr.bf16.gmra.mxu0 %v19951_v8  ;;  %v19953_v44 = vld [vmem:[#allocation37_spill] sm:$0xff] }
 0x2c2   :  { %v16507_v1 = vadd.f32 %v6143_v21, %v16412_v33  ;;  %v16510_v55 = vadd.f32 %v6204_v45, %v16302_v25  ;;  %6870 = vmatprep.mubr.bf16.mxu0 %v19952_v34  ;;  %11807 = vmatpush3.bf16.msra.mxu0 %v13023_v2 }
 0x2c3   :  { %v6145_v59 = vpop.f32.mrf.mxu1  ;;  %v6206_v17 = vpop.f32.mrf.mxu0  ;;  %11808 = vmatprep.subr.bf16.mxu0 %v13025_v56  ;;  %v13031_v56 = vld [vmem:[%s19613_s4 + $0x4d0] ss:$12 sps:$4 sm:$0xff]  }
 0x2c4   :  { %v16520_v33 = vadd.f32 %v6145_v59, %v16418_v36  ;;  %v16523_v25 = vadd.f32 %v6206_v17, %v16316_v19  ;;  %v13033_v19 = vld [vmem:[%s19613_s4 + $0x578] ss:$12 sps:$4 sm:$0xff]  }
 0x2c5   :  { %v6147_v21 = vpop.f32.mrf.mxu1  ;;  %v6208_v45 = vpop.f32.mrf.mxu0  ;;  %v19954_v59 = vld [vmem:[#allocation40_spill] sm:$0xff] }
 0x2c6   :  { %v16526_v2 = vadd.f32 %v6147_v21, %v16429_v13  ;;  %v16529_v34 = vadd.f32 %v6208_v45, %v16323_v35  ;;  %11809 = vmatpush3.bf16.msra.mxu0 %v13027_v22  ;;  %v19955_v21 = vld [vmem:[#allocation26_spill] sm:$0xff] }
 0x2c7   :  { %v6151_v8 = vpop.f32.mrf.mxu1  ;;  %6814 = vmatmul.mubr.bf16.gmra.mxu1 %v19953_v44  ;;  %v6210_v36 = vpop.f32.mrf.mxu0  ;;  %11810 = vmatprep.subr.bf16.mxu0 %v13029_v32  ;;  %v19956_v44 = vld [vmem:[#allocation30_spill] sm:$0xff] }
 0x2c8   :  { %v16539_v13 = vadd.f32 %v6151_v8, %v16436_v61  ;;  %6951 = vmatprep.mubr.bf16.mxu1 %v19954_v59  ;;  %v16543_v35 = vadd.f32 %v6210_v36, %v16335_v26  ;;  %v13035_v61 = vld [vmem:[%s19613_s4 + $0x4b8] ss:$12 sps:$4 sm:$0xff]   ;;  %v13037_v36 = vld [vmem:[%s19613_s4 + $0x560] ss:$12 sps:$4 sm:$0xff]  }
 0x2c9   :  { %v6153_v22 = vpop.f32.mrf.mxu1  ;;  %v6214_v17 = vpop.f32.mrf.mxu0  ;;  %6871 = vmatmul.mubr.bf16.gmra.mxu0 %v19955_v21  ;;  %v13041_v21 = vld [vmem:[%s19613_s4 + $0x548] ss:$12 sps:$4 sm:$0xff]  }
 0x2ca   :  { %v16547_v45 = vadd.f32 %v6153_v22, %v16443_v11  ;;  %v16550_v32 = vadd.f32 %v6214_v17, %v16342_v0  ;;  %6878 = vmatprep.mubr.bf16.mxu0 %v19956_v44  ;;  %11811 = vmatpush3.bf16.msra.mxu0 %v13031_v56  ;;  %v13016_v0 = vld [vmem:[%s19613_s4 + $0x6b0] ss:$12 sps:$4 sm:$0xff]   ;;  %v13018_v22 = vld [vmem:[%s19613_s4 + $0x758] ss:$12 sps:$4 sm:$0xff]  }
 0x2cb   :  { %v6155_v8 = vpop.f32.mrf.mxu1  ;;  %v6216_v26 = vpop.f32.mrf.mxu0  ;;  %11812 = vmatprep.subr.bf16.mxu0 %v13033_v19 }
 0x2cc   :  { %v16560_v11 = vadd.f32 %v6155_v8, %v16449_v20  ;;  %v16566_v56 = vadd.f32 %v6216_v26, %v16357_v39  ;;  %v13038_v20 = vld [vmem:[%s19613_s4 + $0x4a0] ss:$12 sps:$4 sm:$0xff]   ;;  %v19957_v39 = vld [vmem:[#allocation42_spill] sm:$0xff] }
 0x2cd   :  { %v6157_v59 = vpop.f32.mrf.mxu1  ;;  %v6218_v19 = vpop.f32.mrf.mxu0 }
 0x2ce   :  { %v16572_v17 = vadd.f32 %v6157_v59, %v16463_v41  ;;  %v16575_v44 = vadd.f32 %v6218_v19, %v16364_v24  ;;  %11813 = vmatpush3.bf16.msra.mxu0 %v13035_v61  ;;  %v19958_v59 = vld [vmem:[#allocation44_spill] sm:$0xff] }
 0x2cf   :  { %v6307_v8 = vpop.f32.mrf.mxu1  ;;  %6952 = vmatmul.mubr.bf16.vlgmr.msra.gmra.mxu1 %v19957_v39  ;;  %v6220_v26 = vpop.f32.mrf.mxu0  ;;  %11814 = vmatprep.subr.bf16.mxu0 %v13037_v36  ;;  %v13020_v24 = vld [vmem:[%s19613_s4 + $0x698] ss:$12 sps:$4 sm:$0xff]  }
 0x2d0   :  { %v16585_v41 = vadd.f32 %v6307_v8, %v16470_v48  ;;  %6959 = vmatprep.mubr.bf16.mxu1 %v19958_v59  ;;  %11867 = vmatpush3.bf16.msra.mxu1 %v13016_v0  ;;  %v16592_v61 = vadd.f32 %v6220_v26, %v16378_v52  ;;  %v19959_v39 = vld [vmem:[#allocation31_spill] sm:$0xff]  ;;  %v13022_v48 = vld [vmem:[%s19613_s4 + $0x740] ss:$12 sps:$4 sm:$0xff]   ;;  %v13042_v52 = vld [vmem:[%s19613_s4 + $0x488] ss:$12 sps:$4 sm:$0xff]  }
 0x2d1   :  { %v6309_v19 = vpop.f32.mrf.mxu1  ;;  %11868 = vmatprep.subr.bf16.mxu1 %v13018_v22  ;;  %v6224_v36 = vpop.f32.mrf.mxu0  ;;  %6879 = vmatmul.mubr.bf16.gmra.mxu0 %v19959_v39  ;;  %v19960_v59 = vld [vmem:[#allocation35_spill] sm:$0xff] }
 0x2d2   :  { %v16599_v8 = vadd.f32 %v6309_v19, %v16483_v40  ;;  %v16602_v0 = vadd.f32 %v6224_v36, %v16385_v23  ;;  %6886 = vmatprep.mubr.bf16.mxu0 %v19960_v59  ;;  %11815 = vmatpush3.bf16.msra.mxu0 %v13038_v20  ;;  %v13045_v39 = vld [vmem:[%s19613_s4 + $0x8f0] ss:$12 sps:$4 sm:$0xff]   ;;  %v13024_v20 = vld [vmem:[%s19613_s4 + $0x680] ss:$12 sps:$4 sm:$0xff]  }
 0x2d3   :  { %v6311_v22 = vpop.f32.mrf.mxu1  ;;  %v6226_v26 = vpop.f32.mrf.mxu0  ;;  %11816 = vmatprep.subr.bf16.mxu0 %v13041_v21  ;;  %v13026_v21 = vld [vmem:[%s19613_s4 + $0x728] ss:$12 sps:$4 sm:$0xff]  }
 0x2d4   :  { %v16612_v40 = vadd.f32 %v6311_v22, %v16489_v18  ;;  %11869 = vmatpush3.bf16.msra.mxu1 %v13020_v24  ;;  %v16615_v23 = vadd.f32 %v6226_v26, %v16402_v47  ;;  %v19961_v24 = vld [vmem:[#allocation47_spill] sm:$0xff] }
 0x2d5   :  { %v6313_v59 = vpop.f32.mrf.mxu1  ;;  %11870 = vmatprep.subr.bf16.mxu1 %v13022_v48  ;;  %v6228_v19 = vpop.f32.mrf.mxu0  ;;  %v19962_v48 = vld [vmem:[#allocation48_spill] sm:$0xff] }
 0x2d6   :  { %v16624_v36 = vadd.f32 %v6313_v59, %v16503_v27  ;;  %v16627_v18 = vadd.f32 %v6228_v19, %v16409_v60  ;;  %11817 = vmatpush3.bf16.msra.mxu0 %v13042_v52  ;;  %v13028_v60 = vld [vmem:[%s19613_s4 + $0x668] ss:$12 sps:$4 sm:$0xff]   ;;  %v19963_v59 = vld [vmem:[#allocation36_spill] sm:$0xff] }
 0x2d7   :  { %v6317_v47 = vpop.f32.mrf.mxu1  ;;  %6960 = vmatmul.mubr.bf16.gmra.mxu1 %v19961_v24  ;;  %v6230_v22 = vpop.f32.mrf.mxu0  ;;  %11930 = vmatprep.subr.bf16.mxu0 %v13045_v39  ;;  %v19992_v24 = vld [vmem:[#allocation59_spill] sm:$0xff] }
 0x2d8   :  { %v16631_v26 = vadd.f32 %v6317_v47, %v16510_v55  ;;  %6967 = vmatprep.mubr.bf16.mxu1 %v19962_v48  ;;  %11871 = vmatpush3.bf16.msra.mxu1 %v13024_v20  ;;  %v16635_v15 = vadd.f32 %v6230_v22, %v16415_v31  ;;  %v13030_v55 = vld [vmem:[%s19613_s4 + $0x710] ss:$12 sps:$4 sm:$0xff]   ;;  %v13073_v48 = vld [vmem:[%s19613_s4 + $0x848] ss:$12 sps:$4 sm:$0xff]  }
 0x2d9   :  { %v6319_v27 = vpop.f32.mrf.mxu1  ;;  %v6234_v52 = vpop.f32.mrf.mxu0  ;;  %6887 = vmatmul.mubr.bf16.gmra.mxu0 %v19963_v59  ;;  %11872 = vmatprep.subr.bf16.mxu1 %v13026_v21  ;;  %v19964_v31 = vld [vmem:[#allocation38_spill] sm:$0xff] }
 0x2da   :  { %v16645_v39 = vadd.f32 %v6319_v27, %v16523_v25  ;;  %v16648_v20 = vadd.f32 %v6234_v52, %v16425_v49  ;;  %6894 = vmatprep.mubr.bf16.mxu0 %v19964_v31  ;;  %v13032_v21 = vld [vmem:[%s19613_s4 + $0x650] ss:$12 sps:$4 sm:$0xff]   ;;  %v13034_v49 = vld [vmem:[%s19613_s4 + $0x6f8] ss:$12 sps:$4 sm:$0xff]  }
 0x2db   :  { %v6321_v19 = vpop.f32.mrf.mxu1  ;;  %v6236_v47 = vpop.f32.mrf.mxu0 }
 0x2dc   :  { %v16652_v22 = vadd.f32 %v6321_v19, %v16529_v34  ;;  %v16655_v59 = vadd.f32 %v6236_v47, %v16433_v62  ;;  %11873 = vmatpush3.bf16.msra.mxu1 %v13028_v60 }
 0x2dd   :  { %v6323_v25 = vpop.f32.mrf.mxu1  ;;  %v6238_v27 = vpop.f32.mrf.mxu0  ;;  %11874 = vmatprep.subr.bf16.mxu1 %v13030_v55 }
 0x2de   :  { %v16664_v52 = vadd.f32 %v6323_v25, %v16543_v35  ;;  %v16667_v34 = vadd.f32 %v6238_v27, %v16440_v43  ;;  %v13036_v35 = vld [vmem:[%s19613_s4 + $0x638] ss:$12 sps:$4 sm:$0xff]  }
 0x2df   :  { %v6327_v62 = vpop.f32.mrf.mxu1  ;;  %6968 = vmatmul.mubr.bf16.gmra.mxu1 %v19930_v63  ;;  %v6240_v60 = vpop.f32.mrf.mxu0  ;;  %v19965_v25 = vld [vmem:[#allocation39_spill] sm:$0xff] }
 0x2e0   :  { %v16671_v19 = vadd.f32 %v6327_v62, %v16550_v32  ;;  %6975 = vmatprep.mubr.bf16.mxu1 %v15109_v54  ;;  %v16675_v55 = vadd.f32 %v6240_v60, %v16446_v16  ;;  %11875 = vmatpush3.bf16.msra.mxu1 %v13032_v21  ;;  %v13039_v32 = vld [vmem:[%s19613_s4 + $0x6e0] ss:$12 sps:$4 sm:$0xff]  }
 0x2e1   :  { %v6329_v47 = vpop.f32.mrf.mxu1  ;;  %v6244_v43 = vpop.f32.mrf.mxu0  ;;  %6895 = vmatmul.mubr.bf16.gmra.mxu0 %v19965_v25  ;;  %11876 = vmatprep.subr.bf16.mxu1 %v13034_v49  ;;  %v19966_v21 = vld [vmem:[#allocation41_spill] sm:$0xff] }
 0x2e2   :  { %v16685_v27 = vadd.f32 %v6329_v47, %v16566_v56  ;;  %v16688_v16 = vadd.f32 %v6244_v43, %v16459_v38  ;;  %6902 = vmatprep.mubr.bf16.mxu0 %v19966_v21  ;;  %v13040_v49 = vld [vmem:[%s19613_s4 + $0x620] ss:$12 sps:$4 sm:$0xff]   ;;  %v13043_v38 = vld [vmem:[%s19613_s4 + $0x6c8] ss:$12 sps:$4 sm:$0xff]  }
 0x2e3   :  { %v6331_v62 = vpop.f32.mrf.mxu1  ;;  %v6246_v60 = vpop.f32.mrf.mxu0 }
 0x2e4   :  { %v16692_v54 = vadd.f32 %v6331_v62, %v16575_v44  ;;  %v16695_v25 = vadd.f32 %v6246_v60, %v16467_v58  ;;  %11877 = vmatpush3.bf16.msra.mxu1 %v13036_v35  ;;  %v19967_v60 = vld [vmem:[#allocation76_spill] sm:$0xff] }
 0x2e5   :  { %v6333_v56 = vpop.f32.mrf.mxu1  ;;  %v6248_v47 = vpop.f32.mrf.mxu0  ;;  %11878 = vmatprep.subr.bf16.mxu1 %v13039_v32 }
 0x2e6   :  { %v16704_v43 = vadd.f32 %v6333_v56, %v16592_v61  ;;  %v16707_v44 = vadd.f32 %v6248_v47, %v16480_v9  ;;  %v13044_v61 = vld [vmem:[%s19613_s4 + $0x608] ss:$12 sps:$4 sm:$0xff]  }
 0x2e7   :  { %v6337_v58 = vpop.f32.mrf.mxu1  ;;  %6976 = vmatmul.mubr.bf16.gmra.mxu1 %v15217_v46  ;;  %v6250_v35 = vpop.f32.mrf.mxu0  ;;  %v19968_v47 = vld [vmem:[#allocation45_spill] sm:$0xff] }
 0x2e8   :  { %v16711_v62 = vadd.f32 %v6337_v58, %v16602_v0  ;;  %6983 = vmatprep.mubr.bf16.mxu1 %v19967_v60  ;;  %v16715_v32 = vadd.f32 %v6250_v35, %v16486_v30  ;;  %11879 = vmatpush3.bf16.msra.mxu1 %v13040_v49  ;;  %v13046_v0 = vld [vmem:[%s19613_s4 + $0xa70] ss:$12 sps:$4 sm:$0xff]  }
 0x2e9   :  { %v6339_v56 = vpop.f32.mrf.mxu1  ;;  %v6254_v9 = vpop.f32.mrf.mxu0  ;;  %6903 = vmatmul.mubr.bf16.gmra.mxu0 %v19968_v47  ;;  %11880 = vmatprep.subr.bf16.mxu1 %v13043_v38  ;;  %v19969_v35 = vld [vmem:[#allocation46_spill] sm:$0xff] }
 0x2ea   :  { %v16725_v58 = vadd.f32 %v6339_v56, %v16615_v23  ;;  %v6255_v30 = vadd.f32 %v6254_v9, %v16499_v5  ;;  %6910 = vmatprep.mubr.bf16.mxu0 %v19969_v35  ;;  %v19970_v56 = vld [vmem:[#allocation84_spill] sm:$0xff] }
 0x2eb   :  { %v6341_v49 = vpop.f32.mrf.mxu1  ;;  %v6256_v60 = vpop.f32.mrf.mxu0 }
 0x2ec   :  { %v16730_v46 = vadd.f32 %v6341_v49, %v16627_v18  ;;  %v6257_v21 = vadd.f32 %v6256_v60, %v16507_v1  ;;  %11881 = vmatpush3.bf16.msra.mxu1 %v13044_v61 }
 0x2ed   :  { %v6343_v38 = vpop.f32.mrf.mxu1  ;;  %v6258_v47 = vpop.f32.mrf.mxu0  ;;  %11994 = vmatprep.subr.bf16.mxu1 %v13046_v0  ;;  %v19971_v0 = vld [vmem:[#allocation49_spill] sm:$0xff] }
 0x2ee   :  { %v16734_v63 = vadd.f32 %v6343_v38, %v16635_v15  ;;  %v16737_v23 = vadd.f32 %v6258_v47, %v16520_v33  ;;  %v19972_v47 = vld [vmem:[#allocation51_spill] sm:$0xff] }
 0x2ef   :  { %v6347_v5 = vpop.f32.mrf.mxu1  ;;  %6984 = vmatmul.mubr.bf16.gmra.mxu1 %v19970_v56  ;;  %v6260_v9 = vpop.f32.mrf.mxu0 }
 0x2f0   :  { %v16741_v35 = vadd.f32 %v6347_v5, %v16648_v20  ;;  %6991 = vmatprep.mubr.bf16.mxu1 %v15302_v14  ;;  %v6261_v1 = vadd.f32 %v6260_v9, %v16526_v2 }
 0x2f1   :  { %v6349_v18 = vpop.f32.mrf.mxu1  ;;  %v6264_v61 = vpop.f32.mrf.mxu0  ;;  %6911 = vmatmul.mubr.bf16.gmra.mxu0 %v19971_v0 }
 0x2f2   :  { %v16747_v15 = vadd.f32 %v6349_v18, %v16655_v59  ;;  %v16750_v33 = vadd.f32 %v6264_v61, %v16539_v13  ;;  %7048 = vmatprep.mubr.bf16.mxu0 %v19972_v47  ;;  %v13047_v13 = vld [vmem:[%s19613_s4 + $0x830] ss:$12 sps:$4 sm:$0xff]   ;;  %v19973_v47 = vld [vmem:[#allocation52_spill] sm:$0xff] }
 0x2f3   :  { %v6351_v49 = vpop.f32.mrf.mxu1  ;;  %v6266_v60 = vpop.f32.mrf.mxu0 }
 0x2f4   :  { %v16754_v20 = vadd.f32 %v6351_v49, %v16667_v34  ;;  %v16757_v38 = vadd.f32 %v6266_v60, %v16547_v45  ;;  %v13049_v45 = vld [vmem:[%s19613_s4 + $0x8d8] ss:$12 sps:$4 sm:$0xff]   ;;  %v19975_v60 = vld [vmem:[#allocation53_spill] sm:$0xff] }
 0x2f5   :  { %v6353_v2 = vpop.f32.mrf.mxu1  ;;  %v6268_v5 = vpop.f32.mrf.mxu0 }
 0x2f6   :  { %v16760_v56 = vadd.f32 %v6353_v2, %v16675_v55  ;;  %v16763_v59 = vadd.f32 %v6268_v5, %v16560_v11 }
 0x2f7   :  { %v6357_v9 = vpop.f32.mrf.mxu1  ;;  %6992 = vmatmul.mubr.bf16.gmra.mxu1 %v15333_v42  ;;  %v6270_v34 = vpop.f32.mrf.mxu0 }
 0x2f8   :  { %v16773_v18 = vadd.f32 %v6357_v9, %v16688_v16  ;;  %6999 = vmatprep.mubr.bf16.mxu1 %v15347_v57  ;;  %v16777_v11 = vadd.f32 %v6270_v34, %v16572_v17  ;;  %v13051_v16 = vld [vmem:[%s19613_s4 + $0x818] ss:$12 sps:$4 sm:$0xff]   ;;  %v13053_v17 = vld [vmem:[%s19613_s4 + $0x8c0] ss:$12 sps:$4 sm:$0xff]  }
 0x2f9   :  { %v6359_v55 = vpop.f32.mrf.mxu1  ;;  %v16779_v61 = vpop.f32.mrf.mxu0  ;;  %7049 = vmatmul.mubr.bf16.vlgmr.msra.gmra.mxu0 %v19973_v47  ;;  %v19981_v57 = vld [vmem:[#allocation83_spill] sm:$0xff] }
 0x2fa   :  { %v16783_v49 = vadd.f32 %v6359_v55, %v16695_v25  ;;  %7056 = vmatprep.mubr.bf16.mxu0 %v19975_v60  ;;  %11931 = vmatpush3.bf16.msra.mxu0 %v13047_v13  ;;  %v13055_v55 = vld [vmem:[%s19613_s4 + $0x800] ss:$12 sps:$4 sm:$0xff]  }
 0x2fb   :  { %v6361_v2 = vpop.f32.mrf.mxu1  ;;  %v16789_v5 = vpop.f32.mrf.mxu0  ;;  %11932 = vmatprep.subr.bf16.mxu0 %v13049_v45 }
 0x2fc   :  { %19974 = vst [vmem:[#allocation24_spill] sm:$0xff] %v16783_v49  ;;  %v16795_v9 = vadd.f32 %v6361_v2, %v16707_v44  ;;  %v13057_v44 = vld [vmem:[%s19613_s4 + $0x8a8] ss:$12 sps:$4 sm:$0xff]   ;;  %v20011_v49 = vld [vmem:[#allocation67_spill] sm:$0xff] }
 0x2fd   :  { %v6363_v25 = vpop.f32.mrf.mxu1  ;;  %v16797_v34 = vpop.f32.mrf.mxu0  ;;  %v19979_v2 = vld [vmem:[#allocation82_spill] sm:$0xff] }
 0x2fe   :  { %19976 = vst [vmem:[#allocation17_spill] sm:$0xff] %v16795_v9  ;;  %v16800_v13 = vadd.f32 %v6363_v25, %v16715_v32  ;;  %11933 = vmatpush3.bf16.msra.mxu0 %v13051_v16 }
 0x2ff   :  { %v6367_v47 = vpop.f32.mrf.mxu1  ;;  %7000 = vmatmul.mubr.bf16.gmra.mxu1 %v15382_v12  ;;  %v16806_v45 = vpop.f32.mrf.mxu0  ;;  %11934 = vmatprep.subr.bf16.mxu0 %v13053_v17  ;;  %v13059_v17 = vld [vmem:[%s19613_s4 + $0x7e8] ss:$12 sps:$4 sm:$0xff]  }
 0x300   :  { %19977 = vst [vmem:[#allocation16_spill] sm:$0xff] %v16800_v13  ;;  %v16811_v60 = vadd.f32 %v6367_v47, %v6255_v30  ;;  %7007 = vmatprep.mubr.bf16.mxu1 %v15393_v50  ;;  %v13061_v30 = vld [vmem:[%s19613_s4 + $0x890] ss:$12 sps:$4 sm:$0xff]  }
 0x301   :  { %v6369_v32 = vpop.f32.mrf.mxu1  ;;  %v16814_v16 = vpop.f32.mrf.mxu0  ;;  %7057 = vmatmul.mubr.bf16.gmra.mxu0 %v19979_v2  ;;  %v19986_v50 = vld [vmem:[#allocation86_spill] sm:$0xff] }
 0x302   :  { %19978 = vst [vmem:[#allocation40_spill] sm:$0xff] %v16811_v60  ;;  %v16817_v25 = vadd.f32 %v6369_v32, %v6257_v21  ;;  %7064 = vmatprep.mubr.bf16.mxu0 %v19981_v57  ;;  %11935 = vmatpush3.bf16.msra.mxu0 %v13055_v55  ;;  %v13063_v55 = vld [vmem:[%s19613_s4 + $0x7d0] ss:$12 sps:$4 sm:$0xff]   ;;  %v13075_v60 = vld [vmem:[%s19613_s4 + $0x9c8] ss:$12 sps:$4 sm:$0xff]  }
 0x303   :  { %v6371_v12 = vpop.f32.mrf.mxu1  ;;  %v16823_v42 = vpop.f32.mrf.mxu0  ;;  %11936 = vmatprep.subr.bf16.mxu0 %v13057_v44 }
 0x304   :  { %19980 = vst [vmem:[#allocation42_spill] sm:$0xff] %v16817_v25  ;;  %v16829_v47 = vadd.f32 %v6371_v12, %v16737_v23  ;;  %v13065_v12 = vld [vmem:[%s19613_s4 + $0x878] ss:$12 sps:$4 sm:$0xff]  }
 0x305   :  { %v6373_v21 = vpop.f32.mrf.mxu1  ;;  %v16831_v32 = vpop.f32.mrf.mxu0 }
 0x306   :  { %19982 = vst [vmem:[#allocation35_spill] sm:$0xff] %v16829_v47  ;;  %v16833_v57 = vadd.f32 %v6373_v21, %v6261_v1  ;;  %11937 = vmatpush3.bf16.msra.mxu0 %v13059_v17  ;;  %v19985_v1 = vld [vmem:[#allocation96_spill] sm:$0xff] }
 0x307   :  { %v6377_v2 = vpop.f32.mrf.mxu1  ;;  %7008 = vmatmul.mubr.bf16.gmra.mxu1 %v19940_v7  ;;  %v16839_v44 = vpop.f32.mrf.mxu0  ;;  %11938 = vmatprep.subr.bf16.mxu0 %v13061_v30  ;;  %v19988_v7 = vld [vmem:[#allocation87_spill] sm:$0xff]  ;;  %v20002_v47 = vld [vmem:[#allocation56_spill] sm:$0xff] }
 0x308   :  { %19983 = vst [vmem:[#allocation36_spill] sm:$0xff] %v16833_v57  ;;  %v16845_v23 = vadd.f32 %v6377_v2, %v16750_v33  ;;  %7145 = vmatprep.mubr.bf16.mxu1 %v19985_v1  ;;  %v13067_v30 = vld [vmem:[%s19613_s4 + $0x7b8] ss:$12 sps:$4 sm:$0xff]   ;;  %v13069_v2 = vld [vmem:[%s19613_s4 + $0x860] ss:$12 sps:$4 sm:$0xff]  }
 0x309   :  { %v6379_v17 = vpop.f32.mrf.mxu1  ;;  %v16848_v21 = vpop.f32.mrf.mxu0  ;;  %7065 = vmatmul.mubr.bf16.gmra.mxu0 %v19986_v50 }
 0x30a   :  { %19984 = vst [vmem:[#allocation76_spill] sm:$0xff] %v16845_v23  ;;  %v16852_v0 = vadd.f32 %v6379_v17, %v16757_v38  ;;  %7072 = vmatprep.mubr.bf16.mxu0 %v19988_v7  ;;  %11939 = vmatpush3.bf16.msra.mxu0 %v13063_v55  ;;  %v13048_v7 = vld [vmem:[%s19613_s4 + $0x9b0] ss:$12 sps:$4 sm:$0xff]   ;;  %v13050_v55 = vld [vmem:[%s19613_s4 + $0xa58] ss:$12 sps:$4 sm:$0xff]   ;;  %v19991_v17 = vld [vmem:[#allocation97_spill] sm:$0xff] }
 0x30b   :  { %v6381_v14 = vpop.f32.mrf.mxu1  ;;  %v16858_v33 = vpop.f32.mrf.mxu0  ;;  %11940 = vmatprep.subr.bf16.mxu0 %v13065_v12  ;;  %v13068_v23 = vld [vmem:[%s19613_s4 + $0x938] ss:$12 sps:$4 sm:$0xff]  }
 0x30c   :  { %19987 = vst [vmem:[#allocation84_spill] sm:$0xff] %v16852_v0  ;;  %v16864_v50 = vadd.f32 %v6381_v14, %v16763_v59  ;;  %v13070_v14 = vld [vmem:[%s19613_s4 + $0x7a0] ss:$12 sps:$4 sm:$0xff]  }
 0x30d   :  { %v6383_v38 = vpop.f32.mrf.mxu1  ;;  %v16872_v1 = vpop.f32.mrf.mxu0  ;;  %v20000_v0 = vld [vmem:[#allocation100_spill] sm:$0xff] }
 0x30e   :  { %19989 = vst [vmem:[#allocation51_spill] sm:$0xff] %v16864_v50  ;;  %v16875_v12 = vadd.f32 %v6383_v38, %v16777_v11  ;;  %11941 = vmatpush3.bf16.msra.mxu0 %v13067_v30  ;;  %v13052_v11 = vld [vmem:[%s19613_s4 + $0x998] ss:$12 sps:$4 sm:$0xff]  }
 0x30f   :  { %v16880_v59 = vpop.f32.mrf.mxu1  ;;  %7146 = vmatmul.mubr.bf16.vlgmr.msra.gmra.mxu1 %v19991_v17  ;;  %v16883_v31 = vpop.f32.mrf.mxu0  ;;  %11942 = vmatprep.subr.bf16.mxu0 %v13069_v2  ;;  %v19993_v17 = vld [vmem:[#allocation90_spill] sm:$0xff]  ;;  %v13054_v2 = vld [vmem:[%s19613_s4 + $0xa40] ss:$12 sps:$4 sm:$0xff]  }
 0x310   :  { %19990 = vst [vmem:[#allocation52_spill] sm:$0xff] %v16875_v12  ;;  %7153 = vmatprep.mubr.bf16.mxu1 %v19992_v24  ;;  %11995 = vmatpush3.bf16.msra.mxu1 %v13048_v7  ;;  %v13056_v24 = vld [vmem:[%s19613_s4 + $0x980] ss:$12 sps:$4 sm:$0xff]   ;;  %v13074_v7 = vld [vmem:[%s19613_s4 + $0x788] ss:$12 sps:$4 sm:$0xff]  }
 0x311   :  { %v16892_v30 = vpop.f32.mrf.mxu1  ;;  %11996 = vmatprep.subr.bf16.mxu1 %v13050_v55  ;;  %v16894_v38 = vpop.f32.mrf.mxu0  ;;  %7073 = vmatmul.mubr.bf16.gmra.mxu0 %v19993_v17  ;;  %v13058_v17 = vld [vmem:[%s19613_s4 + $0xa28] ss:$12 sps:$4 sm:$0xff]  }
 0x312   :  { %7080 = vmatprep.mubr.bf16.mxu0 %v19994_v51  ;;  %11943 = vmatpush3.bf16.msra.mxu0 %v13070_v14  ;;  %v13077_v51 = vld [vmem:[%s19613_s4 + $0xbf0] ss:$12 sps:$4 sm:$0xff]  }
 0x313   :  { %v16907_v55 = vpop.f32.mrf.mxu1  ;;  %v16909_v29 = vpop.f32.mrf.mxu0  ;;  %11944 = vmatprep.subr.bf16.mxu0 %v13073_v48  ;;  %v13060_v48 = vld [vmem:[%s19613_s4 + $0x968] ss:$12 sps:$4 sm:$0xff]  }
 0x314   :  { %11997 = vmatpush3.bf16.msra.mxu1 %v13052_v11 }
 0x315   :  { %v16917_v4 = vpop.f32.mrf.mxu1  ;;  %11998 = vmatprep.subr.bf16.mxu1 %v13054_v2  ;;  %v16919_v14 = vpop.f32.mrf.mxu0 }
 0x316   :  { %11945 = vmatpush3.bf16.msra.mxu0 %v13074_v7  ;;  %v19998_v7 = vld [vmem:[#allocation50_spill] sm:$0xff] }
 0x317   :  { %v16921_v37 = vpop.f32.mrf.mxu1  ;;  %7154 = vmatmul.mubr.bf16.gmra.mxu1 %v19995_v53  ;;  %v16924_v10 = vpop.f32.mrf.mxu0  ;;  %12058 = vmatprep.subr.bf16.mxu0 %v13077_v51  ;;  %v13062_v53 = vld [vmem:[%s19613_s4 + $0xa10] ss:$12 sps:$4 sm:$0xff]  }
 0x318   :  { %7161 = vmatprep.mubr.bf16.mxu1 %v19996_v28  ;;  %11999 = vmatpush3.bf16.msra.mxu1 %v13056_v24  ;;  %v13064_v28 = vld [vmem:[%s19613_s4 + $0x950] ss:$12 sps:$4 sm:$0xff]  }
 0x319   :  { %v16930_v11 = vpop.f32.mrf.mxu1  ;;  %v16932_v2 = vpop.f32.mrf.mxu0  ;;  %7081 = vmatmul.mubr.bf16.gmra.mxu0 %v19997_v3  ;;  %12000 = vmatprep.subr.bf16.mxu1 %v13058_v17 }
 0x31a   :  { %7088 = vmatprep.mubr.bf16.mxu0 %v19998_v7  ;;  %v19999_v7 = vld [vmem:[#allocation64_spill] sm:$0xff] }
 0x31b   :  { %v16942_v24 = vpop.f32.mrf.mxu1  ;;  %v16944_v51 = vpop.f32.mrf.mxu0 }
 0x31c   :  { %12001 = vmatpush3.bf16.msra.mxu1 %v13060_v48 }
 0x31d   :  { %v16949_v3 = vpop.f32.mrf.mxu1  ;;  %v16951_v17 = vpop.f32.mrf.mxu0  ;;  %12002 = vmatprep.subr.bf16.mxu1 %v13062_v53  ;;  %v13071_v53 = vld [vmem:[%s19613_s4 + $0x9e0] ss:$12 sps:$4 sm:$0xff]  }
 0x31f   :  { %v16953_v12 = vpop.f32.mrf.mxu1  ;;  %7162 = vmatmul.mubr.bf16.gmra.mxu1 %v19999_v7  ;;  %v16956_v50 = vpop.f32.mrf.mxu0  ;;  %v20003_v7 = vld [vmem:[#allocation57_spill] sm:$0xff] }
 0x320   :  { %7169 = vmatprep.mubr.bf16.mxu1 %v20000_v0  ;;  %12003 = vmatpush3.bf16.msra.mxu1 %v13064_v28  ;;  %v13072_v0 = vld [vmem:[%s19613_s4 + $0x920] ss:$12 sps:$4 sm:$0xff]  }
 0x321   :  { %v16962_v57 = vpop.f32.mrf.mxu1  ;;  %v16964_v48 = vpop.f32.mrf.mxu0  ;;  %7089 = vmatmul.mubr.bf16.gmra.mxu0 %v20002_v47  ;;  %12004 = vmatprep.subr.bf16.mxu1 %v13066_v6 }
 0x322   :  { %20001 = vst [vmem:[#allocation53_spill] sm:$0xff] %v16964_v48  ;;  %7096 = vmatprep.mubr.bf16.mxu0 %v20003_v7  ;;  %v20009_v7 = vld [vmem:[#allocation101_spill] sm:$0xff] }
 0x323   :  { %v16974_v28 = vpop.f32.mrf.mxu1  ;;  %v16976_v25 = vpop.f32.mrf.mxu0 }
 0x324   :  { %20004 = vst [vmem:[#allocation82_spill] sm:$0xff] %v16974_v28  ;;  %20005 = vst [vmem:[#allocation83_spill] sm:$0xff] %v16976_v25  ;;  %12005 = vmatpush3.bf16.msra.mxu1 %v13068_v23  ;;  %v13076_v25 = vld [vmem:[%s19613_s4 + $0x908] ss:$12 sps:$4 sm:$0xff]  }
 0x325   :  { %v16981_v6 = vpop.f32.mrf.mxu1  ;;  %v16983_v47 = vpop.f32.mrf.mxu0  ;;  %12006 = vmatprep.subr.bf16.mxu1 %v13071_v53  ;;  %v13078_v53 = vld [vmem:[%s19613_s4 + $0xd70] ss:$12 sps:$4 sm:$0xff]  }
 0x326   :  { %20006 = vst [vmem:[#allocation96_spill] sm:$0xff] %v16981_v6  ;;  %20007 = vst [vmem:[#allocation86_spill] sm:$0xff] %v16983_v47  ;;  %v20014_v6 = vld [vmem:[#allocation58_spill] sm:$0xff]  ;;  %v20030_v47 = vld [vmem:[#allocation8_spill] sm:$0xff] }
 0x327   :  { %v16985_v13 = vpop.f32.mrf.mxu1  ;;  %7170 = vmatmul.mubr.bf16.gmra.mxu1 %v20009_v7  ;;  %v16988_v9 = vpop.f32.mrf.mxu0  ;;  %v20015_v7 = vld [vmem:[#allocation98_spill] sm:$0xff] }
 0x328   :  { %20008 = vst [vmem:[#allocation87_spill] sm:$0xff] %v16985_v13  ;;  %20010 = vst [vmem:[#allocation97_spill] sm:$0xff] %v16988_v9  ;;  %7177 = vmatprep.mubr.bf16.mxu1 %v20011_v49  ;;  %12007 = vmatpush3.bf16.msra.mxu1 %v13072_v0 }
 0x329   :  { %v16994_v28 = vpop.f32.mrf.mxu1  ;;  %v16996_v23 = vpop.f32.mrf.mxu0  ;;  %7097 = vmatmul.mubr.bf16.gmra.mxu0 %v20014_v6  ;;  %12008 = vmatprep.subr.bf16.mxu1 %v13075_v60  ;;  %v20021_v6 = vld [vmem:[#allocation69_spill] sm:$0xff] }
 0x32a   :  { %20012 = vst [vmem:[#allocation59_spill] sm:$0xff] %v16994_v28  ;;  %20013 = vst [vmem:[#allocation90_spill] sm:$0xff] %v16996_v23  ;;  %7104 = vmatprep.mubr.bf16.mxu0 %v20015_v7  ;;  %v20023_v28 = vld [vmem:[#allocation70_spill] sm:$0xff]  ;;  %v7598_v7 = vld [vmem:[%s19618_s5] sm:$0x7] }
 0x32b   :  { %v17003_v9 = vpop.f32.mrf.mxu1  ;;  %v17005_v49 = vpop.f32.mrf.mxu0  ;;  %v17040_v48 = vrot.slane %v7598_v7, %v20030_v47 }
 0x32c   :  { %20016 = vst [vmem:[#allocation91_spill] sm:$0xff] %v17003_v9  ;;  %20017 = vst [vmem:[#allocation61_spill] sm:$0xff] %v17005_v49  ;;  %12009 = vmatpush3.bf16.msra.mxu1 %v13076_v25  ;;  %v7663_v25 = vld [vmem:[%s19619_s6] sm:$0x7] }
 0x32d   :  { %v17007_v0 = vpop.f32.mrf.mxu1  ;;  %v17009_v13 = vpop.f32.mrf.mxu0  ;;  %12122 = vmatprep.subr.bf16.mxu1 %v13078_v53  ;;  %v20025_v53 = vld [vmem:[#allocation99_spill] sm:$0xff] }
 0x32e   :  { %20018 = vst [vmem:[#allocation62_spill] sm:$0xff] %v17007_v0  ;;  %20019 = vst [vmem:[#allocation94_spill] sm:$0xff] %v17009_v13 }
 0x32f   :  { %v17011_v23 = vpop.f32.mrf.mxu1  ;;  %7178 = vmatmul.mubr.bf16.gmra.mxu1 %v20021_v6  ;;  %v17014_v60 = vpop.f32.mrf.mxu0 }
 0x330   :  { %20020 = vst [vmem:[#allocation50_spill] sm:$0xff] %v17011_v23  ;;  %20022 = vst [vmem:[#allocation64_spill] sm:$0xff] %v17014_v60  ;;  %7185 = vmatprep.mubr.bf16.mxu1 %v20023_v28  ;;  %v20026_v23 = vld [vmem:[#allocation60_spill] sm:$0xff]  ;;  %v20029_v28 = vld [vmem:[#allocation7_spill] sm:$0xff] }
 0x331   :  { %v17023_v0 = vpop.f32.mrf.mxu1  ;;  %v17025_v13 = vpop.f32.mrf.mxu0  ;;  %7105 = vmatmul.mubr.bf16.gmra.mxu0 %v20025_v53  ;;  %v17034_v49 = vrot.slane %v7598_v7, %v20029_v28  ;;  %v17037_v9 = vrot.slane %v7663_v25, %v20029_v28  ;;  %v6423_v53 = vadd.f32 %v16789_v5, %v16599_v8  ;;  %v6431_v28 = vadd.f32 %v16814_v16, %v16631_v26 }
 0x332   :  { %20024 = vst [vmem:[#allocation100_spill] sm:$0xff] %v17025_v13  ;;  %7242 = vmatprep.mubr.bf16.mxu0 %v20026_v23  ;;  %v6421_v13 = vadd.f32 %v16779_v61, %v16585_v41  ;;  %v6425_v23 = vadd.f32 %v16797_v34, %v16612_v40  ;;  %v6433_v7 = vadd.f32 %v16823_v42, %v16645_v39  ;;  %v13079_v42 = vld [vmem:[%s19613_s4 + $0xb30] ss:$12 sps:$4 sm:$0xff]  }
 0x333   :  { %v17029_v6 = vpop.f32.mrf.mxu1  ;;  %v17031_v60 = vpop.f32.mrf.mxu0  ;;  %v6435_v41 = vadd.f32 %v16831_v32, %v16652_v22  ;;  %v6437_v40 = vadd.f32 %v16839_v44, %v16664_v52  ;;  %v6441_v5 = vadd.f32 %v16848_v21, %v16671_v19  ;;  %v6445_v26 = vadd.f32 %v16872_v1, %v16692_v54  ;;  %v13081_v54 = vld [vmem:[%s19613_s4 + $0xbd8] ss:$12 sps:$4 sm:$0xff]  }
 0x334   :  { %20027 = vst [vmem:[#allocation56_spill] sm:$0xff] %v17029_v6  ;;  %20028 = vst [vmem:[#allocation57_spill] sm:$0xff] %v17031_v60  ;;  %v17049_v60 = vrot.slane %v7663_v25, %v20030_v47  ;;  %v6427_v6 = vadd.f32 %v16806_v45, %v16624_v36  ;;  %v6443_v36 = vadd.f32 %v16858_v33, %v16685_v27  ;;  %v20031_v27 = vld [vmem:[#allocation72_spill] sm:$0xff]  ;;  %v20039_v47 = vld [vmem:[#allocation83_spill] sm:$0xff] }
 0x335   :  { %v17059_v61 = vpop.f32.mrf.mxu1  ;;  %v17061_v8 = vpop.f32.mrf.mxu0  ;;  %v6534_v39 = vadd.f32 %v16880_v59, %v6421_v13  ;;  %v6536_v22 = vadd.f32 %v16892_v30, %v6423_v53  ;;  %v6447_v52 = vadd.f32 %v16883_v31, %v16704_v43  ;;  %v6451_v19 = vadd.f32 %v16894_v38, %v16711_v62  ;;  %v20032_v62 = vld [vmem:[#allocation74_spill] sm:$0xff]  ;;  %v20034_v59 = vld [vmem:[#allocation63_spill] sm:$0xff] }
 0x336   :  { %v6538_v13 = vadd.f32 %v16907_v55, %v6425_v23  ;;  %v6540_v16 = vadd.f32 %v16917_v4, %v6427_v6  ;;  %v6453_v31 = vadd.f32 %v16909_v29, %v16725_v58  ;;  %v6455_v43 = vadd.f32 %v16919_v14, %v16730_v46  ;;  %v20033_v29 = vld [vmem:[#allocation43_spill] sm:$0xff]  ;;  %v13085_v14 = vld [vmem:[%s19613_s4 + $0xbc0] ss:$12 sps:$4 sm:$0xff]   ;;  %v20041_v53 = vld [vmem:[#allocation86_spill] sm:$0xff] }
 0x337   :  { %v17080_v34 = vpop.f32.mrf.mxu1  ;;  %7186 = vmatmul.mubr.bf16.gmra.mxu1 %v20031_v27  ;;  %v17083_v45 = vpop.f32.mrf.mxu0  ;;  %v6544_v32 = vadd.f32 %v16921_v37, %v6431_v28  ;;  %v17097_v44 = vadd.f32 %v16930_v11, %v6433_v7  ;;  %v6457_v21 = vadd.f32 %v16924_v10, %v16734_v63  ;;  %v6461_v33 = vadd.f32 %v16932_v2, %v16741_v35  ;;  %v13083_v63 = vld [vmem:[%s19613_s4 + $0xb18] ss:$12 sps:$4 sm:$0xff]   ;;  %v20040_v6 = vld [vmem:[#allocation17_spill] sm:$0xff] }
 0x338   :  { %7193 = vmatprep.mubr.bf16.mxu1 %v20032_v62  ;;  %v17107_v46 = vadd.f32 %v16942_v24, %v6435_v41  ;;  %v6463_v37 = vadd.f32 %v16944_v51, %v16747_v15  ;;  %v17116_v10 = vadd.f32 %v16949_v3, %v6437_v40  ;;  %v17119_v35 = vadd.f32 %v16953_v12, %v6441_v5  ;;  %v20035_v12 = vld [vmem:[#allocation53_spill] sm:$0xff]  ;;  %v20036_v51 = vld [vmem:[#allocation82_spill] sm:$0xff]  ;;  %v20046_v27 = vld [vmem:[#allocation40_spill] sm:$0xff] }
 0x339   :  { %v17103_v4 = vpop.f32.mrf.mxu1  ;;  %v6646_v1 = vpop.f32.mrf.mxu0  ;;  %7243 = vmatmul.mubr.bf16.vlgmr.msra.gmra.mxu0 %v20033_v29  ;;  %v6465_v30 = vadd.f32 %v16951_v17, %v16754_v20  ;;  %v6467_v15 = vadd.f32 %v16956_v50, %v16760_v56  ;;  %v17131_v11 = vadd.f32 %v16962_v57, %v6443_v36  ;;  %v6471_v2 = vadd.f32 %v20035_v12, %v16773_v18  ;;  %v20037_v56 = vld [vmem:[#allocation96_spill] sm:$0xff]  ;;  %v20042_v18 = vld [vmem:[#allocation87_spill] sm:$0xff]  ;;  %v13089_v29 = vld [vmem:[%s19613_s4 + $0xba8] ss:$12 sps:$4 sm:$0xff]  }
 0x33a   :  { %v6647_v58 = vadd.f32 %v6646_v1, %v6534_v39  ;;  %7250 = vmatprep.mubr.bf16.mxu0 %v20034_v59  ;;  %12059 = vmatpush3.bf16.msra.mxu0 %v13079_v42  ;;  %v17137_v3 = vadd.f32 %v20036_v51, %v6445_v26  ;;  %v17140_v50 = vadd.f32 %v20037_v56, %v6447_v52  ;;  %v20038_v17 = vld [vmem:[#allocation24_spill] sm:$0xff]  ;;  %v20043_v26 = vld [vmem:[#allocation59_spill] sm:$0xff]  ;;  %v20048_v1 = vld [vmem:[#allocation78_spill] sm:$0xff] }
 0x33b   :  { %v17125_v38 = vpop.f32.mrf.mxu1  ;;  %v6648_v55 = vpop.f32.mrf.mxu0  ;;  %12060 = vmatprep.subr.bf16.mxu0 %v13081_v54  ;;  %v6473_v25 = vadd.f32 %v20039_v47, %v20038_v17  ;;  %v17146_v23 = vadd.f32 %v20041_v53, %v20040_v6  ;;  %v17151_v7 = vadd.f32 %v20042_v18, %v6451_v19  ;;  %v13087_v36 = vld [vmem:[%s19613_s4 + $0xb00] ss:$12 sps:$4 sm:$0xff]   ;;  %v17159_v42 = vadd.f32 %v20043_v26, %v6453_v31  ;;  %v20047_v54 = vld [vmem:[#allocation90_spill] sm:$0xff]  ;;  %v20055_v47 = vld [vmem:[#allocation35_spill] sm:$0xff] }
 0x33c   :  { %v7615_v24 = vmul.f32 %v17034_v49, %v6647_v58  ;;  %v6649_v20 = vadd.f32 %v6648_v55, %v6536_v22  ;;  %v20044_v39 = vld [vmem:[#allocation16_spill] sm:$0xff]  ;;  %v20045_v22 = vld [vmem:[#allocation97_spill] sm:$0xff]  ;;  %v17165_v19 = vadd.f32 %v20047_v54, %v20046_v27  ;;  %v20049_v58 = vld [vmem:[#allocation91_spill] sm:$0xff] }
 0x33d   :  { %v17148_v57 = vpop.f32.mrf.mxu1  ;;  %v6650_v28 = vpop.f32.mrf.mxu0  ;;  %v6477_v52 = vadd.f32 %v20045_v22, %v20044_v39  ;;  %v17174_v31 = vadd.f32 %v20049_v58, %v6455_v43  ;;  %v20050_v59 = vld [vmem:[#allocation42_spill] sm:$0xff]  ;;  %v20052_v12 = vld [vmem:[#allocation104_spill] sm:$0xff]  ;;  %v20057_v26 = vld [vmem:[#allocation65_spill] sm:$0xff] }
 0x33e   :  { %v7680_v41 = vadd.f32 %v17037_v9, %v7615_v24  ;;  %v7616_v40 = vmul.f32 %v17040_v48, %v6649_v20  ;;  %v6651_v5 = vadd.f32 %v6650_v28, %v6538_v13  ;;  %12061 = vmatpush3.bf16.msra.mxu0 %v13083_v63  ;;  %v20051_v63 = vld [vmem:[#allocation61_spill] sm:$0xff]  ;;  %v20053_v51 = vld [vmem:[#allocation62_spill] sm:$0xff]  ;;  %v20058_v39 = vld [vmem:[#allocation36_spill] sm:$0xff] }
 0x33f   :  { %v17167_v62 = vpop.f32.mrf.mxu1  ;;  %7194 = vmatmul.mubr.bf16.gmra.mxu1 %v20048_v1  ;;  %v6652_v13 = vpop.f32.mrf.mxu0  ;;  %12062 = vmatprep.subr.bf16.mxu0 %v13085_v14  ;;  %v6483_v55 = vadd.f32 %v20051_v63, %v20050_v59  ;;  %v17182_v56 = vadd.f32 %v20053_v51, %v6457_v21  ;;  %v20054_v14 = vld [vmem:[#allocation50_spill] sm:$0xff]  ;;  %v20059_v22 = vld [vmem:[#allocation64_spill] sm:$0xff] }
 0x340   :  { %7201 = vmatprep.mubr.bf16.mxu1 %v20052_v12  ;;  %v7681_v24 = vadd.f32 %v17049_v60, %v7616_v40  ;;  %v7618_v20 = vmul.f32 %v17034_v49, %v6651_v5  ;;  %v17185_v17 = vadd.f32 %v20054_v14, %v6461_v33  ;;  %v20056_v6 = vld [vmem:[#allocation94_spill] sm:$0xff]  ;;  %v6653_v28 = vadd.f32 %v6652_v13, %v6540_v16  ;;  %v20061_v16 = vld [vmem:[#allocation76_spill] sm:$0xff] }
 0x341   :  { %v6485_v53 = vadd.f32 %v20056_v6, %v20055_v47  ;;  %v6595_v43 = vpop.f32.mrf.mxu1  ;;  %v6656_v18 = vpop.f32.mrf.mxu0  ;;  %7251 = vmatmul.mubr.bf16.gmra.mxu0 %v20057_v26  ;;  %v6487_v27 = vadd.f32 %v20059_v22, %v20058_v39  ;;  %v7728_v40 = vmax.f32 %v7680_v41, 0.0  ;;  %v20060_v1 = vld [vmem:[#allocation66_spill] sm:$0xff]  ;;  %v17197_v33 = vadd.f32 %v17023_v0, %v6463_v37  ;;  %v20062_v13 = vld [vmem:[#allocation100_spill] sm:$0xff]  ;;  %v20065_v0 = vld [vmem:[#allocation57_spill] sm:$0xff] }
 0x342   :  { %v7729_v54 = vmax.f32 %v7681_v24, 0.0  ;;  %v6657_v5 = vadd.f32 %v6656_v18, %v6544_v32  ;;  %7258 = vmatprep.mubr.bf16.mxu0 %v20060_v1  ;;  %12063 = vmatpush3.bf16.msra.mxu0 %v13087_v36  ;;  %v13091_v21 = vld [vmem:[%s19613_s4 + $0xae8] ss:$12 sps:$4 sm:$0xff]   ;;  %v6491_v58 = vadd.f32 %v20062_v13, %v20061_v16  ;;  %v7683_v63 = vadd.f32 %v17037_v9, %v7618_v20  ;;  %v13093_v32 = vld [vmem:[%s19613_s4 + $0xb90] ss:$12 sps:$4 sm:$0xff]   ;;  %v20063_v36 = vld [vmem:[#allocation56_spill] sm:$0xff] }
 0x343   :  { %v6597_v59 = vpop.f32.mrf.mxu1  ;;  %v7619_v41 = vmul.f32 %v17040_v48, %v6653_v28  ;;  %v6658_v12 = vpop.f32.mrf.mxu0  ;;  %12064 = vmatprep.subr.bf16.mxu0 %v13089_v29  ;;  %v17207_v24 = vadd.f32 %v20063_v36, %v6465_v30  ;;  %v20064_v51 = vld [vmem:[#allocation84_spill] sm:$0xff]  ;;  %v17213_v6 = vadd.f32 %v17059_v61, %v6467_v15  ;;  %v20066_v20 = vld [vmem:[#allocation51_spill] sm:$0xff]  ;;  %v17222_v39 = vadd.f32 %v17080_v34, %v6471_v2  ;;  %v20069_v1 = vld [vmem:[#allocation13_spill] sm:$0xff] }
 0x344   :  { %v6493_v37 = vadd.f32 %v20065_v0, %v20064_v51  ;;  %v11450_v14 = vpack.c.bf16 %v7729_v54, %v7728_v40  ;;  %v7621_v47 = vmul.f32 %v17034_v49, %v6657_v5  ;;  %v17217_v28 = vadd.f32 %v17061_v8, %v20066_v20  ;;  %v20067_v40 = vld [vmem:[#allocation52_spill] sm:$0xff] }
 0x345   :  { %v6599_v29 = vpop.f32.mrf.mxu1  ;;  %v7684_v18 = vadd.f32 %v17049_v60, %v7619_v41  ;;  %v6659_v26 = vadd.f32 %v6658_v12, %v17097_v44  ;;  %v6660_v30 = vpop.f32.mrf.mxu0  ;;  %v17225_v22 = vadd.f32 %v17103_v4, %v6473_v25  ;;  %v17229_v61 = vadd.f32 %v17083_v45, %v20067_v40  ;;  %v20068_v44 = vld [vmem:[#allocation105_spill] sm:$0xff]  ;;  %v13095_v45 = vld [vmem:[%s19613_s4 + $0xad0] ss:$12 sps:$4 sm:$0xff]   ;;  %v13097_v13 = vld [vmem:[%s19613_s4 + $0xb78] ss:$12 sps:$4 sm:$0xff]  }
 0x346   :  { %7872 = vst [vmem:[%s19616_s10 + $0x4] sm:$0xff] %v11450_v14  ;;  %v6661_v8 = vadd.f32 %v6660_v30, %v17107_v46  ;;  %12065 = vmatpush3.bf16.msra.mxu0 %v13091_v21  ;;  %v7731_v54 = vmax.f32 %v7683_v63, 0.0  ;;  %v7686_v2 = vadd.f32 %v17037_v9, %v7621_v47  ;;  %v17243_v5 = vadd.f32 %v17125_v38, %v17146_v23  ;;  %v20070_v12 = vld [vmem:[#allocation68_spill] sm:$0xff] }
 0x347   :  { %v6603_v15 = vpop.f32.mrf.mxu1  ;;  %7202 = vmatmul.mubr.bf16.gmra.mxu1 %v20068_v44  ;;  %v7732_v34 = vmax.f32 %v7684_v18, 0.0  ;;  %v7622_v4 = vmul.f32 %v17040_v48, %v6659_v26  ;;  %v6662_v25 = vpop.f32.mrf.mxu0  ;;  %12066 = vmatprep.subr.bf16.mxu0 %v13093_v32  ;;  %v17246_v46 = vadd.f32 %v17148_v57, %v6477_v52  ;;  %v17256_v63 = vadd.f32 %v17167_v62, %v17165_v19  ;;  %v13082_v14 = vld [vmem:[%s19613_s4 + $0xd58] ss:$12 sps:$4 sm:$0xff]   ;;  %v17294_v44 = vld [vmem:[%s19613_s4 + $0xb60] ss:$12 sps:$4 sm:$0xff]  }
 0x348   :  { %7339 = vmatprep.mubr.bf16.mxu1 %v20069_v1  ;;  %v7624_v21 = vmul.f32 %v17034_v49, %v6661_v8  ;;  %v6663_v16 = vadd.f32 %v6662_v25, %v17116_v10  ;;  %v17258_v41 = vadd.f32 %v6595_v43, %v6483_v55  ;;  %v17262_v32 = vadd.f32 %v6597_v59, %v6485_v53  ;;  %v13080_v10 = vld [vmem:[%s19613_s4 + $0xcb0] ss:$12 sps:$4 sm:$0xff]   ;;  %v17311_v1 = vld [vmem:[%s19613_s4 + $0xaa0] ss:$12 sps:$4 sm:$0xff]  }
 0x349   :  { %v6605_v38 = vpop.f32.mrf.mxu1  ;;  %v11451_v23 = vpack.c.bf16 %v7732_v34, %v7731_v54  ;;  %v7687_v57 = vadd.f32 %v17049_v60, %v7622_v4  ;;  %v6666_v52 = vpop.f32.mrf.mxu0  ;;  %7259 = vmatmul.mubr.bf16.gmra.mxu0 %v20070_v12  ;;  %v20071_v55 = vld [vmem:[#allocation102_spill] sm:$0xff]  ;;  %v17271_v43 = vadd.f32 %v6599_v29, %v6487_v27  ;;  %v17273_v51 = vadd.f32 %v6603_v15, %v6491_v58  ;;  %v7906_v18 = vld [vmem:[#allocation3 + $0x98] sm:$0x11] }
 0x34a   :  { %v7689_v36 = vadd.f32 %v17037_v9, %v7624_v21  ;;  %v7625_v19 = vmul.f32 %v17040_v48, %v6663_v16  ;;  %v6667_v62 = vadd.f32 %v6666_v52, %v17119_v35  ;;  %7266 = vmatprep.mubr.bf16.mxu0 %v20071_v55  ;;  %v7734_v53 = vmax.f32 %v7686_v2, 0.0  ;;  %12067 = vmatpush3.bf16.msra.mxu0 %v13095_v45  ;;  %v13099_v35 = vld [vmem:[%s19613_s4 + $0xab8] ss:$12 sps:$4 sm:$0xff]   ;;  %v13086_v52 = vld [vmem:[%s19613_s4 + $0xd40] ss:$12 sps:$4 sm:$0xff]  }
 0x34b   :  { %v6607_v0 = vpop.f32.mrf.mxu1  ;;  %7873 = vst [vmem:[%s19616_s10 + $0x14] sm:$0xff] %v11451_v23  ;;  %v7735_v59 = vmax.f32 %v7687_v57, 0.0  ;;  %v6668_v47 = vpop.f32.mrf.mxu0  ;;  %v17284_v27 = vadd.f32 %v6605_v38, %v6493_v37  ;;  %12068 = vmatprep.subr.bf16.mxu0 %v13097_v13  ;;  %v7912_v26 = vld [vmem:[#allocation3 + $0x278] sm:$0x11]  ;;  %v7907_v54 = vsel %vm13846_vm8, 4286644096, %v7906_v18 }
 0x34c   :  { %v7737_v58 = vmax.f32 %v7689_v36, 0.0  ;;  %v7690_v20 = vadd.f32 %v17049_v60, %v7625_v19  ;;  %v7627_v29 = vmul.f32 %v17034_v49, %v6667_v62  ;;  %v6669_v8 = vadd.f32 %v6668_v47, %v17131_v11  ;;  %v7918_v34 = vld [vmem:[#allocation3 + $0xf8] sm:$0x11]  ;;  %7908 = vst [vmem:[#allocation3 + $0x98] sm:$0x11] %v7907_v54  ;;  %v17318_v13 = vld [vmem:[%s19612_s0] sm:$0xff] }
 0x34d   :  { %v17288_v30 = vpop.f32.mrf.mxu1  ;;  %v11452_v40 = vpack.c.bf16 %v7735_v59, %v7734_v53  ;;  %v6670_v15 = vpop.f32.mrf.mxu0  ;;  %v17299_v2 = vadd.f32 %v6607_v0, %v17217_v28  ;;  %v13084_v11 = vld [vmem:[%s19613_s4 + $0xc98] ss:$12 sps:$4 sm:$0xff]   ;;  %v13161_v21 = vmov 4286644096   ;;  %v20073_v38 = vld [vmem:[#allocation14_spill] sm:$0xff] }
 0x34e   :  { %v7738_v4 = vmax.f32 %v7690_v20, 0.0  ;;  %v17302_v25 = vadd.f32 %v17037_v9, %v7627_v29  ;;  %v6671_v45 = vadd.f32 %v6670_v15, %v17137_v3  ;;  %7888 = vst [vmem:[#allocation3 + $0x220] sm:$0xff] %v13161_v21  ;;  %7890 = vst [vmem:[#allocation3 + $0x248] sm:$0x11] %v13161_v21  ;;  %v8002_v28 = vld [vmem:[#allocation3 + $0x120] sm:$0x11]  ;;  %v7628_v23 = vmul.f32 %v17040_v48, %v6669_v8 }
 0x34f   :  { %v8008_v16 = vld [vmem:[#allocation3] sm:$0x11]  ;;  %7891 = vst [vmem:[#allocation3 + $0x270] sm:$0x11] %v13161_v21  ;;  %7894 = vst [vmem:[#allocation3 + $0x1b0] sm:$0x11] %v13161_v21  ;;  %v11626_v3 = vpop.f32.mrf.mxu1  ;;  %7340 = vmatmul.mubr.bf16.vlgmr.msra.gmra.mxu1 %v20073_v38  ;;  %v6672_v57 = vpop.f32.mrf.mxu0  ;;  %12069 = vmatpush3.bf16.msra.mxu0 %v13099_v35 }
 0x350   :  { %7895 = vst [vmem:[#allocation3 + $0xe8] sm:$0x11] %v13161_v21  ;;  %7899 = vst [vmem:[#allocation3 + $0x218] sm:$0x11] %v13161_v21  ;;  %v7913_v12 = vsel %vm13846_vm8, 4286644096, %v7912_v26  ;;  %12123 = vmatpush3.bf16.msra.mxu1 %v13080_v10  ;;  %v11453_v0 = vpack.c.bf16 %v7738_v4, %v7737_v58  ;;  %v7630_v59 = vmul.f32 %v17034_v49, %v6671_v45  ;;  %12070 = vmatprep.subr.bf16.mxu0 %v17294_v44 }
 0x351   :  { %7900 = vst [vmem:[#allocation3 + $0xa0] sm:$0x11] %v13161_v21  ;;  %7903 = vst [vmem:[#allocation3 + $0x78] sm:$0x11] %v13161_v21  ;;  %v7919_v36 = vsel %vm13846_vm8, 4286644096, %v7918_v34  ;;  %v6673_v47 = vadd.f32 %v6672_v57, %v17140_v50  ;;  %v11627_v10 = vpop.f32.mrf.mxu1  ;;  %12124 = vmatprep.subr.bf16.mxu1 %v13082_v14  ;;  %v7693_v58 = vadd.f32 %v17049_v60, %v7628_v23  ;;  %v6676_v18 = vpop.f32.mrf.mxu0 }
 0x352   :  { %7904 = vst [vmem:[#allocation3 + $0x190] sm:$0x11] %v13161_v21  ;;  %7874 = vst [vmem:[%s19616_s10 + $0x24] sm:$0xff] %v11452_v40  ;;  %v8003_v62 = vsel %vm13868_vm11, 4286644096, %v8002_v28  ;;  %v20075_v55 = vld [vmem:[#allocation15_spill] sm:$0xff]  ;;  %v17360_v15 = vadd.f32 %v11627_v10, %v11626_v3  ;;  %v7695_v14 = vadd.f32 %v17037_v9, %v7630_v59  ;;  %v6677_v34 = vadd.f32 %v6676_v18, %v17151_v7 }
 0x353   :  { %7347 = vmatprep.mubr.bf16.mxu1 %v20075_v55  ;;  %v7740_v53 = vmax.f32 %v17302_v25, 0.0  ;;  %v13105_v35 = vld [vmem:[%s19613_s4 + $0xb48] ss:$12 sps:$4 sm:$0xff]   ;;  %7914 = vst [vmem:[#allocation3 + $0x278] sm:$0x11] %v7913_v12  ;;  %v20076_v26 = vld [vmem:[#allocation103_spill] sm:$0xff]  ;;  %v7631_v54 = vmul.f32 %v17040_v48, %v6673_v47  ;;  %v11629_v25 = vpop.f32.mrf.mxu1  ;;  %v6678_v28 = vpop.f32.mrf.mxu0  ;;  %12071 = vmatpush3.bf16.msra.mxu0 %v17311_v1 }
 0x354   :  { %7920 = vst [vmem:[#allocation3 + $0xf8] sm:$0x11] %v7919_v36  ;;  %8004 = vst [vmem:[#allocation3 + $0x120] sm:$0x11] %v8003_v62  ;;  %v8014_v20 = vld [vmem:[#allocation3 + $0x28] sm:$0x11]  ;;  %7267 = vmatmul.mubr.bf16.gmra.mxu0 %v20076_v26  ;;  %12125 = vmatpush3.bf16.msra.mxu1 %v13084_v11  ;;  %v7633_v7 = vmul.f32 %v17034_v49, %v6677_v34  ;;  %v6679_v12 = vadd.f32 %v6678_v28, %v17159_v42 }
 0x355   :  { %v17351_v29 = vld [vmem:[%s19612_s0 + $0x10] sm:$0xff]  ;;  %v8009_v50 = vsel %vm13868_vm11, 4286644096, %v8008_v16  ;;  %v8015_v40 = vsel %vm13868_vm11, 4286644096, %v8014_v20  ;;  %v8131_v8 = vshrl.u32 %v17318_v13, 16  ;;  %v7696_v57 = vadd.f32 %v17049_v60, %v7631_v54  ;;  %12126 = vmatprep.subr.bf16.mxu1 %v13086_v52  ;;  %v6680_v11 = vpop.f32.mrf.mxu0  ;;  %12072 = vmatprep.subr.bf16.mxu0 %v13105_v35 }
 0x356   :  { %7875 = vst [vmem:[%s19616_s10 + $0x34] sm:$0xff] %v11453_v0  ;;  %v20077_v4 = vld [vmem:[#allocation71_spill] sm:$0xff]  ;;  %8010 = vst [vmem:[#allocation3] sm:$0x11] %v8009_v50  ;;  %v7741_v45 = vmax.f32 %v7693_v58, 0.0  ;;  %v8134_v3 = vshll.u32 %v17318_v13, 16  ;;  %v11630_v13 = vpop.f32.mrf.mxu1  ;;  %v7698_v20 = vadd.f32 %v17037_v9, %v7633_v7  ;;  %v6681_v35 = vadd.f32 %v6680_v11, %v17174_v31 }
 0x357   :  { %7274 = vmatprep.mubr.bf16.mxu0 %v20077_v4  ;;  %8016 = vst [vmem:[#allocation3 + $0x28] sm:$0x11] %v8015_v40  ;;  %v17370_v16 = vrot.slane %v8131_v8, 7  ;;  %v8147_v38 = vshrl.u32 %v17351_v29, 16  ;;  %v7743_v23 = vmax.f32 %v7695_v14, 0.0  ;;  %v8102_v44 = vld [vmem:[%s19612_s0 + $0x20] sm:$0xff]  ;;  %v17391_v1 = vadd.f32 %v11630_v13, %v11629_v25  ;;  %v6682_v18 = vpop.f32.mrf.mxu0 }
 0x358   :  { %v13088_v36 = vld [vmem:[%s19613_s4 + $0xc80] ss:$12 sps:$4 sm:$0xff]   ;;  %v11454_v62 = vpack.c.bf16 %v7741_v45, %v7740_v53  ;;  %v13090_v55 = vld [vmem:[%s19613_s4 + $0xd28] ss:$12 sps:$4 sm:$0xff]   ;;  %v7744_v47 = vmax.f32 %v7696_v57, 0.0  ;;  %v7634_v53 = vmul.f32 %v17040_v48, %v6679_v12  ;;  %v11632_v10 = vpop.f32.mrf.mxu1  ;;  %v13109_v26 = vld [vmem:[%s19617_s7 + $0x78] sm:$0xff]   ;;  %v6683_v25 = vadd.f32 %v6682_v18, %v17182_v56 }
 0x359   :  { %v8136_v42 = vor.u32 %v8134_v3, %v17370_v16  ;;  %v8144_v0 = vrot.slane %v17370_v16, 4  ;;  %v17389_v59 = vrot.slane %v8147_v38, 7  ;;  %v13106_v52 = vld [vmem:[%s19613_s4 + $0xa88] ss:$12 sps:$4 sm:$0xff]   ;;  %v8150_v50 = vshll.u32 %v17351_v29, 16  ;;  %v20079_v14 = vld [vmem:[#allocation19_spill] sm:$0xff]  ;;  %12127 = vmatpush3.bf16.msra.mxu1 %v13088_v36  ;;  %v6686_v3 = vpop.f32.mrf.mxu0 }
 0x35a   :  { %v20078_v58 = vld [vmem:[#allocation18_spill] sm:$0xff]  ;;  %7876 = vst [vmem:[%s19616_s10 + $0x44] sm:$0xff] %v11454_v62  ;;  %v8163_v8 = vshrl.u32 %v8102_v44, 16  ;;  %v11455_v54 = vpack.c.bf16 %v7744_v47, %v7743_v23  ;;  %v7746_v34 = vmax.f32 %v7698_v20, 0.0  ;;  %v7699_v4 = vadd.f32 %v17049_v60, %v7634_v53  ;;  %v8450_v45 = vld [vmem:[#allocation3 + $0x98] sm:$0xff]  ;;  %v11633_v28 = vpop.f32.mrf.mxu1  ;;  %12128 = vmatprep.subr.bf16.mxu1 %v13090_v55  ;;  %v20081_v11 = vld [vmem:[#allocation77_spill] sm:$0xff]  ;;  %12073 = vmatpush3.bf16.msra.mxu0 %v13106_v52 }
 0x35b   :  { %7348 = vmatmul.mubr.bf16.gmra.mxu1 %v20078_v58  ;;  %v8160_v40 = vrot.slane %v17389_v59, 4  ;;  %v13092_v31 = vld [vmem:[%s19613_s4 + $0xc68] ss:$12 sps:$4 sm:$0xff]   ;;  %v7636_v29 = vmul.f32 %v17034_v49, %v6681_v35  ;;  %v20080_v38 = vld [vmem:[#allocation75_spill] sm:$0xff]  ;;  %v8152_v57 = vor.u32 %v8150_v50, %v17389_v59  ;;  %v8166_v56 = vshll.u32 %v8102_v44, 16  ;;  %v6688_v53 = vpop.f32.mrf.mxu0  ;;  %12186 = vmatprep.subr.bf16.mxu0 %v13109_v26 }
 0x35c   :  { %7355 = vmatprep.mubr.bf16.mxu1 %v20079_v14  ;;  %7275 = vmatmul.mubr.bf16.gmra.mxu0 %v20080_v38  ;;  %v13094_v23 = vld [vmem:[%s19613_s4 + $0xd10] ss:$12 sps:$4 sm:$0xff]   ;;  %v8165_v7 = vrot.slane %v8163_v8, 7  ;;  %v17420_v12 = vadd.f32 %v11633_v28, %v11632_v10  ;;  %7877 = vst [vmem:[%s19616_s10 + $0x54] sm:$0xff] %v11455_v54  ;;  %v7747_v36 = vmax.f32 %v7699_v4, 0.0  ;;  %v7637_v13 = vmul.f32 %v17040_v48, %v6683_v25  ;;  %v11635_v59 = vpop.f32.mrf.mxu1 }
 0x35d   :  { %v6687_v62 = vadd.f32 %v6686_v3, %v17185_v17  ;;  %7282 = vmatprep.mubr.bf16.mxu0 %v20081_v11  ;;  %v8456_v55 = vld [vmem:[#allocation3 + $0x120] sm:$0x11]  ;;  %v8462_v47 = vld [vmem:[#allocation3 + $0x278] sm:$0xff]  ;;  %v7701_v44 = vadd.f32 %v17037_v9, %v7636_v29  ;;  %v17431_v18 = vsel %vm13899_vm0, %v8136_v42, %v8450_v45  ;;  %v6689_v52 = vadd.f32 %v6688_v53, %v17197_v33  ;;  %v6690_v42 = vpop.f32.mrf.mxu0 }
 0x35e   :  { %v8468_v20 = vld [vmem:[#allocation3] sm:$0x11]  ;;  %v8168_v10 = vor.u32 %v8166_v56, %v8165_v7  ;;  %v8176_v58 = vrot.slane %v8165_v7, 4  ;;  %v11456_v50 = vpack.c.bf16 %v7747_v36, %v7746_v34  ;;  %v7702_v17 = vadd.f32 %v17049_v60, %v7637_v13  ;;  %12129 = vmatpush3.bf16.msra.mxu1 %v13092_v31  ;;  %v13096_v14 = vld [vmem:[%s19613_s4 + $0xc50] ss:$12 sps:$4 sm:$0xff]   ;;  %8452 = vst [vmem:[#allocation3 + $0x98] sm:$0xff] %v17431_v18  ;;  %v11636_v4 = vpop.f32.mrf.mxu1 }
 0x35f   :  { %v7639_v8 = vmul.f32 %v17034_v49, %v6687_v62  ;;  %v8474_v26 = vld [vmem:[#allocation3 + $0xf8] sm:$0xff]  ;;  %v8480_v54 = vld [vmem:[#allocation3 + $0x28] sm:$0x11]  ;;  %v7749_v25 = vmax.f32 %v7701_v44, 0.0  ;;  %12130 = vmatprep.subr.bf16.mxu1 %v13094_v23  ;;  %v8457_v33 = vsel %vm13846_vm8, %v8144_v0, %v8456_v55  ;;  %v17449_v31 = vsel %vm13899_vm0, %v8152_v57, %v8462_v47  ;;  %v20083_v23 = vld [vmem:[#allocation20_spill] sm:$0xff]  ;;  %v6692_v57 = vpop.f32.mrf.mxu0 }
 0x360   :  { %v13098_v34 = vld [vmem:[%s19613_s4 + $0xcf8] ss:$12 sps:$4 sm:$0xff]   ;;  %v8469_v45 = vsel %vm13846_vm8, %v8160_v40, %v8468_v20  ;;  %v17453_v28 = vadd.f32 %v11636_v4, %v11635_v59  ;;  %7878 = vst [vmem:[%s19616_s10 + $0x64] sm:$0xff] %v11456_v50  ;;  %v7750_v29 = vmax.f32 %v7702_v17, 0.0  ;;  %v7640_v16 = vmul.f32 %v17040_v48, %v6689_v52  ;;  %8458 = vst [vmem:[#allocation3 + $0x120] sm:$0x11] %v8457_v33  ;;  %v11638_v38 = vpop.f32.mrf.mxu1 }
 0x361   :  { %v7704_v3 = vadd.f32 %v17037_v9, %v7639_v8  ;;  %8464 = vst [vmem:[#allocation3 + $0x278] sm:$0xff] %v17449_v31  ;;  %8470 = vst [vmem:[#allocation3] sm:$0x11] %v8469_v45  ;;  %v7909_v0 = vld [vmem:[#allocation3 + $0x1a8] sm:$0x11]  ;;  %v6691_v40 = vadd.f32 %v6690_v42, %v17207_v24  ;;  %v17465_v7 = vsel %vm13899_vm0, %v8168_v10, %v8474_v26  ;;  %v6696_v44 = vpop.f32.mrf.mxu0  ;;  %v20085_v53 = vld [vmem:[#allocation79_spill] sm:$0xff] }
 0x362   :  { %v8481_v56 = vsel %vm13846_vm8, %v8176_v58, %v8480_v54  ;;  %v8770_v36 = vmax.bf16 %v13161_v21, %v17431_v18  ;;  %v20084_v13 = vld [vmem:[#allocation109_spill] sm:$0xff]  ;;  %v11457_v62 = vpack.c.bf16 %v7750_v29, %v7749_v25  ;;  %v7705_v55 = vadd.f32 %v17049_v60, %v7640_v16  ;;  %12131 = vmatpush3.bf16.msra.mxu1 %v13096_v14  ;;  %v13100_v24 = vld [vmem:[%s19613_s4 + $0xc38] ss:$12 sps:$4 sm:$0xff]   ;;  %v11639_v20 = vpop.f32.mrf.mxu1 }
 0x363   :  { %7356 = vmatmul.mubr.bf16.gmra.mxu1 %v20083_v23  ;;  %v7752_v11 = vmax.f32 %v7704_v3, 0.0  ;;  %v6693_v47 = vadd.f32 %v6692_v57, %v17213_v6  ;;  %8476 = vst [vmem:[#allocation3 + $0xf8] sm:$0xff] %v17465_v7  ;;  %8482 = vst [vmem:[#allocation3 + $0x28] sm:$0x11] %v8481_v56  ;;  %v7642_v59 = vmul.f32 %v17034_v49, %v6691_v40  ;;  %12132 = vmatprep.subr.bf16.mxu1 %v13098_v34  ;;  %v13103_v10 = vld [vmem:[%s19613_s4 + $0xce0] ss:$12 sps:$4 sm:$0xff]   ;;  %v6698_v4 = vpop.f32.mrf.mxu0 }
 0x364   :  { %7363 = vmatprep.mubr.bf16.mxu1 %v20084_v13  ;;  %7283 = vmatmul.mubr.bf16.gmra.mxu0 %v20085_v53  ;;  %v8774_v6 = vmax.bf16 %v17449_v31, %v17431_v18  ;;  %v17486_v58 = vmax.bf16 %v8770_v36, %v17449_v31  ;;  %v7910_v50 = vsel %vm13846_vm8, 4286644096, %v7909_v0  ;;  %v17490_v17 = vadd.f32 %v11639_v20, %v11638_v38  ;;  %v20086_v26 = vld [vmem:[#allocation80_spill] sm:$0xff]  ;;  %v11641_v18 = vpop.f32.mrf.mxu1  ;;  %v13107_v16 = vld [vmem:[%s19613_s4 + $0xcc8] ss:$12 sps:$4 sm:$0xff]  }
 0x365   :  { %7879 = vst [vmem:[%s19616_s10 + $0x74] sm:$0xff] %v11457_v62  ;;  %v7753_v8 = vmax.f32 %v7705_v55, 0.0  ;;  %v7643_v52 = vmul.f32 %v17040_v48, %v6693_v47  ;;  %v6697_v14 = vadd.f32 %v6696_v44, %v17222_v39  ;;  %7290 = vmatprep.mubr.bf16.mxu0 %v20086_v26  ;;  %7911 = vst [vmem:[#allocation3 + $0x1a8] sm:$0x11] %v7910_v50  ;;  %v13104_v3 = vld [vmem:[%s19613_s4 + $0xc20] ss:$12 sps:$4 sm:$0xff]   ;;  %v6700_v57 = vpop.f32.mrf.mxu0 }
 0x366   :  { %v7707_v54 = vadd.f32 %v17037_v9, %v7642_v59  ;;  %v17500_v25 = vmax.bf16 %v8774_v6, %v17465_v7  ;;  %v8964_v42 = vshrl.u32 %v17486_v58, 16  ;;  %v8967_v34 = vshll.u32 %v17486_v58, 16  ;;  %12133 = vmatpush3.bf16.msra.mxu1 %v13100_v24  ;;  %v8644_v0 = vld [vmem:[#allocation3 + $0x248] sm:$0x11]  ;;  %v11642_v23 = vpop.f32.mrf.mxu1  ;;  %v20087_v20 = vld [vmem:[#allocation110_spill] sm:$0xff] }
 0x367   :  { %v11458_v33 = vpack.c.bf16 %v7753_v8, %v7752_v11  ;;  %v7708_v45 = vadd.f32 %v17049_v60, %v7643_v52  ;;  %v7645_v29 = vmul.f32 %v17034_v49, %v6697_v14  ;;  %v6699_v39 = vadd.f32 %v6698_v4, %v17225_v22  ;;  %12134 = vmatprep.subr.bf16.mxu1 %v13103_v10  ;;  %v8648_v56 = vld [vmem:[#allocation3 + $0x120] sm:$0x11]  ;;  %v6702_v44 = vpop.f32.mrf.mxu0  ;;  %v20088_v8 = vld [vmem:[#allocation27_spill] sm:$0xff] }
 0x368   :  { %v17515_v38 = vadd.f32 %v17288_v30, %v17229_v61  ;;  %v7755_v40 = vmax.f32 %v7707_v54, 0.0  ;;  %v8708_v22 = vld [vmem:[#allocation3 + $0x120] sm:$0x11]  ;;  %v8966_v36 = vrot.slane %v8964_v42, 4  ;;  %v17519_v62 = vadd.f32 %v11642_v23, %v11641_v18  ;;  %v11644_v24 = vpop.f32.mrf.mxu1  ;;  %v13108_v54 = vld [vmem:[%s19613_s4 + $0xc08] ss:$12 sps:$4 sm:$0xff]  }
 0x369   :  { %7880 = vst [vmem:[%s19616_s10 + $0x84] sm:$0xff] %v11458_v33  ;;  %v7756_v11 = vmax.f32 %v7708_v45, 0.0  ;;  %v7710_v61 = vadd.f32 %v17037_v9, %v7645_v29  ;;  %v7646_v30 = vmul.f32 %v17040_v48, %v6699_v39  ;;  %v8712_v55 = vld [vmem:[#allocation3] sm:$0x11]  ;;  %v6701_v59 = vadd.f32 %v6700_v57, %v17243_v5  ;;  %v6706_v42 = vpop.f32.mrf.mxu0  ;;  %v20089_v33 = vld [vmem:[#allocation81_spill] sm:$0xff]  ;;  %v20090_v23 = vld [vmem:[#allocation107_spill] sm:$0xff] }
 0x36a   :  { %v8837_v47 = vld [vmem:[#allocation3] sm:$0x11]  ;;  %v8772_v53 = vmax.bf16 %v8708_v22, %v8644_v0  ;;  %v8776_v10 = vmax.bf16 %v8712_v55, %v8648_v56  ;;  %v8841_v6 = vld [vmem:[#allocation3 + $0x28] sm:$0x11]  ;;  %v8969_v50 = vrot.slane %v8967_v34, 5  ;;  %v6703_v18 = vadd.f32 %v6702_v44, %v17246_v46  ;;  %12135 = vmatpush3.bf16.msra.mxu1 %v13104_v3  ;;  %v11645_v4 = vpop.f32.mrf.mxu1  ;;  %v13110_v34 = vld [vmem:[%s19617_s7 + $0xf8] sm:$0xff]  }
 0x36b   :  { %7364 = vmatmul.mubr.bf16.gmra.mxu1 %v20087_v20  ;;  %v11459_v52 = vpack.c.bf16 %v7756_v11, %v7755_v40  ;;  %v7758_v14 = vmax.f32 %v7710_v61, 0.0  ;;  %v7711_v26 = vadd.f32 %v17049_v60, %v7646_v30  ;;  %v7648_v5 = vmul.f32 %v17034_v49, %v6701_v59  ;;  %12136 = vmatprep.subr.bf16.mxu1 %v13107_v16  ;;  %v6708_v56 = vpop.f32.mrf.mxu0 }
 0x36c   :  { %7371 = vmatprep.mubr.bf16.mxu1 %v20088_v8  ;;  %7291 = vmatmul.mubr.bf16.gmra.mxu0 %v20089_v33  ;;  %v17539_v45 = vmax.bf16 %v8837_v47, %v8772_v53  ;;  %v17541_v29 = vmax.bf16 %v8841_v6, %v8776_v10  ;;  %v8992_v46 = vshrl.u32 %v17500_v25, 16  ;;  %v17544_v39 = vadd.f32 %v11645_v4, %v11644_v24  ;;  %v11647_v40 = vpop.f32.mrf.mxu1 }
 0x36d   :  { %7881 = vst [vmem:[%s19616_s10 + $0x94] sm:$0xff] %v11459_v52  ;;  %v7759_v3 = vmax.f32 %v7711_v26, 0.0  ;;  %v7649_v0 = vmul.f32 %v17040_v48, %v6703_v18  ;;  %v6707_v16 = vadd.f32 %v6706_v42, %v17256_v63  ;;  %7298 = vmatprep.mubr.bf16.mxu0 %v20090_v23  ;;  %v7713_v57 = vadd.f32 %v17037_v9, %v7648_v5  ;;  %v6710_v59 = vpop.f32.mrf.mxu0  ;;  %v20091_v52 = vld [vmem:[#allocation28_spill] sm:$0xff]  ;;  %v20093_v42 = vld [vmem:[#allocation29_spill] sm:$0xff] }
 0x36e   :  { %v8970_v22 = vor.u32 %v8969_v50, %v8966_v36  ;;  %v8973_v11 = vshll.u32 %v17539_v45, 16  ;;  %v8994_v61 = vrot.slane %v8992_v46, 4  ;;  %v6709_v24 = vadd.f32 %v6708_v56, %v17258_v41  ;;  %12137 = vmatpush3.bf16.msra.mxu1 %v13108_v54  ;;  %v11648_v20 = vpop.f32.mrf.mxu1 }
 0x36f   :  { %v11460_v30 = vpack.c.bf16 %v7759_v3, %v7758_v14  ;;  %v7714_v55 = vadd.f32 %v17049_v60, %v7649_v0  ;;  %v7651_v47 = vmul.f32 %v17034_v49, %v6707_v16  ;;  %v7761_v63 = vmax.f32 %v7713_v57, 0.0  ;;  %12250 = vmatprep.subr.bf16.mxu1 %v13110_v34  ;;  %v6712_v26 = vpop.f32.mrf.mxu0 }
 0x370   :  { %v8971_v44 = vrot.slane %v8970_v22, 4  ;;  %v8975_v53 = vrot.slane %v8973_v11, 5  ;;  %v8995_v10 = vshll.u32 %v17500_v25, 16  ;;  %v17558_v36 = vadd.f32 %v11648_v20, %v11647_v40  ;;  %v11650_v8 = vpop.f32.mrf.mxu1 }
 0x371   :  { %7882 = vst [vmem:[%s19616_s10 + $0xa4] sm:$0xff] %v11460_v30  ;;  %v7762_v6 = vmax.f32 %v7714_v55, 0.0  ;;  %v7716_v50 = vadd.f32 %v17037_v9, %v7651_v47  ;;  %v7652_v41 = vmul.f32 %v17040_v48, %v6709_v24  ;;  %v6711_v14 = vadd.f32 %v6710_v59, %v17262_v32  ;;  %v6716_v23 = vpop.f32.mrf.mxu0  ;;  %v20094_v32 = vld [vmem:[#allocation108_spill] sm:$0xff]  ;;  %v20095_v55 = vld [vmem:[#allocation21_spill] sm:$0xff] }
 0x372   :  { %v8976_v54 = vsel %vm14282_vm3, %v8971_v44, %v8975_v53  ;;  %v8997_v4 = vrot.slane %v8995_v10, 5  ;;  %v9001_v5 = vshll.u32 %v17541_v29, 16  ;;  %v6713_v3 = vadd.f32 %v6712_v26, %v17271_v43  ;;  %v11651_v0 = vpop.f32.mrf.mxu1 }
 0x373   :  { %7372 = vmatmul.mubr.bf16.gmra.mxu1 %v20091_v52  ;;  %v11461_v33 = vpack.c.bf16 %v7762_v6, %v7761_v63  ;;  %v7764_v34 = vmax.f32 %v7716_v50, 0.0  ;;  %v7717_v46 = vadd.f32 %v17049_v60, %v7652_v41  ;;  %v7654_v16 = vmul.f32 %v17034_v49, %v6711_v14 }
 0x374   :  { %7379 = vmatprep.mubr.bf16.mxu1 %v20093_v42  ;;  %7299 = vmatmul.mubr.bf16.gmra.mxu0 %v20094_v32  ;;  %v8998_v40 = vor.u32 %v8997_v4, %v8994_v61  ;;  %v9003_v57 = vrot.slane %v9001_v5, 5  ;;  %v9443_v56 = vmax.bf16 %v8976_v54, %v17486_v58  ;;  %v17576_v22 = vadd.f32 %v11651_v0, %v11650_v8  ;;  %v11653_v47 = vpop.f32.mrf.mxu1  ;;  %v6718_v61 = vpop.f32.mrf.mxu0  ;;  %v13111_v4 = vld [vmem:[%s19617_s7 + $0x38] sm:$0xff]   ;;  %v7915_v5 = vld [vmem:[#allocation3 + $0x160] sm:$0x11]  ;;  %v7921_v42 = vld [vmem:[#allocation3 + $0x168] sm:$0x11] }
 0x375   :  { %7883 = vst [vmem:[%s19616_s10 + $0xb4] sm:$0xff] %v11461_v33  ;;  %v7765_v11 = vmax.f32 %v7717_v46, 0.0  ;;  %v7655_v30 = vmul.f32 %v17040_v48, %v6713_v3  ;;  %v6717_v43 = vadd.f32 %v6716_v23, %v17273_v51  ;;  %7436 = vmatprep.mubr.bf16.mxu0 %v20095_v55  ;;  %v7719_v24 = vadd.f32 %v17037_v9, %v7654_v16  ;;  %v13113_v0 = vld [vmem:[%s19617_s7 + $0x70] sm:$0xff]   ;;  %v8011_v55 = vld [vmem:[#allocation3 + $0xd8] sm:$0x11] }
 0x376   :  { %v8999_v20 = vrot.slane %v8998_v40, 4  ;;  %v11304_v63 = vrot.slane %v17486_v58, 9  ;;  %v9541_v59 = vrot.slane %v17539_v45, 5  ;;  %v6719_v6 = vadd.f32 %v6718_v61, %v17284_v27  ;;  %v11654_v50 = vpop.f32.mrf.mxu1  ;;  %v6720_v41 = vpop.f32.mrf.mxu0  ;;  %v8005_v40 = vld [vmem:[#allocation3 + $0x230] sm:$0x11] }
 0x377   :  { %v11462_v44 = vpack.c.bf16 %v7765_v11, %v7764_v34  ;;  %v7720_v53 = vadd.f32 %v17049_v60, %v7655_v30  ;;  %v7657_v10 = vmul.f32 %v17034_v49, %v6717_v43  ;;  %v7767_v51 = vmax.f32 %v7719_v24, 0.0  ;;  %v20097_v34 = vld [vmem:[#allocation33_spill] sm:$0xff] }
 0x378   :  { %v9004_v8 = vsel %vm14282_vm3, %v8999_v20, %v9003_v57  ;;  %v9542_v14 = vsel %vm14847_vm6, %v11304_v63, %v9541_v59  ;;  %v11306_v58 = vrot.slane %v17500_v25, 9  ;;  %v17595_v26 = vadd.f32 %v11654_v50, %v11653_v47  ;;  %v11656_v33 = vpop.f32.mrf.mxu1  ;;  %v6722_v3 = vpop.f32.mrf.mxu0  ;;  %v20098_v57 = vld [vmem:[#allocation34_spill] sm:$0xff]  ;;  %v8017_v47 = vld [vmem:[#allocation3 + $0x1c8] sm:$0x11] }
 0x379   :  { %7884 = vst [vmem:[%s19616_s10 + $0xc4] sm:$0xff] %v11462_v44  ;;  %v7768_v45 = vmax.f32 %v7720_v53, 0.0  ;;  %v7722_v27 = vadd.f32 %v17037_v9, %v7657_v10  ;;  %v7658_v54 = vmul.f32 %v17040_v48, %v6719_v6  ;;  %v6721_v46 = vadd.f32 %v6720_v41, %v17299_v2  ;;  %v20100_v53 = vld [vmem:[#allocation25_spill] sm:$0xff] }
 0x37a   :  { %v9445_v16 = vmax.bf16 %v9004_v8, %v17500_v25  ;;  %v9549_v23 = vrot.slane %v17541_v29, 5  ;;  %v17612_v32 = vmax.bf16 %v9542_v14, %v9443_v56  ;;  %v6723_v2 = vadd.f32 %v6722_v3, %v17515_v38  ;;  %v11657_v24 = vpop.f32.mrf.mxu1  ;;  %v11690_v20 = vpop.f32.mrf.mxu0  ;;  %v20099_v25 = vld [vmem:[#allocation22_spill] sm:$0xff]  ;;  %v13117_v10 = vld [vmem:[%s19617_s7 + $0x68] sm:$0xff]  }
 0x37b   :  { %7380 = vmatmul.mubr.bf16.gmra.mxu1 %v20097_v34  ;;  %v11463_v11 = vpack.c.bf16 %v7768_v45, %v7767_v51  ;;  %v7770_v30 = vmax.f32 %v7722_v27, 0.0  ;;  %v7723_v43 = vadd.f32 %v17049_v60, %v7658_v54  ;;  %v7660_v61 = vmul.f32 %v17034_v49, %v6721_v46  ;;  %v13115_v29 = vld [vmem:[%s19617_s7 + $0x30] sm:$0xff]   ;;  %v8099_v50 = vld [vmem:[%s19612_s0 + $0x8] sm:$0xff]  ;;  %v17646_v51 = vld [vmem:[%s19612_s0 + $0x18] sm:$0xff] }
 0x37c   :  { %7387 = vmatprep.mubr.bf16.mxu1 %v20098_v57  ;;  %7437 = vmatmul.mubr.bf16.vlgmr.msra.gmra.mxu0 %v20099_v25  ;;  %v9550_v56 = vsel %vm14847_vm6, %v11306_v58, %v9549_v23  ;;  %v7916_v63 = vsel %vm13846_vm8, 4286644096, %v7915_v5  ;;  %v7922_v38 = vsel %vm13846_vm8, 4286644096, %v7921_v42  ;;  %v17628_v59 = vadd.f32 %v11657_v24, %v11656_v33  ;;  %v11691_v8 = vpop.f32.mrf.mxu0  ;;  %v13119_v57 = vld [vmem:[%s19617_s7 + $0x28] sm:$0xff]  }
 0x37d   :  { %7885 = vst [vmem:[%s19616_s10 + $0xd4] sm:$0xff] %v11463_v11  ;;  %v7771_v49 = vmax.f32 %v7723_v43, 0.0  ;;  %v7661_v44 = vmul.f32 %v17040_v48, %v6723_v2  ;;  %7444 = vmatprep.mubr.bf16.mxu0 %v20100_v53  ;;  %12187 = vmatpush3.bf16.msra.mxu0 %v13111_v4  ;;  %v17638_v6 = vmax.bf16 %v9550_v56, %v9445_v16  ;;  %7917 = vst [vmem:[#allocation3 + $0x160] sm:$0x11] %v7916_v63  ;;  %v11659_v48 = vpop.f32.mrf.mxu1  ;;  %v20101_v2 = vld [vmem:[#allocation37_spill] sm:$0xff]  ;;  %v13123_v63 = vld [vmem:[%s19617_s7 + $0x20] sm:$0xff]  }
 0x37e   :  { %7923 = vst [vmem:[#allocation3 + $0x168] sm:$0x11] %v7922_v38  ;;  %v7725_v41 = vadd.f32 %v17037_v9, %v7660_v61  ;;  %12188 = vmatprep.subr.bf16.mxu0 %v13113_v0  ;;  %v8006_v14 = vsel %vm13868_vm11, 4286644096, %v8005_v40  ;;  %v8012_v58 = vsel %vm13868_vm11, 4286644096, %v8011_v55  ;;  %v11692_v4 = vadd.f32 %v11691_v8, %v11690_v20  ;;  %v11693_v34 = vpop.f32.mrf.mxu0 }
 0x37f   :  { %v8018_v45 = vsel %vm13868_vm11, 4286644096, %v8017_v47  ;;  %v11464_v27 = vpack.c.bf16 %v7771_v49, %v7770_v30  ;;  %v7726_v54 = vadd.f32 %v17049_v60, %v7661_v44  ;;  %8007 = vst [vmem:[#allocation3 + $0x230] sm:$0x11] %v8006_v14  ;;  %8013 = vst [vmem:[#allocation3 + $0xd8] sm:$0x11] %v8012_v58  ;;  %v11660_v42 = vpop.f32.mrf.mxu1 }
 0x380   :  { %8019 = vst [vmem:[#allocation3 + $0x1c8] sm:$0x11] %v8018_v45  ;;  %v8103_v9 = vld [vmem:[%s19612_s0 + $0x28] sm:$0xff]  ;;  %v7773_v33 = vmax.f32 %v7725_v41, 0.0  ;;  %v8138_v3 = vshrl.u32 %v8099_v50, 16  ;;  %v8141_v0 = vshll.u32 %v8099_v50, 16  ;;  %v17663_v16 = vadd.f32 %v11660_v42, %v11659_v48  ;;  %v11694_v55 = vpop.f32.mrf.mxu0 }
 0x381   :  { %v7924_v60 = vld [vmem:[#allocation3 + $0x118] sm:$0x11]  ;;  %7886 = vst [vmem:[%s19616_s10 + $0xe4] sm:$0xff] %v11464_v27  ;;  %v7774_v23 = vmax.f32 %v7726_v54, 0.0  ;;  %v17669_v40 = vadd.f32 %v11692_v4, %v17360_v15  ;;  %12189 = vmatpush3.bf16.msra.mxu0 %v13115_v29  ;;  %v8154_v11 = vshrl.u32 %v17646_v51, 16  ;;  %v11662_v43 = vpop.f32.mrf.mxu1  ;;  %v13121_v47 = vld [vmem:[%s19617_s7 + $0x60] sm:$0xff]   ;;  %v11695_v56 = vadd.f32 %v11694_v55, %v11693_v34 }
 0x382   :  { %v7930_v30 = vld [vmem:[#allocation3 + $0x240] sm:$0x11]  ;;  %12190 = vmatprep.subr.bf16.mxu0 %v13117_v10  ;;  %v8140_v24 = vrot.slane %v8138_v3, 7  ;;  %v8157_v15 = vshll.u32 %v17646_v51, 16  ;;  %v8170_v61 = vshrl.u32 %v8103_v9, 16  ;;  %v8173_v20 = vshll.u32 %v8103_v9, 16  ;;  %v11696_v50 = vpop.f32.mrf.mxu0 }
 0x383   :  { %7388 = vmatmul.mubr.bf16.gmra.mxu1 %v20101_v2  ;;  %v20102_v25 = vld [vmem:[#allocation113_spill] sm:$0xff]  ;;  %v11465_v29 = vpack.c.bf16 %v7774_v23, %v7773_v33  ;;  %v8156_v38 = vrot.slane %v8154_v11, 7  ;;  %v7925_v44 = vsel %vm13846_vm8, 4286644096, %v7924_v60  ;;  %v17689_v53 = vld [vmem:[%s19612_s0 + $0x30] sm:$0xff]  ;;  %v11663_v10 = vpop.f32.mrf.mxu1  ;;  %v13125_v48 = vld [vmem:[%s19617_s7 + $0x58] sm:$0xff]   ;;  %v17703_v54 = vadd.f32 %v11695_v56, %v17391_v1 }
 0x384   :  { %7395 = vmatprep.mubr.bf16.mxu1 %v20102_v25  ;;  %v8453_v49 = vld [vmem:[#allocation3 + $0x1a8] sm:$0xff]  ;;  %v20103_v51 = vld [vmem:[#allocation26_spill] sm:$0xff]  ;;  %v8143_v41 = vor.u32 %v8141_v0, %v8140_v24  ;;  %v8145_v8 = vrot.slane %v8140_v24, 4  ;;  %v8172_v14 = vrot.slane %v8170_v61, 7  ;;  %v8465_v58 = vld [vmem:[#allocation3 + $0x160] sm:$0xff]  ;;  %v17697_v27 = vadd.f32 %v11663_v10, %v11662_v43  ;;  %v11697_v60 = vpop.f32.mrf.mxu0 }
 0x385   :  { %7445 = vmatmul.mubr.bf16.gmra.mxu0 %v20103_v51  ;;  %7926 = vst [vmem:[#allocation3 + $0x118] sm:$0x11] %v7925_v44  ;;  %v7931_v45 = vsel %vm13846_vm8, 4286644096, %v7930_v30  ;;  %7887 = vst [vmem:[%s19616_s10 + $0xf4] sm:$0xff] %v11465_v29  ;;  %v20104_v4 = vld [vmem:[#allocation30_spill] sm:$0xff]  ;;  %v8159_v9 = vor.u32 %v8157_v15, %v8156_v38  ;;  %v11665_v0 = vpop.f32.mrf.mxu1  ;;  %v11698_v55 = vadd.f32 %v11697_v60, %v11696_v50 }
 0x386   :  { %7452 = vmatprep.mubr.bf16.mxu0 %v20104_v4  ;;  %12191 = vmatpush3.bf16.msra.mxu0 %v13119_v57  ;;  %v8161_v42 = vrot.slane %v8156_v38, 4  ;;  %v8477_v33 = vld [vmem:[#allocation3 + $0x168] sm:$0xff]  ;;  %7932 = vst [vmem:[#allocation3 + $0x240] sm:$0x11] %v7931_v45  ;;  %v8020_v34 = vld [vmem:[#allocation3 + $0xb8] sm:$0x11]  ;;  %v8175_v23 = vor.u32 %v8173_v20, %v8172_v14  ;;  %v8454_v30 = vsel %vm13899_vm0, %v8143_v41, %v8453_v49  ;;  %v11699_v20 = vpop.f32.mrf.mxu0 }
 0x387   :  { %v8026_v3 = vld [vmem:[#allocation3 + $0x1f8] sm:$0x11]  ;;  %12192 = vmatprep.subr.bf16.mxu0 %v13121_v47  ;;  %v8177_v11 = vrot.slane %v8172_v14, 4  ;;  %v8459_v43 = vld [vmem:[#allocation3 + $0x230] sm:$0x11]  ;;  %v8179_v2 = vshrl.u32 %v17689_v53, 16  ;;  %v17713_v24 = vsel %vm13899_vm0, %v8159_v9, %v8465_v58  ;;  %v11666_v61 = vpop.f32.mrf.mxu1  ;;  %v8771_v56 = vmax.bf16 %v13161_v21, %v8454_v30 }
 0x388   :  { %v8471_v1 = vld [vmem:[#allocation3 + $0xd8] sm:$0x11]  ;;  %8455 = vst [vmem:[#allocation3 + $0x1a8] sm:$0xff] %v8454_v30  ;;  %v8460_v57 = vsel %vm13846_vm8, %v8145_v8, %v8459_v43  ;;  %v8483_v15 = vld [vmem:[#allocation3 + $0x1c8] sm:$0x11]  ;;  %8467 = vst [vmem:[#allocation3 + $0x160] sm:$0xff] %v17713_v24  ;;  %v17720_v25 = vsel %vm13899_vm0, %v8175_v23, %v8477_v33  ;;  %v8775_v38 = vmax.bf16 %v17713_v24, %v8454_v30  ;;  %v11700_v14 = vpop.f32.mrf.mxu0 }
 0x389   :  { %v8472_v47 = vsel %vm13846_vm8, %v8161_v42, %v8471_v1  ;;  %8461 = vst [vmem:[#allocation3 + $0x230] sm:$0x11] %v8460_v57  ;;  %v8484_v29 = vsel %vm13846_vm8, %v8177_v11, %v8483_v15  ;;  %v17729_v49 = vld [vmem:[%s19612_s0 + $0x40] sm:$0xff]  ;;  %v17731_v44 = vadd.f32 %v11666_v61, %v11665_v0  ;;  %v17734_v10 = vadd.f32 %v11698_v55, %v17420_v12  ;;  %v13127_v50 = vld [vmem:[%s19617_s7 + $0x18] sm:$0xff]   ;;  %v11668_v41 = vpop.f32.mrf.mxu1  ;;  %v20105_v8 = vld [vmem:[#allocation114_spill] sm:$0xff] }
 0x38a   :  { %8473 = vst [vmem:[#allocation3 + $0xd8] sm:$0x11] %v8472_v47  ;;  %12193 = vmatpush3.bf16.msra.mxu0 %v13123_v63  ;;  %8479 = vst [vmem:[#allocation3 + $0x168] sm:$0xff] %v17720_v25  ;;  %v8021_v21 = vsel %vm13868_vm11, 4286644096, %v8020_v34  ;;  %v13129_v12 = vld [vmem:[%s19617_s7 + $0x50] sm:$0xff]   ;;  %v17749_v63 = vmax.bf16 %v8771_v56, %v17713_v24  ;;  %v17752_v58 = vmax.bf16 %v8775_v38, %v17720_v25  ;;  %v11702_v0 = vpop.f32.mrf.mxu0 }
 0x38b   :  { %8485 = vst [vmem:[#allocation3 + $0x1c8] sm:$0x11] %v8484_v29  ;;  %v8027_v51 = vsel %vm13868_vm11, 4286644096, %v8026_v3  ;;  %7396 = vmatmul.mubr.bf16.gmra.mxu1 %v20105_v8  ;;  %12194 = vmatprep.subr.bf16.mxu0 %v13125_v48  ;;  %8022 = vst [vmem:[#allocation3 + $0xb8] sm:$0x11] %v8021_v21  ;;  %v11701_v9 = vadd.f32 %v11700_v14, %v11699_v20  ;;  %v11669_v3 = vpop.f32.mrf.mxu1 }
 0x38c   :  { %8028 = vst [vmem:[#allocation3 + $0x1f8] sm:$0x11] %v8027_v51  ;;  %v17754_v45 = vrot.slane %v8179_v2, 7  ;;  %v20106_v4 = vld [vmem:[#allocation44_spill] sm:$0xff]  ;;  %v8182_v42 = vshll.u32 %v17689_v53, 16  ;;  %v8195_v48 = vshrl.u32 %v17729_v49, 16  ;;  %v17769_v53 = vadd.f32 %v11669_v3, %v11668_v41  ;;  %v11703_v38 = vpop.f32.mrf.mxu0 }
 0x38d   :  { %7533 = vmatprep.mubr.bf16.mxu1 %v20106_v4  ;;  %v8198_v33 = vshll.u32 %v17729_v49, 16  ;;  %v17760_v34 = vld [vmem:[#allocation3] sm:$0x11]  ;;  %v20107_v60 = vld [vmem:[#allocation31_spill] sm:$0xff]  ;;  %v8978_v23 = vshrl.u32 %v17749_v63, 16  ;;  %v8981_v11 = vshll.u32 %v17749_v63, 16  ;;  %v17775_v55 = vadd.f32 %v11701_v9, %v17453_v28  ;;  %v11671_v29 = vpop.f32.mrf.mxu1 }
 0x38e   :  { %7453 = vmatmul.mubr.bf16.gmra.mxu0 %v20107_v60  ;;  %v9006_v30 = vshrl.u32 %v17752_v58, 16  ;;  %v9009_v43 = vshll.u32 %v17752_v58, 16  ;;  %v17767_v1 = vld [vmem:[#allocation3 + $0x28] sm:$0x11]  ;;  %v13112_v2 = vld [vmem:[%s19617_s7 + $0xb8] sm:$0xff]   ;;  %v13131_v47 = vld [vmem:[%s19617_s7 + $0x10] sm:$0xff]   ;;  %v11704_v8 = vadd.f32 %v11703_v38, %v11702_v0  ;;  %v8184_v3 = vor.u32 %v8182_v42, %v17754_v45  ;;  %v11705_v5 = vpop.f32.mrf.mxu0 }
 0x38f   :  { %v20108_v57 = vld [vmem:[#allocation111_spill] sm:$0xff]  ;;  %12195 = vmatpush3.bf16.msra.mxu0 %v13127_v50  ;;  %v8645_v15 = vld [vmem:[#allocation3 + $0x270] sm:$0x11]  ;;  %v11305_v61 = vrot.slane %v17749_v63, 9  ;;  %v13133_v28 = vld [vmem:[%s19617_s7 + $0x48] sm:$0xff]   ;;  %v8980_v50 = vrot.slane %v8978_v23, 4  ;;  %v8780_v60 = vmax.bf16 %v17767_v1, %v17760_v34 }
 0x390   :  { %7460 = vmatprep.mubr.bf16.mxu0 %v20108_v57  ;;  %v13114_v56 = vld [vmem:[%s19617_s7 + $0xf0] sm:$0xff]   ;;  %12196 = vmatprep.subr.bf16.mxu0 %v13129_v12  ;;  %v8983_v21 = vrot.slane %v8981_v11, 5  ;;  %v9008_v51 = vrot.slane %v9006_v30, 4  ;;  %v9011_v41 = vrot.slane %v9009_v43, 5  ;;  %v11672_v57 = vpop.f32.mrf.mxu1  ;;  %v8486_v0 = vld [vmem:[#allocation3 + $0x118] sm:$0xff]  ;;  %v17797_v20 = vadd.f32 %v11704_v8, %v17490_v17  ;;  %v13135_v42 = vld [vmem:[%s19617_s7 + $0x8] sm:$0xff]  }
 0x391   :  { %v8649_v14 = vld [vmem:[#allocation3 + $0x230] sm:$0x11]  ;;  %v8713_v9 = vld [vmem:[#allocation3 + $0xd8] sm:$0x11]  ;;  %v17794_v38 = vadd.f32 %v11672_v57, %v11671_v29  ;;  %v11706_v29 = vpop.f32.mrf.mxu0  ;;  %v20110_v57 = vld [vmem:[#allocation48_spill] sm:$0xff] }
 0x392   :  { %v8709_v4 = vld [vmem:[#allocation3 + $0x230] sm:$0x11]  ;;  %v8777_v13 = vmax.bf16 %v8713_v9, %v8649_v14  ;;  %v8838_v23 = vld [vmem:[#allocation3 + $0xd8] sm:$0x11]  ;;  %v8842_v11 = vld [vmem:[#allocation3 + $0x1c8] sm:$0x11]  ;;  %v8984_v30 = vor.u32 %v8983_v21, %v8980_v50  ;;  %v9012_v43 = vor.u32 %v9011_v41, %v9008_v51  ;;  %v11754_v50 = vpop.f32.mrf.mxu1 }
 0x393   :  { %v8773_v46 = vmax.bf16 %v8709_v4, %v8645_v15  ;;  %12197 = vmatpush3.bf16.msra.mxu0 %v13131_v47  ;;  %v13137_v15 = vld [vmem:[%s19617_s7 + $0x40] sm:$0xff]   ;;  %v8192_v14 = vrot.slane %v17754_v45, 4  ;;  %v8197_v4 = vrot.slane %v8195_v48, 7  ;;  %v20109_v21 = vld [vmem:[#allocation47_spill] sm:$0xff]  ;;  %v7927_v9 = vld [vmem:[#allocation3 + $0x228] sm:$0x11]  ;;  %v11707_v45 = vadd.f32 %v11706_v29, %v11705_v5 }
 0x394   :  { %7534 = vmatmul.mubr.bf16.vlgmr.msra.gmra.mxu1 %v20109_v21  ;;  %12198 = vmatprep.subr.bf16.mxu0 %v13133_v28  ;;  %v8906_v17 = vmax.bf16 %v8842_v11, %v8777_v13  ;;  %v8985_v41 = vrot.slane %v8984_v30, 4  ;;  %v9013_v47 = vrot.slane %v9012_v43, 4  ;;  %v8492_v8 = vld [vmem:[#allocation3 + $0xb8] sm:$0x11]  ;;  %v13116_v12 = vld [vmem:[%s19617_s7 + $0xb0] sm:$0xff]   ;;  %v13118_v48 = vld [vmem:[%s19617_s7 + $0xe8] sm:$0xff]   ;;  %v17818_v28 = vsel %vm13899_vm0, %v8184_v3, %v8486_v0  ;;  %v11755_v11 = vpop.f32.mrf.mxu1 }
 0x395   :  { %v8902_v51 = vmax.bf16 %v8838_v23, %v8773_v46  ;;  %7541 = vmatprep.mubr.bf16.mxu1 %v20110_v57  ;;  %12251 = vmatpush3.bf16.msra.mxu1 %v13112_v2  ;;  %v8200_v46 = vor.u32 %v8198_v33, %v8197_v4  ;;  %v8208_v13 = vrot.slane %v8197_v4, 4  ;;  %v8498_v23 = vld [vmem:[#allocation3 + $0x240] sm:$0xff]  ;;  %v11708_v2 = vpop.f32.mrf.mxu0  ;;  %8488 = vst [vmem:[#allocation3 + $0x118] sm:$0xff] %v17818_v28  ;;  %v8504_v57 = vld [vmem:[#allocation3 + $0x1f8] sm:$0x11]  ;;  %v20112_v4 = vld [vmem:[#allocation38_spill] sm:$0xff] }
 0x396   :  { %12252 = vmatprep.subr.bf16.mxu1 %v13114_v56  ;;  %v20111_v30 = vld [vmem:[#allocation112_spill] sm:$0xff]  ;;  %v9015_v5 = vshll.u32 %v8906_v17, 16  ;;  %v9553_v29 = vrot.slane %v8906_v17, 5  ;;  %v11756_v49 = vadd.f32 %v11755_v11, %v11754_v50  ;;  %v17823_v33 = vadd.f32 %v11707_v45, %v17519_v62  ;;  %v13130_v34 = vld [vmem:[%s19617_s7 + $0xd0] sm:$0xff]  }
 0x397   :  { %7461 = vmatmul.mubr.bf16.gmra.mxu0 %v20111_v30  ;;  %v8987_v43 = vshll.u32 %v8902_v51, 16  ;;  %v9545_v21 = vrot.slane %v8902_v51, 5  ;;  %v13138_v56 = vld [vmem:[%s19617_s7] sm:$0xff]   ;;  %v8493_v3 = vsel %vm13846_vm8, %v8192_v14, %v8492_v8  ;;  %v7928_v0 = vsel %vm13846_vm8, 4286644096, %v7927_v9  ;;  %v11757_v51 = vpop.f32.mrf.mxu1  ;;  %v11709_v17 = vpop.f32.mrf.mxu0 }
 0x398   :  { %7468 = vmatprep.mubr.bf16.mxu0 %v20112_v4  ;;  %12199 = vmatpush3.bf16.msra.mxu0 %v13135_v42  ;;  %v9017_v11 = vrot.slane %v9015_v5, 5  ;;  %v20113_v42 = vrot.slane %v17752_v58, 9  ;;  %8494 = vst [vmem:[#allocation3 + $0xb8] sm:$0x11] %v8493_v3  ;;  %7929 = vst [vmem:[#allocation3 + $0x228] sm:$0x11] %v7928_v0  ;;  %v17842_v14 = vadd.f32 %v11756_v49, %v17669_v40 }
 0x399   :  { %12200 = vmatprep.subr.bf16.mxu0 %v13137_v15  ;;  %v8989_v50 = vrot.slane %v8987_v43, 5  ;;  %v9546_v62 = vsel %vm14847_vm6, %v11305_v61, %v9545_v21  ;;  %12253 = vmatpush3.bf16.msra.mxu1 %v13116_v12  ;;  %v11710_v8 = vadd.f32 %v11709_v17, %v11708_v2  ;;  %v13120_v15 = vld [vmem:[%s19617_s7 + $0xa8] sm:$0xff]   ;;  %v17849_v9 = vsel %vm13899_vm0, %v8200_v46, %v8498_v23  ;;  %v11758_v30 = vpop.f32.mrf.mxu1  ;;  %v11711_v43 = vpop.f32.mrf.mxu0  ;;  %v13122_v40 = vld [vmem:[%s19617_s7 + $0xe0] sm:$0xff]   ;;  %v7933_v23 = vld [vmem:[#allocation3 + $0x258] sm:$0x11] }
 0x39a   :  { %v9554_v45 = vsel %vm14847_vm6, %v20113_v42, %v9553_v29  ;;  %v8505_v61 = vsel %vm13846_vm8, %v8208_v13, %v8504_v57  ;;  %12254 = vmatprep.subr.bf16.mxu1 %v13118_v48  ;;  %v9018_v2 = vsel %vm14282_vm3, %v9013_v47, %v9017_v11  ;;  %8500 = vst [vmem:[#allocation3 + $0x240] sm:$0xff] %v17849_v9  ;;  %v20115_v57 = vld [vmem:[#allocation54_spill] sm:$0xff]  ;;  %v7934_v17 = vsel %vm13846_vm8, 4286644096, %v7933_v23  ;;  %v20117_v42 = vld [vmem:[#allocation39_spill] sm:$0xff] }
 0x39b   :  { %v8990_v12 = vsel %vm14282_vm3, %v8985_v41, %v8989_v50  ;;  %8506 = vst [vmem:[#allocation3 + $0x1f8] sm:$0x11] %v8505_v61  ;;  %v8782_v46 = vmax.bf16 %v17818_v28, %v17465_v7  ;;  %v20114_v48 = vmax.bf16 %v17465_v7, %v17449_v31  ;;  %v11759_v5 = vadd.f32 %v11758_v30, %v11757_v51  ;;  %v11760_v29 = vpop.f32.mrf.mxu1  ;;  %v11712_v49 = vpop.f32.mrf.mxu0  ;;  %v8656_v51 = vld [vmem:[#allocation3 + $0x28] sm:$0x11] }
 0x39c   :  { %v17870_v21 = vadd.f32 %v11710_v8, %v17544_v39  ;;  %12201 = vmatpush3.bf16.msra.mxu0 %v13138_v56  ;;  %v9444_v41 = vmax.bf16 %v8990_v12, %v17749_v63  ;;  %v9446_v47 = vmax.bf16 %v9018_v2, %v17752_v58  ;;  %7542 = vmatmul.mubr.bf16.gmra.mxu1 %v20115_v57  ;;  %v20116_v56 = vld [vmem:[#allocation55_spill] sm:$0xff]  ;;  %v13124_v58 = vld [vmem:[%s19617_s7 + $0xa0] sm:$0xff]   ;;  %v20118_v12 = vld [vmem:[#allocation41_spill] sm:$0xff] }
 0x39d   :  { %v17867_v13 = vmax.bf16 %v20114_v48, %v17818_v28  ;;  %v17876_v4 = vmax.bf16 %v8782_v46, %v17849_v9  ;;  %v17882_v39 = vadd.f32 %v11759_v5, %v17703_v54  ;;  %7549 = vmatprep.mubr.bf16.mxu1 %v20116_v56  ;;  %12255 = vmatpush3.bf16.msra.mxu1 %v13120_v15  ;;  %v11761_v50 = vpop.f32.mrf.mxu1  ;;  %v11714_v11 = vpop.f32.mrf.mxu0  ;;  %v13126_v54 = vld [vmem:[%s19617_s7 + $0xd8] sm:$0xff]  }
 0x39e   :  { %v11713_v63 = vadd.f32 %v11712_v49, %v11711_v43  ;;  %v17888_v0 = vmax.bf16 %v9546_v62, %v9444_v41  ;;  %12256 = vmatprep.subr.bf16.mxu1 %v13122_v40  ;;  %v17896_v8 = vmax.bf16 %v9554_v45, %v9446_v47  ;;  %7935 = vst [vmem:[#allocation3 + $0x258] sm:$0x11] %v7934_v17  ;;  %v20131_v41 = vld [vmem:[#allocation116_spill] sm:$0xff] }
 0x39f   :  { %v9020_v31 = vshrl.u32 %v17867_v13, 16  ;;  %v9023_v7 = vshll.u32 %v17867_v13, 16  ;;  %v11308_v3 = vrot.slane %v17867_v13, 9  ;;  %7469 = vmatmul.mubr.bf16.gmra.mxu0 %v20117_v42  ;;  %v9048_v62 = vshrl.u32 %v17876_v4, 16  ;;  %v8720_v2 = vld [vmem:[#allocation3 + $0xb8] sm:$0x11]  ;;  %v11763_v23 = vpop.f32.mrf.mxu1  ;;  %v11715_v45 = vpop.f32.mrf.mxu0 }
 0x3a0   :  { %v11762_v30 = vadd.f32 %v11761_v50, %v11760_v29  ;;  %v17900_v43 = vadd.f32 %v11713_v63, %v17558_v36  ;;  %7476 = vmatprep.mubr.bf16.mxu0 %v20118_v12  ;;  %v8845_v46 = vld [vmem:[#allocation3 + $0xb8] sm:$0x11]  ;;  %v9051_v40 = vshll.u32 %v17876_v4, 16  ;;  %v11310_v48 = vrot.slane %v17876_v4, 9 }
 0x3a1   :  { %v9022_v15 = vrot.slane %v9020_v31, 4  ;;  %v9025_v61 = vrot.slane %v9023_v7, 5  ;;  %v8784_v47 = vmax.bf16 %v8720_v2, %v8656_v51  ;;  %v8909_v36 = vmax.bf16 %v8845_v46, %v8780_v60  ;;  %v8023_v29 = vld [vmem:[#allocation3 + $0x198] sm:$0x11]  ;;  %12257 = vmatpush3.bf16.msra.mxu1 %v13124_v58  ;;  %v11764_v17 = vpop.f32.mrf.mxu1  ;;  %v11717_v50 = vpop.f32.mrf.mxu0 }
 0x3a2   :  { %v17913_v57 = vadd.f32 %v11762_v30, %v17734_v10  ;;  %v11716_v49 = vadd.f32 %v11715_v45, %v11714_v11  ;;  %v13128_v31 = vld [vmem:[%s19617_s7 + $0x98] sm:$0xff]   ;;  %v9050_v63 = vrot.slane %v9048_v62, 4  ;;  %12258 = vmatprep.subr.bf16.mxu1 %v13126_v54  ;;  %v9053_v10 = vrot.slane %v9051_v40, 5  ;;  %v8029_v11 = vld [vmem:[#allocation3 + $0x268] sm:$0x11] }
 0x3a3   :  { %v8849_v7 = vld [vmem:[#allocation3 + $0x1f8] sm:$0x11]  ;;  %v9026_v56 = vor.u32 %v9025_v61, %v9022_v15  ;;  %v9029_v60 = vshll.u32 %v8909_v36, 16  ;;  %v9557_v51 = vrot.slane %v8909_v36, 5  ;;  %v11765_v58 = vadd.f32 %v11764_v17, %v11763_v23  ;;  %v11766_v61 = vpop.f32.mrf.mxu1  ;;  %v20119_v62 = vld [vmem:[#allocation73_spill] sm:$0xff]  ;;  %v11718_v12 = vpop.f32.mrf.mxu0  ;;  %v13132_v36 = vld [vmem:[%s19617_s7 + $0x90] sm:$0xff]  }
 0x3a4   :  { %v8913_v1 = vmax.bf16 %v8849_v7, %v8784_v47  ;;  %v17922_v42 = vadd.f32 %v11716_v49, %v17576_v22  ;;  %v8024_v15 = vsel %vm13868_vm11, 4286644096, %v8023_v29  ;;  %v8105_v54 = vld [vmem:[%s19612_s0 + $0x38] sm:$0xff]  ;;  %7550 = vmatmul.mubr.bf16.gmra.mxu1 %v20119_v62  ;;  %v9054_v46 = vor.u32 %v9053_v10, %v9050_v63 }
 0x3a5   :  { %v9027_v30 = vrot.slane %v9026_v56, 4  ;;  %v9031_v2 = vrot.slane %v9029_v60, 5  ;;  %v9558_v23 = vsel %vm14847_vm6, %v11308_v3, %v9557_v51  ;;  %8025 = vst [vmem:[#allocation3 + $0x198] sm:$0x11] %v8024_v15  ;;  %v17933_v22 = vadd.f32 %v11765_v58, %v17775_v55  ;;  %v20120_v45 = vld [vmem:[#allocation11_spill] sm:$0xff]  ;;  %12259 = vmatpush3.bf16.msra.mxu1 %v13128_v31  ;;  %v8107_v3 = vld [vmem:[%s19612_s0 + $0x48] sm:$0xff]  ;;  %v11767_v7 = vpop.f32.mrf.mxu1  ;;  %v11720_v56 = vpop.f32.mrf.mxu0 }
 0x3a6   :  { %v9057_v40 = vshll.u32 %v8913_v1, 16  ;;  %7557 = vmatprep.mubr.bf16.mxu1 %v20120_v45  ;;  %v11719_v47 = vadd.f32 %v11718_v12, %v11717_v50  ;;  %v9565_v29 = vrot.slane %v8913_v1, 5  ;;  %v8030_v49 = vsel %vm13868_vm11, 4286644096, %v8029_v11  ;;  %v20121_v55 = vld [vmem:[#allocation45_spill] sm:$0xff]  ;;  %12260 = vmatprep.subr.bf16.mxu1 %v13130_v34  ;;  %v20122_v51 = vld [vmem:[#allocation46_spill] sm:$0xff] }
 0x3a7   :  { %7477 = vmatmul.mubr.bf16.gmra.mxu0 %v20121_v55  ;;  %v13134_v31 = vld [vmem:[%s19617_s7 + $0xc8] sm:$0xff]   ;;  %v9032_v63 = vsel %vm14282_vm3, %v9027_v30, %v9031_v2  ;;  %v9055_v17 = vrot.slane %v9054_v46, 4  ;;  %8031 = vst [vmem:[#allocation3 + $0x268] sm:$0x11] %v8030_v49  ;;  %v8186_v1 = vshrl.u32 %v8105_v54, 16  ;;  %v11768_v60 = vadd.f32 %v11767_v7, %v11766_v61  ;;  %v11769_v15 = vpop.f32.mrf.mxu1  ;;  %v11721_v62 = vpop.f32.mrf.mxu0 }
 0x3a8   :  { %v9059_v50 = vrot.slane %v9057_v40, 5  ;;  %v17951_v10 = vadd.f32 %v11719_v47, %v17595_v26  ;;  %7484 = vmatprep.mubr.bf16.mxu0 %v20122_v51  ;;  %v9447_v11 = vmax.bf16 %v9032_v63, %v17867_v13  ;;  %v9566_v34 = vsel %vm14847_vm6, %v11310_v48, %v9565_v29  ;;  %v17957_v58 = vld [vmem:[#allocation3 + $0xd8] sm:$0x11]  ;;  %v17961_v46 = vld [vmem:[#allocation3 + $0x1c8] sm:$0x11]  ;;  %v20123_v51 = vld [vmem:[#allocation12_spill] sm:$0xff] }
 0x3a9   :  { %v8188_v12 = vrot.slane %v8186_v1, 7  ;;  %v8189_v2 = vshll.u32 %v8105_v54, 16  ;;  %v8202_v61 = vshrl.u32 %v8107_v3, 16  ;;  %v17964_v26 = vadd.f32 %v11768_v60, %v17797_v20  ;;  %12261 = vmatpush3.bf16.msra.mxu1 %v13132_v36  ;;  %v13136_v13 = vld [vmem:[%s19617_s7 + $0x88] sm:$0xff]   ;;  %v11770_v29 = vpop.f32.mrf.mxu1  ;;  %v11723_v49 = vpop.f32.mrf.mxu0  ;;  %v13139_v54 = vld [vmem:[%s19617_s7 + $0xc0] sm:$0xff]  }
 0x3aa   :  { %v9060_v30 = vsel %vm14282_vm3, %v9055_v17, %v9059_v50  ;;  %v11722_v40 = vadd.f32 %v11721_v62, %v11720_v56  ;;  %v17970_v45 = vmax.bf16 %v9558_v23, %v9447_v11  ;;  %v8489_v47 = vld [vmem:[#allocation3 + $0x228] sm:$0xff]  ;;  %12262 = vmatprep.subr.bf16.mxu1 %v13134_v31  ;;  %v8205_v36 = vshll.u32 %v8107_v3, 16  ;;  %v8501_v50 = vld [vmem:[#allocation3 + $0x258] sm:$0xff] }
 0x3ab   :  { %v9449_v48 = vmax.bf16 %v9060_v30, %v17876_v4  ;;  %v8191_v20 = vor.u32 %v8189_v2, %v8188_v12  ;;  %v8193_v7 = vrot.slane %v8188_v12, 4  ;;  %v8204_v56 = vrot.slane %v8202_v61, 7  ;;  %v7936_v55 = vld [vmem:[#allocation3 + $0xa8] sm:$0x11]  ;;  %v7942_v1 = vld [vmem:[#allocation3 + $0x158] sm:$0x11]  ;;  %v11772_v60 = vpop.f32.mrf.mxu1  ;;  %v11724_v11 = vpop.f32.mrf.mxu0 }
 0x3ac   :  { %v11771_v63 = vadd.f32 %v11770_v29, %v11769_v15  ;;  %v17976_v17 = vadd.f32 %v11722_v40, %v17628_v59  ;;  %v8495_v23 = vld [vmem:[#allocation3 + $0x198] sm:$0x11]  ;;  %v8781_v31 = vmax.bf16 %v17961_v46, %v17957_v58  ;;  %7558 = vmatmul.mubr.bf16.gmra.mxu1 %v20123_v51  ;;  %v8038_v15 = vld [vmem:[#allocation3 + $0x30] sm:$0x11]  ;;  %v20124_v2 = vld [vmem:[#allocation85_spill] sm:$0xff]  ;;  %v11725_v61 = vadd.f32 %v11724_v11, %v11723_v49 }
 0x3ad   :  { %v17978_v4 = vmax.bf16 %v9566_v34, %v9449_v48  ;;  %v8207_v62 = vor.u32 %v8205_v36, %v8204_v56  ;;  %v8209_v30 = vrot.slane %v8204_v56, 4  ;;  %v17985_v3 = vsel %vm13899_vm0, %v8191_v20, %v8489_v47  ;;  %v8032_v34 = vld [vmem:[#allocation3 + $0x38] sm:$0x11]  ;;  %7565 = vmatprep.mubr.bf16.mxu1 %v20124_v2  ;;  %12263 = vmatpush3.bf16.msra.mxu1 %v13136_v13  ;;  %v13140_v40 = vld [vmem:[%s19617_s7 + $0x80] sm:$0xff]   ;;  %v11773_v49 = vpop.f32.mrf.mxu1  ;;  %v11726_v13 = vpop.f32.mrf.mxu0  ;;  %v20125_v20 = vld [vmem:[#allocation49_spill] sm:$0xff] }
 0x3ae   :  { %v8496_v59 = vsel %vm13846_vm8, %v8193_v7, %v8495_v23  ;;  %v17990_v12 = vadd.f32 %v11771_v63, %v17823_v33  ;;  %8491 = vst [vmem:[#allocation3 + $0x228] sm:$0xff] %v17985_v3  ;;  %v8507_v47 = vld [vmem:[#allocation3 + $0x268] sm:$0x11]  ;;  %v7937_v29 = vsel %vm13846_vm8, 4286644096, %v7936_v55  ;;  %v8108_v33 = vld [vmem:[%s19612_s0 + $0x50] sm:$0xff]  ;;  %12264 = vmatprep.subr.bf16.mxu1 %v13139_v54  ;;  %v11774_v63 = vadd.f32 %v11773_v49, %v11772_v60 }
 0x3af   :  { %8497 = vst [vmem:[#allocation3 + $0x198] sm:$0x11] %v8496_v59  ;;  %7485 = vmatmul.mubr.bf16.gmra.mxu0 %v20125_v20  ;;  %v18009_v56 = vsel %vm13899_vm0, %v8207_v62, %v8501_v50  ;;  %v8508_v36 = vsel %vm13846_vm8, %v8209_v30, %v8507_v47  ;;  %7938 = vst [vmem:[#allocation3 + $0xa8] sm:$0x11] %v7937_v29  ;;  %v7943_v55 = vsel %vm13846_vm8, 4286644096, %v7942_v1  ;;  %v11775_v1 = vpop.f32.mrf.mxu1  ;;  %v11727_v60 = vpop.f32.mrf.mxu0 }
 0x3b0   :  { %v18016_v23 = vadd.f32 %v11725_v61, %v17663_v16  ;;  %v20126_v51 = vld [vmem:[#allocation115_spill] sm:$0xff]  ;;  %8503 = vst [vmem:[#allocation3 + $0x258] sm:$0xff] %v18009_v56  ;;  %8509 = vst [vmem:[#allocation3 + $0x268] sm:$0x11] %v8508_v36  ;;  %v8783_v54 = vmax.bf16 %v17985_v3, %v17720_v25  ;;  %v20127_v50 = vmax.bf16 %v17720_v25, %v17713_v24  ;;  %v18031_v16 = vld [vmem:[%s19612_s0 + $0x60] sm:$0xff]  ;;  %v8211_v59 = vshrl.u32 %v8108_v33, 16 }
 0x3b1   :  { %7492 = vmatprep.mubr.bf16.mxu0 %v20126_v51  ;;  %7944 = vst [vmem:[#allocation3 + $0x158] sm:$0x11] %v7943_v55  ;;  %v8033_v62 = vsel %vm13868_vm11, 4286644096, %v8032_v34  ;;  %v8039_v30 = vsel %vm13868_vm11, 4286644096, %v8038_v15  ;;  %v18038_v24 = vadd.f32 %v11774_v63, %v17870_v21  ;;  %v11728_v25 = vadd.f32 %v11727_v60, %v11726_v13  ;;  %12265 = vmatpush3.bf16.msra.mxu1 %v13140_v40  ;;  %v11776_v29 = vpop.f32.mrf.mxu1  ;;  %v11729_v49 = vpop.f32.mrf.mxu0 }
 0x3b2   :  { %v18026_v11 = vmax.bf16 %v20127_v50, %v17985_v3  ;;  %v8214_v2 = vshll.u32 %v8108_v33, 16  ;;  %v18041_v61 = vmax.bf16 %v8783_v54, %v18009_v56  ;;  %8034 = vst [vmem:[#allocation3 + $0x38] sm:$0x11] %v8033_v62  ;;  %8040 = vst [vmem:[#allocation3 + $0x30] sm:$0x11] %v8039_v30  ;;  %v18046_v33 = vrot.slane %v8211_v59, 7 }
 0x3b3   :  { %20128 = vst [vmem:[#allocation101_spill] sm:$0xff] %v18038_v24  ;;  %v8657_v34 = vld [vmem:[#allocation3 + $0x1c8] sm:$0x11]  ;;  %v8227_v21 = vshrl.u32 %v18031_v16, 16  ;;  %v11777_v13 = vadd.f32 %v11776_v29, %v11775_v1  ;;  %v18050_v40 = vadd.f32 %v11728_v25, %v17697_v27  ;;  %v11778_v63 = vpop.f32.mrf.mxu1  ;;  %v20129_v51 = vld [vmem:[#allocation88_spill] sm:$0xff]  ;;  %v11730_v54 = vpop.f32.mrf.mxu0 }
 0x3b4   :  { %v9034_v47 = vshrl.u32 %v18026_v11, 16  ;;  %v9037_v20 = vshll.u32 %v18026_v11, 16  ;;  %v11309_v15 = vrot.slane %v18026_v11, 9  ;;  %v9062_v55 = vshrl.u32 %v18041_v61, 16  ;;  %7566 = vmatmul.mubr.bf16.gmra.mxu1 %v20129_v51  ;;  %v20130_v25 = vld [vmem:[#allocation89_spill] sm:$0xff] }
 0x3b5   :  { %v9065_v30 = vshll.u32 %v18041_v61, 16  ;;  %v8216_v59 = vor.u32 %v8214_v2, %v18046_v33  ;;  %v18059_v27 = vadd.f32 %v11777_v13, %v17900_v43  ;;  %7573 = vmatprep.mubr.bf16.mxu1 %v20130_v25  ;;  %v11779_v5 = vpop.f32.mrf.mxu1  ;;  %v11311_v1 = vrot.slane %v18041_v61, 9 }
 0x3b6   :  { %v9036_v36 = vrot.slane %v9034_v47, 4  ;;  %v8721_v50 = vld [vmem:[#allocation3 + $0x198] sm:$0x11]  ;;  %v9039_v62 = vrot.slane %v9037_v20, 5  ;;  %v11731_v47 = vadd.f32 %v11730_v54, %v11729_v49  ;;  %v11732_v20 = vpop.f32.mrf.mxu0  ;;  %v9064_v48 = vrot.slane %v9062_v55, 4 }
 0x3b7   :  { %v8846_v60 = vld [vmem:[#allocation3 + $0x198] sm:$0x11]  ;;  %v8785_v29 = vmax.bf16 %v8721_v50, %v8657_v34  ;;  %7493 = vmatmul.mubr.bf16.gmra.mxu0 %v20131_v41  ;;  %v8850_v7 = vld [vmem:[#allocation3 + $0x268] sm:$0x11]  ;;  %v9067_v24 = vrot.slane %v9065_v30, 5  ;;  %v11780_v43 = vadd.f32 %v11779_v5, %v11778_v63  ;;  %v20132_v49 = vcombine.high %v17612_v32, %v17638_v6 }
 0x3b8   :  { %v8910_v51 = vmax.bf16 %v8846_v60, %v8781_v31  ;;  %v9040_v2 = vor.u32 %v9039_v62, %v9036_v36  ;;  %v18068_v13 = vadd.f32 %v11731_v47, %v17731_v44  ;;  %v11781_v31 = vpop.f32.mrf.mxu1  ;;  %v11733_v34 = vpop.f32.mrf.mxu0  ;;  %v8224_v36 = vrot.slane %v18046_v33, 4 }
 0x3b9   :  { %10179 = vmatprep.mubr.bf16.mxu0 %v20132_v49  ;;  %v8914_v58 = vmax.bf16 %v8850_v7, %v8785_v29  ;;  %v9068_v41 = vor.u32 %v9067_v24, %v9064_v48  ;;  %v18075_v55 = vadd.f32 %v11780_v43, %v17922_v42  ;;  %v11734_v5 = vadd.f32 %v11733_v34, %v11732_v20  ;;  %v8510_v29 = vld [vmem:[#allocation3 + $0xa8] sm:$0xff]  ;;  %v8516_v33 = vld [vmem:[#allocation3 + $0x38] sm:$0x11]  ;;  %v20133_v43 = vld [vmem:[#allocation92_spill] sm:$0xff] }
 0x3ba   :  { %v9043_v46 = vshll.u32 %v8910_v51, 16  ;;  %v9041_v54 = vrot.slane %v9040_v2, 4  ;;  %v9561_v50 = vrot.slane %v8910_v51, 5  ;;  %v11782_v60 = vpop.f32.mrf.mxu1  ;;  %v11735_v62 = vpop.f32.mrf.mxu0  ;;  %v8229_v47 = vrot.slane %v8227_v21, 7  ;;  %v18084_v51 = vld [vmem:[#allocation3 + $0xb8] sm:$0x11] }
 0x3bb   :  { %v9071_v44 = vshll.u32 %v8914_v58, 16  ;;  %v9069_v30 = vrot.slane %v9068_v41, 4  ;;  %v9569_v25 = vrot.slane %v8914_v58, 5  ;;  %v11783_v2 = vadd.f32 %v11782_v60, %v11781_v31  ;;  %v18091_v31 = vld [vmem:[#allocation3 + $0x1f8] sm:$0x11] }
 0x3bc   :  { %v9045_v63 = vrot.slane %v9043_v46, 5  ;;  %v9562_v7 = vsel %vm14847_vm6, %v11309_v15, %v9561_v50  ;;  %v18080_v48 = vadd.f32 %v11734_v5, %v17769_v53  ;;  %v11784_v20 = vpop.f32.mrf.mxu1  ;;  %7574 = vmatmul.mubr.bf16.gmra.mxu1 %v20133_v43  ;;  %v11736_v49 = vpop.f32.mrf.mxu0  ;;  %v8230_v58 = vshll.u32 %v18031_v16, 16  ;;  %v8528_v46 = vld [vmem:[#allocation3 + $0x30] sm:$0x11] }
 0x3bd   :  { %v9073_v24 = vrot.slane %v9071_v44, 5  ;;  %v9570_v21 = vsel %vm14847_vm6, %v11311_v1, %v9569_v25  ;;  %v8240_v53 = vrot.slane %v8229_v47, 4  ;;  %v18094_v34 = vadd.f32 %v11783_v2, %v17951_v10  ;;  %v8522_v1 = vld [vmem:[#allocation3 + $0x158] sm:$0xff] }
 0x3be   :  { %v9046_v42 = vsel %vm14282_vm3, %v9041_v54, %v9045_v63  ;;  %v20134_v54 = vld [vmem:[#allocation93_spill] sm:$0xff]  ;;  %v11737_v41 = vadd.f32 %v11736_v49, %v11735_v62  ;;  %v11785_v5 = vpop.f32.mrf.mxu1  ;;  %v11818_v16 = vpop.f32.mrf.mxu0  ;;  %v20135_v63 = vcombine.low %v17612_v32, %v17638_v6  ;;  %v8232_v60 = vor.u32 %v8230_v58, %v8229_v47  ;;  %v8035_v58 = vld [vmem:[#allocation3 + $0xc0] sm:$0x11] }
 0x3bf   :  { %v9448_v15 = vmax.bf16 %v9046_v42, %v18026_v11  ;;  %7581 = vmatprep.mubr.bf16.mxu1 %v20134_v54  ;;  %v9074_v50 = vsel %vm14282_vm3, %v9069_v30, %v9073_v24  ;;  %v18101_v11 = vsel %vm13899_vm0, %v8216_v59, %v8510_v29  ;;  %v8517_v62 = vsel %vm13846_vm8, %v8224_v36, %v8516_v33  ;;  %v7939_v30 = vld [vmem:[#allocation3 + $0xf0] sm:$0x11] }
 0x3c0   :  { %10180 = vmatmul.mubr.bf16.vlgmr.msra.gmra.mxu0 %v20135_v63  ;;  %v9450_v10 = vmax.bf16 %v9074_v50, %v18041_v61  ;;  %8512 = vst [vmem:[#allocation3 + $0xa8] sm:$0xff] %v18101_v11  ;;  %v7945_v59 = vld [vmem:[#allocation3 + $0xb0] sm:$0x11]  ;;  %v11786_v25 = vadd.f32 %v11785_v5, %v11784_v20  ;;  %v18113_v29 = vadd.f32 %v11737_v41, %v17794_v38  ;;  %8518 = vst [vmem:[#allocation3 + $0x38] sm:$0x11] %v8517_v62  ;;  %v11819_v47 = vpop.f32.mrf.mxu0  ;;  %v20138_v5 = vld [vmem:[#allocation95_spill] sm:$0xff] }
 0x3c1   :  { %v18107_v44 = vmax.bf16 %v9562_v7, %v9448_v15  ;;  %v20136_v32 = vcombine.high %v17970_v45, %v17978_v4  ;;  %v8529_v6 = vsel %vm13846_vm8, %v8240_v53, %v8528_v46  ;;  %v8788_v61 = vmax.bf16 %v18091_v31, %v18084_v51  ;;  %v11787_v7 = vpop.f32.mrf.mxu1  ;;  %v18157_v41 = vld [vmem:[#allocation3 + $0x198] sm:$0x11]  ;;  %v18159_v50 = vld [vmem:[#allocation3 + $0x268] sm:$0x11] }
 0x3c2   :  { %v18122_v36 = vmax.bf16 %v9570_v21, %v9450_v10  ;;  %v18126_v2 = vsel %vm13899_vm0, %v8232_v60, %v8522_v1  ;;  %8530 = vst [vmem:[#allocation3 + $0x30] sm:$0x11] %v8529_v6  ;;  %v8790_v38 = vmax.bf16 %v18101_v11, %v17849_v9  ;;  %v20137_v42 = vmax.bf16 %v17849_v9, %v17818_v28  ;;  %v11821_v15 = vpop.f32.mrf.mxu0  ;;  %v8664_v63 = vld [vmem:[#allocation3 + $0x1f8] sm:$0x11] }
 0x3c3   :  { %10187 = vmatprep.mubr.bf16.mxu0 %v20136_v32  ;;  %v18137_v33 = vadd.f32 %v11786_v25, %v17976_v17  ;;  %v11820_v51 = vadd.f32 %v11819_v47, %v11818_v16  ;;  %8524 = vst [vmem:[#allocation3 + $0x158] sm:$0xff] %v18126_v2  ;;  %v7940_v20 = vsel %vm13846_vm8, 4286644096, %v7939_v30  ;;  %v7946_v43 = vsel %vm13846_vm8, 4286644096, %v7945_v59  ;;  %v11788_v49 = vpop.f32.mrf.mxu1  ;;  %v20139_v59 = vld [vmem:[#allocation23_spill] sm:$0xff] }
 0x3c4   :  { %v18134_v24 = vmax.bf16 %v20137_v42, %v18101_v11  ;;  %v11343_v21 = vcombine.high %v18107_v44, %v18122_v36  ;;  %v18149_v9 = vmax.bf16 %v8790_v38, %v18126_v2  ;;  %7941 = vst [vmem:[#allocation3 + $0xf0] sm:$0x11] %v7940_v20  ;;  %7947 = vst [vmem:[#allocation3 + $0xb0] sm:$0x11] %v7946_v43  ;;  %7582 = vmatmul.mubr.bf16.gmra.mxu1 %v20138_v5  ;;  %v11822_v16 = vpop.f32.mrf.mxu0  ;;  %v8109_v47 = vld [vmem:[%s19612_s0 + $0x58] sm:$0xff] }
 0x3c5   :  { %v11789_v53 = vadd.f32 %v11788_v49, %v11787_v7  ;;  %v18153_v46 = vadd.f32 %v11820_v51, %v17842_v14  ;;  %v11790_v1 = vpop.f32.mrf.mxu1  ;;  %7589 = vmatprep.mubr.bf16.mxu1 %v20139_v59  ;;  %v11823_v25 = vadd.f32 %v11822_v16, %v11821_v15  ;;  %v8036_v6 = vsel %vm13868_vm11, 4286644096, %v8035_v58  ;;  %v8041_v7 = vld [vmem:[#allocation3 + $0x170] sm:$0x11] }
 0x3c6   :  { %v9076_v17 = vshrl.u32 %v18134_v24, 16  ;;  %v9079_v31 = vshll.u32 %v18134_v24, 16  ;;  %v11312_v54 = vrot.slane %v18134_v24, 9  ;;  %v9104_v60 = vshrl.u32 %v18149_v9, 16  ;;  %v11824_v42 = vpop.f32.mrf.mxu0  ;;  %8037 = vst [vmem:[#allocation3 + $0xc0] sm:$0x11] %v8036_v6 }
 0x3c7   :  { %v9107_v62 = vshll.u32 %v18149_v9, 16  ;;  %v11314_v14 = vrot.slane %v18149_v9, 9  ;;  %v18166_v30 = vadd.f32 %v11789_v53, %v18016_v23  ;;  %v11791_v38 = vpop.f32.mrf.mxu1  ;;  %v20140_v51 = vcombine.low %v17970_v45, %v17978_v4  ;;  %v8728_v23 = vld [vmem:[#allocation3 + $0x38] sm:$0x11] }
 0x3c8   :  { %v9078_v10 = vrot.slane %v9076_v17, 4  ;;  %v9081_v32 = vrot.slane %v9079_v31, 5  ;;  %v8853_v20 = vld [vmem:[#allocation3 + $0x38] sm:$0x11]  ;;  %v9106_v43 = vrot.slane %v9104_v60, 4  ;;  %v8787_v15 = vmax.bf16 %v18009_v56, %v17985_v3  ;;  %v11825_v4 = vpop.f32.mrf.mxu0 }
 0x3c9   :  { %10188 = vmatmul.mubr.bf16.gmra.mxu0 %v20140_v51  ;;  %v9109_v49 = vrot.slane %v9107_v62, 5  ;;  %v11792_v58 = vadd.f32 %v11791_v38, %v11790_v1  ;;  %v18182_v53 = vadd.f32 %v11823_v25, %v17882_v39  ;;  %v8792_v31 = vmax.bf16 %v8728_v23, %v8664_v63  ;;  %v8857_v5 = vld [vmem:[#allocation3 + $0x30] sm:$0x11]  ;;  %v11793_v45 = vpop.f32.mrf.mxu1 }
 0x3ca   :  { %v8917_v16 = vmax.bf16 %v8853_v20, %v8788_v61  ;;  %v9082_v59 = vor.u32 %v9081_v32, %v9078_v10  ;;  %v8042_v60 = vsel %vm13868_vm11, 4286644096, %v8041_v7  ;;  %v8218_v62 = vshrl.u32 %v8109_v47, 16  ;;  %v11827_v25 = vpop.f32.mrf.mxu0 }
 0x3cb   :  { %v9110_v51 = vor.u32 %v9109_v49, %v9106_v43  ;;  %v18187_v6 = vadd.f32 %v11792_v58, %v18050_v40  ;;  %v11826_v28 = vadd.f32 %v11825_v4, %v11824_v42  ;;  %v8921_v17 = vmax.bf16 %v8857_v5, %v8792_v31  ;;  %8043 = vst [vmem:[#allocation3 + $0x170] sm:$0x11] %v8042_v60  ;;  %v11794_v39 = vpop.f32.mrf.mxu1  ;;  %v8111_v40 = vld [vmem:[%s19612_s0 + $0x68] sm:$0xff]  ;;  %v20141_v43 = vld [vmem:[#allocation106_spill] sm:$0xff] }
 0x3cc   :  { %v9085_v1 = vshll.u32 %v8917_v16, 16  ;;  %v9083_v63 = vrot.slane %v9082_v59, 4  ;;  %v9573_v61 = vrot.slane %v8917_v16, 5  ;;  %v8220_v23 = vrot.slane %v8218_v62, 7  ;;  %7590 = vmatmul.mubr.bf16.gmra.mxu1 %v20141_v43  ;;  %v11828_v49 = vpop.f32.mrf.mxu0 }
 0x3cd   :  { %v9111_v38 = vrot.slane %v9110_v51, 4  ;;  %v11795_v20 = vadd.f32 %v11794_v39, %v11793_v45  ;;  %v18190_v10 = vadd.f32 %v11826_v28, %v17913_v57  ;;  %v9113_v7 = vshll.u32 %v8921_v17, 16  ;;  %v11796_v42 = vpop.f32.mrf.mxu1  ;;  %v8513_v51 = vld [vmem:[#allocation3 + $0xf0] sm:$0xff] }
 0x3ce   :  { %v9087_v32 = vrot.slane %v9085_v1, 5  ;;  %v9574_v58 = vsel %vm14847_vm6, %v11312_v54, %v9573_v61  ;;  %v9581_v31 = vrot.slane %v8921_v17, 5  ;;  %v8221_v5 = vshll.u32 %v8109_v47, 16  ;;  %v11830_v62 = vpop.f32.mrf.mxu0  ;;  %v8519_v1 = vld [vmem:[#allocation3 + $0xc0] sm:$0x11] }
 0x3cf   :  { %v8225_v16 = vrot.slane %v8220_v23, 4  ;;  %v18199_v45 = vadd.f32 %v11795_v20, %v18068_v13  ;;  %v20142_v57 = vcombine.high %v17888_v0, %v17896_v8  ;;  %v11829_v28 = vadd.f32 %v11828_v49, %v11827_v25  ;;  %v11797_v60 = vpop.f32.mrf.mxu1  ;;  %v8044_v49 = vld [vmem:[#allocation3 + $0x178] sm:$0x11] }
 0x3d0   :  { %v9088_v4 = vsel %vm14282_vm3, %v9083_v63, %v9087_v32  ;;  %v9115_v59 = vrot.slane %v9113_v7, 5  ;;  %v9582_v47 = vsel %vm14847_vm6, %v11314_v14, %v9581_v31  ;;  %v8223_v17 = vor.u32 %v8221_v5, %v8220_v23  ;;  %v11831_v32 = vpop.f32.mrf.mxu0  ;;  %v7948_v23 = vld [vmem:[#allocation3 + $0x150] sm:$0x11] }
 0x3d1   :  { %10276 = vmatprep.mubr.bf16.mxu1 %v20142_v57  ;;  %v9451_v54 = vmax.bf16 %v9088_v4, %v18134_v24  ;;  %v8234_v13 = vshrl.u32 %v8111_v40, 16  ;;  %v11798_v39 = vadd.f32 %v11797_v60, %v11796_v42  ;;  %v18210_v61 = vadd.f32 %v11829_v28, %v17933_v22  ;;  %v11799_v20 = vpop.f32.mrf.mxu1 }
 0x3d2   :  { %v9116_v25 = vsel %vm14282_vm3, %v9111_v38, %v9115_v59  ;;  %v8237_v63 = vshll.u32 %v8111_v40, 16  ;;  %v18217_v14 = vsel %vm13899_vm0, %v8223_v17, %v8513_v51  ;;  %v11832_v22 = vadd.f32 %v11831_v32, %v11830_v62  ;;  %v8525_v40 = vld [vmem:[#allocation3 + $0xb0] sm:$0xff]  ;;  %v11833_v57 = vpop.f32.mrf.mxu0 }
 0x3d3   :  { %v9453_v7 = vmax.bf16 %v9116_v25, %v18149_v9  ;;  %v9707_v43 = vmax.bf16 %v9574_v58, %v9451_v54  ;;  %v8236_v24 = vrot.slane %v8234_v13, 7  ;;  %v18220_v42 = vadd.f32 %v11798_v39, %v18080_v48  ;;  %8515 = vst [vmem:[#allocation3 + $0xf0] sm:$0xff] %v18217_v14  ;;  %v8531_v31 = vld [vmem:[#allocation3 + $0x170] sm:$0x11]  ;;  %v11800_v58 = vpop.f32.mrf.mxu1 }
 0x3d4   :  { %v8520_v38 = vsel %vm13846_vm8, %v8225_v16, %v8519_v1  ;;  %v8791_v9 = vmax.bf16 %v18217_v14, %v18009_v56  ;;  %v18231_v48 = vmax.bf16 %v8787_v15, %v18217_v14  ;;  %v11801_v59 = vadd.f32 %v11800_v58, %v11799_v20  ;;  %v8112_v62 = vld [vmem:[%s19612_s0 + $0x70] sm:$0xff] }
 0x3d5   :  { %v9709_v5 = vmax.bf16 %v9582_v47, %v9453_v7  ;;  %v8239_v28 = vor.u32 %v8237_v63, %v8236_v24  ;;  %v8241_v4 = vrot.slane %v8236_v24, 4  ;;  %8521 = vst [vmem:[#allocation3 + $0xc0] sm:$0x11] %v8520_v38  ;;  %v18234_v16 = vadd.f32 %v11832_v22, %v17964_v26  ;;  %v11882_v54 = vpop.f32.mrf.mxu1  ;;  %v11834_v47 = vpop.f32.mrf.mxu0 }
 0x3d6   :  { %v7949_v51 = vsel %vm13846_vm8, 4286644096, %v7948_v23  ;;  %v8045_v60 = vsel %vm13868_vm11, 4286644096, %v8044_v49  ;;  %v20143_v3 = vcombine.low %v17888_v0, %v17896_v8  ;;  %v18253_v13 = vadd.f32 %v11801_v59, %v18113_v29 }
 0x3d7   :  { %v11345_v56 = vcombine.high %v9707_v43, %v9709_v5  ;;  %v11344_v15 = vcombine.low %v9707_v43, %v9709_v5  ;;  %v18248_v26 = vsel %vm13899_vm0, %v8239_v28, %v8525_v40  ;;  %v8532_v17 = vsel %vm13846_vm8, %v8241_v4, %v8531_v31  ;;  %7950 = vst [vmem:[#allocation3 + $0x150] sm:$0x11] %v7949_v51  ;;  %v11883_v39 = vpop.f32.mrf.mxu1  ;;  %v11836_v25 = vpop.f32.mrf.mxu0  ;;  %v8665_v43 = vld [vmem:[#allocation3 + $0x268] sm:$0x11] }
 0x3d8   :  { %10277 = vmatmul.mubr.bf16.vlgmr.msra.gmra.mxu1 %v20143_v3  ;;  %8046 = vst [vmem:[#allocation3 + $0x178] sm:$0x11] %v8045_v60  ;;  %20144 = vst [vmem:[#allocation67_spill] sm:$0xff] %v18253_v13  ;;  %v11835_v0 = vadd.f32 %v11834_v47, %v11833_v57  ;;  %v18260_v8 = vmax.bf16 %v8791_v9, %v18248_v26  ;;  %v9090_v1 = vshrl.u32 %v18231_v48, 16  ;;  %v9093_v63 = vshll.u32 %v18231_v48, 16  ;;  %v20147_v47 = vld [vmem:[#allocation101_spill] sm:$0xff] }
 0x3d9   :  { %10284 = vmatprep.mubr.bf16.mxu1 %v11343_v21  ;;  %8527 = vst [vmem:[#allocation3 + $0xb0] sm:$0xff] %v18248_v26  ;;  %8533 = vst [vmem:[#allocation3 + $0x170] sm:$0x11] %v8532_v17  ;;  %10195 = vmatprep.mubr.bf16.mxu0 %v11345_v56  ;;  %v11313_v29 = vrot.slane %v18231_v48, 9  ;;  %v8243_v20 = vshrl.u32 %v8112_v62, 16  ;;  %v8246_v32 = vshll.u32 %v8112_v62, 16  ;;  %v11884_v7 = vadd.f32 %v11883_v39, %v11882_v54  ;;  %v11885_v49 = vpop.f32.mrf.mxu1  ;;  %v11837_v31 = vpop.f32.mrf.mxu0 }
 0x3da   :  { %10196 = vmatmul.mubr.bf16.gmra.mxu0 %v11344_v15  ;;  %v18266_v21 = vadd.f32 %v11835_v0, %v17990_v12  ;;  %v9092_v24 = vrot.slane %v9090_v1, 4  ;;  %v9118_v23 = vshrl.u32 %v18260_v8, 16  ;;  %v9095_v22 = vrot.slane %v9093_v63, 5  ;;  %v18279_v56 = vld [vmem:[#allocation3 + $0x38] sm:$0x11] }
 0x3db   :  { %v9121_v38 = vshll.u32 %v18260_v8, 16  ;;  %v11315_v40 = vrot.slane %v18260_v8, 9  ;;  %v8245_v9 = vrot.slane %v8243_v20, 7  ;;  %v18272_v58 = vadd.f32 %v11884_v7, %v18153_v46  ;;  %v11886_v59 = vpop.f32.mrf.mxu1  ;;  %v11839_v15 = vpop.f32.mrf.mxu0 }
 0x3dc   :  { %v8729_v5 = vld [vmem:[#allocation3 + $0xc0] sm:$0x11]  ;;  %v9120_v28 = vrot.slane %v9118_v23, 4  ;;  %v11838_v12 = vadd.f32 %v11837_v31, %v11836_v25  ;;  %v8794_v4 = vmax.bf16 %v18126_v2, %v18101_v11  ;;  %v20146_v60 = vmax.bf16 %v18159_v50, %v18157_v41  ;;  %v18284_v11 = vld [vmem:[#allocation3 + $0x30] sm:$0x11] }
 0x3dd   :  { %20145 = vst [vmem:[#allocation58_spill] sm:$0xff] %v18272_v58  ;;  %v8854_v57 = vld [vmem:[#allocation3 + $0xc0] sm:$0x11]  ;;  %v8793_v51 = vmax.bf16 %v8729_v5, %v8665_v43  ;;  %v9096_v54 = vor.u32 %v9095_v22, %v9092_v24  ;;  %v9123_v3 = vrot.slane %v9121_v38, 5  ;;  %v11887_v46 = vadd.f32 %v11886_v59, %v11885_v49  ;;  %v11888_v63 = vpop.f32.mrf.mxu1  ;;  %v11840_v23 = vpop.f32.mrf.mxu0  ;;  %v7951_v31 = vld [vmem:[#allocation3 + $0xc8] sm:$0x11] }
 0x3de   :  { %v8918_v62 = vmax.bf16 %v8854_v57, %v20146_v60  ;;  %v18282_v17 = vadd.f32 %v11838_v12, %v20147_v47  ;;  %v8248_v0 = vor.u32 %v8246_v32, %v8245_v9  ;;  %v8256_v1 = vrot.slane %v8245_v9, 4  ;;  %v8534_v39 = vld [vmem:[#allocation3 + $0x150] sm:$0xff] }
 0x3df   :  { %v8540_v25 = vld [vmem:[#allocation3 + $0x178] sm:$0x11]  ;;  %v20148_v41 = vcombine.low %v18107_v44, %v18122_v36  ;;  %v9097_v20 = vrot.slane %v9096_v54, 4  ;;  %v9124_v43 = vor.u32 %v9123_v3, %v9120_v28  ;;  %v18290_v49 = vadd.f32 %v11887_v46, %v18182_v53  ;;  %v11889_v9 = vpop.f32.mrf.mxu1  ;;  %v18300_v57 = vpop.f32.mrf.mxu0 }
 0x3e0   :  { %v8858_v50 = vld [vmem:[#allocation3 + $0x170] sm:$0x11]  ;;  %v9099_v7 = vshll.u32 %v8918_v62, 16  ;;  %v9577_v24 = vrot.slane %v8918_v62, 5  ;;  %v8535_v22 = vsel %vm13899_vm0, %v8248_v0, %v8534_v39  ;;  %v8541_v38 = vsel %vm13846_vm8, %v8256_v1, %v8540_v25  ;;  %v18317_v39 = vld [vmem:[#allocation3 + $0x220] sm:$0xff] }
 0x3e1   :  { %10285 = vmatmul.mubr.bf16.gmra.mxu1 %v20148_v41  ;;  %20149 = vst [vmem:[#allocation98_spill] sm:$0xff] %v18290_v49  ;;  %v8922_v32 = vmax.bf16 %v8858_v50, %v8793_v51  ;;  %v9125_v36 = vrot.slane %v9124_v43, 4  ;;  %8536 = vst [vmem:[#allocation3 + $0x150] sm:$0xff] %v8535_v22  ;;  %v8796_v53 = vmax.bf16 %v18284_v11, %v18279_v56  ;;  %v11891_v60 = vpop.f32.mrf.mxu1  ;;  %v18309_v46 = vpop.f32.mrf.mxu0  ;;  %v8672_v41 = vld [vmem:[#allocation3 + $0x30] sm:$0x11] }
 0x3e2   :  { %v9101_v44 = vrot.slane %v9099_v7, 5  ;;  %v9578_v5 = vsel %vm14847_vm6, %v11313_v29, %v9577_v24  ;;  %8542 = vst [vmem:[#allocation3 + $0x178] sm:$0x11] %v8541_v38  ;;  %v11890_v28 = vadd.f32 %v11889_v9, %v11888_v63  ;;  %v8798_v51 = vmax.bf16 %v8535_v22, %v18126_v2  ;;  %v8865_v50 = vld [vmem:[#allocation3 + $0x218] sm:$0x11] }
 0x3e3   :  { %v9127_v12 = vshll.u32 %v8922_v32, 16  ;;  %v9585_v59 = vrot.slane %v8922_v32, 5  ;;  %v18305_v54 = vmax.bf16 %v8794_v4, %v8535_v22  ;;  %v11841_v3 = vadd.f32 %v11840_v23, %v11839_v15  ;;  %v11892_v1 = vpop.f32.mrf.mxu1  ;;  %v18325_v11 = vpop.f32.mrf.mxu0  ;;  %v8047_v22 = vld [vmem:[#allocation3 + $0x50] sm:$0x11] }
 0x3e4   :  { %v9102_v62 = vsel %vm14282_vm3, %v9097_v20, %v9101_v44  ;;  %v7952_v29 = vsel %vm13846_vm8, 4286644096, %v7951_v31  ;;  %v18312_v56 = vadd.f32 %v11890_v28, %v18190_v10  ;;  %v18320_v4 = vmax.bf16 %v18317_v39, %v8798_v51 }
 0x3e5   :  { %v9129_v47 = vrot.slane %v9127_v12, 5  ;;  %v9452_v0 = vmax.bf16 %v9102_v62, %v18231_v48  ;;  %v9586_v2 = vsel %vm14847_vm6, %v11315_v40, %v9585_v59  ;;  %7953 = vst [vmem:[#allocation3 + $0xc8] sm:$0x11] %v7952_v29  ;;  %v9132_v15 = vshrl.u32 %v18305_v54, 16  ;;  %v11894_v43 = vpop.f32.mrf.mxu1  ;;  %v18334_v38 = vpop.f32.mrf.mxu0 }
 0x3e6   :  { %20150 = vst [vmem:[#allocation69_spill] sm:$0xff] %v18312_v56  ;;  %v9135_v25 = vshll.u32 %v18305_v54, 16  ;;  %v11316_v10 = vrot.slane %v18305_v54, 9  ;;  %v11893_v63 = vadd.f32 %v11892_v1, %v11891_v60  ;;  %v18330_v20 = vadd.f32 %v11841_v3, %v18059_v27 }
 0x3e7   :  { %v9130_v48 = vsel %vm14282_vm3, %v9125_v36, %v9129_v47  ;;  %v9708_v40 = vmax.bf16 %v9578_v5, %v9452_v0  ;;  %v9134_v24 = vrot.slane %v9132_v15, 4  ;;  %v9160_v32 = vshrl.u32 %v18320_v4, 16  ;;  %v11895_v28 = vpop.f32.mrf.mxu1  ;;  %v18343_v60 = vpop.f32.mrf.mxu0  ;;  %v8113_v47 = vld [vmem:[%s19612_s0 + $0x78] sm:$0xff] }
 0x3e8   :  { %v9454_v7 = vmax.bf16 %v9130_v48, %v18260_v8  ;;  %v9137_v23 = vrot.slane %v9135_v25, 5  ;;  %v18337_v31 = vadd.f32 %v11893_v63, %v18210_v61  ;;  %v9163_v36 = vshll.u32 %v18320_v4, 16 }
 0x3e9   :  { %v8736_v9 = vld [vmem:[#allocation3 + $0x178] sm:$0x11]  ;;  %v11318_v27 = vrot.slane %v18320_v4, 9  ;;  %v8795_v8 = vmax.bf16 %v18248_v26, %v18217_v14  ;;  %v11896_v62 = vadd.f32 %v11895_v28, %v11894_v43  ;;  %v9162_v3 = vrot.slane %v9160_v32, 4  ;;  %v11897_v25 = vpop.f32.mrf.mxu1  ;;  %v18355_v43 = vld [vmem:[#allocation3 + $0xc0] sm:$0x11] }
 0x3ea   :  { %20151 = vst [vmem:[#allocation70_spill] sm:$0xff] %v18337_v31  ;;  %v8861_v44 = vld [vmem:[#allocation3 + $0x178] sm:$0x11]  ;;  %v9710_v5 = vmax.bf16 %v9586_v2, %v9454_v7  ;;  %v8800_v12 = vmax.bf16 %v8736_v9, %v8672_v41  ;;  %v9138_v51 = vor.u32 %v9137_v23, %v9134_v24  ;;  %v9165_v61 = vrot.slane %v9163_v36, 5  ;;  %v18357_v24 = vld [vmem:[#allocation3 + $0x170] sm:$0x11] }
 0x3eb   :  { %v8925_v59 = vmax.bf16 %v8861_v44, %v8796_v53  ;;  %v8048_v29 = vsel %vm13868_vm11, 4286644096, %v8047_v22  ;;  %v18350_v53 = vpop.f32.mrf.mxu0  ;;  %v18353_v63 = vadd.f32 %v11896_v62, %v18234_v16  ;;  %v8253_v22 = vshll.u32 %v8113_v47, 16  ;;  %v7954_v9 = vld [vmem:[#allocation3 + $0x188] sm:$0x11] }
 0x3ec   :  { %v11347_v0 = vcombine.high %v9708_v40, %v9710_v5  ;;  %v11346_v1 = vcombine.low %v9708_v40, %v9710_v5  ;;  %v8929_v15 = vmax.bf16 %v8865_v50, %v8800_v12  ;;  %v9139_v2 = vrot.slane %v9138_v51, 4  ;;  %8049 = vst [vmem:[#allocation3 + $0x50] sm:$0x11] %v8048_v29  ;;  %v11898_v40 = vpop.f32.mrf.mxu1 }
 0x3ed   :  { %20152 = vst [vmem:[#allocation99_spill] sm:$0xff] %v18353_v63  ;;  %v9141_v48 = vshll.u32 %v8925_v59, 16  ;;  %v9166_v41 = vor.u32 %v9165_v61, %v9162_v3  ;;  %v9589_v7 = vrot.slane %v8925_v59, 5  ;;  %v8250_v50 = vshrl.u32 %v8113_v47, 16  ;;  %v18359_v44 = vpop.f32.mrf.mxu0  ;;  %v7960_v61 = vld [vmem:[#allocation3 + $0x138] sm:$0x11] }
 0x3ee   :  { %10292 = vmatprep.mubr.bf16.mxu1 %v11347_v0  ;;  %v9169_v23 = vshll.u32 %v8929_v15, 16  ;;  %v9597_v32 = vrot.slane %v8929_v15, 5  ;;  %v11899_v28 = vadd.f32 %v11898_v40, %v11897_v25  ;;  %v11900_v3 = vpop.f32.mrf.mxu1  ;;  %v7966_v15 = vld [vmem:[#allocation3 + $0x1d8] sm:$0x11]  ;;  %v18419_v14 = vadd.f32 %v18334_v38, %v18325_v11 }
 0x3ef   :  { %10293 = vmatmul.mubr.bf16.gmra.mxu1 %v11346_v1  ;;  %v9143_v36 = vrot.slane %v9141_v48, 5  ;;  %v9167_v16 = vrot.slane %v9166_v41, 4  ;;  %v9590_v5 = vsel %vm14847_vm6, %v11316_v10, %v9589_v7  ;;  %v8252_v51 = vrot.slane %v8250_v50, 7  ;;  %v18367_v29 = vpop.f32.mrf.mxu0  ;;  %v8537_v10 = vld [vmem:[#allocation3 + $0xc8] sm:$0xff] }
 0x3f0   :  { %v9171_v12 = vrot.slane %v9169_v23, 5  ;;  %v9598_v59 = vsel %vm14847_vm6, %v11318_v27, %v9597_v32  ;;  %v18372_v0 = vadd.f32 %v11899_v28, %v18266_v21  ;;  %v11844_v1 = vadd.f32 %v18309_v46, %v18300_v57  ;;  %v11901_v23 = vpop.f32.mrf.mxu1  ;;  %v8056_v21 = vld [vmem:[#allocation3 + $0x88] sm:$0x11] }
 0x3f1   :  { %v9144_v47 = vsel %vm14282_vm3, %v9139_v2, %v9143_v36  ;;  %v7955_v27 = vsel %vm13846_vm8, 4286644096, %v7954_v9  ;;  %v8255_v41 = vor.u32 %v8253_v22, %v8252_v51  ;;  %v8257_v7 = vrot.slane %v8252_v51, 4  ;;  %v8050_v2 = vld [vmem:[#allocation3 + $0x1e0] sm:$0x11]  ;;  %v18381_v32 = vpop.f32.mrf.mxu0  ;;  %v20272_v18 = vld [vmem:[#allocation70_spill] sm:$0xff] }
 0x3f2   :  { %20153 = vst [vmem:[#allocation60_spill] sm:$0xff] %v18372_v0  ;;  %v9172_v25 = vsel %vm14282_vm3, %v9167_v16, %v9171_v12  ;;  %v9455_v48 = vmax.bf16 %v9144_v47, %v18305_v54  ;;  %7956 = vst [vmem:[#allocation3 + $0x188] sm:$0x11] %v7955_v27  ;;  %v18385_v46 = vadd.f32 %v11844_v1, %v18075_v55  ;;  %v7961_v9 = vsel %vm13846_vm8, 4286644096, %v7960_v61  ;;  %v18395_v28 = vpop.f32.mrf.mxu1  ;;  %v8114_v61 = vld [vmem:[%s19612_s0 + $0x80] sm:$0xff] }
 0x3f3   :  { %v9457_v40 = vmax.bf16 %v9172_v25, %v18320_v4  ;;  %v8543_v57 = vld [vmem:[#allocation3 + $0x50] sm:$0x11]  ;;  %v11902_v50 = vadd.f32 %v11901_v23, %v11900_v3  ;;  %v8538_v22 = vsel %vm13899_vm0, %v8255_v41, %v8537_v10  ;;  %7962 = vst [vmem:[#allocation3 + $0x138] sm:$0x11] %v7961_v9  ;;  %v7967_v4 = vsel %vm13846_vm8, 4286644096, %v7966_v15  ;;  %v18397_v55 = vpop.f32.mrf.mxu0 }
 0x3f4   :  { %v8062_v36 = vld [vmem:[#allocation3 + $0x1d0] sm:$0x11]  ;;  %v9711_v54 = vmax.bf16 %v9590_v5, %v9455_v48  ;;  %v8544_v16 = vsel %vm13846_vm8, %v8257_v7, %v8543_v57  ;;  %8539 = vst [vmem:[#allocation3 + $0xc8] sm:$0xff] %v8538_v22  ;;  %v8799_v51 = vmax.bf16 %v8538_v22, %v18248_v26  ;;  %v18403_v5 = vmax.bf16 %v8795_v8, %v8538_v22  ;;  %v18421_v26 = vpop.f32.mrf.mxu1  ;;  %v8118_v48 = vld [vmem:[%s19612_s0 + $0xa0] sm:$0xff] }
 0x3f5   :  { %v9713_v12 = vmax.bf16 %v9598_v59, %v9457_v40  ;;  %8545 = vst [vmem:[#allocation3 + $0x50] sm:$0x11] %v8544_v16  ;;  %v18406_v3 = vadd.f32 %v11902_v50, %v18282_v17  ;;  %7968 = vst [vmem:[#allocation3 + $0x1d8] sm:$0x11] %v7967_v4  ;;  %v8051_v59 = vsel %vm13868_vm11, 4286644096, %v8050_v2  ;;  %v18423_v17 = vpop.f32.mrf.mxu0 }
 0x3f6   :  { %v8057_v47 = vsel %vm13868_vm11, 4286644096, %v8056_v21  ;;  %v8063_v10 = vsel %vm13868_vm11, 4286644096, %v8062_v36  ;;  %v18426_v27 = vmax.bf16 %v18317_v39, %v8799_v51  ;;  %v9146_v15 = vshrl.u32 %v18403_v5, 16  ;;  %v8116_v25 = vld [vmem:[%s19612_s0 + $0x90] sm:$0xff]  ;;  %v18437_v23 = vpop.f32.mrf.mxu1 }
 0x3f7   :  { %20154 = vst [vmem:[#allocation7_spill] sm:$0xff] %v18406_v3  ;;  %v11349_v8 = vcombine.high %v9711_v54, %v9713_v12  ;;  %v11348_v1 = vcombine.low %v9711_v54, %v9713_v12  ;;  %8052 = vst [vmem:[#allocation3 + $0x1e0] sm:$0x11] %v8051_v59  ;;  %v9149_v11 = vshll.u32 %v18403_v5, 16  ;;  %v11317_v38 = vrot.slane %v18403_v5, 9  ;;  %v18439_v2 = vpop.f32.mrf.mxu0 }
 0x3f8   :  { %8058 = vst [vmem:[#allocation3 + $0x88] sm:$0x11] %v8057_v47  ;;  %8064 = vst [vmem:[#allocation3 + $0x1d0] sm:$0x11] %v8063_v10  ;;  %v8259_v41 = vshrl.u32 %v8114_v61, 16  ;;  %v8262_v7 = vshll.u32 %v8114_v61, 16  ;;  %v18444_v12 = vpop.f32.mrf.mxu1 }
 0x3f9   :  { %10203 = vmatprep.mubr.bf16.mxu0 %v11349_v8  ;;  %v9148_v21 = vrot.slane %v9146_v15, 4  ;;  %v9174_v40 = vshrl.u32 %v18426_v27, 16  ;;  %v9177_v57 = vshll.u32 %v18426_v27, 16  ;;  %v8673_v9 = vld [vmem:[#allocation3 + $0x170] sm:$0x11]  ;;  %v9151_v54 = vrot.slane %v9149_v11, 5  ;;  %v18446_v51 = vpop.f32.mrf.mxu0 }
 0x3fa   :  { %10204 = vmatmul.mubr.bf16.gmra.mxu0 %v11348_v1  ;;  %v8866_v36 = vld [vmem:[#allocation3 + $0xa0] sm:$0x11]  ;;  %v8261_v22 = vrot.slane %v8259_v41, 7  ;;  %v8275_v16 = vshrl.u32 %v8116_v25, 16  ;;  %v8278_v4 = vshll.u32 %v8116_v25, 16  ;;  %v8291_v47 = vshrl.u32 %v8118_v48, 16  ;;  %v18448_v63 = vpop.f32.mrf.mxu1 }
 0x3fb   :  { %v9176_v61 = vrot.slane %v9174_v40, 4  ;;  %v9179_v59 = vrot.slane %v9177_v57, 5  ;;  %v8294_v10 = vshll.u32 %v8118_v48, 16  ;;  %v8546_v8 = vld [vmem:[#allocation3 + $0x188] sm:$0xff]  ;;  %v9152_v3 = vor.u32 %v9151_v54, %v9148_v21  ;;  %v18450_v11 = vpop.f32.mrf.mxu0  ;;  %v8558_v56 = vld [vmem:[#allocation3 + $0x138] sm:$0xff] }
 0x3fc   :  { %v8737_v15 = vld [vmem:[#allocation3 + $0x50] sm:$0x11]  ;;  %v8264_v50 = vor.u32 %v8262_v7, %v8261_v22  ;;  %v8272_v1 = vrot.slane %v8261_v22, 4  ;;  %v8277_v0 = vrot.slane %v8275_v16, 7  ;;  %v20155_v41 = vmax.bf16 %v18357_v24, %v18355_v43  ;;  %v18457_v22 = vpop.f32.mrf.mxu1  ;;  %v8570_v24 = vld [vmem:[#allocation3 + $0x1d8] sm:$0xff] }
 0x3fd   :  { %v8862_v62 = vld [vmem:[#allocation3 + $0x50] sm:$0x11]  ;;  %v8801_v25 = vmax.bf16 %v8737_v15, %v8673_v9  ;;  %v9180_v40 = vor.u32 %v9179_v59, %v9176_v61  ;;  %v8293_v57 = vrot.slane %v8291_v47, 7  ;;  %v9153_v48 = vrot.slane %v9152_v3, 4  ;;  %v18459_v16 = vpop.f32.mrf.mxu0 }
 0x3fe   :  { %v8926_v31 = vmax.bf16 %v8862_v62, %v20155_v41  ;;  %v8280_v49 = vor.u32 %v8278_v4, %v8277_v0  ;;  %v8288_v58 = vrot.slane %v8277_v0, 4  ;;  %v8547_v7 = vsel %vm13899_vm0, %v8264_v50, %v8546_v8  ;;  %v8552_v21 = vld [vmem:[#allocation3 + $0x1e0] sm:$0x11]  ;;  %v18467_v4 = vpop.f32.mrf.mxu1 }
 0x3ff   :  { %v8564_v54 = vld [vmem:[#allocation3 + $0x88] sm:$0x11]  ;;  %v8930_v9 = vmax.bf16 %v8866_v36, %v8801_v25  ;;  %v9181_v13 = vrot.slane %v9180_v40, 4  ;;  %8548 = vst [vmem:[#allocation3 + $0x188] sm:$0xff] %v8547_v7  ;;  %v8576_v62 = vld [vmem:[#allocation3 + $0x1d0] sm:$0x11]  ;;  %v8296_v61 = vor.u32 %v8294_v10, %v8293_v57  ;;  %v8553_v0 = vsel %vm13846_vm8, %v8272_v1, %v8552_v21  ;;  %v18469_v59 = vpop.f32.mrf.mxu0 }
 0x400   :  { %v9155_v15 = vshll.u32 %v8926_v31, 16  ;;  %v9593_v43 = vrot.slane %v8926_v31, 5  ;;  %v8304_v3 = vrot.slane %v8293_v57, 4  ;;  %v18465_v50 = vsel %vm13899_vm0, %v8280_v49, %v8558_v56  ;;  %20156 = vst [vmem:[#allocation8_spill] sm:$0xff] %v18469_v59  ;;  %8554 = vst [vmem:[#allocation3 + $0x1e0] sm:$0x11] %v8553_v0  ;;  %v18483_v40 = vpop.f32.mrf.mxu1 }
 0x401   :  { %v9183_v47 = vshll.u32 %v8930_v9, 16  ;;  %v9601_v8 = vrot.slane %v8930_v9, 5  ;;  %8560 = vst [vmem:[#allocation3 + $0x138] sm:$0xff] %v18465_v50  ;;  %v8565_v10 = vsel %vm13846_vm8, %v8288_v58, %v8564_v54  ;;  %v18478_v49 = vsel %vm13899_vm0, %v8296_v61, %v8570_v24  ;;  %v7957_v25 = vld [vmem:[#allocation3 + $0x250] sm:$0x11] }
 0x402   :  { %v9157_v36 = vrot.slane %v9155_v15, 5  ;;  %v9594_v31 = vsel %vm14847_vm6, %v11317_v38, %v9593_v43  ;;  %v8577_v56 = vsel %vm13846_vm8, %v8304_v3, %v8576_v62  ;;  %v8802_v1 = vmax.bf16 %v18317_v39, %v8547_v7  ;;  %v7963_v41 = vld [vmem:[#allocation3 + $0x140] sm:$0x11]  ;;  %v18485_v38 = vpop.f32.mrf.mxu0  ;;  %8566 = vst [vmem:[#allocation3 + $0x88] sm:$0x11] %v8565_v10  ;;  %8572 = vst [vmem:[#allocation3 + $0x1d8] sm:$0xff] %v18478_v49  ;;  %v18505_v62 = vpop.f32.mrf.mxu1 }
 0x403   :  { %20157 = vst [vmem:[#allocation72_spill] sm:$0xff] %v18485_v38  ;;  %v9185_v21 = vrot.slane %v9183_v47, 5  ;;  %v20158_v58 = vrot.slane %v18426_v27, 9  ;;  %8578 = vst [vmem:[#allocation3 + $0x1d0] sm:$0x11] %v8577_v56  ;;  %v8806_v9 = vmax.bf16 %v18465_v50, %v8547_v7  ;;  %v11905_v24 = vadd.f32 %v18421_v26, %v18395_v28 }
 0x404   :  { %v9158_v57 = vsel %vm14282_vm3, %v9153_v48, %v9157_v36  ;;  %v18497_v43 = vmax.bf16 %v8802_v1, %v18465_v50  ;;  %v18501_v48 = vadd.f32 %v18419_v14, %v18094_v34  ;;  %v18507_v61 = vpop.f32.mrf.mxu0  ;;  %v8676_v7 = vld [vmem:[#allocation3 + $0x1b0] sm:$0x11]  ;;  %v7958_v0 = vsel %vm13846_vm8, 4286644096, %v7957_v25  ;;  %v8053_v47 = vld [vmem:[#allocation3 + $0x208] sm:$0x11] }
 0x405   :  { %v9602_v54 = vsel %vm14847_vm6, %v20158_v58, %v9601_v8  ;;  %v9456_v15 = vmax.bf16 %v9158_v57, %v18403_v5  ;;  %20159 = vst [vmem:[#allocation74_spill] sm:$0xff] %v18507_v61  ;;  %v9186_v3 = vsel %vm14282_vm3, %v9181_v13, %v9185_v21  ;;  %v18512_v5 = vmax.bf16 %v8806_v9, %v18478_v49  ;;  %v7969_v13 = vld [vmem:[#allocation3 + $0x1c0] sm:$0x11]  ;;  %v18521_v8 = vpop.f32.mrf.mxu1 }
 0x406   :  { %v7964_v34 = vsel %vm13846_vm8, 4286644096, %v7963_v41  ;;  %v9458_v14 = vmax.bf16 %v9186_v3, %v18426_v27  ;;  %v9188_v26 = vshrl.u32 %v18497_v43, 16  ;;  %v9191_v36 = vshll.u32 %v18497_v43, 16  ;;  %7959 = vst [vmem:[#allocation3 + $0x250] sm:$0x11] %v7958_v0  ;;  %v18523_v10 = vpop.f32.mrf.mxu0 }
 0x407   :  { %v9712_v28 = vmax.bf16 %v9594_v31, %v9456_v15  ;;  %7965 = vst [vmem:[#allocation3 + $0x140] sm:$0x11] %v7964_v34  ;;  %20160 = vst [vmem:[#allocation43_spill] sm:$0xff] %v18523_v10  ;;  %v9216_v56 = vshrl.u32 %v18512_v5, 16  ;;  %v9219_v1 = vshll.u32 %v18512_v5, 16  ;;  %v11320_v25 = vrot.slane %v18497_v43, 9  ;;  %v18532_v0 = vpop.f32.mrf.mxu1 }
 0x408   :  { %v8059_v31 = vld [vmem:[#allocation3 + $0x18] sm:$0x11]  ;;  %v9714_v57 = vmax.bf16 %v9602_v54, %v9458_v14  ;;  %v8680_v21 = vld [vmem:[#allocation3 + $0x1e0] sm:$0x11]  ;;  %v9190_v9 = vrot.slane %v9188_v26, 4  ;;  %v9193_v15 = vrot.slane %v9191_v36, 5  ;;  %v18530_v3 = vadd.f32 %v11905_v24, %v18330_v20  ;;  %v18534_v34 = vpop.f32.mrf.mxu0 }
 0x409   :  { %v8065_v41 = vld [vmem:[#allocation3 + $0x238] sm:$0x11]  ;;  %v8740_v58 = vld [vmem:[#allocation3 + $0x1e0] sm:$0x11]  ;;  %20162 = vst [vmem:[#allocation53_spill] sm:$0xff] %v18534_v34  ;;  %v9218_v61 = vrot.slane %v9216_v56, 4 }
 0x40a   :  { %20161 = vst [vmem:[#allocation63_spill] sm:$0xff] %v18530_v3  ;;  %v8804_v10 = vmax.bf16 %v8740_v58, %v8676_v7  ;;  %v9221_v38 = vrot.slane %v9219_v1, 5  ;;  %v7970_v27 = vsel %vm13846_vm8, 4286644096, %v7969_v13  ;;  %v8115_v54 = vld [vmem:[%s19612_s0 + $0x88] sm:$0xff]  ;;  %v11351_v14 = vcombine.high %v9712_v28, %v9714_v57  ;;  %v18543_v7 = vpop.f32.mrf.mxu1  ;;  %v18545_v56 = vpop.f32.mrf.mxu0 }
 0x40b   :  { %v11350_v26 = vcombine.low %v9712_v28, %v9714_v57  ;;  %v8744_v36 = vld [vmem:[#allocation3 + $0x88] sm:$0x11]  ;;  %v8873_v20 = vld [vmem:[#allocation3 + $0x1d0] sm:$0x11]  ;;  %v9194_v24 = vor.u32 %v9193_v15, %v9190_v9  ;;  %7971 = vst [vmem:[#allocation3 + $0x1c0] sm:$0x11] %v7970_v27  ;;  %v11850_v3 = vadd.f32 %v18350_v53, %v18343_v60 }
 0x40c   :  { %v8869_v59 = vld [vmem:[#allocation3 + $0x88] sm:$0x11]  ;;  %20163 = vst [vmem:[#allocation82_spill] sm:$0xff] %v18545_v56  ;;  %v8808_v1 = vmax.bf16 %v8744_v36, %v8680_v21  ;;  %v9222_v58 = vor.u32 %v9221_v38, %v9218_v61  ;;  %v8054_v34 = vsel %vm13868_vm11, 4286644096, %v8053_v47  ;;  %v8117_v28 = vld [vmem:[%s19612_s0 + $0x98] sm:$0xff]  ;;  %10300 = vmatprep.mubr.bf16.mxu1 %v11351_v14  ;;  %v18556_v21 = vpop.f32.mrf.mxu1 }
 0x40d   :  { %v8933_v13 = vmax.bf16 %v8869_v59, %v8804_v10  ;;  %v9195_v57 = vrot.slane %v9194_v24, 4  ;;  %8055 = vst [vmem:[#allocation3 + $0x208] sm:$0x11] %v8054_v34  ;;  %v8060_v60 = vsel %vm13868_vm11, 4286644096, %v8059_v31  ;;  %v8266_v27 = vshrl.u32 %v8115_v54, 16  ;;  %v18558_v59 = vpop.f32.mrf.mxu0  ;;  %10301 = vmatmul.mubr.bf16.gmra.mxu1 %v11350_v26 }
 0x40e   :  { %v8066_v53 = vsel %vm13868_vm11, 4286644096, %v8065_v41  ;;  %20164 = vst [vmem:[#allocation96_spill] sm:$0xff] %v18558_v59  ;;  %v8937_v38 = vmax.bf16 %v8873_v20, %v8808_v1  ;;  %v9223_v47 = vrot.slane %v9222_v58, 4  ;;  %8061 = vst [vmem:[#allocation3 + $0x18] sm:$0x11] %v8060_v60  ;;  %v18563_v14 = vpop.f32.mrf.mxu1 }
 0x40f   :  { %v9197_v61 = vshll.u32 %v8933_v13, 16  ;;  %v9605_v10 = vrot.slane %v8933_v13, 5  ;;  %8067 = vst [vmem:[#allocation3 + $0x238] sm:$0x11] %v8066_v53  ;;  %v8119_v9 = vld [vmem:[%s19612_s0 + $0xa8] sm:$0xff]  ;;  %v8268_v31 = vrot.slane %v8266_v27, 7  ;;  %v18565_v36 = vpop.f32.mrf.mxu0 }
 0x410   :  { %v8269_v15 = vshll.u32 %v8115_v54, 16  ;;  %v8282_v34 = vshrl.u32 %v8117_v28, 16  ;;  %v8285_v41 = vshll.u32 %v8117_v28, 16  ;;  %20165 = vst [vmem:[#allocation24_spill] sm:$0xff] %v18563_v14  ;;  %20166 = vst [vmem:[#allocation83_spill] sm:$0xff] %v18565_v36  ;;  %v9225_v26 = vshll.u32 %v8937_v38, 16  ;;  %v18569_v56 = vpop.f32.mrf.mxu1 }
 0x411   :  { %v9199_v24 = vrot.slane %v9197_v61, 5  ;;  %v9606_v20 = vsel %vm14847_vm6, %v11320_v25, %v9605_v10  ;;  %v9613_v1 = vrot.slane %v8937_v38, 5  ;;  %v8273_v58 = vrot.slane %v8268_v31, 4  ;;  %v8549_v59 = vld [vmem:[#allocation3 + $0x250] sm:$0xff]  ;;  %20167 = vst [vmem:[#allocation17_spill] sm:$0xff] %v18569_v56  ;;  %v18571_v54 = vpop.f32.mrf.mxu0 }
 0x412   :  { %v8271_v13 = vor.u32 %v8269_v15, %v8268_v31  ;;  %v8284_v60 = vrot.slane %v8282_v34, 7  ;;  %v8298_v53 = vshrl.u32 %v8119_v9, 16  ;;  %20168 = vst [vmem:[#allocation86_spill] sm:$0xff] %v18571_v54  ;;  %v9227_v27 = vrot.slane %v9225_v26, 5  ;;  %v8561_v34 = vld [vmem:[#allocation3 + $0x140] sm:$0xff]  ;;  %v18580_v56 = vpop.f32.mrf.mxu1 }
 0x413   :  { %v9200_v28 = vsel %vm14282_vm3, %v9195_v57, %v9199_v24  ;;  %v20169_v61 = vrot.slane %v18512_v5, 9  ;;  %v8301_v25 = vshll.u32 %v8119_v9, 16  ;;  %v7972_v14 = vld [vmem:[#allocation3 + $0x210] sm:$0x11]  ;;  %v18582_v54 = vpop.f32.mrf.mxu0  ;;  %v18589_v9 = vadd.f32 %v11850_v3, %v18137_v33 }
 0x414   :  { %v9459_v38 = vmax.bf16 %v9200_v28, %v18497_v43  ;;  %v8287_v10 = vor.u32 %v8285_v41, %v8284_v60  ;;  %v8289_v31 = vrot.slane %v8284_v60, 4  ;;  %v8300_v15 = vrot.slane %v8298_v53, 7  ;;  %20170 = vst [vmem:[#allocation87_spill] sm:$0xff] %v18582_v54  ;;  %v8555_v26 = vld [vmem:[#allocation3 + $0x208] sm:$0x11] }
 0x415   :  { %v9614_v36 = vsel %vm14847_vm6, %v20169_v61, %v9613_v1  ;;  %v9228_v57 = vsel %vm14282_vm3, %v9223_v47, %v9227_v27  ;;  %v8550_v24 = vsel %vm13899_vm0, %v8271_v13, %v8549_v59  ;;  %v8573_v1 = vld [vmem:[#allocation3 + $0x1c0] sm:$0xff]  ;;  %v11908_v43 = vadd.f32 %v18444_v12, %v18437_v23  ;;  %v7978_v41 = vld [vmem:[#allocation3 + $0x8] sm:$0x11]  ;;  %v8567_v54 = vld [vmem:[#allocation3 + $0x18] sm:$0x11]  ;;  %v18594_v27 = vpop.f32.mrf.mxu1  ;;  %v18596_v59 = vpop.f32.mrf.mxu0 }
 0x416   :  { %v9461_v60 = vmax.bf16 %v9228_v57, %v18512_v5  ;;  %v9715_v53 = vmax.bf16 %v9606_v20, %v9459_v38  ;;  %v8303_v28 = vor.u32 %v8301_v25, %v8300_v15  ;;  %v8305_v61 = vrot.slane %v8300_v15, 4  ;;  %8551 = vst [vmem:[#allocation3 + $0x250] sm:$0xff] %v8550_v24  ;;  %v8579_v47 = vld [vmem:[#allocation3 + $0x238] sm:$0x11]  ;;  %20171 = vst [vmem:[#allocation59_spill] sm:$0xff] %v18596_v59 }
 0x417   :  { %v8556_v33 = vsel %vm13846_vm8, %v8273_v58, %v8555_v26  ;;  %v18602_v3 = vsel %vm13899_vm0, %v8287_v10, %v8561_v34  ;;  %v8568_v23 = vsel %vm13846_vm8, %v8289_v31, %v8567_v54  ;;  %v8803_v12 = vmax.bf16 %v18317_v39, %v8550_v24  ;;  %v8068_v5 = vld [vmem:[#allocation3 + $0x20] sm:$0x11]  ;;  %v18615_v10 = vpop.f32.mrf.mxu1  ;;  %v18617_v54 = vpop.f32.mrf.mxu0  ;;  %v8120_v34 = vld [vmem:[%s19612_s0 + $0xb0] sm:$0xff] }
 0x418   :  { %v9717_v20 = vmax.bf16 %v9614_v36, %v9461_v60  ;;  %8557 = vst [vmem:[#allocation3 + $0x208] sm:$0x11] %v8556_v33  ;;  %8563 = vst [vmem:[#allocation3 + $0x140] sm:$0xff] %v18602_v3  ;;  %v18610_v13 = vsel %vm13899_vm0, %v8303_v28, %v8573_v1  ;;  %v8580_v58 = vsel %vm13846_vm8, %v8305_v61, %v8579_v47  ;;  %v8074_v38 = vld [vmem:[#allocation3 + $0x40] sm:$0x11] }
 0x419   :  { %8569 = vst [vmem:[#allocation3 + $0x18] sm:$0x11] %v8568_v23  ;;  %v8807_v25 = vmax.bf16 %v18602_v3, %v8550_v24  ;;  %20172 = vst [vmem:[#allocation16_spill] sm:$0xff] %v18615_v10  ;;  %v18621_v39 = vmax.bf16 %v8803_v12, %v18602_v3  ;;  %v18624_v36 = vadd.f32 %v11908_v43, %v18385_v46  ;;  %v7973_v31 = vsel %vm13846_vm8, 4286644096, %v7972_v14  ;;  %v8122_v14 = vld [vmem:[%s19612_s0 + $0xc0] sm:$0xff]  ;;  %v18641_v1 = vpop.f32.mrf.mxu1  ;;  %v18643_v43 = vpop.f32.mrf.mxu0 }
 0x41a   :  { %20173 = vst [vmem:[#allocation97_spill] sm:$0xff] %v18617_v54  ;;  %8575 = vst [vmem:[#allocation3 + $0x1c0] sm:$0xff] %v18610_v13  ;;  %v7979_v15 = vsel %vm13846_vm8, 4286644096, %v7978_v41  ;;  %v11353_v57 = vcombine.high %v9715_v53, %v9717_v20  ;;  %v11352_v24 = vcombine.low %v9715_v53, %v9717_v20  ;;  %v8069_v46 = vsel %vm13868_vm11, 4286644096, %v8068_v5 }
 0x41b   :  { %8581 = vst [vmem:[#allocation3 + $0x238] sm:$0x11] %v8580_v58  ;;  %20174 = vst [vmem:[#allocation40_spill] sm:$0xff] %v18624_v36  ;;  %v18634_v26 = vmax.bf16 %v8807_v25, %v18610_v13  ;;  %v9202_v41 = vshrl.u32 %v18621_v39, 16  ;;  %v9205_v60 = vshll.u32 %v18621_v39, 16  ;;  %v8307_v23 = vshrl.u32 %v8120_v34, 16  ;;  %v18653_v12 = vpop.f32.mrf.mxu1  ;;  %v18655_v5 = vpop.f32.mrf.mxu0 }
 0x41c   :  { %7974 = vst [vmem:[#allocation3 + $0x210] sm:$0x11] %v7973_v31  ;;  %7980 = vst [vmem:[#allocation3 + $0x8] sm:$0x11] %v7979_v15  ;;  %v8075_v28 = vsel %vm13868_vm11, 4286644096, %v8074_v38  ;;  %10211 = vmatprep.mubr.bf16.mxu0 %v11353_v57 }
 0x41d   :  { %20175 = vst [vmem:[#allocation90_spill] sm:$0xff] %v18641_v1  ;;  %20176 = vst [vmem:[#allocation78_spill] sm:$0xff] %v18643_v43  ;;  %v9230_v61 = vshrl.u32 %v18634_v26, 16  ;;  %v9233_v47 = vshll.u32 %v18634_v26, 16  ;;  %10212 = vmatmul.mubr.bf16.gmra.mxu0 %v11352_v24  ;;  %v8677_v20 = vld [vmem:[#allocation3 + $0xe8] sm:$0x11]  ;;  %v18657_v36 = vpop.f32.mrf.mxu1  ;;  %v18659_v43 = vpop.f32.mrf.mxu0  ;;  %v8810_v24 = vmax.bf16 %v18478_v49, %v18465_v50 }
 0x41e   :  { %8070 = vst [vmem:[#allocation3 + $0x20] sm:$0x11] %v8069_v46  ;;  %8076 = vst [vmem:[#allocation3 + $0x40] sm:$0x11] %v8075_v28  ;;  %v9204_v58 = vrot.slane %v9202_v41, 4  ;;  %v9207_v25 = vrot.slane %v9205_v60, 5  ;;  %v11853_v41 = vadd.f32 %v18367_v29, %v18359_v44 }
 0x41f   :  { %20177 = vst [vmem:[#allocation91_spill] sm:$0xff] %v18653_v12  ;;  %20178 = vst [vmem:[#allocation42_spill] sm:$0xff] %v18655_v5  ;;  %v8310_v31 = vshll.u32 %v8120_v34, 16  ;;  %v8323_v15 = vshrl.u32 %v8122_v14, 16  ;;  %v9232_v38 = vrot.slane %v9230_v61, 4  ;;  %v9235_v57 = vrot.slane %v9233_v47, 5  ;;  %v18665_v5 = vpop.f32.mrf.mxu1 }
 0x420   :  { %v8309_v46 = vrot.slane %v8307_v23, 7  ;;  %v8326_v53 = vshll.u32 %v8122_v14, 16  ;;  %20179 = vst [vmem:[#allocation61_spill] sm:$0xff] %v18657_v36  ;;  %20180 = vst [vmem:[#allocation104_spill] sm:$0xff] %v18659_v43  ;;  %v8681_v28 = vld [vmem:[#allocation3 + $0x208] sm:$0x11]  ;;  %v9208_v59 = vor.u32 %v9207_v25, %v9204_v58  ;;  %v18667_v36 = vpop.f32.mrf.mxu0  ;;  %v18670_v25 = vadd.f32 %v11853_v41, %v18166_v30 }
 0x421   :  { %v8741_v33 = vld [vmem:[#allocation3 + $0x208] sm:$0x11]  ;;  %v8745_v54 = vld [vmem:[#allocation3 + $0x18] sm:$0x11]  ;;  %v9236_v23 = vor.u32 %v9235_v57, %v9232_v38  ;;  %20181 = vst [vmem:[#allocation62_spill] sm:$0xff] %v18667_v36  ;;  %v8325_v1 = vrot.slane %v8323_v15, 7 }
 0x422   :  { %v8805_v34 = vmax.bf16 %v8741_v33, %v8677_v20  ;;  %v8809_v60 = vmax.bf16 %v8745_v54, %v8681_v28  ;;  %v8870_v61 = vld [vmem:[#allocation3 + $0x18] sm:$0x11]  ;;  %v8312_v14 = vor.u32 %v8310_v31, %v8309_v46  ;;  %v9209_v43 = vrot.slane %v9208_v59, 4  ;;  %v18676_v20 = vld [vmem:[#allocation3 + $0x88] sm:$0x11]  ;;  %v18678_v31 = vpop.f32.mrf.mxu1  ;;  %v18680_v59 = vpop.f32.mrf.mxu0 }
 0x423   :  { %v8874_v47 = vld [vmem:[#allocation3 + $0x238] sm:$0x11]  ;;  %v8320_v12 = vrot.slane %v8309_v46, 4  ;;  %v8582_v58 = vld [vmem:[#allocation3 + $0x210] sm:$0xff]  ;;  %v9237_v44 = vrot.slane %v9236_v23, 4  ;;  %v8594_v33 = vld [vmem:[#allocation3 + $0x8] sm:$0xff]  ;;  %v8328_v15 = vor.u32 %v8326_v53, %v8325_v1 }
 0x424   :  { %v8934_v50 = vmax.bf16 %v8870_v61, %v8805_v34  ;;  %v8938_v10 = vmax.bf16 %v8874_v47, %v8809_v60  ;;  %v18674_v29 = vsel %vm13899_vm0, %v8312_v14, %v8582_v58  ;;  %20182 = vst [vmem:[#allocation50_spill] sm:$0xff] %v18680_v59  ;;  %v8336_v38 = vrot.slane %v8325_v1, 4  ;;  %v8748_v46 = vld [vmem:[#allocation3 + $0x1d0] sm:$0x11]  ;;  %v18687_v47 = vpop.f32.mrf.mxu1  ;;  %v18689_v23 = vpop.f32.mrf.mxu0  ;;  %v7975_v14 = vld [vmem:[#allocation3 + $0x148] sm:$0x11] }
 0x425   :  { %v8588_v54 = vld [vmem:[#allocation3 + $0x20] sm:$0x11]  ;;  %8584 = vst [vmem:[#allocation3 + $0x210] sm:$0xff] %v18674_v29  ;;  %v8814_v28 = vmax.bf16 %v18674_v29, %v18478_v49  ;;  %20183 = vst [vmem:[#allocation35_spill] sm:$0xff] %v18689_v23  ;;  %v18693_v1 = vsel %vm13899_vm0, %v8328_v15, %v8594_v33  ;;  %v11911_v49 = vadd.f32 %v18457_v22, %v18448_v63 }
 0x426   :  { %v8589_v30 = vsel %vm13846_vm8, %v8320_v12, %v8588_v54  ;;  %v8600_v57 = vld [vmem:[#allocation3 + $0x40] sm:$0x11]  ;;  %v9211_v41 = vshll.u32 %v8934_v50, 16  ;;  %v9239_v34 = vshll.u32 %v8938_v10, 16  ;;  %v9609_v60 = vrot.slane %v8934_v50, 5  ;;  %8596 = vst [vmem:[#allocation3 + $0x8] sm:$0xff] %v18693_v1  ;;  %v18708_v15 = vpop.f32.mrf.mxu1 }
 0x427   :  { %v9617_v61 = vrot.slane %v8938_v10, 5  ;;  %8590 = vst [vmem:[#allocation3 + $0x20] sm:$0x11] %v8589_v30  ;;  %v8601_v53 = vsel %vm13846_vm8, %v8336_v38, %v8600_v57  ;;  %v18698_v12 = vmax.bf16 %v8810_v24, %v18674_v29  ;;  %v20184_v50 = vrot.slane %v18621_v39, 9  ;;  %v18710_v24 = vpop.f32.mrf.mxu0 }
 0x428   :  { %v9213_v10 = vrot.slane %v9211_v41, 5  ;;  %v9241_v58 = vrot.slane %v9239_v34, 5  ;;  %8602 = vst [vmem:[#allocation3 + $0x40] sm:$0x11] %v8601_v53  ;;  %v8812_v33 = vmax.bf16 %v8748_v46, %v18676_v20  ;;  %20185 = vst [vmem:[#allocation94_spill] sm:$0xff] %v18710_v24  ;;  %v20186_v38 = vrot.slane %v18634_v26, 9 }
 0x429   :  { %v9610_v54 = vsel %vm14847_vm6, %v20184_v50, %v9609_v60  ;;  %v18717_v22 = vmax.bf16 %v8814_v28, %v18693_v1  ;;  %v9244_v30 = vshrl.u32 %v18698_v12, 16  ;;  %v9247_v57 = vshll.u32 %v18698_v12, 16  ;;  %v7981_v41 = vld [vmem:[#allocation3 + $0x180] sm:$0x11]  ;;  %v18730_v28 = vpop.f32.mrf.mxu1  ;;  %v18732_v53 = vpop.f32.mrf.mxu0  ;;  %v8688_v24 = vld [vmem:[#allocation3 + $0x1d0] sm:$0x11] }
 0x42a   :  { %v9618_v63 = vsel %vm14847_vm6, %v20186_v38, %v9617_v61  ;;  %v9214_v20 = vsel %vm14282_vm3, %v9209_v43, %v9213_v10  ;;  %v9242_v46 = vsel %vm14282_vm3, %v9237_v44, %v9241_v58  ;;  %v18726_v34 = vadd.f32 %v11911_v49, %v18501_v48  ;;  %v8071_v61 = vld [vmem:[#allocation3 + $0x200] sm:$0x11]  ;;  %20188 = vst [vmem:[#allocation36_spill] sm:$0xff] %v18732_v53 }
 0x42b   :  { %v7976_v60 = vsel %vm13846_vm8, 4286644096, %v7975_v14  ;;  %v9460_v50 = vmax.bf16 %v9214_v20, %v18621_v39  ;;  %v9462_v38 = vmax.bf16 %v9242_v46, %v18634_v26  ;;  %v9246_v43 = vrot.slane %v9244_v30, 4  ;;  %v8077_v44 = vld [vmem:[#allocation3 + $0x1a0] sm:$0x11]  ;;  %v18743_v23 = vpop.f32.mrf.mxu0 }
 0x42c   :  { %20187 = vst [vmem:[#allocation65_spill] sm:$0xff] %v18726_v34  ;;  %v9249_v10 = vrot.slane %v9247_v57, 5  ;;  %7977 = vst [vmem:[#allocation3 + $0x148] sm:$0x11] %v7976_v60  ;;  %v9272_v48 = vshrl.u32 %v18717_v22, 16  ;;  %v9275_v49 = vshll.u32 %v18717_v22, 16  ;;  %v18741_v34 = vpop.f32.mrf.mxu1 }
 0x42d   :  { %v11324_v14 = vrot.slane %v18698_v12, 9  ;;  %v7982_v58 = vsel %vm13846_vm8, 4286644096, %v7981_v41  ;;  %20189 = vst [vmem:[#allocation64_spill] sm:$0xff] %v18743_v23  ;;  %v9716_v39 = vmax.bf16 %v9610_v54, %v9460_v50  ;;  %v9718_v26 = vmax.bf16 %v9618_v63, %v9462_v38  ;;  %v8121_v41 = vld [vmem:[%s19612_s0 + $0xb8] sm:$0xff]  ;;  %v8123_v54 = vld [vmem:[%s19612_s0 + $0xc8] sm:$0xff]  ;;  %v18755_v50 = vpop.f32.mrf.mxu0 }
 0x42e   :  { %v8752_v20 = vld [vmem:[#allocation3 + $0x20] sm:$0x11]  ;;  %v9250_v57 = vor.u32 %v9249_v10, %v9246_v43  ;;  %7983 = vst [vmem:[#allocation3 + $0x180] sm:$0x11] %v7982_v58  ;;  %v8072_v46 = vsel %vm13868_vm11, 4286644096, %v8071_v61  ;;  %v18753_v63 = vpop.f32.mrf.mxu1 }
 0x42f   :  { %v8877_v30 = vld [vmem:[#allocation3 + $0x20] sm:$0x11]  ;;  %v8816_v60 = vmax.bf16 %v8752_v20, %v8688_v24  ;;  %v9274_v36 = vrot.slane %v9272_v48, 4  ;;  %v9277_v53 = vrot.slane %v9275_v49, 5  ;;  %8073 = vst [vmem:[#allocation3 + $0x200] sm:$0x11] %v8072_v46  ;;  %v11355_v38 = vcombine.high %v9716_v39, %v9718_v26 }
 0x430   :  { %v8941_v59 = vmax.bf16 %v8877_v30, %v8812_v33  ;;  %20190 = vst [vmem:[#allocation66_spill] sm:$0xff] %v18753_v63  ;;  %20191 = vst [vmem:[#allocation76_spill] sm:$0xff] %v18755_v50  ;;  %v11354_v43 = vcombine.low %v9716_v39, %v9718_v26  ;;  %v8881_v61 = vld [vmem:[#allocation3 + $0x40] sm:$0x11]  ;;  %v9251_v24 = vrot.slane %v9250_v57, 4  ;;  %v18759_v20 = vpop.f32.mrf.mxu1  ;;  %v18761_v30 = vpop.f32.mrf.mxu0  ;;  %v11326_v46 = vrot.slane %v18717_v22, 9 }
 0x431   :  { %v8078_v33 = vsel %vm13868_vm11, 4286644096, %v8077_v44  ;;  %v8945_v10 = vmax.bf16 %v8881_v61, %v8816_v60  ;;  %v9278_v49 = vor.u32 %v9277_v53, %v9274_v36  ;;  %20192 = vst [vmem:[#allocation100_spill] sm:$0xff] %v18761_v30  ;;  %10308 = vmatprep.mubr.bf16.mxu1 %v11355_v38  ;;  %v8314_v50 = vshrl.u32 %v8121_v41, 16 }
 0x432   :  { %v9253_v48 = vshll.u32 %v8941_v59, 16  ;;  %v9621_v58 = vrot.slane %v8941_v59, 5  ;;  %8079 = vst [vmem:[#allocation3 + $0x1a0] sm:$0x11] %v8078_v33  ;;  %v8317_v23 = vshll.u32 %v8121_v41, 16  ;;  %v8330_v39 = vshrl.u32 %v8123_v54, 16  ;;  %10309 = vmatmul.mubr.bf16.gmra.mxu1 %v11354_v43  ;;  %v18764_v60 = vpop.f32.mrf.mxu1  ;;  %v18766_v36 = vpop.f32.mrf.mxu0 }
 0x433   :  { %v9279_v57 = vrot.slane %v9278_v49, 4  ;;  %v9281_v63 = vshll.u32 %v8945_v10, 16  ;;  %v8333_v44 = vshll.u32 %v8123_v54, 16  ;;  %20193 = vst [vmem:[#allocation56_spill] sm:$0xff] %v18766_v36  ;;  %v9629_v53 = vrot.slane %v8945_v10, 5  ;;  %v8585_v30 = vld [vmem:[#allocation3 + $0x148] sm:$0xff] }
 0x434   :  { %v9255_v26 = vrot.slane %v9253_v48, 5  ;;  %v9622_v59 = vsel %vm14847_vm6, %v11324_v14, %v9621_v58  ;;  %v8316_v61 = vrot.slane %v8314_v50, 7  ;;  %v8332_v38 = vrot.slane %v8330_v39, 7  ;;  %v18776_v48 = vpop.f32.mrf.mxu1  ;;  %v18778_v49 = vpop.f32.mrf.mxu0  ;;  %v7990_v36 = vld [vmem:[#allocation3 + $0x1b8] sm:$0x11] }
 0x435   :  { %v9283_v41 = vrot.slane %v9281_v63, 5  ;;  %v8811_v43 = vmax.bf16 %v18610_v13, %v18602_v3  ;;  %v11856_v54 = vadd.f32 %v18397_v55, %v18381_v32  ;;  %20194 = vst [vmem:[#allocation84_spill] sm:$0xff] %v18778_v49  ;;  %v9630_v50 = vsel %vm14847_vm6, %v11326_v46, %v9629_v53  ;;  %v8597_v63 = vld [vmem:[#allocation3 + $0x180] sm:$0xff] }
 0x436   :  { %v9256_v33 = vsel %vm14282_vm3, %v9251_v24, %v9255_v26  ;;  %v8319_v10 = vor.u32 %v8317_v23, %v8316_v61  ;;  %v8321_v58 = vrot.slane %v8316_v61, 4  ;;  %v8591_v24 = vld [vmem:[#allocation3 + $0x200] sm:$0x11]  ;;  %v8335_v3 = vor.u32 %v8333_v44, %v8332_v38  ;;  %v18788_v49 = vpop.f32.mrf.mxu1  ;;  %v8685_v61 = vld [vmem:[#allocation3 + $0x18] sm:$0x11] }
 0x437   :  { %v9463_v14 = vmax.bf16 %v9256_v33, %v18698_v12  ;;  %v9284_v39 = vsel %vm14282_vm3, %v9279_v57, %v9283_v41  ;;  %v8337_v26 = vrot.slane %v8332_v38, 4  ;;  %v18786_v32 = vadd.f32 %v11856_v54, %v18187_v6  ;;  %v7984_v55 = vld [vmem:[#allocation3 + $0xe0] sm:$0x11]  ;;  %v18790_v12 = vpop.f32.mrf.mxu0  ;;  %v8749_v6 = vld [vmem:[#allocation3 + $0x238] sm:$0x11] }
 0x438   :  { %20195 = vst [vmem:[#allocation57_spill] sm:$0xff] %v18790_v12  ;;  %v9465_v46 = vmax.bf16 %v9284_v39, %v18717_v22  ;;  %v18795_v53 = vsel %vm13899_vm0, %v8319_v10, %v8585_v30  ;;  %v8592_v57 = vsel %vm13846_vm8, %v8321_v58, %v8591_v24  ;;  %v18802_v38 = vsel %vm13899_vm0, %v8335_v3, %v8597_v63  ;;  %v8080_v33 = vld [vmem:[#allocation3 + $0x60] sm:$0x11]  ;;  %v18811_v41 = vpop.f32.mrf.mxu1  ;;  %v8086_v39 = vld [vmem:[#allocation3 + $0x90] sm:$0x11] }
 0x439   :  { %v9719_v23 = vmax.bf16 %v9622_v59, %v9463_v14  ;;  %v8603_v44 = vld [vmem:[#allocation3 + $0x1a0] sm:$0x11]  ;;  %8587 = vst [vmem:[#allocation3 + $0x148] sm:$0xff] %v18795_v53  ;;  %8593 = vst [vmem:[#allocation3 + $0x200] sm:$0x11] %v8592_v57  ;;  %v8815_v30 = vmax.bf16 %v18795_v53, %v18610_v13  ;;  %v18809_v59 = vmax.bf16 %v8811_v43, %v18795_v53  ;;  %v18813_v54 = vpop.f32.mrf.mxu0 }
 0x43a   :  { %v8604_v22 = vsel %vm13846_vm8, %v8337_v26, %v8603_v44  ;;  %20196 = vst [vmem:[#allocation51_spill] sm:$0xff] %v18811_v41  ;;  %20197 = vst [vmem:[#allocation52_spill] sm:$0xff] %v18813_v54  ;;  %v9721_v14 = vmax.bf16 %v9630_v50, %v9465_v46  ;;  %v11914_v10 = vadd.f32 %v18483_v40, %v18467_v4  ;;  %v7985_v58 = vsel %vm13846_vm8, 4286644096, %v7984_v55  ;;  %v8124_v4 = vld [vmem:[%s19612_s0 + $0xd0] sm:$0xff]  ;;  %v18830_v40 = vpop.f32.mrf.mxu1  ;;  %v8126_v57 = vld [vmem:[%s19612_s0 + $0xe0] sm:$0xff] }
 0x43b   :  { %8599 = vst [vmem:[#allocation3 + $0x180] sm:$0xff] %v18802_v38  ;;  %8605 = vst [vmem:[#allocation3 + $0x1a0] sm:$0x11] %v8604_v22  ;;  %v7991_v13 = vsel %vm13846_vm8, 4286644096, %v7990_v36  ;;  %v8813_v43 = vmax.bf16 %v8749_v6, %v8685_v61  ;;  %v18823_v24 = vmax.bf16 %v8815_v30, %v18802_v38  ;;  %v9258_v63 = vshrl.u32 %v18809_v59, 16  ;;  %v18832_v3 = vpop.f32.mrf.mxu0 }
 0x43c   :  { %v9261_v50 = vshll.u32 %v18809_v59, 16  ;;  %7986 = vst [vmem:[#allocation3 + $0xe0] sm:$0x11] %v7985_v58  ;;  %7992 = vst [vmem:[#allocation3 + $0x1b8] sm:$0x11] %v7991_v13  ;;  %v11357_v36 = vcombine.high %v9719_v23, %v9721_v14  ;;  %v11356_v26 = vcombine.low %v9719_v23, %v9721_v14  ;;  %v18835_v55 = vadd.f32 %v11914_v10, %v18589_v9  ;;  %v18844_v30 = vpop.f32.mrf.mxu1 }
 0x43d   :  { %20198 = vst [vmem:[#allocation105_spill] sm:$0xff] %v18830_v40  ;;  %20199 = vst [vmem:[#allocation13_spill] sm:$0xff] %v18832_v3  ;;  %v8081_v46 = vsel %vm13868_vm11, 4286644096, %v8080_v33  ;;  %v9260_v44 = vrot.slane %v9258_v63, 4  ;;  %v9286_v6 = vshrl.u32 %v18823_v24, 16  ;;  %v18846_v23 = vpop.f32.mrf.mxu0 }
 0x43e   :  { %v9263_v61 = vrot.slane %v9261_v50, 5  ;;  %v9289_v22 = vshll.u32 %v18823_v24, 16  ;;  %8082 = vst [vmem:[#allocation3 + $0x60] sm:$0x11] %v8081_v46  ;;  %20200 = vst [vmem:[#allocation68_spill] sm:$0xff] %v18844_v30  ;;  %10219 = vmatprep.mubr.bf16.mxu0 %v11357_v36  ;;  %v8339_v14 = vshrl.u32 %v8124_v4, 16  ;;  %v18850_v3 = vpop.f32.mrf.mxu1 }
 0x43f   :  { %20201 = vst [vmem:[#allocation102_spill] sm:$0xff] %v18846_v23  ;;  %v8689_v9 = vld [vmem:[#allocation3 + $0x238] sm:$0x11]  ;;  %v8087_v33 = vsel %vm13868_vm11, 4286644096, %v8086_v39  ;;  %v8342_v10 = vshll.u32 %v8124_v4, 16  ;;  %10220 = vmatmul.mubr.bf16.gmra.mxu0 %v11356_v26  ;;  %v18852_v46 = vpop.f32.mrf.mxu0 }
 0x440   :  { %v9264_v58 = vor.u32 %v9263_v61, %v9260_v44  ;;  %v9288_v13 = vrot.slane %v9286_v6, 4  ;;  %v9291_v63 = vrot.slane %v9289_v22, 5  ;;  %8088 = vst [vmem:[#allocation3 + $0x90] sm:$0x11] %v8087_v33  ;;  %v8355_v50 = vshrl.u32 %v8126_v57, 16  ;;  %20202 = vst [vmem:[#allocation4_spill] sm:$0xff] %v18850_v3  ;;  %v18855_v26 = vpop.f32.mrf.mxu1 }
 0x441   :  { %20203 = vst [vmem:[#allocation14_spill] sm:$0xff] %v18852_v46  ;;  %v8753_v30 = vld [vmem:[#allocation3 + $0x200] sm:$0x11]  ;;  %v8341_v23 = vrot.slane %v8339_v14, 7  ;;  %v8358_v36 = vshll.u32 %v8126_v57, 16  ;;  %v11325_v4 = vrot.slane %v18809_v59, 9  ;;  %v18857_v44 = vpop.f32.mrf.mxu0  ;;  %v8818_v3 = vmax.bf16 %v18693_v1, %v18674_v29 }
 0x442   :  { %v8878_v40 = vld [vmem:[#allocation3 + $0x200] sm:$0x11]  ;;  %v8817_v41 = vmax.bf16 %v8753_v30, %v8689_v9  ;;  %v9292_v39 = vor.u32 %v9291_v63, %v9288_v13  ;;  %20204 = vst [vmem:[#allocation5_spill] sm:$0xff] %v18857_v44  ;;  %v8357_v22 = vrot.slane %v8355_v50, 7  ;;  %v9265_v14 = vrot.slane %v9264_v58, 4 }
 0x443   :  { %v8882_v54 = vld [vmem:[#allocation3 + $0x1a0] sm:$0x11]  ;;  %v8942_v12 = vmax.bf16 %v8878_v40, %v8813_v43  ;;  %v8344_v61 = vor.u32 %v8342_v10, %v8341_v23  ;;  %v8352_v6 = vrot.slane %v8341_v23, 4  ;;  %v8618_v9 = vld [vmem:[#allocation3 + $0x1b8] sm:$0xff]  ;;  %v18861_v43 = vpop.f32.mrf.mxu1  ;;  %v18863_v40 = vpop.f32.mrf.mxu0  ;;  %v11327_v13 = vrot.slane %v18823_v24, 9 }
 0x444   :  { %v8606_v33 = vld [vmem:[#allocation3 + $0xe0] sm:$0xff]  ;;  %v8946_v46 = vmax.bf16 %v8882_v54, %v8817_v41  ;;  %20205 = vst [vmem:[#allocation15_spill] sm:$0xff] %v18863_v40  ;;  %v8360_v63 = vor.u32 %v8358_v36, %v8357_v22  ;;  %v8368_v44 = vrot.slane %v8357_v22, 4  ;;  %v9293_v29 = vrot.slane %v9292_v39, 4 }
 0x445   :  { %v9267_v57 = vshll.u32 %v8942_v12, 16  ;;  %v9625_v30 = vrot.slane %v8942_v12, 5  ;;  %v18868_v23 = vsel %vm13899_vm0, %v8344_v61, %v8606_v33  ;;  %v8612_v10 = vld [vmem:[#allocation3 + $0x60] sm:$0x11]  ;;  %v18871_v12 = vpop.f32.mrf.mxu1  ;;  %v18873_v58 = vpop.f32.mrf.mxu0 }
 0x446   :  { %v9295_v41 = vshll.u32 %v8946_v46, 16  ;;  %v9633_v54 = vrot.slane %v8946_v46, 5  ;;  %8608 = vst [vmem:[#allocation3 + $0xe0] sm:$0xff] %v18868_v23  ;;  %20206 = vst [vmem:[#allocation103_spill] sm:$0xff] %v18871_v12  ;;  %v8613_v40 = vsel %vm13846_vm8, %v8352_v6, %v8612_v10  ;;  %v18879_v36 = vsel %vm13899_vm0, %v8360_v63, %v8618_v9  ;;  %v7987_v46 = vld [vmem:[#allocation3 + $0xd0] sm:$0x11] }
 0x447   :  { %v9269_v50 = vrot.slane %v9267_v57, 5  ;;  %20207 = vst [vmem:[#allocation71_spill] sm:$0xff] %v18873_v58  ;;  %v8624_v61 = vld [vmem:[#allocation3 + $0x90] sm:$0x11]  ;;  %v8822_v22 = vmax.bf16 %v18868_v23, %v18693_v1  ;;  %v18884_v39 = vmax.bf16 %v8818_v3, %v18868_v23  ;;  %v9626_v58 = vsel %vm14847_vm6, %v11325_v4, %v9625_v30  ;;  %8614 = vst [vmem:[#allocation3 + $0x60] sm:$0x11] %v8613_v40  ;;  %v18893_v9 = vpop.f32.mrf.mxu1  ;;  %v18895_v1 = vpop.f32.mrf.mxu0 }
 0x448   :  { %v9297_v57 = vrot.slane %v9295_v41, 5  ;;  %8620 = vst [vmem:[#allocation3 + $0x1b8] sm:$0xff] %v18879_v36  ;;  %v8625_v6 = vsel %vm13846_vm8, %v8368_v44, %v8624_v61  ;;  %20208 = vst [vmem:[#allocation18_spill] sm:$0xff] %v18893_v9  ;;  %v8692_v63 = vld [vmem:[#allocation3 + $0x20] sm:$0x11]  ;;  %v9634_v44 = vsel %vm14847_vm6, %v11327_v13, %v9633_v54 }
 0x449   :  { %v9270_v33 = vsel %vm14282_vm3, %v9265_v14, %v9269_v50  ;;  %20209 = vst [vmem:[#allocation19_spill] sm:$0xff] %v18895_v1  ;;  %8626 = vst [vmem:[#allocation3 + $0x90] sm:$0x11] %v8625_v6  ;;  %v8756_v10 = vld [vmem:[#allocation3 + $0x40] sm:$0x11]  ;;  %v18899_v14 = vmax.bf16 %v8822_v22, %v18879_v36  ;;  %v9300_v4 = vshrl.u32 %v18884_v39, 16  ;;  %v11917_v50 = vadd.f32 %v18521_v8, %v18505_v62  ;;  %v18911_v22 = vpop.f32.mrf.mxu1 }
 0x44a   :  { %v9464_v3 = vmax.bf16 %v9270_v33, %v18809_v59  ;;  %v9303_v30 = vshll.u32 %v18884_v39, 16  ;;  %v9298_v40 = vsel %vm14282_vm3, %v9293_v29, %v9297_v57  ;;  %v7988_v59 = vsel %vm13846_vm8, 4286644096, %v7987_v46  ;;  %v7993_v41 = vld [vmem:[#allocation3 + $0x100] sm:$0x11]  ;;  %20210 = vst [vmem:[#allocation75_spill] sm:$0xff] %v18911_v22  ;;  %v18913_v33 = vpop.f32.mrf.mxu0 }
 0x44b   :  { %v8083_v61 = vld [vmem:[#allocation3 + $0x10] sm:$0x11]  ;;  %20211 = vst [vmem:[#allocation77_spill] sm:$0xff] %v18913_v33  ;;  %v9466_v6 = vmax.bf16 %v9298_v40, %v18823_v24  ;;  %v9302_v9 = vrot.slane %v9300_v4, 4  ;;  %7989 = vst [vmem:[#allocation3 + $0xd0] sm:$0x11] %v7988_v59  ;;  %v8820_v8 = vmax.bf16 %v8756_v10, %v8692_v63  ;;  %v18922_v46 = vadd.f32 %v11917_v50, %v18670_v25  ;;  %v18924_v33 = vpop.f32.mrf.mxu1 }
 0x44c   :  { %v9720_v1 = vmax.bf16 %v9626_v58, %v9464_v3  ;;  %v9305_v29 = vrot.slane %v9303_v30, 5  ;;  %v8089_v57 = vld [vmem:[#allocation3 + $0x70] sm:$0x11]  ;;  %v8125_v62 = vld [vmem:[%s19612_s0 + $0xd8] sm:$0xff]  ;;  %v9328_v13 = vshrl.u32 %v18899_v14, 16  ;;  %v9331_v54 = vshll.u32 %v18899_v14, 16  ;;  %v18926_v24 = vpop.f32.mrf.mxu0 }
 0x44d   :  { %20212 = vst [vmem:[#allocation6_spill] sm:$0xff] %v18922_v46  ;;  %20213 = vst [vmem:[#allocation20_spill] sm:$0xff] %v18924_v33  ;;  %v9722_v58 = vmax.bf16 %v9634_v44, %v9466_v6  ;;  %v8696_v3 = vld [vmem:[#allocation3 + $0x40] sm:$0x11]  ;;  %v7994_v30 = vsel %vm13846_vm8, 4286644096, %v7993_v41  ;;  %v18937_v59 = vpop.f32.mrf.mxu1 }
 0x44e   :  { %20214 = vst [vmem:[#allocation109_spill] sm:$0xff] %v18926_v24  ;;  %v9306_v4 = vor.u32 %v9305_v29, %v9302_v9  ;;  %v8084_v63 = vsel %vm13868_vm11, 4286644096, %v8083_v61  ;;  %v9330_v10 = vrot.slane %v9328_v13, 4  ;;  %v9333_v40 = vrot.slane %v9331_v54, 5  ;;  %v8127_v50 = vld [vmem:[%s19612_s0 + $0xe8] sm:$0xff]  ;;  %v18939_v9 = vpop.f32.mrf.mxu0 }
 0x44f   :  { %7995 = vst [vmem:[#allocation3 + $0x100] sm:$0x11] %v7994_v30  ;;  %8085 = vst [vmem:[#allocation3 + $0x10] sm:$0x11] %v8084_v63  ;;  %v8090_v25 = vsel %vm13868_vm11, 4286644096, %v8089_v57  ;;  %v11359_v41 = vcombine.high %v9720_v1, %v9722_v58  ;;  %v11358_v6 = vcombine.low %v9720_v1, %v9722_v58  ;;  %v18941_v46 = vpop.f32.mrf.mxu1 }
 0x450   :  { %v8346_v44 = vshrl.u32 %v8125_v62, 16  ;;  %20215 = vst [vmem:[#allocation79_spill] sm:$0xff] %v18937_v59  ;;  %20216 = vst [vmem:[#allocation80_spill] sm:$0xff] %v18939_v9  ;;  %v8760_v29 = vld [vmem:[#allocation3 + $0x60] sm:$0x11]  ;;  %v8349_v13 = vshll.u32 %v8125_v62, 16  ;;  %v9334_v24 = vor.u32 %v9333_v40, %v9330_v10  ;;  %v18943_v33 = vpop.f32.mrf.mxu0 }
 0x451   :  { %v8885_v61 = vld [vmem:[#allocation3 + $0x60] sm:$0x11]  ;;  %8091 = vst [vmem:[#allocation3 + $0x70] sm:$0x11] %v8090_v25  ;;  %v8824_v54 = vmax.bf16 %v8760_v29, %v8696_v3  ;;  %v8889_v30 = vld [vmem:[#allocation3 + $0x90] sm:$0x11]  ;;  %10316 = vmatprep.mubr.bf16.mxu1 %v11359_v41  ;;  %v8819_v41 = vmax.bf16 %v18802_v38, %v18795_v53 }
 0x452   :  { %v8949_v63 = vmax.bf16 %v8885_v61, %v8820_v8  ;;  %v8348_v57 = vrot.slane %v8346_v44, 7  ;;  %20217 = vst [vmem:[#allocation110_spill] sm:$0xff] %v18941_v46  ;;  %20218 = vst [vmem:[#allocation27_spill] sm:$0xff] %v18943_v33  ;;  %v11328_v59 = vrot.slane %v18884_v39, 9  ;;  %v11330_v9 = vrot.slane %v18899_v14, 9  ;;  %10317 = vmatmul.mubr.bf16.gmra.mxu1 %v11358_v6  ;;  %v8609_v29 = vld [vmem:[#allocation3 + $0xd0] sm:$0xff]  ;;  %v18947_v8 = vpop.f32.mrf.mxu1  ;;  %v18949_v10 = vpop.f32.mrf.mxu0 }
 0x453   :  { %v8362_v22 = vshrl.u32 %v8127_v50, 16  ;;  %v8365_v1 = vshll.u32 %v8127_v50, 16  ;;  %v8953_v58 = vmax.bf16 %v8889_v30, %v8824_v54  ;;  %v9307_v25 = vrot.slane %v9306_v4, 4  ;;  %20219 = vst [vmem:[#allocation81_spill] sm:$0xff] %v18949_v10 }
 0x454   :  { %v9309_v62 = vshll.u32 %v8949_v63, 16  ;;  %v9637_v3 = vrot.slane %v8949_v63, 5  ;;  %v8351_v40 = vor.u32 %v8349_v13, %v8348_v57  ;;  %v8353_v44 = vrot.slane %v8348_v57, 4  ;;  %v18953_v6 = vpop.f32.mrf.mxu1  ;;  %v18955_v4 = vpop.f32.mrf.mxu0 }
 0x455   :  { %v8364_v61 = vrot.slane %v8362_v22, 7  ;;  %v9335_v46 = vrot.slane %v9334_v24, 4  ;;  %v9337_v12 = vshll.u32 %v8953_v58, 16  ;;  %v9645_v50 = vrot.slane %v8953_v58, 5  ;;  %20220 = vst [vmem:[#allocation107_spill] sm:$0xff] %v18955_v4 }
 0x456   :  { %v9311_v33 = vrot.slane %v9309_v62, 5  ;;  %v18959_v63 = vsel %vm13899_vm0, %v8351_v40, %v8609_v29  ;;  %v8615_v13 = vld [vmem:[#allocation3 + $0x10] sm:$0x11]  ;;  %v8621_v57 = vld [vmem:[#allocation3 + $0x100] sm:$0xff]  ;;  %v9638_v24 = vsel %vm14847_vm6, %v11328_v59, %v9637_v3  ;;  %v18968_v4 = vpop.f32.mrf.mxu1  ;;  %v18970_v29 = vpop.f32.mrf.mxu0 }
 0x457   :  { %v8367_v54 = vor.u32 %v8365_v1, %v8364_v61  ;;  %v8369_v30 = vrot.slane %v8364_v61, 4  ;;  %v7996_v22 = vld [vmem:[#allocation3 + $0x260] sm:$0x11]  ;;  %v9339_v62 = vrot.slane %v9337_v12, 5  ;;  %8611 = vst [vmem:[#allocation3 + $0xd0] sm:$0xff] %v18959_v63  ;;  %v8616_v1 = vsel %vm13846_vm8, %v8353_v44, %v8615_v13  ;;  %20221 = vst [vmem:[#allocation28_spill] sm:$0xff] %v18968_v4 }
 0x458   :  { %v9312_v53 = vsel %vm14282_vm3, %v9307_v25, %v9311_v33  ;;  %v8627_v58 = vld [vmem:[#allocation3 + $0x70] sm:$0x11]  ;;  %v8092_v61 = vld [vmem:[#allocation3 + $0x80] sm:$0x11]  ;;  %20222 = vst [vmem:[#allocation10_spill] sm:$0xff] %v18970_v29  ;;  %v8823_v59 = vmax.bf16 %v18959_v63, %v18802_v38  ;;  %v9646_v3 = vsel %vm14847_vm6, %v11330_v9, %v9645_v50  ;;  %v18991_v13 = vpop.f32.mrf.mxu1  ;;  %v18993_v38 = vpop.f32.mrf.mxu0 }
 0x459   :  { %v9467_v40 = vmax.bf16 %v9312_v53, %v18884_v39  ;;  %8617 = vst [vmem:[#allocation3 + $0x10] sm:$0x11] %v8616_v1  ;;  %v18975_v12 = vsel %vm13899_vm0, %v8367_v54, %v8621_v57  ;;  %v8628_v33 = vsel %vm13846_vm8, %v8369_v30, %v8627_v58  ;;  %v9340_v25 = vsel %vm14282_vm3, %v9335_v46, %v9339_v62  ;;  %v8693_v39 = vld [vmem:[#allocation3 + $0x200] sm:$0x11] }
 0x45a   :  { %8623 = vst [vmem:[#allocation3 + $0x100] sm:$0xff] %v18975_v12  ;;  %8629 = vst [vmem:[#allocation3 + $0x70] sm:$0x11] %v8628_v33  ;;  %v8757_v44 = vld [vmem:[#allocation3 + $0x1a0] sm:$0x11]  ;;  %v18987_v54 = vmax.bf16 %v8819_v41, %v18959_v63  ;;  %v9469_v46 = vmax.bf16 %v9340_v25, %v18899_v14  ;;  %v18997_v9 = vmax.bf16 %v8823_v59, %v18975_v12  ;;  %v8128_v41 = vld [vmem:[%s19612_s0 + $0xf0] sm:$0xff]  ;;  %v19012_v1 = vpop.f32.mrf.mxu0 }
 0x45b   :  { %v7997_v30 = vsel %vm13846_vm8, 4286644096, %v7996_v22  ;;  %20223 = vst [vmem:[#allocation29_spill] sm:$0xff] %v18991_v13  ;;  %20224 = vst [vmem:[#allocation108_spill] sm:$0xff] %v18993_v38  ;;  %v9723_v57 = vmax.bf16 %v9638_v24, %v9467_v40  ;;  %v8093_v50 = vsel %vm13868_vm11, 4286644096, %v8092_v61  ;;  %v11859_v22 = vadd.f32 %v18439_v2, %v18423_v17  ;;  %v19010_v24 = vpop.f32.mrf.mxu1 }
 0x45c   :  { %7998 = vst [vmem:[#allocation3 + $0x260] sm:$0x11] %v7997_v30  ;;  %v9314_v53 = vshrl.u32 %v18987_v54, 16  ;;  %v9317_v62 = vshll.u32 %v18987_v54, 16  ;;  %v11862_v14 = vadd.f32 %v18450_v11, %v18446_v51  ;;  %8094 = vst [vmem:[#allocation3 + $0x80] sm:$0x11] %v8093_v50  ;;  %v9725_v58 = vmax.bf16 %v9646_v3, %v9469_v46  ;;  %v19018_v29 = vpop.f32.mrf.mxu0 }
 0x45d   :  { %20225 = vst [vmem:[#allocation21_spill] sm:$0xff] %v19010_v24  ;;  %20226 = vst [vmem:[#allocation32_spill] sm:$0xff] %v19012_v1  ;;  %v8821_v61 = vmax.bf16 %v8757_v44, %v8693_v39  ;;  %v9342_v40 = vshrl.u32 %v18997_v9, 16  ;;  %v9345_v33 = vshll.u32 %v18997_v9, 16  ;;  %v8697_v59 = vld [vmem:[#allocation3 + $0x1a0] sm:$0x11]  ;;  %v19016_v38 = vpop.f32.mrf.mxu1  ;;  %v19021_v3 = vadd.f32 %v11859_v22, %v18199_v45 }
 0x45e   :  { %v9316_v17 = vrot.slane %v9314_v53, 4  ;;  %v9319_v2 = vrot.slane %v9317_v62, 5  ;;  %v8371_v25 = vshrl.u32 %v8128_v41, 16  ;;  %v8374_v30 = vshll.u32 %v8128_v41, 16  ;;  %20227 = vst [vmem:[#allocation33_spill] sm:$0xff] %v19016_v38  ;;  %20228 = vst [vmem:[#allocation34_spill] sm:$0xff] %v19018_v29  ;;  %v19028_v41 = vpop.f32.mrf.mxu0 }
 0x45f   :  { %v11361_v51 = vcombine.high %v9723_v57, %v9725_v58  ;;  %v11360_v11 = vcombine.low %v9723_v57, %v9725_v58  ;;  %v9344_v50 = vrot.slane %v9342_v40, 4  ;;  %v9347_v10 = vrot.slane %v9345_v33, 5  ;;  %v19026_v62 = vpop.f32.mrf.mxu1  ;;  %20230 = vst [vmem:[#allocation25_spill] sm:$0xff] %v19028_v41  ;;  %v19034_v22 = vld [vmem:[#allocation3 + $0x60] sm:$0x11] }
 0x460   :  { %v8761_v39 = vld [vmem:[#allocation3 + $0x10] sm:$0x11]  ;;  %v9320_v46 = vor.u32 %v9319_v2, %v9316_v17  ;;  %v19024_v1 = vadd.f32 %v11862_v14, %v18220_v42  ;;  %v8373_v53 = vrot.slane %v8371_v25, 7  ;;  %20229 = vst [vmem:[#allocation22_spill] sm:$0xff] %v19026_v62  ;;  %v19032_v45 = vadd.f32 %v18543_v7, %v18532_v0  ;;  %v19043_v25 = vpop.f32.mrf.mxu0 }
 0x461   :  { %v8886_v44 = vld [vmem:[#allocation3 + $0x10] sm:$0x11]  ;;  %10227 = vmatprep.mubr.bf16.mxu0 %v11361_v51  ;;  %v8825_v29 = vmax.bf16 %v8761_v39, %v8697_v59  ;;  %v9348_v58 = vor.u32 %v9347_v10, %v9344_v50  ;;  %v11329_v14 = vrot.slane %v18987_v54, 9  ;;  %v8826_v59 = vmax.bf16 %v18879_v36, %v18868_v23  ;;  %v19041_v10 = vpop.f32.mrf.mxu1  ;;  %20232 = vst [vmem:[#allocation113_spill] sm:$0xff] %v19043_v25 }
 0x462   :  { %v8890_v38 = vld [vmem:[#allocation3 + $0x70] sm:$0x11]  ;;  %v8950_v57 = vmax.bf16 %v8886_v44, %v8821_v61  ;;  %10228 = vmatmul.mubr.bf16.gmra.mxu0 %v11360_v11  ;;  %v8376_v33 = vor.u32 %v8374_v30, %v8373_v53  ;;  %v8384_v17 = vrot.slane %v8373_v53, 4  ;;  %v7999_v61 = vld [vmem:[#allocation3 + $0x128] sm:$0x11]  ;;  %20231 = vst [vmem:[#allocation37_spill] sm:$0xff] %v19041_v10 }
 0x463   :  { %v19036_v40 = vld [vmem:[#allocation3 + $0x90] sm:$0x11]  ;;  %v8630_v2 = vld [vmem:[#allocation3 + $0x260] sm:$0xff]  ;;  %v8954_v0 = vmax.bf16 %v8890_v38, %v8825_v29  ;;  %v9321_v7 = vrot.slane %v9320_v46, 4  ;;  %v11331_v11 = vrot.slane %v18997_v9, 9  ;;  %v8129_v53 = vld [vmem:[%s19612_s0 + $0xf8] sm:$0xff]  ;;  %v19055_v29 = vpop.f32.mrf.mxu1  ;;  %v19057_v38 = vpop.f32.mrf.mxu0 }
 0x464   :  { %v8095_v42 = vld [vmem:[#allocation3 + $0x130] sm:$0x11]  ;;  %v9323_v51 = vshll.u32 %v8950_v57, 16  ;;  %v9641_v50 = vrot.slane %v8950_v57, 5  ;;  %v8636_v39 = vld [vmem:[#allocation3 + $0x80] sm:$0x11]  ;;  %v8631_v30 = vsel %vm13899_vm0, %v8376_v33, %v8630_v2  ;;  %v8828_v23 = vmax.bf16 %v19036_v40, %v19034_v22 }
 0x465   :  { %v8637_v44 = vsel %vm13846_vm8, %v8384_v17, %v8636_v39  ;;  %20233 = vst [vmem:[#allocation26_spill] sm:$0xff] %v19055_v29  ;;  %20234 = vst [vmem:[#allocation30_spill] sm:$0xff] %v19057_v38  ;;  %v9349_v57 = vrot.slane %v9348_v58, 4  ;;  %v9351_v25 = vshll.u32 %v8954_v0, 16  ;;  %v9649_v41 = vrot.slane %v8954_v0, 5  ;;  %v19066_v2 = vpop.f32.mrf.mxu1  ;;  %v19068_v39 = vpop.f32.mrf.mxu0 }
 0x466   :  { %v9325_v46 = vrot.slane %v9323_v51, 5  ;;  %8632 = vst [vmem:[#allocation3 + $0x260] sm:$0xff] %v8631_v30  ;;  %8638 = vst [vmem:[#allocation3 + $0x80] sm:$0x11] %v8637_v44  ;;  %v8830_v33 = vmax.bf16 %v8631_v30, %v18879_v36  ;;  %v19060_v17 = vmax.bf16 %v8826_v59, %v8631_v30  ;;  %v8000_v22 = vsel %vm13846_vm8, 4286644096, %v7999_v61 }
 0x467   :  { %v8096_v40 = vsel %vm13868_vm11, 4286644096, %v8095_v42  ;;  %20235 = vst [vmem:[#allocation114_spill] sm:$0xff] %v19066_v2  ;;  %20236 = vst [vmem:[#allocation44_spill] sm:$0xff] %v19068_v39  ;;  %v9353_v0 = vrot.slane %v9351_v25, 5  ;;  %v9642_v51 = vsel %vm14847_vm6, %v11329_v14, %v9641_v50  ;;  %v8378_v36 = vshrl.u32 %v8129_v53, 16  ;;  %v19082_v44 = vpop.f32.mrf.mxu1  ;;  %v19084_v25 = vpop.f32.mrf.mxu0 }
 0x468   :  { %v9326_v58 = vsel %vm14282_vm3, %v9321_v7, %v9325_v46  ;;  %8001 = vst [vmem:[#allocation3 + $0x128] sm:$0x11] %v8000_v22  ;;  %8097 = vst [vmem:[#allocation3 + $0x130] sm:$0x11] %v8096_v40  ;;  %v19075_v61 = vld [vmem:[#allocation3 + $0x220] sm:$0xff]  ;;  %v9356_v42 = vshrl.u32 %v19060_v17, 16  ;;  %v9650_v7 = vsel %vm14847_vm6, %v11331_v11, %v9649_v41 }
 0x469   :  { %v9468_v59 = vmax.bf16 %v9326_v58, %v18987_v54  ;;  %v19078_v19 = vmax.bf16 %v19075_v61, %v8830_v33  ;;  %v9359_v30 = vshll.u32 %v19060_v17, 16  ;;  %20237 = vst [vmem:[#allocation31_spill] sm:$0xff] %v19082_v44  ;;  %20238 = vst [vmem:[#allocation111_spill] sm:$0xff] %v19084_v25  ;;  %v9354_v14 = vsel %vm14282_vm3, %v9349_v57, %v9353_v0  ;;  %v8704_v22 = vld [vmem:[#allocation3 + $0x90] sm:$0x11]  ;;  %v19091_v39 = vpop.f32.mrf.mxu1  ;;  %v19093_v38 = vpop.f32.mrf.mxu0  ;;  %v20241_v41 = vld [vmem:[#allocation8_spill] sm:$0xff] }
 0x46a   :  { %v8380_v54 = vrot.slane %v8378_v36, 7  ;;  %v8381_v50 = vshll.u32 %v8129_v53, 16  ;;  %v9470_v46 = vmax.bf16 %v9354_v14, %v18997_v9  ;;  %v9358_v40 = vrot.slane %v9356_v42, 4  ;;  %20239 = vst [vmem:[#allocation47_spill] sm:$0xff] %v19091_v39  ;;  %20240 = vst [vmem:[#allocation48_spill] sm:$0xff] %v19093_v38 }
 0x46b   :  { %v9724_v33 = vmax.bf16 %v9642_v51, %v9468_v59  ;;  %v9361_v58 = vrot.slane %v9359_v30, 5  ;;  %v8897_v44 = vld [vmem:[#allocation3 + $0x78] sm:$0x11]  ;;  %v9384_v25 = vshrl.u32 %v19078_v19, 16  ;;  %v9387_v57 = vshll.u32 %v19078_v19, 16  ;;  %v19100_v30 = vpop.f32.mrf.mxu1  ;;  %v19102_v14 = vpop.f32.mrf.mxu0 }
 0x46c   :  { %v11332_v0 = vrot.slane %v19060_v17, 9  ;;  %v11865_v11 = vadd.f32 %v20241_v41, %v18459_v16  ;;  %v9726_v53 = vmax.bf16 %v9650_v7, %v9470_v46  ;;  %v8383_v59 = vor.u32 %v8381_v50, %v8380_v54  ;;  %v8701_v35 = vld [vmem:[#allocation3 + $0x10] sm:$0x11] }
 0x46d   :  { %v8768_v9 = vld [vmem:[#allocation3 + $0x80] sm:$0x11]  ;;  %v9362_v36 = vor.u32 %v9361_v58, %v9358_v40  ;;  %v8385_v42 = vrot.slane %v8380_v54, 4  ;;  %v9386_v2 = vrot.slane %v9384_v25, 4  ;;  %v9389_v29 = vrot.slane %v9387_v57, 5  ;;  %v19106_v7 = vpop.f32.mrf.mxu1  ;;  %v19108_v50 = vpop.f32.mrf.mxu0 }
 0x46e   :  { %v8893_v51 = vld [vmem:[#allocation3 + $0x80] sm:$0x11]  ;;  %v8832_v38 = vmax.bf16 %v8768_v9, %v8704_v22  ;;  %v11363_v10 = vcombine.high %v9724_v33, %v9726_v53  ;;  %v11362_v62 = vcombine.low %v9724_v33, %v9726_v53  ;;  %v8827_v16 = vmax.bf16 %v18975_v12, %v18959_v63 }
 0x46f   :  { %v8957_v39 = vmax.bf16 %v8893_v51, %v8828_v23  ;;  %v9363_v24 = vrot.slane %v9362_v36, 4  ;;  %v8633_v13 = vld [vmem:[#allocation3 + $0x128] sm:$0xff]  ;;  %v8639_v4 = vld [vmem:[#allocation3 + $0x130] sm:$0x11]  ;;  %v9390_v40 = vor.u32 %v9389_v29, %v9386_v2  ;;  %v19112_v23 = vadd.f32 %v19032_v45, %v18786_v32  ;;  %v20242_v25 = vld [vmem:[#allocation24_spill] sm:$0xff]  ;;  %v19120_v57 = vpop.f32.mrf.mxu1 }
 0x470   :  { %v8961_v54 = vmax.bf16 %v8897_v44, %v8832_v38  ;;  %10324 = vmatprep.mubr.bf16.mxu1 %v11363_v10  ;;  %v11923_v33 = vadd.f32 %v20242_v25, %v18556_v21  ;;  %v8634_v22 = vsel %vm13899_vm0, %v8383_v59, %v8633_v13  ;;  %v8640_v63 = vsel %vm13846_vm8, %v8385_v42, %v8639_v4  ;;  %v19122_v38 = vpop.f32.mrf.mxu0  ;;  %v20243_v21 = vld [vmem:[#allocation67_spill] sm:$0xff]  ;;  %v8765_v13 = vld [vmem:[#allocation3 + $0x70] sm:$0x11]  ;;  %v20244_v51 = vld [vmem:[#allocation72_spill] sm:$0xff] }
 0x471   :  { %v9365_v46 = vshll.u32 %v8957_v39, 16  ;;  %v9653_v58 = vrot.slane %v8957_v39, 5  ;;  %10325 = vmatmul.mubr.bf16.gmra.mxu1 %v11362_v62  ;;  %v9391_v10 = vrot.slane %v9390_v40, 4  ;;  %v11334_v32 = vrot.slane %v19078_v19, 9  ;;  %8635 = vst [vmem:[#allocation3 + $0x128] sm:$0xff] %v8634_v22  ;;  %v19131_v44 = vpop.f32.mrf.mxu1 }
 0x472   :  { %v9393_v2 = vshll.u32 %v8961_v54, 16  ;;  %8641 = vst [vmem:[#allocation3 + $0x130] sm:$0x11] %v8640_v63  ;;  %v9661_v45 = vrot.slane %v8961_v54, 5  ;;  %v19126_v39 = vadd.f32 %v11865_v11, %v20243_v21  ;;  %v8831_v37 = vmax.bf16 %v8634_v22, %v18975_v12  ;;  %v19133_v62 = vpop.f32.mrf.mxu0  ;;  %v20245_v11 = vld [vmem:[#allocation74_spill] sm:$0xff] }
 0x473   :  { %v9367_v29 = vrot.slane %v9365_v46, 5  ;;  %v19129_v4 = vmax.bf16 %v8827_v16, %v8634_v22  ;;  %v9654_v9 = vsel %vm14847_vm6, %v11332_v0, %v9653_v58  ;;  %v11948_v36 = vadd.f32 %v20245_v11, %v20244_v51  ;;  %v20246_v16 = vld [vmem:[#allocation17_spill] sm:$0xff]  ;;  %v19148_v46 = vpop.f32.mrf.mxu1  ;;  %v8705_v22 = vld [vmem:[#allocation3 + $0x70] sm:$0x11]  ;;  %v20250_v51 = vld [vmem:[#allocation43_spill] sm:$0xff] }
 0x474   :  { %v9395_v53 = vrot.slane %v9393_v2, 5  ;;  %v19143_v12 = vmax.bf16 %v19075_v61, %v8831_v37  ;;  %v11926_v54 = vadd.f32 %v18580_v56, %v20246_v16  ;;  %v9662_v40 = vsel %vm14847_vm6, %v11334_v32, %v9661_v45  ;;  %v20249_v45 = vld [vmem:[#allocation58_spill] sm:$0xff]  ;;  %v20251_v11 = vld [vmem:[#allocation53_spill] sm:$0xff] }
 0x475   :  { %v9368_v41 = vsel %vm14282_vm3, %v9363_v24, %v9367_v29  ;;  %v9370_v42 = vshrl.u32 %v19129_v4, 16  ;;  %v19150_v24 = vpop.f32.mrf.mxu0  ;;  %v8829_v58 = vmax.bf16 %v8765_v13, %v8701_v35  ;;  %v19159_v29 = vpop.f32.mrf.mxu1  ;;  %v19164_v21 = vadd.f32 %v11923_v33, %v19021_v3 }
 0x476   :  { %v9471_v59 = vmax.bf16 %v9368_v41, %v19060_v17  ;;  %20247 = vst [vmem:[#allocation112_spill] sm:$0xff] %v19150_v24  ;;  %v9396_v0 = vsel %vm14282_vm3, %v9391_v10, %v9395_v53  ;;  %v9373_v17 = vshll.u32 %v19129_v4, 16  ;;  %v9398_v56 = vshrl.u32 %v19143_v12, 16  ;;  %v8898_v10 = vld [vmem:[#allocation3 + $0x190] sm:$0x11] }
 0x477   :  { %v9473_v61 = vmax.bf16 %v9396_v0, %v19078_v19  ;;  %v9372_v63 = vrot.slane %v9370_v42, 4  ;;  %v19161_v2 = vpop.f32.mrf.mxu0  ;;  %v9401_v32 = vshll.u32 %v19143_v12, 16  ;;  %v7245_v35 = vadd.f32 %v11948_v36, %v20249_v45  ;;  %v19173_v42 = vpop.f32.mrf.mxu1 }
 0x478   :  { %v9727_v25 = vmax.bf16 %v9654_v9, %v9471_v59  ;;  %20248 = vst [vmem:[#allocation38_spill] sm:$0xff] %v19161_v2  ;;  %v9375_v37 = vrot.slane %v9373_v17, 5  ;;  %v9400_v53 = vrot.slane %v9398_v56, 4  ;;  %v19169_v9 = vadd.f32 %v11926_v54, %v19024_v1 }
 0x479   :  { %v9729_v13 = vmax.bf16 %v9662_v40, %v9473_v61  ;;  %v8769_v19 = vld [vmem:[#allocation3 + $0x130] sm:$0x11]  ;;  %v11951_v59 = vadd.f32 %v20251_v11, %v20250_v51  ;;  %v19175_v3 = vpop.f32.mrf.mxu0  ;;  %v9403_v17 = vrot.slane %v9401_v32, 5  ;;  %v11333_v40 = vrot.slane %v19129_v4, 9  ;;  %v20252_v61 = vld [vmem:[#allocation16_spill] sm:$0xff]  ;;  %v19180_v1 = vpop.f32.mrf.mxu1 }
 0x47a   :  { %v8894_v41 = vld [vmem:[#allocation3 + $0x130] sm:$0x11]  ;;  %v8833_v33 = vmax.bf16 %v8769_v19, %v8705_v22  ;;  %v9376_v0 = vor.u32 %v9375_v37, %v9372_v63  ;;  %v11929_v56 = vadd.f32 %v20252_v61, %v18594_v27  ;;  %v20256_v32 = vld [vmem:[#allocation96_spill] sm:$0xff] }
 0x47b   :  { %v8958_v16 = vmax.bf16 %v8894_v41, %v8829_v58  ;;  %v11365_v2 = vcombine.high %v9727_v25, %v9729_v13  ;;  %v11364_v36 = vcombine.low %v9727_v25, %v9729_v13  ;;  %v19182_v54 = vpop.f32.mrf.mxu0  ;;  %v9404_v24 = vor.u32 %v9403_v17, %v9400_v53  ;;  %v20254_v63 = vld [vmem:[#allocation98_spill] sm:$0xff]  ;;  %v19188_v19 = vpop.f32.mrf.mxu1  ;;  %v20260_v17 = vld [vmem:[#allocation83_spill] sm:$0xff] }
 0x47c   :  { %20253 = vst [vmem:[#allocation54_spill] sm:$0xff] %v19182_v54  ;;  %v8962_v45 = vmax.bf16 %v8898_v10, %v8833_v33  ;;  %v9377_v51 = vrot.slane %v9376_v0, 4  ;;  %v11335_v58 = vrot.slane %v19143_v12, 9  ;;  %v7248_v37 = vadd.f32 %v11951_v59, %v20254_v63  ;;  %v20255_v25 = vld [vmem:[#allocation82_spill] sm:$0xff]  ;;  %v20262_v54 = vld [vmem:[#allocation61_spill] sm:$0xff] }
 0x47d   :  { %v9379_v11 = vshll.u32 %v8958_v16, 16  ;;  %10235 = vmatprep.mubr.bf16.mxu0 %v11365_v2  ;;  %v9657_v22 = vrot.slane %v8958_v16, 5  ;;  %v11954_v13 = vadd.f32 %v20256_v32, %v20255_v25  ;;  %v19190_v27 = vpop.f32.mrf.mxu0  ;;  %v9405_v61 = vrot.slane %v9404_v24, 4  ;;  %v20258_v2 = vld [vmem:[#allocation90_spill] sm:$0xff]  ;;  %v20259_v16 = vld [vmem:[#allocation91_spill] sm:$0xff]  ;;  %v19201_v32 = vpop.f32.mrf.mxu1 }
 0x47e   :  { %20257 = vst [vmem:[#allocation55_spill] sm:$0xff] %v19190_v27  ;;  %10236 = vmatmul.mubr.bf16.gmra.mxu0 %v11364_v36  ;;  %v9407_v10 = vshll.u32 %v8962_v45, 16  ;;  %v9665_v33 = vrot.slane %v8962_v45, 5  ;;  %v19193_v53 = vadd.f32 %v11929_v56, %v19126_v39  ;;  %v12012_v0 = vadd.f32 %v20259_v16, %v20258_v2  ;;  %v20261_v59 = vld [vmem:[#allocation86_spill] sm:$0xff]  ;;  %v20264_v56 = vld [vmem:[#allocation87_spill] sm:$0xff] }
 0x47f   :  { %v9381_v41 = vrot.slane %v9379_v11, 5  ;;  %v11957_v63 = vadd.f32 %v20261_v59, %v20260_v17  ;;  %v12015_v25 = vadd.f32 %v18665_v5, %v20262_v54  ;;  %v19203_v27 = vpop.f32.mrf.mxu0  ;;  %v9658_v39 = vsel %vm14847_vm6, %v11333_v40, %v9657_v22  ;;  %v20265_v45 = vld [vmem:[#allocation59_spill] sm:$0xff]  ;;  %v20266_v54 = vld [vmem:[#allocation97_spill] sm:$0xff]  ;;  %v20267_v17 = vld [vmem:[#allocation78_spill] sm:$0xff] }
 0x480   :  { %20263 = vst [vmem:[#allocation39_spill] sm:$0xff] %v19203_v27  ;;  %v9409_v36 = vrot.slane %v9407_v10, 5  ;;  %v11960_v11 = vadd.f32 %v20265_v45, %v20264_v56  ;;  %v9666_v16 = vsel %vm14847_vm6, %v11335_v58, %v9665_v33  ;;  %v12018_v5 = vadd.f32 %v18687_v47, %v18678_v31  ;;  %v19218_v27 = vpop.f32.mrf.mxu1  ;;  %v20270_v58 = vld [vmem:[#allocation66_spill] sm:$0xff]  ;;  %v20271_v33 = vld [vmem:[#allocation69_spill] sm:$0xff] }
 0x481   :  { %v9382_v24 = vsel %vm14282_vm3, %v9377_v51, %v9381_v41  ;;  %v11963_v59 = vadd.f32 %v20267_v17, %v20266_v54  ;;  %v19220_v51 = vpop.f32.mrf.mxu0  ;;  %v12021_v22 = vadd.f32 %v18730_v28, %v18708_v15  ;;  %v20269_v41 = vld [vmem:[#allocation104_spill] sm:$0xff]  ;;  %v12024_v10 = vadd.f32 %v20270_v58, %v18741_v34  ;;  %v20273_v15 = vld [vmem:[#allocation99_spill] sm:$0xff] }
 0x482   :  { %v9472_v2 = vmax.bf16 %v9382_v24, %v19129_v4  ;;  %v9410_v40 = vsel %vm14282_vm3, %v9405_v61, %v9409_v36  ;;  %v20268_v4 = vld [vmem:[#allocation42_spill] sm:$0xff]  ;;  %v7253_v24 = vadd.f32 %v11954_v13, %v20271_v33  ;;  %v7342_v56 = vadd.f32 %v12012_v0, %v7245_v35  ;;  %v19232_v45 = vpop.f32.mrf.mxu1 }
 0x483   :  { %v11966_v52 = vadd.f32 %v20269_v41, %v20268_v4  ;;  %v9474_v31 = vmax.bf16 %v9410_v40, %v19143_v12  ;;  %v19234_v54 = vpop.f32.mrf.mxu0  ;;  %v7256_v61 = vadd.f32 %v11957_v63, %v20272_v18  ;;  %v7345_v36 = vadd.f32 %v12015_v25, %v7248_v37  ;;  %v20274_v41 = vld [vmem:[#allocation60_spill] sm:$0xff]  ;;  %v20277_v40 = vld [vmem:[#allocation7_spill] sm:$0xff] }
 0x484   :  { %v9728_v47 = vmax.bf16 %v9658_v39, %v9472_v2  ;;  %v7261_v28 = vadd.f32 %v11960_v11, %v20273_v15  ;;  %v12027_v17 = vadd.f32 %v18764_v60, %v18759_v20  ;;  %v7350_v34 = vadd.f32 %v12018_v5, %v7253_v24  ;;  %v20275_v39 = vld [vmem:[#allocation36_spill] sm:$0xff]  ;;  %v19243_v35 = vpop.f32.mrf.mxu1  ;;  %v20281_v5 = vld [vmem:[#allocation50_spill] sm:$0xff] }
 0x485   :  { %v9730_v4 = vmax.bf16 %v9666_v16, %v9474_v31  ;;  %v7264_v12 = vadd.f32 %v11963_v59, %v20274_v41  ;;  %v20276_v2 = vld [vmem:[#allocation64_spill] sm:$0xff]  ;;  %v19245_v0 = vadd.f32 %v12021_v22, %v7256_v61  ;;  %v7269_v58 = vadd.f32 %v11966_v52, %v20277_v40  ;;  %v19252_v33 = vpop.f32.mrf.mxu0  ;;  %v20280_v16 = vld [vmem:[#allocation62_spill] sm:$0xff]  ;;  %v20282_v31 = vld [vmem:[#allocation35_spill] sm:$0xff] }
 0x486   :  { %v11975_v13 = vadd.f32 %v20276_v2, %v20275_v39  ;;  %v19248_v63 = vadd.f32 %v12024_v10, %v7261_v28  ;;  %v20278_v37 = vld [vmem:[#allocation76_spill] sm:$0xff]  ;;  %v11969_v59 = vadd.f32 %v20281_v5, %v20280_v16  ;;  %v20283_v24 = vld [vmem:[#allocation94_spill] sm:$0xff]  ;;  %v19260_v22 = vpop.f32.mrf.mxu1  ;;  %v12030_v52 = vadd.f32 %v18788_v49, %v18776_v48  ;;  %v20284_v10 = vld [vmem:[#allocation65_spill] sm:$0xff] }
 0x487   :  { %v20279_v25 = vld [vmem:[#allocation100_spill] sm:$0xff]  ;;  %v11367_v20 = vcombine.high %v9728_v47, %v9730_v4  ;;  %v11366_v60 = vcombine.low %v9728_v47, %v9730_v4  ;;  %v19258_v18 = vadd.f32 %v20283_v24, %v20282_v31  ;;  %v7361_v61 = vadd.f32 %v12027_v17, %v7264_v12  ;;  %v20287_v2 = vld [vmem:[#allocation57_spill] sm:$0xff]  ;;  %v20290_v16 = vld [vmem:[#allocation18_spill] sm:$0xff] }
 0x488   :  { %v11978_v11 = vadd.f32 %v20279_v25, %v20278_v37  ;;  %v7280_v15 = vadd.f32 %v11975_v13, %v20284_v10  ;;  %v20285_v41 = vld [vmem:[#allocation56_spill] sm:$0xff]  ;;  %v12039_v39 = vadd.f32 %v18861_v43, %v18855_v26  ;;  %v20289_v25 = vld [vmem:[#allocation103_spill] sm:$0xff]  ;;  %v19274_v12 = vpop.f32.mrf.mxu1  ;;  %v20292_v49 = vld [vmem:[#allocation105_spill] sm:$0xff] }
 0x489   :  { %10332 = vmatprep.mubr.bf16.mxu1 %v11367_v20  ;;  %v20286_v47 = vld [vmem:[#allocation84_spill] sm:$0xff]  ;;  %v12042_v17 = vadd.f32 %v20290_v16, %v20289_v25  ;;  %v20291_v48 = vld [vmem:[#allocation51_spill] sm:$0xff]  ;;  %v20297_v10 = vld [vmem:[#allocation14_spill] sm:$0xff] }
 0x48a   :  { %v7285_v28 = vadd.f32 %v11978_v11, %v18835_v55  ;;  %v11981_v4 = vadd.f32 %v20286_v47, %v20285_v41  ;;  %v20288_v40 = vld [vmem:[#allocation52_spill] sm:$0xff]  ;;  %10333 = vmatmul.mubr.bf16.gmra.mxu1 %v11366_v60  ;;  %v12033_v13 = vadd.f32 %v20292_v49, %v20291_v48  ;;  %v20293_v55 = vld [vmem:[#allocation13_spill] sm:$0xff]  ;;  %v20294_v11 = vld [vmem:[#allocation102_spill] sm:$0xff]  ;;  %v19284_v41 = vpop.f32.mrf.mxu0  ;;  %v19292_v16 = vpop.f32.mrf.mxu1 }
 0x48b   :  { %v11984_v37 = vadd.f32 %v20288_v40, %v20287_v2  ;;  %v11987_v20 = vadd.f32 %v20294_v11, %v20293_v55  ;;  %v20295_v5 = vld [vmem:[#allocation75_spill] sm:$0xff]  ;;  %v20296_v31 = vld [vmem:[#allocation20_spill] sm:$0xff]  ;;  %v20298_v26 = vld [vmem:[#allocation5_spill] sm:$0xff]  ;;  %20299 = vst [vmem:[#allocation41_spill] sm:$0xff] %v19284_v41  ;;  %v19287_v40 = vadd.f32 %v12039_v39, %v7280_v15  ;;  %v12051_v15 = vadd.f32 %v18953_v6, %v18947_v8 }
 0x48c   :  { %v12045_v24 = vadd.f32 %v20296_v31, %v20295_v5  ;;  %v11990_v43 = vadd.f32 %v20298_v26, %v20297_v10  ;;  %v20300_v47 = vld [vmem:[#allocation6_spill] sm:$0xff]  ;;  %v19290_v25 = vadd.f32 %v12042_v17, %v7285_v28  ;;  %v20301_v55 = vld [vmem:[#allocation79_spill] sm:$0xff]  ;;  %v20306_v28 = vld [vmem:[#allocation77_spill] sm:$0xff] }
 0x48d   :  { %v7288_v2 = vadd.f32 %v11981_v4, %v20300_v47  ;;  %v7293_v60 = vadd.f32 %v11984_v37, %v19112_v23  ;;  %v7296_v48 = vadd.f32 %v11987_v20, %v19164_v21  ;;  %v20302_v11 = vld [vmem:[#allocation110_spill] sm:$0xff]  ;;  %v20303_v31 = vld [vmem:[#allocation15_spill] sm:$0xff]  ;;  %v20307_v39 = vld [vmem:[#allocation28_spill] sm:$0xff]  ;;  %v19308_v21 = vpop.f32.mrf.mxu1 }
 0x48e   :  { %v7301_v49 = vadd.f32 %v11990_v43, %v19169_v9  ;;  %v12048_v5 = vadd.f32 %v20302_v11, %v20301_v55  ;;  %v20304_v10 = vld [vmem:[#allocation71_spill] sm:$0xff]  ;;  %v20308_v37 = vld [vmem:[#allocation29_spill] sm:$0xff]  ;;  %v20310_v47 = vld [vmem:[#allocation80_spill] sm:$0xff] }
 0x48f   :  { %v11993_v26 = vadd.f32 %v20304_v10, %v20303_v31  ;;  %v19300_v41 = vadd.f32 %v12045_v24, %v7288_v2  ;;  %v20305_v23 = vld [vmem:[#allocation19_spill] sm:$0xff]  ;;  %v12054_v17 = vadd.f32 %v20308_v37, %v20307_v39  ;;  %v20309_v43 = vld [vmem:[#allocation109_spill] sm:$0xff]  ;;  %v19317_v31 = vpop.f32.mrf.mxu0  ;;  %v19319_v8 = vadd.f32 %v12051_v15, %v7296_v48  ;;  %v20317_v37 = vld [vmem:[#allocation22_spill] sm:$0xff] }
 0x490   :  { %v12076_v4 = vadd.f32 %v20306_v28, %v20305_v23  ;;  %v19310_v9 = vadd.f32 %v12048_v5, %v7293_v60  ;;  %v12079_v55 = vadd.f32 %v20310_v47, %v20309_v43  ;;  %v20311_v24 = vld [vmem:[#allocation21_spill] sm:$0xff]  ;;  %20313 = vst [vmem:[#allocation73_spill] sm:$0xff] %v19317_v31  ;;  %v20315_v23 = vld [vmem:[#allocation27_spill] sm:$0xff]  ;;  %v19325_v60 = vpop.f32.mrf.mxu1  ;;  %v7366_v5 = vadd.f32 %v12030_v52, %v7269_v58  ;;  %v20321_v48 = vld [vmem:[#allocation4_spill] sm:$0xff] }
 0x491   :  { %v7304_v20 = vadd.f32 %v11993_v26, %v19193_v53  ;;  %v20312_v2 = vld [vmem:[#allocation33_spill] sm:$0xff]  ;;  %v19321_v10 = vadd.f32 %v12054_v17, %v7301_v49  ;;  %v20322_v49 = vld [vmem:[#allocation107_spill] sm:$0xff]  ;;  %v20326_v58 = vld [vmem:[#allocation108_spill] sm:$0xff] }
 0x492   :  { %v12057_v11 = vadd.f32 %v20312_v2, %v20311_v24  ;;  %v7439_v6 = vadd.f32 %v12076_v4, %v7342_v56  ;;  %v20316_v28 = vld [vmem:[#allocation81_spill] sm:$0xff]  ;;  %v7442_v53 = vadd.f32 %v12079_v55, %v7345_v36  ;;  %v19331_v24 = vpop.f32.mrf.mxu0  ;;  %v20320_v2 = vld [vmem:[#allocation68_spill] sm:$0xff]  ;;  %v20323_v4 = vld [vmem:[#allocation10_spill] sm:$0xff]  ;;  %v19339_v31 = vpop.f32.mrf.mxu1 }
 0x493   :  { %20314 = vst [vmem:[#allocation11_spill] sm:$0xff] %v19321_v10  ;;  %v12082_v39 = vadd.f32 %v20316_v28, %v20315_v23  ;;  %v20318_v43 = vld [vmem:[#allocation37_spill] sm:$0xff]  ;;  %20319 = vst [vmem:[#allocation45_spill] sm:$0xff] %v19331_v24  ;;  %v12036_v15 = vadd.f32 %v20321_v48, %v20320_v2  ;;  %v12085_v17 = vadd.f32 %v20323_v4, %v20322_v49  ;;  %v20324_v10 = vld [vmem:[#allocation26_spill] sm:$0xff] }
 0x494   :  { %v19327_v26 = vadd.f32 %v12057_v11, %v7304_v20  ;;  %v12140_v47 = vadd.f32 %v20318_v43, %v20317_v37  ;;  %v20325_v23 = vld [vmem:[#allocation114_spill] sm:$0xff]  ;;  %v20327_v52 = vld [vmem:[#allocation32_spill] sm:$0xff]  ;;  %v20328_v55 = vld [vmem:[#allocation31_spill] sm:$0xff] }
 0x495   :  { %v7447_v56 = vadd.f32 %v12082_v39, %v7350_v34  ;;  %v12143_v28 = vadd.f32 %v20325_v23, %v20324_v10  ;;  %v12088_v20 = vadd.f32 %v20327_v52, %v20326_v58  ;;  %v20329_v11 = vld [vmem:[#allocation47_spill] sm:$0xff]  ;;  %v20330_v43 = vld [vmem:[#allocation34_spill] sm:$0xff]  ;;  %v20331_v24 = vld [vmem:[#allocation25_spill] sm:$0xff]  ;;  %v7450_v34 = vadd.f32 %v12085_v17, %v19245_v0 }
 0x496   :  { %v19341_v36 = vadd.f32 %v12140_v47, %v7439_v6  ;;  %v12146_v37 = vadd.f32 %v20329_v11, %v20328_v55  ;;  %v12091_v2 = vadd.f32 %v20331_v24, %v20330_v43  ;;  %v12149_v10 = vadd.f32 %v19106_v7, %v19100_v30  ;;  %v20332_v48 = vld [vmem:[#allocation113_spill] sm:$0xff]  ;;  %v20333_v49 = vld [vmem:[#allocation30_spill] sm:$0xff]  ;;  %v12175_v47 = vpop.f32.mrf.mxu1  ;;  %v20334_v4 = vld [vmem:[#allocation63_spill] sm:$0xff]  ;;  %v19360_v11 = vpop.f32.mrf.mxu0 }
 0x497   :  { %v19350_v39 = vadd.f32 %v12143_v28, %v7442_v53  ;;  %v12094_v6 = vadd.f32 %v20333_v49, %v20332_v48  ;;  %v7272_v23 = vadd.f32 %v11969_v59, %v20334_v4  ;;  %v7455_v58 = vadd.f32 %v12088_v20, %v19248_v63  ;;  %v20335_v24 = vld [vmem:[#allocation40_spill] sm:$0xff]  ;;  %v20337_v59 = vld [vmem:[#allocation111_spill] sm:$0xff] }
 0x498   :  { %v19358_v52 = vadd.f32 %v12146_v37, %v7447_v56  ;;  %v7458_v55 = vadd.f32 %v12091_v2, %v7361_v61  ;;  %v7277_v0 = vadd.f32 %v19258_v18, %v20335_v24  ;;  %v19364_v53 = vadd.f32 %v12149_v10, %v7450_v34  ;;  %v12177_v7 = vpop.f32.mrf.mxu1  ;;  %v20336_v43 = vld [vmem:[#allocation44_spill] sm:$0xff]  ;;  %v19378_v34 = vpop.f32.mrf.mxu0  ;;  %v20343_v24 = vld [vmem:[#allocation55_spill] sm:$0xff] }
 0x499   :  { %v7463_v17 = vadd.f32 %v12094_v6, %v7366_v5  ;;  %v12152_v30 = vadd.f32 %v19131_v44, %v19120_v57  ;;  %v7369_v28 = vadd.f32 %v12033_v13, %v7272_v23  ;;  %v12097_v48 = vadd.f32 %v20337_v59, %v20336_v43  ;;  %v20338_v20 = vld [vmem:[#allocation48_spill] sm:$0xff] }
 0x49a   :  { %v12155_v63 = vadd.f32 %v19159_v29, %v19148_v46  ;;  %v7374_v61 = vadd.f32 %v12036_v15, %v7277_v0  ;;  %v12100_v18 = vadd.f32 %v19102_v14, %v20338_v20  ;;  %v12178_v37 = vpop.f32.mrf.mxu1  ;;  %v12158_v13 = vadd.f32 %v19180_v1, %v19173_v42  ;;  %v20339_v15 = vld [vmem:[#allocation112_spill] sm:$0xff]  ;;  %v12206_v23 = vpop.f32.mrf.mxu0 }
 0x49b   :  { %v19372_v56 = vadd.f32 %v12152_v30, %v7455_v58  ;;  %v7466_v2 = vadd.f32 %v12097_v48, %v7369_v28  ;;  %v12103_v46 = vadd.f32 %v19122_v38, %v19108_v50  ;;  %v12161_v29 = vadd.f32 %v19201_v32, %v19188_v19  ;;  %v20340_v50 = vld [vmem:[#allocation38_spill] sm:$0xff]  ;;  %v20341_v19 = vld [vmem:[#allocation9_spill] sm:$0xff] }
 0x49c   :  { %v19376_v5 = vadd.f32 %v12155_v63, %v7458_v55  ;;  %v7471_v57 = vadd.f32 %v12100_v18, %v7374_v61  ;;  %v12180_v44 = vpop.f32.mrf.mxu1  ;;  %v12106_v14 = vadd.f32 %v20339_v15, %v19133_v62  ;;  %v19388_v49 = vadd.f32 %v12158_v13, %v7463_v17  ;;  %v13158_v62 = vld [vmem:[%s19618_s5] sm:$0x7]  ;;  %v20342_v55 = vld [vmem:[#allocation54_spill] sm:$0xff]  ;;  %v20346_v13 = vld [vmem:[#allocation73_spill] sm:$0xff] }
 0x49d   :  { %v7474_v6 = vadd.f32 %v12103_v46, %v19287_v40  ;;  %v12164_v4 = vadd.f32 %v19232_v45, %v19218_v27  ;;  %v19393_v58 = vadd.f32 %v12161_v29, %v7466_v2  ;;  %v12109_v38 = vadd.f32 %v19175_v3, %v20340_v50  ;;  %v13159_v17 = vld [vmem:[%s19619_s6] sm:$0x7] }
 0x49e   :  { %v12181_v10 = vpop.f32.mrf.mxu1  ;;  %v7479_v42 = vadd.f32 %v12106_v14, %v19290_v25  ;;  %v19402_v32 = vrot.slane %v13158_v62, %v20341_v19  ;;  %v12167_v27 = vadd.f32 %v19260_v22, %v19243_v35  ;;  %v12112_v25 = vadd.f32 %v20343_v24, %v20342_v55  ;;  %v20344_v35 = vld [vmem:[#allocation39_spill] sm:$0xff]  ;;  %v20348_v55 = vld [vmem:[#allocation45_spill] sm:$0xff] }
 0x49f   :  { %v7568_v40 = vadd.f32 %v12164_v4, %v7471_v57  ;;  %v7482_v45 = vadd.f32 %v12109_v38, %v19300_v41  ;;  %v12170_v3 = vadd.f32 %v19292_v16, %v19274_v12  ;;  %v19415_v30 = vrot.slane %v13159_v17, %v20341_v19  ;;  %v12208_v41 = vpop.f32.mrf.mxu0  ;;  %v20347_v14 = vld [vmem:[#allocation11_spill] sm:$0xff] }
 0x4a0   :  { %v12183_v1 = vpop.f32.mrf.mxu1  ;;  %v7571_v43 = vadd.f32 %v12167_v27, %v7474_v6  ;;  %v12115_v22 = vadd.f32 %v19220_v51, %v20344_v35  ;;  %v7487_v59 = vadd.f32 %v12112_v25, %v19310_v9  ;;  %v12173_v12 = vadd.f32 %v19325_v60, %v19308_v21  ;;  %v20345_v60 = vld [vmem:[#allocation41_spill] sm:$0xff]  ;;  %v19470_v35 = vld [vmem:[%s19621_s9] ss:$0 sm:$0xff] }
 0x4a1   :  { %v7641_v28 = vmul.f32 %v19402_v32, %v7568_v40  ;;  %v7576_v48 = vadd.f32 %v12170_v3, %v7479_v42  ;;  %v12118_v51 = vadd.f32 %v19252_v33, %v19234_v54  ;;  %v12176_v21 = vadd.f32 %v12175_v47, %v19339_v31  ;;  %v12209_v29 = vpop.f32.mrf.mxu0 }
 0x4a2   :  { %v12184_v0 = vpop.f32.mrf.mxu1  ;;  %v7644_v61 = vmul.f32 %v19402_v32, %v7571_v43  ;;  %v7490_v20 = vadd.f32 %v12115_v22, %v19319_v8  ;;  %v7579_v2 = vadd.f32 %v12173_v12, %v7482_v45  ;;  %v12121_v46 = vadd.f32 %v20346_v13, %v20345_v60 }
 0x4a3   :  { %v19424_v63 = vadd.f32 %v19415_v30, %v7641_v28  ;;  %v7647_v18 = vmul.f32 %v19402_v32, %v7576_v48  ;;  %v7495_v6 = vadd.f32 %v12118_v51, %v20347_v14  ;;  %v12179_v4 = vadd.f32 %v12178_v37, %v12177_v7  ;;  %v12211_v27 = vpop.f32.mrf.mxu0 }
 0x4a4   :  { %v12266_v16 = vpop.f32.mrf.mxu1  ;;  %v19432_v9 = vadd.f32 %v19415_v30, %v7644_v61  ;;  %v7650_v8 = vmul.f32 %v19402_v32, %v7579_v2  ;;  %v7584_v54 = vadd.f32 %v12176_v21, %v7487_v59  ;;  %v7498_v33 = vadd.f32 %v12121_v46, %v19327_v26 }
 0x4a5   :  { %v19438_v15 = vadd.f32 %v19415_v30, %v7647_v18  ;;  %v12182_v50 = vadd.f32 %v12181_v10, %v12180_v44  ;;  %v7587_v31 = vadd.f32 %v12179_v4, %v7490_v20  ;;  %v12185_v40 = vadd.f32 %v12184_v0, %v12183_v1  ;;  %v19458_v1 = vld [vmem:[%s19620_s8] ss:$0 sm:$0xff]  ;;  %v12212_v43 = vpop.f32.mrf.mxu0  ;;  %s13162_s8 = smov 64  }
 0x4a6   :  { %v12267_v57 = vpop.f32.mrf.mxu1  ;;  %v19444_v38 = vadd.f32 %v19415_v30, %v7650_v8  ;;  %v7653_v62 = vmul.f32 %v19402_v32, %v7584_v54  ;;  %v12204_v7 = vadd.f32 %v19360_v11, %v20348_v55  ;;  %v12207_v37 = vadd.f32 %v12206_v23, %v19378_v34 }
 0x4a7   :  { %v7592_v19 = vadd.f32 %v12182_v50, %v7495_v6  ;;  %v7656_v45 = vmul.f32 %v19402_v32, %v7587_v31  ;;  %v12268_v24 = vadd.f32 %v12267_v57, %v12266_v16  ;;  %v7595_v25 = vadd.f32 %v12185_v40, %v7498_v33  ;;  %v12214_v57 = vpop.f32.mrf.mxu0 }
 0x4a8   :  { %v12269_v42 = vpop.f32.mrf.mxu1  ;;  %v19452_v44 = vadd.f32 %v19415_v30, %v7653_v62  ;;  %v12210_v59 = vadd.f32 %v12209_v29, %v12208_v41  ;;  %v12213_v51 = vadd.f32 %v12212_v43, %v12211_v27 }
 0x4a9   :  { %v7659_v10 = vmul.f32 %v19402_v32, %v7592_v19  ;;  %v19461_v0 = vadd.f32 %v19415_v30, %v7656_v45  ;;  %v10279_v11 = vadd.f32 %v12268_v24, %v12204_v7  ;;  %v7662_v23 = vmul.f32 %v19402_v32, %v7595_v25  ;;  %v12215_v8 = vpop.f32.mrf.mxu0 }
 0x4aa   :  { %v12270_v47 = vpop.f32.mrf.mxu1  ;;  %v12216_v19 = vadd.f32 %v12215_v8, %v12214_v57 }
 0x4ab   :  { %v12271_v3 = vadd.f32 %v12270_v47, %v12269_v42  ;;  %v19464_v34 = vadd.f32 %v19415_v30, %v7659_v10  ;;  %v10348_v22 = vmul.f32 %v19458_v1, %v10279_v11  ;;  %v19474_v16 = vadd.f32 %v19415_v30, %v7662_v23  ;;  %v12217_v54 = vpop.f32.mrf.mxu0 }
 0x4ac   :  { %v12272_v26 = vpop.f32.mrf.mxu1 }
 0x4ad   :  { %v10282_v28 = vadd.f32 %v12271_v3, %v12207_v37  ;;  %v10371_v2 = vadd.f32 %v19470_v35, %v10348_v22  ;;  %v12218_v27 = vpop.f32.mrf.mxu0 }
 0x4ae   :  { %v12273_v17 = vpop.f32.mrf.mxu1  ;;  %v12219_v37 = vadd.f32 %v12218_v27, %v12217_v54 }
 0x4af   :  { %v12274_v48 = vadd.f32 %v12273_v17, %v12272_v26  ;;  %v10349_v61 = vmul.f32 %v19458_v1, %v10282_v28  ;;  %v10387_v41 = vmax.f32 %v10371_v2, 0.0 }
 0x4b0   :  { %v12275_v12 = vpop.f32.mrf.mxu1 }
 0x4b1   :  { %v10287_v20 = vadd.f32 %v12274_v48, %v12210_v59  ;;  %v10372_v60 = vadd.f32 %v19470_v35, %v10349_v61 }
 0x4b2   :  { %v12276_v18 = vpop.f32.mrf.mxu1 }
 0x4b3   :  { %v12277_v21 = vadd.f32 %v12276_v18, %v12275_v12  ;;  %v10350_v13 = vmul.f32 %v19458_v1, %v10287_v20  ;;  %v10388_v29 = vmax.f32 %v10372_v60, 0.0 }
 0x4b4   :  { %v12278_v33 = vpop.f32.mrf.mxu1 }
 0x4b5   :  { %v10290_v46 = vadd.f32 %v12277_v21, %v12213_v51  ;;  %v12317_v6 = vpack.i.bf16 %v10388_v29, %v10387_v41  ;;  %v10373_v4 = vadd.f32 %v19470_v35, %v10350_v13 }
 0x4b6   :  { %v12279_v47 = vpop.f32.mrf.mxu1 }
 0x4b7   :  { %v10351_v14 = vmul.f32 %v19458_v1, %v10290_v46  ;;  %12318 = vrot.lane.b32.xlu0 %v12317_v6, %s13162_s8  ;;  %v10389_v50 = vmax.f32 %v10373_v4, 0.0  ;;  %v12280_v40 = vadd.f32 %v12279_v47, %v12278_v33 }
 0x4b8   :  { %v12281_v45 = vpop.f32.mrf.mxu1 }
 0x4b9   :  { %v10374_v42 = vadd.f32 %v19470_v35, %v10351_v14  ;;  %v10295_v55 = vadd.f32 %v12280_v40, %v12216_v19 }
 0x4ba   :  { %v12282_v7 = vpop.f32.mrf.mxu1  ;;  %v12220_v43 = vpop.f32.mrf.mxu0 }
 0x4bb   :  { %v10390_v31 = vmax.f32 %v10374_v42, 0.0  ;;  %v10352_v24 = vmul.f32 %v19458_v1, %v10295_v55  ;;  %v12283_v26 = vadd.f32 %v12282_v7, %v12281_v45 }
 0x4bc   :  { %v12221_v22 = vpop.f32.mrf.mxu0 }
 0x4bd   :  { %v12322_v62 = vpack.i.bf16 %v10390_v31, %v10389_v50  ;;  %v10298_v10 = vadd.f32 %v12283_v26, %v12219_v37  ;;  %v10375_v3 = vadd.f32 %v19470_v35, %v10352_v24  ;;  %v12222_v61 = vadd.f32 %v12221_v22, %v12220_v43 }
 0x4be   :  { %v12223_v59 = vpop.f32.mrf.mxu0 }
 0x4bf   :  { %12323 = vrot.lane.b32.xlu0 %v12322_v62, %s13162_s8  ;;  %v10353_v25 = vmul.f32 %v19458_v1, %v10298_v10  ;;  %v10391_v17 = vmax.f32 %v10375_v3, 0.0 }
 0x4c0   :  { %v12224_v18 = vpop.f32.mrf.mxu0 }
 0x4c1   :  { %v10376_v11 = vadd.f32 %v19470_v35, %v10353_v25  ;;  %v12225_v21 = vadd.f32 %v12224_v18, %v12223_v59 }
 0x4c3   :  { %v10392_v23 = vmax.f32 %v10376_v11, 0.0 }
 0x4c5   :  { %v12327_v28 = vpack.i.bf16 %v10392_v23, %v10391_v17 }
 0x4c7   :  { %12328 = vrot.lane.b32.xlu1 %v12327_v28, %s13162_s8 }
 0x4cd   :  { %v12284_v48 = vpop.f32.mrf.mxu1 }
 0x4cf   :  { %v12285_v12 = vpop.f32.mrf.mxu1 }
 0x4d0   :  { %v12286_v20 = vadd.f32 %v12285_v12, %v12284_v48 }
 0x4d1   :  { %v12287_v2 = vpop.f32.mrf.mxu1 }
 0x4d2   :  { %v10303_v51 = vadd.f32 %v12286_v20, %v12222_v61 }
 0x4d3   :  { %v12288_v57 = vpop.f32.mrf.mxu1 }
 0x4d4   :  { %v10354_v60 = vmul.f32 %v19458_v1, %v10303_v51  ;;  %v12289_v13 = vadd.f32 %v12288_v57, %v12287_v2 }
 0x4d6   :  { %v10306_v46 = vadd.f32 %v12289_v13, %v12225_v21  ;;  %v10377_v29 = vadd.f32 %v19470_v35, %v10354_v60 }
 0x4d8   :  { %v10355_v41 = vmul.f32 %v19458_v1, %v10306_v46  ;;  %v10393_v14 = vmax.f32 %v10377_v29, 0.0  ;;  %v7620_v29 = vmul.f32 %v19402_v32, %v19350_v39 }
 0x4da   :  { %v10378_v8 = vadd.f32 %v19470_v35, %v10355_v41  ;;  %v7617_v41 = vmul.f32 %v19402_v32, %v19341_v36 }
 0x4dc   :  { %v10394_v6 = vmax.f32 %v10378_v8, 0.0 }
 0x4dd   :  { %v12226_v42 = vpop.f32.mrf.mxu0 }
 0x4de   :  { %v12332_v4 = vpack.i.bf16 %v10394_v6, %v10393_v14 }
 0x4df   :  { %v12227_v54 = vpop.f32.mrf.mxu0 }
 0x4e0   :  { %12333 = vrot.lane.b32.xlu1 %v12332_v4, %s13162_s8  ;;  %v12228_v47 = vadd.f32 %v12227_v54, %v12226_v42  ;;  %v7682_v4 = vadd.f32 %v19415_v30, %v7617_v41  ;;  %v7685_v42 = vadd.f32 %v19415_v30, %v7620_v29 }
 0x4e1   :  { %v12229_v33 = vpop.f32.mrf.mxu0 }
 0x4e2   :  { %v7730_v39 = vmax.f32 %v7682_v4, 0.0 }
 0x4e3   :  { %v12230_v19 = vpop.f32.mrf.mxu0 }
 0x4e4   :  { %v12231_v55 = vadd.f32 %v12230_v19, %v12229_v33  ;;  %v7623_v33 = vmul.f32 %v19402_v32, %v19358_v52 }
 0x4f2   :  { %v12290_v50 = vpop.f32.mrf.mxu1 }
 0x4f4   :  { %v12291_v31 = vpop.f32.mrf.mxu1 }
 0x4f5   :  { %v12292_v62 = vadd.f32 %v12291_v31, %v12290_v50  ;;  %v7626_v50 = vmul.f32 %v19402_v32, %v19364_v53  ;;  %v7733_v31 = vmax.f32 %v7685_v42, 0.0 }
 0x4f6   :  { %v12293_v40 = vpop.f32.mrf.mxu1 }
 0x4f7   :  { %v10311_v27 = vadd.f32 %v12292_v62, %v12228_v47 }
 0x4f8   :  { %v12294_v45 = vpop.f32.mrf.mxu1 }
 0x4f9   :  { %v10356_v7 = vmul.f32 %v19458_v1, %v10311_v27  ;;  %v12295_v37 = vadd.f32 %v12294_v45, %v12293_v40  ;;  %v7688_v40 = vadd.f32 %v19415_v30, %v7623_v33  ;;  %v7691_v27 = vadd.f32 %v19415_v30, %v7626_v50 }
 0x4fb   :  { %v10314_v24 = vadd.f32 %v12295_v37, %v12231_v55  ;;  %v10379_v10 = vadd.f32 %v19470_v35, %v10356_v7 }
 0x4fd   :  { %v10357_v26 = vmul.f32 %v19458_v1, %v10314_v24  ;;  %v10395_v3 = vmax.f32 %v10379_v10, 0.0  ;;  %v7736_v24 = vmax.f32 %v7688_v40, 0.0 }
 0x4ff   :  { %v10380_v25 = vadd.f32 %v19470_v35, %v10357_v26  ;;  %v12232_v23 = vpop.f32.mrf.mxu0  ;;  %v7739_v26 = vmax.f32 %v7691_v27, 0.0 }
 0x501   :  { %v10396_v11 = vmax.f32 %v10380_v25, 0.0  ;;  %v12233_v28 = vpop.f32.mrf.mxu0 }
 0x502   :  { %v12234_v48 = vadd.f32 %v12233_v28, %v12232_v23 }
 0x503   :  { %v12337_v17 = vpack.i.bf16 %v10396_v11, %v10395_v3  ;;  %v12235_v43 = vpop.f32.mrf.mxu0 }
 0x505   :  { %12338 = vrot.lane.b32.xlu0 %v12337_v17, %s13162_s8  ;;  %v12236_v61 = vpop.f32.mrf.mxu0 }
 0x506   :  { %v12237_v51 = vadd.f32 %v12236_v61, %v12235_v43  ;;  %v7632_v61 = vmul.f32 %v19402_v32, %v19376_v5 }
 0x512   :  { %v12296_v22 = vpop.f32.mrf.mxu1 }
 0x514   :  { %v12297_v59 = vpop.f32.mrf.mxu1 }
 0x515   :  { %v12298_v12 = vadd.f32 %v12297_v59, %v12296_v22 }
 0x516   :  { %v12299_v20 = vpop.f32.mrf.mxu1 }
 0x517   :  { %v10319_v18 = vadd.f32 %v12298_v12, %v12234_v48  ;;  %v7629_v12 = vmul.f32 %v19402_v32, %v19372_v56 }
 0x518   :  { %v12300_v2 = vpop.f32.mrf.mxu1 }
 0x519   :  { %v10358_v57 = vmul.f32 %v19458_v1, %v10319_v18  ;;  %v12301_v21 = vadd.f32 %v12300_v2, %v12299_v20 }
 0x51b   :  { %v10322_v60 = vadd.f32 %v12301_v21, %v12237_v51  ;;  %v10381_v46 = vadd.f32 %v19470_v35, %v10358_v57 }
 0x51d   :  { %v10359_v13 = vmul.f32 %v19458_v1, %v10322_v60  ;;  %v10397_v14 = vmax.f32 %v10381_v46, 0.0  ;;  %v7697_v46 = vadd.f32 %v19415_v30, %v7632_v61 }
 0x51f   :  { %v10382_v8 = vadd.f32 %v19470_v35, %v10359_v13  ;;  %v7694_v13 = vadd.f32 %v19415_v30, %v7629_v12  ;;  %v7745_v5 = vmax.f32 %v7697_v46, 0.0 }
 0x521   :  { %v10398_v6 = vmax.f32 %v10382_v8, 0.0 }
 0x522   :  { %v12238_v19 = vpop.f32.mrf.mxu0 }
 0x523   :  { %v12342_v54 = vpack.i.bf16 %v10398_v6, %v10397_v14  ;;  %v7742_v14 = vmax.f32 %v7694_v13, 0.0 }
 0x524   :  { %v12239_v53 = vpop.f32.mrf.mxu0 }
 0x525   :  { %12343 = vrot.lane.b32.xlu1 %v12342_v54, %s13162_s8  ;;  %v12240_v59 = vadd.f32 %v12239_v53, %v12238_v19 }
 0x526   :  { %v12241_v17 = vpop.f32.mrf.mxu0 }
 0x528   :  { %v12242_v20 = vpop.f32.mrf.mxu0 }
 0x529   :  { %v12319_v36 = vpop.permute.xlu0 %12318  ;;  %v12243_v57 = vadd.f32 %v12242_v20, %v12241_v17  ;;  %v7638_v17 = vmul.f32 %v19402_v32, %v19393_v58 }
 0x52a   :  { %v12321_v47 = vunpack.i.h.bf16 %v12319_v36  ;;  %v12320_v62 = vunpack.i.l.bf16 %v12319_v36 }
 0x52c   :  { %v10468_v45 = vsel %vm10467_vm7, %v7730_v39, %v12320_v62  ;;  %v10469_v52 = vsel %vm10467_vm7, %v7733_v31, %v12321_v47 }
 0x52d   :  { %v11466_v55 = vpack.c.bf16 %v10468_v45, %v10468_v45  ;;  %v11467_v7 = vpack.c.bf16 %v10469_v52, %v10469_v52 }
 0x52f   :  { %10548 = vst [vmem:[%s19616_s10 + $0xc] sm:$0xf] %v11466_v55  ;;  %10549 = vst [vmem:[%s19616_s10 + $0x1c] sm:$0xf] %v11467_v7 }
 0x531   :  { %v12324_v37 = vpop.permute.xlu0 %12323  ;;  %v12302_v23 = vpop.f32.mrf.mxu1 }
 0x532   :  { %v12326_v10 = vunpack.i.h.bf16 %v12324_v37  ;;  %v12325_v25 = vunpack.i.l.bf16 %v12324_v37 }
 0x533   :  { %v12303_v22 = vpop.f32.mrf.mxu1 }
 0x534   :  { %v10470_v3 = vsel %vm10467_vm7, %v7736_v24, %v12325_v25  ;;  %v10471_v11 = vsel %vm10467_vm7, %v7739_v26, %v12326_v10  ;;  %v12304_v48 = vadd.f32 %v12303_v22, %v12302_v23 }
 0x535   :  { %v11468_v28 = vpack.c.bf16 %v10470_v3, %v10470_v3  ;;  %v11469_v43 = vpack.c.bf16 %v10471_v11, %v10471_v11  ;;  %v12305_v18 = vpop.f32.mrf.mxu1  ;;  %v7635_v11 = vmul.f32 %v19402_v32, %v19388_v49 }
 0x536   :  { %v10327_v2 = vadd.f32 %v12304_v48, %v12240_v59  ;;  %v7703_v59 = vadd.f32 %v19415_v30, %v7638_v17 }
 0x537   :  { %10550 = vst [vmem:[%s19616_s10 + $0x2c] sm:$0xf] %v11468_v28  ;;  %10551 = vst [vmem:[%s19616_s10 + $0x3c] sm:$0xf] %v11469_v43  ;;  %v12306_v51 = vpop.f32.mrf.mxu1  ;;  %v7700_v22 = vadd.f32 %v19415_v30, %v7635_v11 }
 0x538   :  { %v10360_v21 = vmul.f32 %v19458_v1, %v10327_v2  ;;  %v12307_v60 = vadd.f32 %v12306_v51, %v12305_v18  ;;  %v7751_v2 = vmax.f32 %v7703_v59, 0.0 }
 0x539   :  { %v12329_v8 = vpop.permute.xlu1 %12328  ;;  %v7748_v18 = vmax.f32 %v7700_v22, 0.0 }
 0x53a   :  { %v10330_v41 = vadd.f32 %v12307_v60, %v12243_v57  ;;  %v10383_v56 = vadd.f32 %v19470_v35, %v10360_v21  ;;  %v12331_v6 = vunpack.i.h.bf16 %v12329_v8  ;;  %v12330_v4 = vunpack.i.l.bf16 %v12329_v8 }
 0x53b   :  { %v7754_v57 = vmax.f32 %v19424_v63, 0.0  ;;  %v7757_v21 = vmax.f32 %v19432_v9, 0.0  ;;  %v7760_v63 = vmax.f32 %v19438_v15, 0.0  ;;  %v7763_v9 = vmax.f32 %v19444_v38, 0.0 }
 0x53c   :  { %v10361_v29 = vmul.f32 %v19458_v1, %v10330_v41  ;;  %v10472_v54 = vsel %vm10467_vm7, %v7742_v14, %v12330_v4  ;;  %v10473_v33 = vsel %vm10467_vm7, %v7745_v5, %v12331_v6  ;;  %v10399_v50 = vmax.f32 %v10383_v56, 0.0 }
 0x53d   :  { %v11470_v39 = vpack.c.bf16 %v10472_v54, %v10472_v54  ;;  %v11471_v31 = vpack.c.bf16 %v10473_v33, %v10473_v33  ;;  %v7766_v15 = vmax.f32 %v19452_v44, 0.0  ;;  %v7769_v38 = vmax.f32 %v19461_v0, 0.0 }
 0x53e   :  { %v10384_v42 = vadd.f32 %v19470_v35, %v10361_v29  ;;  %v12244_v47 = vpop.f32.mrf.mxu0  ;;  %v7772_v44 = vmax.f32 %v19464_v34, 0.0  ;;  %v7775_v0 = vmax.f32 %v19474_v16, 0.0 }
 0x53f   :  { %10552 = vst [vmem:[%s19616_s10 + $0x4c] sm:$0xf] %v11470_v39  ;;  %10553 = vst [vmem:[%s19616_s10 + $0x5c] sm:$0xf] %v11471_v31 }
 0x540   :  { %v10400_v36 = vmax.f32 %v10384_v42, 0.0  ;;  %v12245_v19 = vpop.f32.mrf.mxu0 }
 0x541   :  { %v12246_v52 = vadd.f32 %v12245_v19, %v12244_v47 }
 0x542   :  { %v12347_v62 = vpack.i.bf16 %v10400_v36, %v10399_v50  ;;  %v12247_v40 = vpop.f32.mrf.mxu0 }
 0x544   :  { %12348 = vrot.lane.b32.xlu0 %v12347_v62, %s13162_s8  ;;  %v12248_v7 = vpop.f32.mrf.mxu0 }
 0x545   :  { %v12249_v26 = vadd.f32 %v12248_v7, %v12247_v40 }
 0x54a   :  { %v12308_v27 = vpop.f32.mrf.mxu1 }
 0x54c   :  { %v12309_v45 = vpop.f32.mrf.mxu1 }
 0x54d   :  { %v12310_v55 = vadd.f32 %v12309_v45, %v12308_v27 }
 0x54e   :  { %v12311_v53 = vpop.f32.mrf.mxu1 }
 0x54f   :  { %v10335_v37 = vadd.f32 %v12310_v55, %v12246_v52 }
 0x550   :  { %v12312_v24 = vpop.f32.mrf.mxu1 }
 0x551   :  { %v10362_v10 = vmul.f32 %v19458_v1, %v10335_v37  ;;  %v12313_v25 = vadd.f32 %v12312_v24, %v12311_v53 }
 0x552   :  { %v12334_v20 = vpop.permute.xlu1 %12333 }
 0x553   :  { %v10338_v3 = vadd.f32 %v12313_v25, %v12249_v26  ;;  %v10385_v28 = vadd.f32 %v19470_v35, %v10362_v10  ;;  %v12336_v49 = vunpack.i.h.bf16 %v12334_v20  ;;  %v12335_v51 = vunpack.i.l.bf16 %v12334_v20 }
 0x555   :  { %v10363_v23 = vmul.f32 %v19458_v1, %v10338_v3  ;;  %v10401_v48 = vmax.f32 %v10385_v28, 0.0  ;;  %v10474_v58 = vsel %vm10467_vm7, %v7748_v18, %v12335_v51  ;;  %v10475_v32 = vsel %vm10467_vm7, %v7751_v2, %v12336_v49 }
 0x556   :  { %v11472_v1 = vpack.c.bf16 %v10474_v58, %v10474_v58 }
 0x557   :  { %v10386_v43 = vadd.f32 %v19470_v35, %v10363_v23  ;;  %v11473_v35 = vpack.c.bf16 %v10475_v32, %v10475_v32 }
 0x558   :  { %10554 = vst [vmem:[%s19616_s10 + $0x6c] sm:$0xf] %v11472_v1 }
 0x559   :  { %v10402_v12 = vmax.f32 %v10386_v43, 0.0  ;;  %10555 = vst [vmem:[%s19616_s10 + $0x7c] sm:$0xf] %v11473_v35 }
 0x55b   :  { %v12352_v61 = vpack.i.bf16 %v10402_v12, %v10401_v48 }
 0x55d   :  { %12353 = vrot.lane.b32.xlu1 %v12352_v61, %s13162_s8 }
 0x577   :  { %v12339_v30 = vpop.permute.xlu0 %12338 }
 0x578   :  { %v12341_v60 = vunpack.i.h.bf16 %v12339_v30  ;;  %v12340_v13 = vunpack.i.l.bf16 %v12339_v30 }
 0x57a   :  { %v10476_v46 = vsel %vm10467_vm7, %v7754_v57, %v12340_v13  ;;  %v10477_v41 = vsel %vm10467_vm7, %v7757_v21, %v12341_v60 }
 0x57b   :  { %v11474_v29 = vpack.c.bf16 %v10476_v46, %v10476_v46  ;;  %v11475_v56 = vpack.c.bf16 %v10477_v41, %v10477_v41 }
 0x57d   :  { %10556 = vst [vmem:[%s19616_s10 + $0x8c] sm:$0xf] %v11474_v29  ;;  %10557 = vst [vmem:[%s19616_s10 + $0x9c] sm:$0xf] %v11475_v56 }
 0x597   :  { %v12344_v8 = vpop.permute.xlu1 %12343 }
 0x598   :  { %v12346_v14 = vunpack.i.h.bf16 %v12344_v8  ;;  %v12345_v5 = vunpack.i.l.bf16 %v12344_v8 }
 0x59a   :  { %v10478_v6 = vsel %vm10467_vm7, %v7760_v63, %v12345_v5  ;;  %v10479_v4 = vsel %vm10467_vm7, %v7763_v9, %v12346_v14 }
 0x59b   :  { %v11476_v42 = vpack.c.bf16 %v10478_v6, %v10478_v6  ;;  %v11477_v54 = vpack.c.bf16 %v10479_v4, %v10479_v4 }
 0x59d   :  { %10558 = vst [vmem:[%s19616_s10 + $0xac] sm:$0xf] %v11476_v42  ;;  %10559 = vst [vmem:[%s19616_s10 + $0xbc] sm:$0xf] %v11477_v54 }
 0x5b6   :  { %v12349_v33 = vpop.permute.xlu0 %12348 }
 0x5b7   :  { %v12351_v50 = vunpack.i.h.bf16 %v12349_v33  ;;  %v12350_v36 = vunpack.i.l.bf16 %v12349_v33 }
 0x5b9   :  { %v10480_v39 = vsel %vm10467_vm7, %v7766_v15, %v12350_v36  ;;  %v10481_v31 = vsel %vm10467_vm7, %v7769_v38, %v12351_v50 }
 0x5ba   :  { %v11478_v47 = vpack.c.bf16 %v10480_v39, %v10480_v39  ;;  %v11479_v62 = vpack.c.bf16 %v10481_v31, %v10481_v31 }
 0x5bc   :  { %10560 = vst [vmem:[%s19616_s10 + $0xcc] sm:$0xf] %v11478_v47  ;;  %10561 = vst [vmem:[%s19616_s10 + $0xdc] sm:$0xf] %v11479_v62 }
 0x5cf   :  { %v12354_v19 = vpop.permute.xlu1 %12353 }
 0x5d0   :  { %v12356_v40 = vunpack.i.h.bf16 %v12354_v19  ;;  %v12355_v27 = vunpack.i.l.bf16 %v12354_v19 }
 0x5d2   :  { %v10482_v45 = vsel %vm10467_vm7, %v7772_v44, %v12355_v27  ;;  %v10483_v52 = vsel %vm10467_vm7, %v7775_v0, %v12356_v40 }
 0x5d3   :  { %v11480_v55 = vpack.c.bf16 %v10482_v45, %v10482_v45  ;;  %v11481_v7 = vpack.c.bf16 %v10483_v52, %v10483_v52 }
 0x5d5   :  { %10562 = vst [vmem:[%s19616_s10 + $0xec] sm:$0xf] %v11480_v55  ;;  %10563 = vst [vmem:[%s19616_s10 + $0xfc] sm:$0xf] %v11481_v7 }

</bundles_post_ra>
